<compile_context>
chip_gen: v7x
topology: tpu7x:2x2x1
jax: 0.10.0
libtpu: 0.0.40
codegen_flags: <defaults>
</compile_context>

<pallas_src>
import functools

import jax
import jax.numpy as jnp
from jax.experimental import pallas as pl
from jax.experimental.pallas import tpu as pltpu


# ----------------------------------------------------------------------------
# Small helpers
# ----------------------------------------------------------------------------
def _round_up(x, m):
    return (x + m - 1) // m * m


def _pick_tile(dim, unit, max_tile):
    """Largest multiple of `unit` that divides `dim` and is <= max_tile."""
    best = unit
    t = unit
    while t <= min(dim, max_tile):
        if dim % t == 0:
            best = t
        t += unit
    return best


def _erf_approx(x):
    # Abramowitz & Stegun 7.1.26 rational approximation, |err| <= 1.5e-7
    # (replaces lax.erf in-kernel; only exp / reciprocal needed -> EUP).
    a1, a2, a3, a4, a5 = 0.254829592, -0.284496736, 1.421413741, -1.453152027, 1.061405429
    p = 0.3275911
    s = jnp.where(x < 0.0, -1.0, 1.0)
    ax = jnp.abs(x)
    t = 1.0 / (1.0 + p * ax)
    poly = ((((a5 * t + a4) * t + a3) * t + a2) * t + a1) * t
    return s * (1.0 - poly * jnp.exp(-ax * ax))


# ----------------------------------------------------------------------------
# Pallas kernels
# ----------------------------------------------------------------------------
def _mm_kernel(act, has_res, a_ref, b_ref, bias_ref, *refs):
    """acc += a @ b (bf16 in, f32 acc); epilogue: +bias [+residual] [ReLU|GELU]."""
    if has_res:
        res_ref, o_ref, acc_ref = refs
    else:
        res_ref = None
        o_ref, acc_ref = refs

    @pl.when(pl.program_id(2) == 0)
    def _init():
        acc_ref[...] = jnp.zeros_like(acc_ref)

    acc_ref[...] += jnp.dot(a_ref[...], b_ref[...], preferred_element_type=jnp.float32)

    @pl.when(pl.program_id(2) == pl.num_programs(2) - 1)
    def _finalize():
        y = acc_ref[...] + bias_ref[...]
        if has_res:
            y = y + res_ref[...]
        if act == "relu":
            y = jnp.maximum(y, 0.0)
        elif act == "gelu":
            y = 0.5 * y * (1.0 + _erf_approx(y * 0.7071067811865476))
        o_ref[...] = y


def _maxpool_kernel(*refs):
    """Fold k*k tap tiles with elementwise maximum (VPU only)."""
    o_ref = refs[-1]
    m = refs[0][...]
    for r in refs[1:-1]:
        m = jnp.maximum(m, r[...])
    o_ref[...] = m


# ----------------------------------------------------------------------------
# Fused matmul wrapper (bf16 operands, f32 accumulate, padded/tiled grid)
# ----------------------------------------------------------------------------
def matmul_bias_act(a, b, bias, act="none", residual=None):
    """act((a @ b) + bias [+ residual]) with a tiled Pallas matmul kernel.

    a: (M, K) f32, b: (K, N) f32, bias: (N,) f32, residual: optional (M, N) f32.
    Dims are zero-padded to M%16 == K%128 == N%128 == 0 and sliced back.
    """
    M, K = a.shape
    Kb, N = b.shape
    assert K == Kb
    Mp, Kp, Np = _round_up(M, 16), _round_up(K, 128), _round_up(N, 128)
    tm = _pick_tile(Mp, 16, 256)
    tk = _pick_tile(Kp, 128, 1024)
    tn = _pick_tile(Np, 128, 256)

    # bf16 MXU operands; accumulation and epilogue stay f32.
    a_p = jnp.pad(a.astype(jnp.float32), ((0, Mp - M), (0, Kp - K))).astype(jnp.bfloat16)
    b_p = jnp.pad(b.astype(jnp.float32), ((0, Kp - K), (0, Np - N))).astype(jnp.bfloat16)
    bias_p = jnp.pad(bias.astype(jnp.float32), (0, Np - N)).reshape(1, Np)

    inputs = [a_p, b_p, bias_p]
    in_specs = [
        pl.BlockSpec((tm, tk), lambda i, j, k: (i, k)),
        pl.BlockSpec((tk, tn), lambda i, j, k: (k, j)),
        pl.BlockSpec((1, tn), lambda i, j, k: (0, j)),
    ]
    if residual is not None:
        r_p = jnp.pad(residual.astype(jnp.float32), ((0, Mp - M), (0, Np - N)))
        inputs.append(r_p)
        in_specs.append(pl.BlockSpec((tm, tn), lambda i, j, k: (i, j)))

    out = pl.pallas_call(
        functools.partial(_mm_kernel, act, residual is not None),
        out_shape=jax.ShapeDtypeStruct((Mp, Np), jnp.float32),
        grid=(Mp // tm, Np // tn, Kp // tk),
        in_specs=in_specs,
        out_specs=pl.BlockSpec((tm, tn), lambda i, j, k: (i, j)),
        scratch_shapes=[pltpu.VMEM((tm, tn), jnp.float32)],
        compiler_params=pltpu.CompilerParams(
            dimension_semantics=("parallel", "parallel", "arbitrary")),
    )(*inputs)
    return out[:M, :N]


# ----------------------------------------------------------------------------
# Layer wrappers (NHWC layout; im2col / slicing is plain-JAX glue under jit)
# ----------------------------------------------------------------------------
def conv2d_bn_act(x, wmat, bias, kh, kw, stride, padding, act, residual=None):
    """Conv2d (no bias) + folded-BN bias + optional fused residual/activation.

    x: (N, H, W, Cin) NHWC; wmat: (kh*kw*Cin, Cout) with BN scale pre-folded.
    residual (optional): (N, Ho, Wo, Cout) NHWC, fused as add before activation.
    """
    N, H, W, Cin = x.shape
    Cout = wmat.shape[1]
    Ho = (H + 2 * padding - kh) // stride + 1
    Wo = (W + 2 * padding - kw) // stride + 1
    if padding:
        x = jnp.pad(x, ((0, 0), (padding, padding), (padding, padding), (0, 0)))
    if kh == 1 and kw == 1 and stride == 1:
        a = x.reshape(N * Ho * Wo, Cin)
    else:
        taps = [x[:, i:i + stride * Ho:stride, j:j + stride * Wo:stride, :]
                for i in range(kh) for j in range(kw)]
        a = jnp.concatenate(taps, axis=-1).reshape(N * Ho * Wo, kh * kw * Cin)
    res2d = None if residual is None else residual.reshape(N * Ho * Wo, Cout)
    out = matmul_bias_act(a, wmat, bias, act=act, residual=res2d)
    return out.reshape(N, Ho, Wo, Cout)


def maxpool2d(x, k, stride, padding):
    """MaxPool2d in NHWC; k*k taps folded with jnp.maximum inside one kernel."""
    N, H, W, C = x.shape
    Ho = (H + 2 * padding - k) // stride + 1
    Wo = (W + 2 * padding - k) // stride + 1
    xp = jnp.pad(x, ((0, 0), (padding, padding), (padding, padding), (0, 0)),
                 constant_values=-jnp.inf)
    taps = [
        xp[:, i:i + stride * Ho:stride, j:j + stride * Wo:stride, :]
        .reshape(N * Ho, Wo * C).astype(jnp.float32)
        for i in range(k) for j in range(k)
    ]
    R, Ccols = N * Ho, Wo * C
    Rp, Cp = _round_up(R, 8), _round_up(Ccols, 128)   # lane-dense, unmasked stores
    taps = [jnp.pad(t, ((0, Rp - R), (0, Cp - Ccols))) for t in taps]
    out = pl.pallas_call(
        _maxpool_kernel,
        out_shape=jax.ShapeDtypeStruct((Rp, Cp), jnp.float32),
        grid=(1,),
        in_specs=[pl.BlockSpec((Rp, Cp), lambda i: (0, 0))] * (k * k),
        out_specs=pl.BlockSpec((Rp, Cp), lambda i: (0, 0)),
    )(*taps)
    return out[:R, :Ccols].reshape(N, Ho, Wo, C)


# ----------------------------------------------------------------------------
# Parameters (deterministic init mirroring _initialize_weights; BN folded)
# ----------------------------------------------------------------------------
def _bn_affine(c, eps=1e-5):
    gamma = jnp.ones((c,), jnp.float32)
    beta = jnp.zeros((c,), jnp.float32)
    mean = jnp.zeros((c,), jnp.float32)
    var = jnp.ones((c,), jnp.float32)
    scale = gamma / jnp.sqrt(var + eps)
    bias = beta - mean * scale
    return scale, bias


def _conv_bn_params(key, cout, cin, kh, kw):
    fan_out = cout * kh * kw
    std = (2.0 / fan_out) ** 0.5
    w = jax.random.normal(key, (cout, cin, kh, kw), jnp.float32) * std
    scale, bias = _bn_affine(cout)
    # Fold the eval-mode BN scale into the conv weight; epilogue is bias add only.
    wmat = (w * scale[:, None, None, None]).transpose(2, 3, 1, 0).reshape(kh * kw * cin, cout)
    return wmat, bias


def init_params(key, num_block=(1, 1, 1, 1)):
    keys = iter(jax.random.split(key, 64))
    params = {}
    params["conv1_w"], params["conv1_b"] = _conv_bn_params(next(keys), 64, 1, 7, 7)

    in_ch = 64
    layers = []
    for out_ch, nb, stride0 in zip((64, 128, 256, 512), num_block, (1, 2, 2, 2)):
        blocks = []
        for s in [stride0] + [1] * (nb - 1):
            blk = {}
            blk["w1"], blk["b1"] = _conv_bn_params(next(keys), out_ch, in_ch, 3, 3)
            blk["w2"], blk["b2"] = _conv_bn_params(next(keys), out_ch, out_ch, 3, 3)
            if s != 1 or in_ch != out_ch:     # BasicBlock (expansion=1) shortcut
                blk["ws"], blk["bs"] = _conv_bn_params(next(keys), out_ch, in_ch, 1, 1)
            in_ch = out_ch
            blocks.append(blk)
        layers.append(blocks)
    params["layers"] = layers

    params["fc_w"] = jax.random.normal(next(keys), (400, 512), jnp.float32) * 0.01
    params["fc_b"] = jnp.zeros((400,), jnp.float32)
    return params


# ----------------------------------------------------------------------------
# Forward pass (jit'ed; anchor/positive/negative of a triplet can be stacked
# on the batch axis by the caller to raise MXU row utilization)
# ----------------------------------------------------------------------------
def basic_block(x, blk, stride):
    if "ws" in blk:
        sc = conv2d_bn_act(x, blk["ws"], blk["bs"], 1, 1, stride, 0, act="none")
    else:
        sc = x
    out = conv2d_bn_act(x, blk["w1"], blk["b1"], 3, 3, stride, 1, act="relu")
    # residual add + ReLU fused into the second conv's matmul epilogue
    out = conv2d_bn_act(out, blk["w2"], blk["b2"], 3, 3, 1, 1, act="relu", residual=sc)
    return out


@jax.jit
def resnet_triplet_forward(params, x):
    # x: (N, 1, H, W) NCHW like PyTorch -> convert once to NHWC.
    x = jnp.transpose(x, (0, 2, 3, 1))
    # conv1: Conv 7x7/2 + BN + ReLU (fused) + MaxPool 3x3/2
    x = conv2d_bn_act(x, params["conv1_w"], params["conv1_b"], 7, 7, 2, 3, act="relu")
    x = maxpool2d(x, 3, 2, 1)
    # conv2_x .. conv5_x
    for li, blocks in enumerate(params["layers"]):
        for bi, blk in enumerate(blocks):
            stride = 2 if (li > 0 and bi == 0) else 1
            x = basic_block(x, blk, stride)
    # AdaptiveAvgPool2d((1,1)) + flatten (spatial is 1x1 here; tiny XLA glue)
    feat = jnp.mean(x, axis=(1, 2))                            # (N, 512)
    # fc: Linear(512, 400) with GELU fused in-kernel; Dropout(0.3) = identity (eval).
    y = matmul_bias_act(feat, params["fc_w"].T, params["fc_b"], act="gelu")
    return y


if __name__ == "__main__":
    key = jax.random.PRNGKey(0)
    pkey, xkey = jax.random.split(key)
    params = init_params(pkey, num_block=(1, 1, 1, 1))
    x = jax.random.normal(xkey, (2, 1, 32, 32), jnp.float32)   # (N, C=1, H, W) NCHW

    out = resnet_triplet_forward(params, x)
    out = jax.block_until_ready(out)
    assert out.shape == (2, 400), out.shape
    assert bool(jnp.all(jnp.isfinite(out)))
    print("KERNEL_OK")
</pallas_src>

<mosaic_0001>
module attributes {stable_mosaic.version = 11 : i64} {
  func.func @_mm_kernel(%arg0: i32, %arg1: i32, %arg2: i32, %arg3: memref<256x128xbf16, #tpu.memory_space<vmem>>, %arg4: memref<128x128xbf16, #tpu.memory_space<vmem>>, %arg5: memref<1x128xf32, #tpu.memory_space<vmem>>, %arg6: memref<256x128xf32, #tpu.memory_space<vmem>>, %arg7: memref<256x128xf32, #tpu.memory_space<vmem>>) attributes {dimension_semantics = [#tpu.dimension_semantics<parallel>, #tpu.dimension_semantics<parallel>, #tpu.dimension_semantics<arbitrary>], iteration_bounds = array<i64: 2, 1, 1>, scalar_prefetch = 0 : i64, scratch_operands = 1 : i64, tpu.core_type = #tpu.core_type<tc>, window_params = [{transform_indices = @transform_0, window_bounds = array<i64: 256, 128>}, {transform_indices = @transform_1, window_bounds = array<i64: 128, 128>}, {transform_indices = @transform_2, window_bounds = array<i64: 1, 128>}, {transform_indices = @transform_3, window_bounds = array<i64: 256, 128>}]} {
    %c0_i32 = arith.constant 0 : i32
    %0 = arith.cmpi eq, %arg2, %c0_i32 : i32
    %1 = arith.extui %0 : i1 to i32
    %c0_i32_0 = arith.constant 0 : i32
    %2 = arith.cmpi ne, %1, %c0_i32_0 : i32
    scf.if %2 {
      %cst_10 = arith.constant 0.000000e+00 : f32
      %12 = vector.broadcast %cst_10 : f32 to vector<256x128xf32>
      %c0_11 = arith.constant 0 : index
      %c0_12 = arith.constant 0 : index
      %13 = vector.load %arg7[%c0_11, %c0_12] : memref<256x128xf32, #tpu.memory_space<vmem>>, vector<256x128xf32>
      tpu.vector_store %arg7[%c0_11, %c0_12], %12 {strides = array<i32>} : memref<256x128xf32, #tpu.memory_space<vmem>>, vector<256x128xf32>,
    } else {
    }
    %c0 = arith.constant 0 : index
    %c0_1 = arith.constant 0 : index
    %3 = vector.load %arg7[%c0, %c0_1] : memref<256x128xf32, #tpu.memory_space<vmem>>, vector<256x128xf32>
    %c0_2 = arith.constant 0 : index
    %c0_3 = arith.constant 0 : index
    %4 = vector.load %arg3[%c0_2, %c0_3] : memref<256x128xbf16, #tpu.memory_space<vmem>>, vector<256x128xbf16>
    %c0_4 = arith.constant 0 : index
    %c0_5 = arith.constant 0 : index
    %5 = vector.load %arg4[%c0_4, %c0_5] : memref<128x128xbf16, #tpu.memory_space<vmem>>, vector<128x128xbf16>
    %cst = arith.constant dense<0.000000e+00> : vector<256x128xf32>
    %6 = tpu.matmul %4, %5, %cst {dimension_numbers = #tpu.dot_dimension_numbers<[1], [0], [0], [1], [0, 0, 1, 1], [], []>} : vector<256x128xbf16>, vector<128x128xbf16>, vector<256x128xf32> -> vector<256x128xf32>
    %7 = arith.addf %3, %6 : vector<256x128xf32>
    %c0_6 = arith.constant 0 : index
    %c0_7 = arith.constant 0 : index
    %8 = vector.load %arg7[%c0_6, %c0_7] : memref<256x128xf32, #tpu.memory_space<vmem>>, vector<256x128xf32>
    tpu.vector_store %arg7[%c0_6, %c0_7], %7 {strides = array<i32>} : memref<256x128xf32, #tpu.memory_space<vmem>>, vector<256x128xf32>,
    %c0_i32_8 = arith.constant 0 : i32
    %9 = arith.cmpi eq, %arg2, %c0_i32_8 : i32
    %10 = arith.extui %9 : i1 to i32
    %c0_i32_9 = arith.constant 0 : i32
    %11 = arith.cmpi ne, %10, %c0_i32_9 : i32
    scf.if %11 {
      %c0_10 = arith.constant 0 : index
      %c0_11 = arith.constant 0 : index
      %12 = vector.load %arg7[%c0_10, %c0_11] : memref<256x128xf32, #tpu.memory_space<vmem>>, vector<256x128xf32>
      %c0_12 = arith.constant 0 : index
      %c0_13 = arith.constant 0 : index
      %13 = vector.load %arg5[%c0_12, %c0_13] : memref<1x128xf32, #tpu.memory_space<vmem>>, vector<1x128xf32>
      %14 = vector.broadcast %13 : vector<1x128xf32> to vector<256x128xf32>
      %15 = arith.addf %12, %14 : vector<256x128xf32>
      %cst_14 = arith.constant 0.000000e+00 : f32
      %16 = vector.broadcast %cst_14 : f32 to vector<256x128xf32>
      %17 = arith.maximumf %15, %16 : vector<256x128xf32>
      %c0_15 = arith.constant 0 : index
      %c0_16 = arith.constant 0 : index
      %18 = vector.load %arg6[%c0_15, %c0_16] : memref<256x128xf32, #tpu.memory_space<vmem>>, vector<256x128xf32>
      tpu.vector_store %arg6[%c0_15, %c0_16], %17 {strides = array<i32>} : memref<256x128xf32, #tpu.memory_space<vmem>>, vector<256x128xf32>,
    } else {
    }
    return
  }
  func.func @transform_0(%arg0: i32, %arg1: i32, %arg2: i32) -> (i32, i32) {
    %c0_i32 = arith.constant 0 : i32
    return %arg0, %arg2 : i32, i32
  }
  func.func @transform_1(%arg0: i32, %arg1: i32, %arg2: i32) -> (i32, i32) {
    %c0_i32 = arith.constant 0 : i32
    return %arg2, %arg1 : i32, i32
  }
  func.func @transform_2(%arg0: i32, %arg1: i32, %arg2: i32) -> (i32, i32) {
    %c0_i32 = arith.constant 0 : i32
    %c0_i32_0 = arith.constant 0 : i32
    return %c0_i32, %arg1 : i32, i32
  }
  func.func @transform_3(%arg0: i32, %arg1: i32, %arg2: i32) -> (i32, i32) {
    %c0_i32 = arith.constant 0 : i32
    return %arg0, %arg1 : i32, i32
  }
}

module attributes {stable_mosaic.version = 11 : i64} {
  func.func @_maxpool_kernel(%arg0: i32, %arg1: memref<16x512xf32, #tpu.memory_space<vmem>>, %arg2: memref<16x512xf32, #tpu.memory_space<vmem>>, %arg3: memref<16x512xf32, #tpu.memory_space<vmem>>, %arg4: memref<16x512xf32, #tpu.memory_space<vmem>>, %arg5: memref<16x512xf32, #tpu.memory_space<vmem>>, %arg6: memref<16x512xf32, #tpu.memory_space<vmem>>, %arg7: memref<16x512xf32, #tpu.memory_space<vmem>>, %arg8: memref<16x512xf32, #tpu.memory_space<vmem>>, %arg9: memref<16x512xf32, #tpu.memory_space<vmem>>, %arg10: memref<16x512xf32, #tpu.memory_space<vmem>>) attributes {dimension_semantics = [#tpu.dimension_semantics<arbitrary>], iteration_bounds = array<i64: 1>, scalar_prefetch = 0 : i64, scratch_operands = 0 : i64, tpu.core_type = #tpu.core_type<tc>, window_params = [{pipeline_mode = #tpu.pipeline_mode<synchronous>, transform_indices = @transform_0, window_bounds = array<i64: 16, 512>}, {pipeline_mode = #tpu.pipeline_mode<synchronous>, transform_indices = @transform_1, window_bounds = array<i64: 16, 512>}, {pipeline_mode = #tpu.pipeline_mode<synchronous>, transform_indices = @transform_2, window_bounds = array<i64: 16, 512>}, {pipeline_mode = #tpu.pipeline_mode<synchronous>, transform_indices = @transform_3, window_bounds = array<i64: 16, 512>}, {pipeline_mode = #tpu.pipeline_mode<synchronous>, transform_indices = @transform_4, window_bounds = array<i64: 16, 512>}, {pipeline_mode = #tpu.pipeline_mode<synchronous>, transform_indices = @transform_5, window_bounds = array<i64: 16, 512>}, {pipeline_mode = #tpu.pipeline_mode<synchronous>, transform_indices = @transform_6, window_bounds = array<i64: 16, 512>}, {pipeline_mode = #tpu.pipeline_mode<synchronous>, transform_indices = @transform_7, window_bounds = array<i64: 16, 512>}, {pipeline_mode = #tpu.pipeline_mode<synchronous>, transform_indices = @transform_8, window_bounds = array<i64: 16, 512>}, {pipeline_mode = #tpu.pipeline_mode<synchronous>, transform_indices = @transform_9, window_bounds = array<i64: 16, 512>}]} {
    %c0 = arith.constant 0 : index
    %c0_0 = arith.constant 0 : index
    %0 = vector.load %arg1[%c0, %c0_0] : memref<16x512xf32, #tpu.memory_space<vmem>>, vector<16x512xf32>
    %c0_1 = arith.constant 0 : index
    %c0_2 = arith.constant 0 : index
    %1 = vector.load %arg2[%c0_1, %c0_2] : memref<16x512xf32, #tpu.memory_space<vmem>>, vector<16x512xf32>
    %2 = arith.maximumf %0, %1 : vector<16x512xf32>
    %c0_3 = arith.constant 0 : index
    %c0_4 = arith.constant 0 : index
    %3 = vector.load %arg3[%c0_3, %c0_4] : memref<16x512xf32, #tpu.memory_space<vmem>>, vector<16x512xf32>
    %4 = arith.maximumf %2, %3 : vector<16x512xf32>
    %c0_5 = arith.constant 0 : index
    %c0_6 = arith.constant 0 : index
    %5 = vector.load %arg4[%c0_5, %c0_6] : memref<16x512xf32, #tpu.memory_space<vmem>>, vector<16x512xf32>
    %6 = arith.maximumf %4, %5 : vector<16x512xf32>
    %c0_7 = arith.constant 0 : index
    %c0_8 = arith.constant 0 : index
    %7 = vector.load %arg5[%c0_7, %c0_8] : memref<16x512xf32, #tpu.memory_space<vmem>>, vector<16x512xf32>
    %8 = arith.maximumf %6, %7 : vector<16x512xf32>
    %c0_9 = arith.constant 0 : index
    %c0_10 = arith.constant 0 : index
    %9 = vector.load %arg6[%c0_9, %c0_10] : memref<16x512xf32, #tpu.memory_space<vmem>>, vector<16x512xf32>
    %10 = arith.maximumf %8, %9 : vector<16x512xf32>
    %c0_11 = arith.constant 0 : index
    %c0_12 = arith.constant 0 : index
    %11 = vector.load %arg7[%c0_11, %c0_12] : memref<16x512xf32, #tpu.memory_space<vmem>>, vector<16x512xf32>
    %12 = arith.maximumf %10, %11 : vector<16x512xf32>
    %c0_13 = arith.constant 0 : index
    %c0_14 = arith.constant 0 : index
    %13 = vector.load %arg8[%c0_13, %c0_14] : memref<16x512xf32, #tpu.memory_space<vmem>>, vector<16x512xf32>
    %14 = arith.maximumf %12, %13 : vector<16x512xf32>
    %c0_15 = arith.constant 0 : index
    %c0_16 = arith.constant 0 : index
    %15 = vector.load %arg9[%c0_15, %c0_16] : memref<16x512xf32, #tpu.memory_space<vmem>>, vector<16x512xf32>
    %16 = arith.maximumf %14, %15 : vector<16x512xf32>
    %c0_17 = arith.constant 0 : index
    %c0_18 = arith.constant 0 : index
    %17 = vector.load %arg10[%c0_17, %c0_18] : memref<16x512xf32, #tpu.memory_space<vmem>>, vector<16x512xf32>
    tpu.vector_store %arg10[%c0_17, %c0_18], %16 {strides = array<i32>} : memref<16x512xf32, #tpu.memory_space<vmem>>, vector<16x512xf32>,
    return
  }
  func.func @transform_0(%arg0: i32) -> (i32, i32) {
    %c0_i32 = arith.constant 0 : i32
    %c0_i32_0 = arith.constant 0 : i32
    %c0_i32_1 = arith.constant 0 : i32
    return %c0_i32, %c0_i32_0 : i32, i32
  }
  func.func @transform_1(%arg0: i32) -> (i32, i32) {
    %c0_i32 = arith.constant 0 : i32
    %c0_i32_0 = arith.constant 0 : i32
    %c0_i32_1 = arith.constant 0 : i32
    return %c0_i32, %c0_i32_0 : i32, i32
  }
  func.func @transform_2(%arg0: i32) -> (i32, i32) {
    %c0_i32 = arith.constant 0 : i32
    %c0_i32_0 = arith.constant 0 : i32
    %c0_i32_1 = arith.constant 0 : i32
    return %c0_i32, %c0_i32_0 : i32, i32
  }
  func.func @transform_3(%arg0: i32) -> (i32, i32) {
    %c0_i32 = arith.constant 0 : i32
    %c0_i32_0 = arith.constant 0 : i32
    %c0_i32_1 = arith.constant 0 : i32
    return %c0_i32, %c0_i32_0 : i32, i32
  }
  func.func @transform_4(%arg0: i32) -> (i32, i32) {
    %c0_i32 = arith.constant 0 : i32
    %c0_i32_0 = arith.constant 0 : i32
    %c0_i32_1 = arith.constant 0 : i32
    return %c0_i32, %c0_i32_0 : i32, i32
  }
  func.func @transform_5(%arg0: i32) -> (i32, i32) {
    %c0_i32 = arith.constant 0 : i32
    %c0_i32_0 = arith.constant 0 : i32
    %c0_i32_1 = arith.constant 0 : i32
    return %c0_i32, %c0_i32_0 : i32, i32
  }
  func.func @transform_6(%arg0: i32) -> (i32, i32) {
    %c0_i32 = arith.constant 0 : i32
    %c0_i32_0 = arith.constant 0 : i32
    %c0_i32_1 = arith.constant 0 : i32
    return %c0_i32, %c0_i32_0 : i32, i32
  }
  func.func @transform_7(%arg0: i32) -> (i32, i32) {
    %c0_i32 = arith.constant 0 : i32
    %c0_i32_0 = arith.constant 0 : i32
    %c0_i32_1 = arith.constant 0 : i32
    return %c0_i32, %c0_i32_0 : i32, i32
  }
  func.func @transform_8(%arg0: i32) -> (i32, i32) {
    %c0_i32 = arith.constant 0 : i32
    %c0_i32_0 = arith.constant 0 : i32
    %c0_i32_1 = arith.constant 0 : i32
    return %c0_i32, %c0_i32_0 : i32, i32
  }
  func.func @transform_9(%arg0: i32) -> (i32, i32) {
    %c0_i32 = arith.constant 0 : i32
    %c0_i32_0 = arith.constant 0 : i32
    %c0_i32_1 = arith.constant 0 : i32
    return %c0_i32, %c0_i32_0 : i32, i32
  }
}

module attributes {stable_mosaic.version = 11 : i64} {
  func.func @_mm_kernel(%arg0: i32, %arg1: i32, %arg2: i32, %arg3: memref<128x640xbf16, #tpu.memory_space<vmem>>, %arg4: memref<640x128xbf16, #tpu.memory_space<vmem>>, %arg5: memref<1x128xf32, #tpu.memory_space<vmem>>, %arg6: memref<128x128xf32, #tpu.memory_space<vmem>>, %arg7: memref<128x128xf32, #tpu.memory_space<vmem>>) attributes {dimension_semantics = [#tpu.dimension_semantics<parallel>, #tpu.dimension_semantics<parallel>, #tpu.dimension_semantics<arbitrary>], iteration_bounds = array<i64: 1, 1, 1>, scalar_prefetch = 0 : i64, scratch_operands = 1 : i64, tpu.core_type = #tpu.core_type<tc>, window_params = [{transform_indices = @transform_0, window_bounds = array<i64: 128, 640>}, {transform_indices = @transform_1, window_bounds = array<i64: 640, 128>}, {transform_indices = @transform_2, window_bounds = array<i64: 1, 128>}, {transform_indices = @transform_3, window_bounds = array<i64: 128, 128>}]} {
    %c0_i32 = arith.constant 0 : i32
    %0 = arith.cmpi eq, %arg2, %c0_i32 : i32
    %1 = arith.extui %0 : i1 to i32
    %c0_i32_0 = arith.constant 0 : i32
    %2 = arith.cmpi ne, %1, %c0_i32_0 : i32
    scf.if %2 {
      %cst_10 = arith.constant 0.000000e+00 : f32
      %12 = vector.broadcast %cst_10 : f32 to vector<128x128xf32>
      %c0_11 = arith.constant 0 : index
      %c0_12 = arith.constant 0 : index
      %13 = vector.load %arg7[%c0_11, %c0_12] : memref<128x128xf32, #tpu.memory_space<vmem>>, vector<128x128xf32>
      tpu.vector_store %arg7[%c0_11, %c0_12], %12 {strides = array<i32>} : memref<128x128xf32, #tpu.memory_space<vmem>>, vector<128x128xf32>,
    } else {
    }
    %c0 = arith.constant 0 : index
    %c0_1 = arith.constant 0 : index
    %3 = vector.load %arg7[%c0, %c0_1] : memref<128x128xf32, #tpu.memory_space<vmem>>, vector<128x128xf32>
    %c0_2 = arith.constant 0 : index
    %c0_3 = arith.constant 0 : index
    %4 = vector.load %arg3[%c0_2, %c0_3] : memref<128x640xbf16, #tpu.memory_space<vmem>>, vector<128x640xbf16>
    %c0_4 = arith.constant 0 : index
    %c0_5 = arith.constant 0 : index
    %5 = vector.load %arg4[%c0_4, %c0_5] : memref<640x128xbf16, #tpu.memory_space<vmem>>, vector<640x128xbf16>
    %cst = arith.constant dense<0.000000e+00> : vector<128x128xf32>
    %6 = tpu.matmul %4, %5, %cst {dimension_numbers = #tpu.dot_dimension_numbers<[1], [0], [0], [1], [0, 0, 1, 1], [], []>} : vector<128x640xbf16>, vector<640x128xbf16>, vector<128x128xf32> -> vector<128x128xf32>
    %7 = arith.addf %3, %6 : vector<128x128xf32>
    %c0_6 = arith.constant 0 : index
    %c0_7 = arith.constant 0 : index
    %8 = vector.load %arg7[%c0_6, %c0_7] : memref<128x128xf32, #tpu.memory_space<vmem>>, vector<128x128xf32>
    tpu.vector_store %arg7[%c0_6, %c0_7], %7 {strides = array<i32>} : memref<128x128xf32, #tpu.memory_space<vmem>>, vector<128x128xf32>,
    %c0_i32_8 = arith.constant 0 : i32
    %9 = arith.cmpi eq, %arg2, %c0_i32_8 : i32
    %10 = arith.extui %9 : i1 to i32
    %c0_i32_9 = arith.constant 0 : i32
    %11 = arith.cmpi ne, %10, %c0_i32_9 : i32
    scf.if %11 {
      %c0_10 = arith.constant 0 : index
      %c0_11 = arith.constant 0 : index
      %12 = vector.load %arg7[%c0_10, %c0_11] : memref<128x128xf32, #tpu.memory_space<vmem>>, vector<128x128xf32>
      %c0_12 = arith.constant 0 : index
      %c0_13 = arith.constant 0 : index
      %13 = vector.load %arg5[%c0_12, %c0_13] : memref<1x128xf32, #tpu.memory_space<vmem>>, vector<1x128xf32>
      %14 = vector.broadcast %13 : vector<1x128xf32> to vector<128x128xf32>
      %15 = arith.addf %12, %14 : vector<128x128xf32>
      %cst_14 = arith.constant 0.000000e+00 : f32
      %16 = vector.broadcast %cst_14 : f32 to vector<128x128xf32>
      %17 = arith.maximumf %15, %16 : vector<128x128xf32>
      %c0_15 = arith.constant 0 : index
      %c0_16 = arith.constant 0 : index
      %18 = vector.load %arg6[%c0_15, %c0_16] : memref<128x128xf32, #tpu.memory_space<vmem>>, vector<128x128xf32>
      tpu.vector_store %arg6[%c0_15, %c0_16], %17 {strides = array<i32>} : memref<128x128xf32, #tpu.memory_space<vmem>>, vector<128x128xf32>,
    } else {
    }
    return
  }
  func.func @transform_0(%arg0: i32, %arg1: i32, %arg2: i32) -> (i32, i32) {
    %c0_i32 = arith.constant 0 : i32
    return %arg0, %arg2 : i32, i32
  }
  func.func @transform_1(%arg0: i32, %arg1: i32, %arg2: i32) -> (i32, i32) {
    %c0_i32 = arith.constant 0 : i32
    return %arg2, %arg1 : i32, i32
  }
  func.func @transform_2(%arg0: i32, %arg1: i32, %arg2: i32) -> (i32, i32) {
    %c0_i32 = arith.constant 0 : i32
    %c0_i32_0 = arith.constant 0 : i32
    return %c0_i32, %arg1 : i32, i32
  }
  func.func @transform_3(%arg0: i32, %arg1: i32, %arg2: i32) -> (i32, i32) {
    %c0_i32 = arith.constant 0 : i32
    return %arg0, %arg1 : i32, i32
  }
}

module attributes {stable_mosaic.version = 11 : i64} {
  func.func @_mm_kernel(%arg0: i32, %arg1: i32, %arg2: i32, %arg3: memref<128x640xbf16, #tpu.memory_space<vmem>>, %arg4: memref<640x128xbf16, #tpu.memory_space<vmem>>, %arg5: memref<1x128xf32, #tpu.memory_space<vmem>>, %arg6: memref<128x128xf32, #tpu.memory_space<vmem>>, %arg7: memref<128x128xf32, #tpu.memory_space<vmem>>, %arg8: memref<128x128xf32, #tpu.memory_space<vmem>>) attributes {dimension_semantics = [#tpu.dimension_semantics<parallel>, #tpu.dimension_semantics<parallel>, #tpu.dimension_semantics<arbitrary>], iteration_bounds = array<i64: 1, 1, 1>, scalar_prefetch = 0 : i64, scratch_operands = 1 : i64, tpu.core_type = #tpu.core_type<tc>, window_params = [{transform_indices = @transform_0, window_bounds = array<i64: 128, 640>}, {transform_indices = @transform_1, window_bounds = array<i64: 640, 128>}, {transform_indices = @transform_2, window_bounds = array<i64: 1, 128>}, {transform_indices = @transform_3, window_bounds = array<i64: 128, 128>}, {transform_indices = @transform_4, window_bounds = array<i64: 128, 128>}]} {
    %c0_i32 = arith.constant 0 : i32
    %0 = arith.cmpi eq, %arg2, %c0_i32 : i32
    %1 = arith.extui %0 : i1 to i32
    %c0_i32_0 = arith.constant 0 : i32
    %2 = arith.cmpi ne, %1, %c0_i32_0 : i32
    scf.if %2 {
      %cst_10 = arith.constant 0.000000e+00 : f32
      %12 = vector.broadcast %cst_10 : f32 to vector<128x128xf32>
      %c0_11 = arith.constant 0 : index
      %c0_12 = arith.constant 0 : index
      %13 = vector.load %arg8[%c0_11, %c0_12] : memref<128x128xf32, #tpu.memory_space<vmem>>, vector<128x128xf32>
      tpu.vector_store %arg8[%c0_11, %c0_12], %12 {strides = array<i32>} : memref<128x128xf32, #tpu.memory_space<vmem>>, vector<128x128xf32>,
    } else {
    }
    %c0 = arith.constant 0 : index
    %c0_1 = arith.constant 0 : index
    %3 = vector.load %arg8[%c0, %c0_1] : memref<128x128xf32, #tpu.memory_space<vmem>>, vector<128x128xf32>
    %c0_2 = arith.constant 0 : index
    %c0_3 = arith.constant 0 : index
    %4 = vector.load %arg3[%c0_2, %c0_3] : memref<128x640xbf16, #tpu.memory_space<vmem>>, vector<128x640xbf16>
    %c0_4 = arith.constant 0 : index
    %c0_5 = arith.constant 0 : index
    %5 = vector.load %arg4[%c0_4, %c0_5] : memref<640x128xbf16, #tpu.memory_space<vmem>>, vector<640x128xbf16>
    %cst = arith.constant dense<0.000000e+00> : vector<128x128xf32>
    %6 = tpu.matmul %4, %5, %cst {dimension_numbers = #tpu.dot_dimension_numbers<[1], [0], [0], [1], [0, 0, 1, 1], [], []>} : vector<128x640xbf16>, vector<640x128xbf16>, vector<128x128xf32> -> vector<128x128xf32>
    %7 = arith.addf %3, %6 : vector<128x128xf32>
    %c0_6 = arith.constant 0 : index
    %c0_7 = arith.constant 0 : index
    %8 = vector.load %arg8[%c0_6, %c0_7] : memref<128x128xf32, #tpu.memory_space<vmem>>, vector<128x128xf32>
    tpu.vector_store %arg8[%c0_6, %c0_7], %7 {strides = array<i32>} : memref<128x128xf32, #tpu.memory_space<vmem>>, vector<128x128xf32>,
    %c0_i32_8 = arith.constant 0 : i32
    %9 = arith.cmpi eq, %arg2, %c0_i32_8 : i32
    %10 = arith.extui %9 : i1 to i32
    %c0_i32_9 = arith.constant 0 : i32
    %11 = arith.cmpi ne, %10, %c0_i32_9 : i32
    scf.if %11 {
      %c0_10 = arith.constant 0 : index
      %c0_11 = arith.constant 0 : index
      %12 = vector.load %arg8[%c0_10, %c0_11] : memref<128x128xf32, #tpu.memory_space<vmem>>, vector<128x128xf32>
      %c0_12 = arith.constant 0 : index
      %c0_13 = arith.constant 0 : index
      %13 = vector.load %arg5[%c0_12, %c0_13] : memref<1x128xf32, #tpu.memory_space<vmem>>, vector<1x128xf32>
      %14 = vector.broadcast %13 : vector<1x128xf32> to vector<128x128xf32>
      %15 = arith.addf %12, %14 : vector<128x128xf32>
      %c0_14 = arith.constant 0 : index
      %c0_15 = arith.constant 0 : index
      %16 = vector.load %arg6[%c0_14, %c0_15] : memref<128x128xf32, #tpu.memory_space<vmem>>, vector<128x128xf32>
      %17 = arith.addf %15, %16 : vector<128x128xf32>
      %cst_16 = arith.constant 0.000000e+00 : f32
      %18 = vector.broadcast %cst_16 : f32 to vector<128x128xf32>
      %19 = arith.maximumf %17, %18 : vector<128x128xf32>
      %c0_17 = arith.constant 0 : index
      %c0_18 = arith.constant 0 : index
      %20 = vector.load %arg7[%c0_17, %c0_18] : memref<128x128xf32, #tpu.memory_space<vmem>>, vector<128x128xf32>
      tpu.vector_store %arg7[%c0_17, %c0_18], %19 {strides = array<i32>} : memref<128x128xf32, #tpu.memory_space<vmem>>, vector<128x128xf32>,
    } else {
    }
    return
  }
  func.func @transform_0(%arg0: i32, %arg1: i32, %arg2: i32) -> (i32, i32) {
    %c0_i32 = arith.constant 0 : i32
    return %arg0, %arg2 : i32, i32
  }
  func.func @transform_1(%arg0: i32, %arg1: i32, %arg2: i32) -> (i32, i32) {
    %c0_i32 = arith.constant 0 : i32
    return %arg2, %arg1 : i32, i32
  }
  func.func @transform_2(%arg0: i32, %arg1: i32, %arg2: i32) -> (i32, i32) {
    %c0_i32 = arith.constant 0 : i32
    %c0_i32_0 = arith.constant 0 : i32
    return %c0_i32, %arg1 : i32, i32
  }
  func.func @transform_3(%arg0: i32, %arg1: i32, %arg2: i32) -> (i32, i32) {
    %c0_i32 = arith.constant 0 : i32
    return %arg0, %arg1 : i32, i32
  }
  func.func @transform_4(%arg0: i32, %arg1: i32, %arg2: i32) -> (i32, i32) {
    %c0_i32 = arith.constant 0 : i32
    return %arg0, %arg1 : i32, i32
  }
}

module attributes {stable_mosaic.version = 11 : i64} {
  func.func @_mm_kernel(%arg0: i32, %arg1: i32, %arg2: i32, %arg3: memref<32x640xbf16, #tpu.memory_space<vmem>>, %arg4: memref<640x128xbf16, #tpu.memory_space<vmem>>, %arg5: memref<1x128xf32, #tpu.memory_space<vmem>>, %arg6: memref<32x128xf32, #tpu.memory_space<vmem>>, %arg7: memref<32x128xf32, #tpu.memory_space<vmem>>) attributes {dimension_semantics = [#tpu.dimension_semantics<parallel>, #tpu.dimension_semantics<parallel>, #tpu.dimension_semantics<arbitrary>], iteration_bounds = array<i64: 1, 1, 1>, scalar_prefetch = 0 : i64, scratch_operands = 1 : i64, tpu.core_type = #tpu.core_type<tc>, window_params = [{transform_indices = @transform_0, window_bounds = array<i64: 32, 640>}, {transform_indices = @transform_1, window_bounds = array<i64: 640, 128>}, {transform_indices = @transform_2, window_bounds = array<i64: 1, 128>}, {transform_indices = @transform_3, window_bounds = array<i64: 32, 128>}]} {
    %c0_i32 = arith.constant 0 : i32
    %0 = arith.cmpi eq, %arg2, %c0_i32 : i32
    %1 = arith.extui %0 : i1 to i32
    %c0_i32_0 = arith.constant 0 : i32
    %2 = arith.cmpi ne, %1, %c0_i32_0 : i32
    scf.if %2 {
      %cst_10 = arith.constant 0.000000e+00 : f32
      %12 = vector.broadcast %cst_10 : f32 to vector<32x128xf32>
      %c0_11 = arith.constant 0 : index
      %c0_12 = arith.constant 0 : index
      %13 = vector.load %arg7[%c0_11, %c0_12] : memref<32x128xf32, #tpu.memory_space<vmem>>, vector<32x128xf32>
      tpu.vector_store %arg7[%c0_11, %c0_12], %12 {strides = array<i32>} : memref<32x128xf32, #tpu.memory_space<vmem>>, vector<32x128xf32>,
    } else {
    }
    %c0 = arith.constant 0 : index
    %c0_1 = arith.constant 0 : index
    %3 = vector.load %arg7[%c0, %c0_1] : memref<32x128xf32, #tpu.memory_space<vmem>>, vector<32x128xf32>
    %c0_2 = arith.constant 0 : index
    %c0_3 = arith.constant 0 : index
    %4 = vector.load %arg3[%c0_2, %c0_3] : memref<32x640xbf16, #tpu.memory_space<vmem>>, vector<32x640xbf16>
    %c0_4 = arith.constant 0 : index
    %c0_5 = arith.constant 0 : index
    %5 = vector.load %arg4[%c0_4, %c0_5] : memref<640x128xbf16, #tpu.memory_space<vmem>>, vector<640x128xbf16>
    %cst = arith.constant dense<0.000000e+00> : vector<32x128xf32>
    %6 = tpu.matmul %4, %5, %cst {dimension_numbers = #tpu.dot_dimension_numbers<[1], [0], [0], [1], [0, 0, 1, 1], [], []>} : vector<32x640xbf16>, vector<640x128xbf16>, vector<32x128xf32> -> vector<32x128xf32>
    %7 = arith.addf %3, %6 : vector<32x128xf32>
    %c0_6 = arith.constant 0 : index
    %c0_7 = arith.constant 0 : index
    %8 = vector.load %arg7[%c0_6, %c0_7] : memref<32x128xf32, #tpu.memory_space<vmem>>, vector<32x128xf32>
    tpu.vector_store %arg7[%c0_6, %c0_7], %7 {strides = array<i32>} : memref<32x128xf32, #tpu.memory_space<vmem>>, vector<32x128xf32>,
    %c0_i32_8 = arith.constant 0 : i32
    %9 = arith.cmpi eq, %arg2, %c0_i32_8 : i32
    %10 = arith.extui %9 : i1 to i32
    %c0_i32_9 = arith.constant 0 : i32
    %11 = arith.cmpi ne, %10, %c0_i32_9 : i32
    scf.if %11 {
      %c0_10 = arith.constant 0 : index
      %c0_11 = arith.constant 0 : index
      %12 = vector.load %arg7[%c0_10, %c0_11] : memref<32x128xf32, #tpu.memory_space<vmem>>, vector<32x128xf32>
      %c0_12 = arith.constant 0 : index
      %c0_13 = arith.constant 0 : index
      %13 = vector.load %arg5[%c0_12, %c0_13] : memref<1x128xf32, #tpu.memory_space<vmem>>, vector<1x128xf32>
      %14 = vector.broadcast %13 : vector<1x128xf32> to vector<32x128xf32>
      %15 = arith.addf %12, %14 : vector<32x128xf32>
      %cst_14 = arith.constant 0.000000e+00 : f32
      %16 = vector.broadcast %cst_14 : f32 to vector<32x128xf32>
      %17 = arith.maximumf %15, %16 : vector<32x128xf32>
      %c0_15 = arith.constant 0 : index
      %c0_16 = arith.constant 0 : index
      %18 = vector.load %arg6[%c0_15, %c0_16] : memref<32x128xf32, #tpu.memory_space<vmem>>, vector<32x128xf32>
      tpu.vector_store %arg6[%c0_15, %c0_16], %17 {strides = array<i32>} : memref<32x128xf32, #tpu.memory_space<vmem>>, vector<32x128xf32>,
    } else {
    }
    return
  }
  func.func @transform_0(%arg0: i32, %arg1: i32, %arg2: i32) -> (i32, i32) {
    %c0_i32 = arith.constant 0 : i32
    return %arg0, %arg2 : i32, i32
  }
  func.func @transform_1(%arg0: i32, %arg1: i32, %arg2: i32) -> (i32, i32) {
    %c0_i32 = arith.constant 0 : i32
    return %arg2, %arg1 : i32, i32
  }
  func.func @transform_2(%arg0: i32, %arg1: i32, %arg2: i32) -> (i32, i32) {
    %c0_i32 = arith.constant 0 : i32
    %c0_i32_0 = arith.constant 0 : i32
    return %c0_i32, %arg1 : i32, i32
  }
  func.func @transform_3(%arg0: i32, %arg1: i32, %arg2: i32) -> (i32, i32) {
    %c0_i32 = arith.constant 0 : i32
    return %arg0, %arg1 : i32, i32
  }
}

module attributes {stable_mosaic.version = 11 : i64} {
  func.func @_mm_kernel(%arg0: i32, %arg1: i32, %arg2: i32, %arg3: memref<32x384xbf16, #tpu.memory_space<vmem>>, %arg4: memref<384x128xbf16, #tpu.memory_space<vmem>>, %arg5: memref<1x128xf32, #tpu.memory_space<vmem>>, %arg6: memref<32x128xf32, #tpu.memory_space<vmem>>, %arg7: memref<32x128xf32, #tpu.memory_space<vmem>>, %arg8: memref<32x128xf32, #tpu.memory_space<vmem>>) attributes {dimension_semantics = [#tpu.dimension_semantics<parallel>, #tpu.dimension_semantics<parallel>, #tpu.dimension_semantics<arbitrary>], iteration_bounds = array<i64: 1, 1, 3>, scalar_prefetch = 0 : i64, scratch_operands = 1 : i64, tpu.core_type = #tpu.core_type<tc>, window_params = [{transform_indices = @transform_0, window_bounds = array<i64: 32, 384>}, {transform_indices = @transform_1, window_bounds = array<i64: 384, 128>}, {transform_indices = @transform_2, window_bounds = array<i64: 1, 128>}, {transform_indices = @transform_3, window_bounds = array<i64: 32, 128>}, {transform_indices = @transform_4, window_bounds = array<i64: 32, 128>}]} {
    %c0_i32 = arith.constant 0 : i32
    %0 = arith.cmpi eq, %arg2, %c0_i32 : i32
    %1 = arith.extui %0 : i1 to i32
    %c0_i32_0 = arith.constant 0 : i32
    %2 = arith.cmpi ne, %1, %c0_i32_0 : i32
    scf.if %2 {
      %cst_9 = arith.constant 0.000000e+00 : f32
      %12 = vector.broadcast %cst_9 : f32 to vector<32x128xf32>
      %c0_10 = arith.constant 0 : index
      %c0_11 = arith.constant 0 : index
      %13 = vector.load %arg8[%c0_10, %c0_11] : memref<32x128xf32, #tpu.memory_space<vmem>>, vector<32x128xf32>
      tpu.vector_store %arg8[%c0_10, %c0_11], %12 {strides = array<i32>} : memref<32x128xf32, #tpu.memory_space<vmem>>, vector<32x128xf32>,
    } else {
    }
    %c0 = arith.constant 0 : index
    %c0_1 = arith.constant 0 : index
    %3 = vector.load %arg8[%c0, %c0_1] : memref<32x128xf32, #tpu.memory_space<vmem>>, vector<32x128xf32>
    %c0_2 = arith.constant 0 : index
    %c0_3 = arith.constant 0 : index
    %4 = vector.load %arg3[%c0_2, %c0_3] : memref<32x384xbf16, #tpu.memory_space<vmem>>, vector<32x384xbf16>
    %c0_4 = arith.constant 0 : index
    %c0_5 = arith.constant 0 : index
    %5 = vector.load %arg4[%c0_4, %c0_5] : memref<384x128xbf16, #tpu.memory_space<vmem>>, vector<384x128xbf16>
    %cst = arith.constant dense<0.000000e+00> : vector<32x128xf32>
    %6 = tpu.matmul %4, %5, %cst {dimension_numbers = #tpu.dot_dimension_numbers<[1], [0], [0], [1], [0, 0, 1, 1], [], []>} : vector<32x384xbf16>, vector<384x128xbf16>, vector<32x128xf32> -> vector<32x128xf32>
    %7 = arith.addf %3, %6 : vector<32x128xf32>
    %c0_6 = arith.constant 0 : index
    %c0_7 = arith.constant 0 : index
    %8 = vector.load %arg8[%c0_6, %c0_7] : memref<32x128xf32, #tpu.memory_space<vmem>>, vector<32x128xf32>
    tpu.vector_store %arg8[%c0_6, %c0_7], %7 {strides = array<i32>} : memref<32x128xf32, #tpu.memory_space<vmem>>, vector<32x128xf32>,
    %c2_i32 = arith.constant 2 : i32
    %9 = arith.cmpi eq, %arg2, %c2_i32 : i32
    %10 = arith.extui %9 : i1 to i32
    %c0_i32_8 = arith.constant 0 : i32
    %11 = arith.cmpi ne, %10, %c0_i32_8 : i32
    scf.if %11 {
      %c0_9 = arith.constant 0 : index
      %c0_10 = arith.constant 0 : index
      %12 = vector.load %arg8[%c0_9, %c0_10] : memref<32x128xf32, #tpu.memory_space<vmem>>, vector<32x128xf32>
      %c0_11 = arith.constant 0 : index
      %c0_12 = arith.constant 0 : index
      %13 = vector.load %arg5[%c0_11, %c0_12] : memref<1x128xf32, #tpu.memory_space<vmem>>, vector<1x128xf32>
      %14 = vector.broadcast %13 : vector<1x128xf32> to vector<32x128xf32>
      %15 = arith.addf %12, %14 : vector<32x128xf32>
      %c0_13 = arith.constant 0 : index
      %c0_14 = arith.constant 0 : index
      %16 = vector.load %arg6[%c0_13, %c0_14] : memref<32x128xf32, #tpu.memory_space<vmem>>, vector<32x128xf32>
      %17 = arith.addf %15, %16 : vector<32x128xf32>
      %cst_15 = arith.constant 0.000000e+00 : f32
      %18 = vector.broadcast %cst_15 : f32 to vector<32x128xf32>
      %19 = arith.maximumf %17, %18 : vector<32x128xf32>
      %c0_16 = arith.constant 0 : index
      %c0_17 = arith.constant 0 : index
      %20 = vector.load %arg7[%c0_16, %c0_17] : memref<32x128xf32, #tpu.memory_space<vmem>>, vector<32x128xf32>
      tpu.vector_store %arg7[%c0_16, %c0_17], %19 {strides = array<i32>} : memref<32x128xf32, #tpu.memory_space<vmem>>, vector<32x128xf32>,
    } else {
    }
    return
  }
  func.func @transform_0(%arg0: i32, %arg1: i32, %arg2: i32) -> (i32, i32) {
    %c0_i32 = arith.constant 0 : i32
    return %arg0, %arg2 : i32, i32
  }
  func.func @transform_1(%arg0: i32, %arg1: i32, %arg2: i32) -> (i32, i32) {
    %c0_i32 = arith.constant 0 : i32
    return %arg2, %arg1 : i32, i32
  }
  func.func @transform_2(%arg0: i32, %arg1: i32, %arg2: i32) -> (i32, i32) {
    %c0_i32 = arith.constant 0 : i32
    %c0_i32_0 = arith.constant 0 : i32
    return %c0_i32, %arg1 : i32, i32
  }
  func.func @transform_3(%arg0: i32, %arg1: i32, %arg2: i32) -> (i32, i32) {
    %c0_i32 = arith.constant 0 : i32
    return %arg0, %arg1 : i32, i32
  }
  func.func @transform_4(%arg0: i32, %arg1: i32, %arg2: i32) -> (i32, i32) {
    %c0_i32 = arith.constant 0 : i32
    return %arg0, %arg1 : i32, i32
  }
}

module attributes {stable_mosaic.version = 11 : i64} {
  func.func @_mm_kernel(%arg0: i32, %arg1: i32, %arg2: i32, %arg3: memref<32x128xbf16, #tpu.memory_space<vmem>>, %arg4: memref<128x128xbf16, #tpu.memory_space<vmem>>, %arg5: memref<1x128xf32, #tpu.memory_space<vmem>>, %arg6: memref<32x128xf32, #tpu.memory_space<vmem>>, %arg7: memref<32x128xf32, #tpu.memory_space<vmem>>) attributes {dimension_semantics = [#tpu.dimension_semantics<parallel>, #tpu.dimension_semantics<parallel>, #tpu.dimension_semantics<arbitrary>], iteration_bounds = array<i64: 1, 1, 1>, scalar_prefetch = 0 : i64, scratch_operands = 1 : i64, tpu.core_type = #tpu.core_type<tc>, window_params = [{transform_indices = @transform_0, window_bounds = array<i64: 32, 128>}, {transform_indices = @transform_1, window_bounds = array<i64: 128, 128>}, {transform_indices = @transform_2, window_bounds = array<i64: 1, 128>}, {transform_indices = @transform_3, window_bounds = array<i64: 32, 128>}]} {
    %c0_i32 = arith.constant 0 : i32
    %0 = arith.cmpi eq, %arg2, %c0_i32 : i32
    %1 = arith.extui %0 : i1 to i32
    %c0_i32_0 = arith.constant 0 : i32
    %2 = arith.cmpi ne, %1, %c0_i32_0 : i32
    scf.if %2 {
      %cst_10 = arith.constant 0.000000e+00 : f32
      %12 = vector.broadcast %cst_10 : f32 to vector<32x128xf32>
      %c0_11 = arith.constant 0 : index
      %c0_12 = arith.constant 0 : index
      %13 = vector.load %arg7[%c0_11, %c0_12] : memref<32x128xf32, #tpu.memory_space<vmem>>, vector<32x128xf32>
      tpu.vector_store %arg7[%c0_11, %c0_12], %12 {strides = array<i32>} : memref<32x128xf32, #tpu.memory_space<vmem>>, vector<32x128xf32>,
    } else {
    }
    %c0 = arith.constant 0 : index
    %c0_1 = arith.constant 0 : index
    %3 = vector.load %arg7[%c0, %c0_1] : memref<32x128xf32, #tpu.memory_space<vmem>>, vector<32x128xf32>
    %c0_2 = arith.constant 0 : index
    %c0_3 = arith.constant 0 : index
    %4 = vector.load %arg3[%c0_2, %c0_3] : memref<32x128xbf16, #tpu.memory_space<vmem>>, vector<32x128xbf16>
    %c0_4 = arith.constant 0 : index
    %c0_5 = arith.constant 0 : index
    %5 = vector.load %arg4[%c0_4, %c0_5] : memref<128x128xbf16, #tpu.memory_space<vmem>>, vector<128x128xbf16>
    %cst = arith.constant dense<0.000000e+00> : vector<32x128xf32>
    %6 = tpu.matmul %4, %5, %cst {dimension_numbers = #tpu.dot_dimension_numbers<[1], [0], [0], [1], [0, 0, 1, 1], [], []>} : vector<32x128xbf16>, vector<128x128xbf16>, vector<32x128xf32> -> vector<32x128xf32>
    %7 = arith.addf %3, %6 : vector<32x128xf32>
    %c0_6 = arith.constant 0 : index
    %c0_7 = arith.constant 0 : index
    %8 = vector.load %arg7[%c0_6, %c0_7] : memref<32x128xf32, #tpu.memory_space<vmem>>, vector<32x128xf32>
    tpu.vector_store %arg7[%c0_6, %c0_7], %7 {strides = array<i32>} : memref<32x128xf32, #tpu.memory_space<vmem>>, vector<32x128xf32>,
    %c0_i32_8 = arith.constant 0 : i32
    %9 = arith.cmpi eq, %arg2, %c0_i32_8 : i32
    %10 = arith.extui %9 : i1 to i32
    %c0_i32_9 = arith.constant 0 : i32
    %11 = arith.cmpi ne, %10, %c0_i32_9 : i32
    scf.if %11 {
      %c0_10 = arith.constant 0 : index
      %c0_11 = arith.constant 0 : index
      %12 = vector.load %arg7[%c0_10, %c0_11] : memref<32x128xf32, #tpu.memory_space<vmem>>, vector<32x128xf32>
      %c0_12 = arith.constant 0 : index
      %c0_13 = arith.constant 0 : index
      %13 = vector.load %arg5[%c0_12, %c0_13] : memref<1x128xf32, #tpu.memory_space<vmem>>, vector<1x128xf32>
      %14 = vector.broadcast %13 : vector<1x128xf32> to vector<32x128xf32>
      %15 = arith.addf %12, %14 : vector<32x128xf32>
      %c0_14 = arith.constant 0 : index
      %c0_15 = arith.constant 0 : index
      %16 = vector.load %arg6[%c0_14, %c0_15] : memref<32x128xf32, #tpu.memory_space<vmem>>, vector<32x128xf32>
      tpu.vector_store %arg6[%c0_14, %c0_15], %15 {strides = array<i32>} : memref<32x128xf32, #tpu.memory_space<vmem>>, vector<32x128xf32>,
    } else {
    }
    return
  }
  func.func @transform_0(%arg0: i32, %arg1: i32, %arg2: i32) -> (i32, i32) {
    %c0_i32 = arith.constant 0 : i32
    return %arg0, %arg2 : i32, i32
  }
  func.func @transform_1(%arg0: i32, %arg1: i32, %arg2: i32) -> (i32, i32) {
    %c0_i32 = arith.constant 0 : i32
    return %arg2, %arg1 : i32, i32
  }
  func.func @transform_2(%arg0: i32, %arg1: i32, %arg2: i32) -> (i32, i32) {
    %c0_i32 = arith.constant 0 : i32
    %c0_i32_0 = arith.constant 0 : i32
    return %c0_i32, %arg1 : i32, i32
  }
  func.func @transform_3(%arg0: i32, %arg1: i32, %arg2: i32) -> (i32, i32) {
    %c0_i32 = arith.constant 0 : i32
    return %arg0, %arg1 : i32, i32
  }
}

module attributes {stable_mosaic.version = 11 : i64} {
  func.func @_mm_kernel(%arg0: i32, %arg1: i32, %arg2: i32, %arg3: memref<16x384xbf16, #tpu.memory_space<vmem>>, %arg4: memref<384x256xbf16, #tpu.memory_space<vmem>>, %arg5: memref<1x256xf32, #tpu.memory_space<vmem>>, %arg6: memref<16x256xf32, #tpu.memory_space<vmem>>, %arg7: memref<16x256xf32, #tpu.memory_space<vmem>>) attributes {dimension_semantics = [#tpu.dimension_semantics<parallel>, #tpu.dimension_semantics<parallel>, #tpu.dimension_semantics<arbitrary>], iteration_bounds = array<i64: 1, 1, 3>, scalar_prefetch = 0 : i64, scratch_operands = 1 : i64, tpu.core_type = #tpu.core_type<tc>, window_params = [{transform_indices = @transform_0, window_bounds = array<i64: 16, 384>}, {transform_indices = @transform_1, window_bounds = array<i64: 384, 256>}, {transform_indices = @transform_2, window_bounds = array<i64: 1, 256>}, {transform_indices = @transform_3, window_bounds = array<i64: 16, 256>}]} {
    %c0_i32 = arith.constant 0 : i32
    %0 = arith.cmpi eq, %arg2, %c0_i32 : i32
    %1 = arith.extui %0 : i1 to i32
    %c0_i32_0 = arith.constant 0 : i32
    %2 = arith.cmpi ne, %1, %c0_i32_0 : i32
    scf.if %2 {
      %cst_9 = arith.constant 0.000000e+00 : f32
      %12 = vector.broadcast %cst_9 : f32 to vector<16x256xf32>
      %c0_10 = arith.constant 0 : index
      %c0_11 = arith.constant 0 : index
      %13 = vector.load %arg7[%c0_10, %c0_11] : memref<16x256xf32, #tpu.memory_space<vmem>>, vector<16x256xf32>
      tpu.vector_store %arg7[%c0_10, %c0_11], %12 {strides = array<i32>} : memref<16x256xf32, #tpu.memory_space<vmem>>, vector<16x256xf32>,
    } else {
    }
    %c0 = arith.constant 0 : index
    %c0_1 = arith.constant 0 : index
    %3 = vector.load %arg7[%c0, %c0_1] : memref<16x256xf32, #tpu.memory_space<vmem>>, vector<16x256xf32>
    %c0_2 = arith.constant 0 : index
    %c0_3 = arith.constant 0 : index
    %4 = vector.load %arg3[%c0_2, %c0_3] : memref<16x384xbf16, #tpu.memory_space<vmem>>, vector<16x384xbf16>
    %c0_4 = arith.constant 0 : index
    %c0_5 = arith.constant 0 : index
    %5 = vector.load %arg4[%c0_4, %c0_5] : memref<384x256xbf16, #tpu.memory_space<vmem>>, vector<384x256xbf16>
    %cst = arith.constant dense<0.000000e+00> : vector<16x256xf32>
    %6 = tpu.matmul %4, %5, %cst {dimension_numbers = #tpu.dot_dimension_numbers<[1], [0], [0], [1], [0, 0, 1, 1], [], []>} : vector<16x384xbf16>, vector<384x256xbf16>, vector<16x256xf32> -> vector<16x256xf32>
    %7 = arith.addf %3, %6 : vector<16x256xf32>
    %c0_6 = arith.constant 0 : index
    %c0_7 = arith.constant 0 : index
    %8 = vector.load %arg7[%c0_6, %c0_7] : memref<16x256xf32, #tpu.memory_space<vmem>>, vector<16x256xf32>
    tpu.vector_store %arg7[%c0_6, %c0_7], %7 {strides = array<i32>} : memref<16x256xf32, #tpu.memory_space<vmem>>, vector<16x256xf32>,
    %c2_i32 = arith.constant 2 : i32
    %9 = arith.cmpi eq, %arg2, %c2_i32 : i32
    %10 = arith.extui %9 : i1 to i32
    %c0_i32_8 = arith.constant 0 : i32
    %11 = arith.cmpi ne, %10, %c0_i32_8 : i32
    scf.if %11 {
      %c0_9 = arith.constant 0 : index
      %c0_10 = arith.constant 0 : index
      %12 = vector.load %arg7[%c0_9, %c0_10] : memref<16x256xf32, #tpu.memory_space<vmem>>, vector<16x256xf32>
      %c0_11 = arith.constant 0 : index
      %c0_12 = arith.constant 0 : index
      %13 = vector.load %arg5[%c0_11, %c0_12] : memref<1x256xf32, #tpu.memory_space<vmem>>, vector<1x256xf32>
      %14 = vector.broadcast %13 : vector<1x256xf32> to vector<16x256xf32>
      %15 = arith.addf %12, %14 : vector<16x256xf32>
      %cst_13 = arith.constant 0.000000e+00 : f32
      %16 = vector.broadcast %cst_13 : f32 to vector<16x256xf32>
      %17 = arith.maximumf %15, %16 : vector<16x256xf32>
      %c0_14 = arith.constant 0 : index
      %c0_15 = arith.constant 0 : index
      %18 = vector.load %arg6[%c0_14, %c0_15] : memref<16x256xf32, #tpu.memory_space<vmem>>, vector<16x256xf32>
      tpu.vector_store %arg6[%c0_14, %c0_15], %17 {strides = array<i32>} : memref<16x256xf32, #tpu.memory_space<vmem>>, vector<16x256xf32>,
    } else {
    }
    return
  }
  func.func @transform_0(%arg0: i32, %arg1: i32, %arg2: i32) -> (i32, i32) {
    %c0_i32 = arith.constant 0 : i32
    return %arg0, %arg2 : i32, i32
  }
  func.func @transform_1(%arg0: i32, %arg1: i32, %arg2: i32) -> (i32, i32) {
    %c0_i32 = arith.constant 0 : i32
    return %arg2, %arg1 : i32, i32
  }
  func.func @transform_2(%arg0: i32, %arg1: i32, %arg2: i32) -> (i32, i32) {
    %c0_i32 = arith.constant 0 : i32
    %c0_i32_0 = arith.constant 0 : i32
    return %c0_i32, %arg1 : i32, i32
  }
  func.func @transform_3(%arg0: i32, %arg1: i32, %arg2: i32) -> (i32, i32) {
    %c0_i32 = arith.constant 0 : i32
    return %arg0, %arg1 : i32, i32
  }
}

module attributes {stable_mosaic.version = 11 : i64} {
  func.func @_mm_kernel(%arg0: i32, %arg1: i32, %arg2: i32, %arg3: memref<16x128xbf16, #tpu.memory_space<vmem>>, %arg4: memref<128x256xbf16, #tpu.memory_space<vmem>>, %arg5: memref<1x256xf32, #tpu.memory_space<vmem>>, %arg6: memref<16x256xf32, #tpu.memory_space<vmem>>, %arg7: memref<16x256xf32, #tpu.memory_space<vmem>>) attributes {dimension_semantics = [#tpu.dimension_semantics<parallel>, #tpu.dimension_semantics<parallel>, #tpu.dimension_semantics<arbitrary>], iteration_bounds = array<i64: 1, 1, 1>, scalar_prefetch = 0 : i64, scratch_operands = 1 : i64, tpu.core_type = #tpu.core_type<tc>, window_params = [{transform_indices = @transform_0, window_bounds = array<i64: 16, 128>}, {transform_indices = @transform_1, window_bounds = array<i64: 128, 256>}, {transform_indices = @transform_2, window_bounds = array<i64: 1, 256>}, {transform_indices = @transform_3, window_bounds = array<i64: 16, 256>}]} {
    %c0_i32 = arith.constant 0 : i32
    %0 = arith.cmpi eq, %arg2, %c0_i32 : i32
    %1 = arith.extui %0 : i1 to i32
    %c0_i32_0 = arith.constant 0 : i32
    %2 = arith.cmpi ne, %1, %c0_i32_0 : i32
    scf.if %2 {
      %cst_10 = arith.constant 0.000000e+00 : f32
      %12 = vector.broadcast %cst_10 : f32 to vector<16x256xf32>
      %c0_11 = arith.constant 0 : index
      %c0_12 = arith.constant 0 : index
      %13 = vector.load %arg7[%c0_11, %c0_12] : memref<16x256xf32, #tpu.memory_space<vmem>>, vector<16x256xf32>
      tpu.vector_store %arg7[%c0_11, %c0_12], %12 {strides = array<i32>} : memref<16x256xf32, #tpu.memory_space<vmem>>, vector<16x256xf32>,
    } else {
    }
    %c0 = arith.constant 0 : index
    %c0_1 = arith.constant 0 : index
    %3 = vector.load %arg7[%c0, %c0_1] : memref<16x256xf32, #tpu.memory_space<vmem>>, vector<16x256xf32>
    %c0_2 = arith.constant 0 : index
    %c0_3 = arith.constant 0 : index
    %4 = vector.load %arg3[%c0_2, %c0_3] : memref<16x128xbf16, #tpu.memory_space<vmem>>, vector<16x128xbf16>
    %c0_4 = arith.constant 0 : index
    %c0_5 = arith.constant 0 : index
    %5 = vector.load %arg4[%c0_4, %c0_5] : memref<128x256xbf16, #tpu.memory_space<vmem>>, vector<128x256xbf16>
    %cst = arith.constant dense<0.000000e+00> : vector<16x256xf32>
    %6 = tpu.matmul %4, %5, %cst {dimension_numbers = #tpu.dot_dimension_numbers<[1], [0], [0], [1], [0, 0, 1, 1], [], []>} : vector<16x128xbf16>, vector<128x256xbf16>, vector<16x256xf32> -> vector<16x256xf32>
    %7 = arith.addf %3, %6 : vector<16x256xf32>
    %c0_6 = arith.constant 0 : index
    %c0_7 = arith.constant 0 : index
    %8 = vector.load %arg7[%c0_6, %c0_7] : memref<16x256xf32, #tpu.memory_space<vmem>>, vector<16x256xf32>
    tpu.vector_store %arg7[%c0_6, %c0_7], %7 {strides = array<i32>} : memref<16x256xf32, #tpu.memory_space<vmem>>, vector<16x256xf32>,
    %c0_i32_8 = arith.constant 0 : i32
    %9 = arith.cmpi eq, %arg2, %c0_i32_8 : i32
    %10 = arith.extui %9 : i1 to i32
    %c0_i32_9 = arith.constant 0 : i32
    %11 = arith.cmpi ne, %10, %c0_i32_9 : i32
    scf.if %11 {
      %c0_10 = arith.constant 0 : index
      %c0_11 = arith.constant 0 : index
      %12 = vector.load %arg7[%c0_10, %c0_11] : memref<16x256xf32, #tpu.memory_space<vmem>>, vector<16x256xf32>
      %c0_12 = arith.constant 0 : index
      %c0_13 = arith.constant 0 : index
      %13 = vector.load %arg5[%c0_12, %c0_13] : memref<1x256xf32, #tpu.memory_space<vmem>>, vector<1x256xf32>
      %14 = vector.broadcast %13 : vector<1x256xf32> to vector<16x256xf32>
      %15 = arith.addf %12, %14 : vector<16x256xf32>
      %c0_14 = arith.constant 0 : index
      %c0_15 = arith.constant 0 : index
      %16 = vector.load %arg6[%c0_14, %c0_15] : memref<16x256xf32, #tpu.memory_space<vmem>>, vector<16x256xf32>
      tpu.vector_store %arg6[%c0_14, %c0_15], %15 {strides = array<i32>} : memref<16x256xf32, #tpu.memory_space<vmem>>, vector<16x256xf32>,
    } else {
    }
    return
  }
  func.func @transform_0(%arg0: i32, %arg1: i32, %arg2: i32) -> (i32, i32) {
    %c0_i32 = arith.constant 0 : i32
    return %arg0, %arg2 : i32, i32
  }
  func.func @transform_1(%arg0: i32, %arg1: i32, %arg2: i32) -> (i32, i32) {
    %c0_i32 = arith.constant 0 : i32
    return %arg2, %arg1 : i32, i32
  }
  func.func @transform_2(%arg0: i32, %arg1: i32, %arg2: i32) -> (i32, i32) {
    %c0_i32 = arith.constant 0 : i32
    %c0_i32_0 = arith.constant 0 : i32
    return %c0_i32, %arg1 : i32, i32
  }
  func.func @transform_3(%arg0: i32, %arg1: i32, %arg2: i32) -> (i32, i32) {
    %c0_i32 = arith.constant 0 : i32
    return %arg0, %arg1 : i32, i32
  }
}

module attributes {stable_mosaic.version = 11 : i64} {
  func.func @_mm_kernel(%arg0: i32, %arg1: i32, %arg2: i32, %arg3: memref<16x768xbf16, #tpu.memory_space<vmem>>, %arg4: memref<768x256xbf16, #tpu.memory_space<vmem>>, %arg5: memref<1x256xf32, #tpu.memory_space<vmem>>, %arg6: memref<16x256xf32, #tpu.memory_space<vmem>>, %arg7: memref<16x256xf32, #tpu.memory_space<vmem>>, %arg8: memref<16x256xf32, #tpu.memory_space<vmem>>) attributes {dimension_semantics = [#tpu.dimension_semantics<parallel>, #tpu.dimension_semantics<parallel>, #tpu.dimension_semantics<arbitrary>], iteration_bounds = array<i64: 1, 1, 3>, scalar_prefetch = 0 : i64, scratch_operands = 1 : i64, tpu.core_type = #tpu.core_type<tc>, window_params = [{transform_indices = @transform_0, window_bounds = array<i64: 16, 768>}, {transform_indices = @transform_1, window_bounds = array<i64: 768, 256>}, {transform_indices = @transform_2, window_bounds = array<i64: 1, 256>}, {transform_indices = @transform_3, window_bounds = array<i64: 16, 256>}, {transform_indices = @transform_4, window_bounds = array<i64: 16, 256>}]} {
    %c0_i32 = arith.constant 0 : i32
    %0 = arith.cmpi eq, %arg2, %c0_i32 : i32
    %1 = arith.extui %0 : i1 to i32
    %c0_i32_0 = arith.constant 0 : i32
    %2 = arith.cmpi ne, %1, %c0_i32_0 : i32
    scf.if %2 {
      %cst_9 = arith.constant 0.000000e+00 : f32
      %12 = vector.broadcast %cst_9 : f32 to vector<16x256xf32>
      %c0_10 = arith.constant 0 : index
      %c0_11 = arith.constant 0 : index
      %13 = vector.load %arg8[%c0_10, %c0_11] : memref<16x256xf32, #tpu.memory_space<vmem>>, vector<16x256xf32>
      tpu.vector_store %arg8[%c0_10, %c0_11], %12 {strides = array<i32>} : memref<16x256xf32, #tpu.memory_space<vmem>>, vector<16x256xf32>,
    } else {
    }
    %c0 = arith.constant 0 : index
    %c0_1 = arith.constant 0 : index
    %3 = vector.load %arg8[%c0, %c0_1] : memref<16x256xf32, #tpu.memory_space<vmem>>, vector<16x256xf32>
    %c0_2 = arith.constant 0 : index
    %c0_3 = arith.constant 0 : index
    %4 = vector.load %arg3[%c0_2, %c0_3] : memref<16x768xbf16, #tpu.memory_space<vmem>>, vector<16x768xbf16>
    %c0_4 = arith.constant 0 : index
    %c0_5 = arith.constant 0 : index
    %5 = vector.load %arg4[%c0_4, %c0_5] : memref<768x256xbf16, #tpu.memory_space<vmem>>, vector<768x256xbf16>
    %cst = arith.constant dense<0.000000e+00> : vector<16x256xf32>
    %6 = tpu.matmul %4, %5, %cst {dimension_numbers = #tpu.dot_dimension_numbers<[1], [0], [0], [1], [0, 0, 1, 1], [], []>} : vector<16x768xbf16>, vector<768x256xbf16>, vector<16x256xf32> -> vector<16x256xf32>
    %7 = arith.addf %3, %6 : vector<16x256xf32>
    %c0_6 = arith.constant 0 : index
    %c0_7 = arith.constant 0 : index
    %8 = vector.load %arg8[%c0_6, %c0_7] : memref<16x256xf32, #tpu.memory_space<vmem>>, vector<16x256xf32>
    tpu.vector_store %arg8[%c0_6, %c0_7], %7 {strides = array<i32>} : memref<16x256xf32, #tpu.memory_space<vmem>>, vector<16x256xf32>,
    %c2_i32 = arith.constant 2 : i32
    %9 = arith.cmpi eq, %arg2, %c2_i32 : i32
    %10 = arith.extui %9 : i1 to i32
    %c0_i32_8 = arith.constant 0 : i32
    %11 = arith.cmpi ne, %10, %c0_i32_8 : i32
    scf.if %11 {
      %c0_9 = arith.constant 0 : index
      %c0_10 = arith.constant 0 : index
      %12 = vector.load %arg8[%c0_9, %c0_10] : memref<16x256xf32, #tpu.memory_space<vmem>>, vector<16x256xf32>
      %c0_11 = arith.constant 0 : index
      %c0_12 = arith.constant 0 : index
      %13 = vector.load %arg5[%c0_11, %c0_12] : memref<1x256xf32, #tpu.memory_space<vmem>>, vector<1x256xf32>
      %14 = vector.broadcast %13 : vector<1x256xf32> to vector<16x256xf32>
      %15 = arith.addf %12, %14 : vector<16x256xf32>
      %c0_13 = arith.constant 0 : index
      %c0_14 = arith.constant 0 : index
      %16 = vector.load %arg6[%c0_13, %c0_14] : memref<16x256xf32, #tpu.memory_space<vmem>>, vector<16x256xf32>
      %17 = arith.addf %15, %16 : vector<16x256xf32>
      %cst_15 = arith.constant 0.000000e+00 : f32
      %18 = vector.broadcast %cst_15 : f32 to vector<16x256xf32>
      %19 = arith.maximumf %17, %18 : vector<16x256xf32>
      %c0_16 = arith.constant 0 : index
      %c0_17 = arith.constant 0 : index
      %20 = vector.load %arg7[%c0_16, %c0_17] : memref<16x256xf32, #tpu.memory_space<vmem>>, vector<16x256xf32>
      tpu.vector_store %arg7[%c0_16, %c0_17], %19 {strides = array<i32>} : memref<16x256xf32, #tpu.memory_space<vmem>>, vector<16x256xf32>,
    } else {
    }
    return
  }
  func.func @transform_0(%arg0: i32, %arg1: i32, %arg2: i32) -> (i32, i32) {
    %c0_i32 = arith.constant 0 : i32
    return %arg0, %arg2 : i32, i32
  }
  func.func @transform_1(%arg0: i32, %arg1: i32, %arg2: i32) -> (i32, i32) {
    %c0_i32 = arith.constant 0 : i32
    return %arg2, %arg1 : i32, i32
  }
  func.func @transform_2(%arg0: i32, %arg1: i32, %arg2: i32) -> (i32, i32) {
    %c0_i32 = arith.constant 0 : i32
    %c0_i32_0 = arith.constant 0 : i32
    return %c0_i32, %arg1 : i32, i32
  }
  func.func @transform_3(%arg0: i32, %arg1: i32, %arg2: i32) -> (i32, i32) {
    %c0_i32 = arith.constant 0 : i32
    return %arg0, %arg1 : i32, i32
  }
  func.func @transform_4(%arg0: i32, %arg1: i32, %arg2: i32) -> (i32, i32) {
    %c0_i32 = arith.constant 0 : i32
    return %arg0, %arg1 : i32, i32
  }
}

module attributes {stable_mosaic.version = 11 : i64} {
  func.func @_mm_kernel(%arg0: i32, %arg1: i32, %arg2: i32, %arg3: memref<16x768xbf16, #tpu.memory_space<vmem>>, %arg4: memref<768x256xbf16, #tpu.memory_space<vmem>>, %arg5: memref<1x256xf32, #tpu.memory_space<vmem>>, %arg6: memref<16x256xf32, #tpu.memory_space<vmem>>, %arg7: memref<16x256xf32, #tpu.memory_space<vmem>>) attributes {dimension_semantics = [#tpu.dimension_semantics<parallel>, #tpu.dimension_semantics<parallel>, #tpu.dimension_semantics<arbitrary>], iteration_bounds = array<i64: 1, 2, 3>, scalar_prefetch = 0 : i64, scratch_operands = 1 : i64, tpu.core_type = #tpu.core_type<tc>, window_params = [{transform_indices = @transform_0, window_bounds = array<i64: 16, 768>}, {transform_indices = @transform_1, window_bounds = array<i64: 768, 256>}, {transform_indices = @transform_2, window_bounds = array<i64: 1, 256>}, {transform_indices = @transform_3, window_bounds = array<i64: 16, 256>}]} {
    %c0_i32 = arith.constant 0 : i32
    %0 = arith.cmpi eq, %arg2, %c0_i32 : i32
    %1 = arith.extui %0 : i1 to i32
    %c0_i32_0 = arith.constant 0 : i32
    %2 = arith.cmpi ne, %1, %c0_i32_0 : i32
    scf.if %2 {
      %cst_9 = arith.constant 0.000000e+00 : f32
      %12 = vector.broadcast %cst_9 : f32 to vector<16x256xf32>
      %c0_10 = arith.constant 0 : index
      %c0_11 = arith.constant 0 : index
      %13 = vector.load %arg7[%c0_10, %c0_11] : memref<16x256xf32, #tpu.memory_space<vmem>>, vector<16x256xf32>
      tpu.vector_store %arg7[%c0_10, %c0_11], %12 {strides = array<i32>} : memref<16x256xf32, #tpu.memory_space<vmem>>, vector<16x256xf32>,
    } else {
    }
    %c0 = arith.constant 0 : index
    %c0_1 = arith.constant 0 : index
    %3 = vector.load %arg7[%c0, %c0_1] : memref<16x256xf32, #tpu.memory_space<vmem>>, vector<16x256xf32>
    %c0_2 = arith.constant 0 : index
    %c0_3 = arith.constant 0 : index
    %4 = vector.load %arg3[%c0_2, %c0_3] : memref<16x768xbf16, #tpu.memory_space<vmem>>, vector<16x768xbf16>
    %c0_4 = arith.constant 0 : index
    %c0_5 = arith.constant 0 : index
    %5 = vector.load %arg4[%c0_4, %c0_5] : memref<768x256xbf16, #tpu.memory_space<vmem>>, vector<768x256xbf16>
    %cst = arith.constant dense<0.000000e+00> : vector<16x256xf32>
    %6 = tpu.matmul %4, %5, %cst {dimension_numbers = #tpu.dot_dimension_numbers<[1], [0], [0], [1], [0, 0, 1, 1], [], []>} : vector<16x768xbf16>, vector<768x256xbf16>, vector<16x256xf32> -> vector<16x256xf32>
    %7 = arith.addf %3, %6 : vector<16x256xf32>
    %c0_6 = arith.constant 0 : index
    %c0_7 = arith.constant 0 : index
    %8 = vector.load %arg7[%c0_6, %c0_7] : memref<16x256xf32, #tpu.memory_space<vmem>>, vector<16x256xf32>
    tpu.vector_store %arg7[%c0_6, %c0_7], %7 {strides = array<i32>} : memref<16x256xf32, #tpu.memory_space<vmem>>, vector<16x256xf32>,
    %c2_i32 = arith.constant 2 : i32
    %9 = arith.cmpi eq, %arg2, %c2_i32 : i32
    %10 = arith.extui %9 : i1 to i32
    %c0_i32_8 = arith.constant 0 : i32
    %11 = arith.cmpi ne, %10, %c0_i32_8 : i32
    scf.if %11 {
      %c0_9 = arith.constant 0 : index
      %c0_10 = arith.constant 0 : index
      %12 = vector.load %arg7[%c0_9, %c0_10] : memref<16x256xf32, #tpu.memory_space<vmem>>, vector<16x256xf32>
      %c0_11 = arith.constant 0 : index
      %c0_12 = arith.constant 0 : index
      %13 = vector.load %arg5[%c0_11, %c0_12] : memref<1x256xf32, #tpu.memory_space<vmem>>, vector<1x256xf32>
      %14 = vector.broadcast %13 : vector<1x256xf32> to vector<16x256xf32>
      %15 = arith.addf %12, %14 : vector<16x256xf32>
      %cst_13 = arith.constant 0.000000e+00 : f32
      %16 = vector.broadcast %cst_13 : f32 to vector<16x256xf32>
      %17 = arith.maximumf %15, %16 : vector<16x256xf32>
      %c0_14 = arith.constant 0 : index
      %c0_15 = arith.constant 0 : index
      %18 = vector.load %arg6[%c0_14, %c0_15] : memref<16x256xf32, #tpu.memory_space<vmem>>, vector<16x256xf32>
      tpu.vector_store %arg6[%c0_14, %c0_15], %17 {strides = array<i32>} : memref<16x256xf32, #tpu.memory_space<vmem>>, vector<16x256xf32>,
    } else {
    }
    return
  }
  func.func @transform_0(%arg0: i32, %arg1: i32, %arg2: i32) -> (i32, i32) {
    %c0_i32 = arith.constant 0 : i32
    return %arg0, %arg2 : i32, i32
  }
  func.func @transform_1(%arg0: i32, %arg1: i32, %arg2: i32) -> (i32, i32) {
    %c0_i32 = arith.constant 0 : i32
    return %arg2, %arg1 : i32, i32
  }
  func.func @transform_2(%arg0: i32, %arg1: i32, %arg2: i32) -> (i32, i32) {
    %c0_i32 = arith.constant 0 : i32
    %c0_i32_0 = arith.constant 0 : i32
    return %c0_i32, %arg1 : i32, i32
  }
  func.func @transform_3(%arg0: i32, %arg1: i32, %arg2: i32) -> (i32, i32) {
    %c0_i32 = arith.constant 0 : i32
    return %arg0, %arg1 : i32, i32
  }
}

module attributes {stable_mosaic.version = 11 : i64} {
  func.func @_mm_kernel(%arg0: i32, %arg1: i32, %arg2: i32, %arg3: memref<16x256xbf16, #tpu.memory_space<vmem>>, %arg4: memref<256x256xbf16, #tpu.memory_space<vmem>>, %arg5: memref<1x256xf32, #tpu.memory_space<vmem>>, %arg6: memref<16x256xf32, #tpu.memory_space<vmem>>, %arg7: memref<16x256xf32, #tpu.memory_space<vmem>>) attributes {dimension_semantics = [#tpu.dimension_semantics<parallel>, #tpu.dimension_semantics<parallel>, #tpu.dimension_semantics<arbitrary>], iteration_bounds = array<i64: 1, 2, 1>, scalar_prefetch = 0 : i64, scratch_operands = 1 : i64, tpu.core_type = #tpu.core_type<tc>, window_params = [{transform_indices = @transform_0, window_bounds = array<i64: 16, 256>}, {transform_indices = @transform_1, window_bounds = array<i64: 256, 256>}, {transform_indices = @transform_2, window_bounds = array<i64: 1, 256>}, {transform_indices = @transform_3, window_bounds = array<i64: 16, 256>}]} {
    %c0_i32 = arith.constant 0 : i32
    %0 = arith.cmpi eq, %arg2, %c0_i32 : i32
    %1 = arith.extui %0 : i1 to i32
    %c0_i32_0 = arith.constant 0 : i32
    %2 = arith.cmpi ne, %1, %c0_i32_0 : i32
    scf.if %2 {
      %cst_10 = arith.constant 0.000000e+00 : f32
      %12 = vector.broadcast %cst_10 : f32 to vector<16x256xf32>
      %c0_11 = arith.constant 0 : index
      %c0_12 = arith.constant 0 : index
      %13 = vector.load %arg7[%c0_11, %c0_12] : memref<16x256xf32, #tpu.memory_space<vmem>>, vector<16x256xf32>
      tpu.vector_store %arg7[%c0_11, %c0_12], %12 {strides = array<i32>} : memref<16x256xf32, #tpu.memory_space<vmem>>, vector<16x256xf32>,
    } else {
    }
    %c0 = arith.constant 0 : index
    %c0_1 = arith.constant 0 : index
    %3 = vector.load %arg7[%c0, %c0_1] : memref<16x256xf32, #tpu.memory_space<vmem>>, vector<16x256xf32>
    %c0_2 = arith.constant 0 : index
    %c0_3 = arith.constant 0 : index
    %4 = vector.load %arg3[%c0_2, %c0_3] : memref<16x256xbf16, #tpu.memory_space<vmem>>, vector<16x256xbf16>
    %c0_4 = arith.constant 0 : index
    %c0_5 = arith.constant 0 : index
    %5 = vector.load %arg4[%c0_4, %c0_5] : memref<256x256xbf16, #tpu.memory_space<vmem>>, vector<256x256xbf16>
    %cst = arith.constant dense<0.000000e+00> : vector<16x256xf32>
    %6 = tpu.matmul %4, %5, %cst {dimension_numbers = #tpu.dot_dimension_numbers<[1], [0], [0], [1], [0, 0, 1, 1], [], []>} : vector<16x256xbf16>, vector<256x256xbf16>, vector<16x256xf32> -> vector<16x256xf32>
    %7 = arith.addf %3, %6 : vector<16x256xf32>
    %c0_6 = arith.constant 0 : index
    %c0_7 = arith.constant 0 : index
    %8 = vector.load %arg7[%c0_6, %c0_7] : memref<16x256xf32, #tpu.memory_space<vmem>>, vector<16x256xf32>
    tpu.vector_store %arg7[%c0_6, %c0_7], %7 {strides = array<i32>} : memref<16x256xf32, #tpu.memory_space<vmem>>, vector<16x256xf32>,
    %c0_i32_8 = arith.constant 0 : i32
    %9 = arith.cmpi eq, %arg2, %c0_i32_8 : i32
    %10 = arith.extui %9 : i1 to i32
    %c0_i32_9 = arith.constant 0 : i32
    %11 = arith.cmpi ne, %10, %c0_i32_9 : i32
    scf.if %11 {
      %c0_10 = arith.constant 0 : index
      %c0_11 = arith.constant 0 : index
      %12 = vector.load %arg7[%c0_10, %c0_11] : memref<16x256xf32, #tpu.memory_space<vmem>>, vector<16x256xf32>
      %c0_12 = arith.constant 0 : index
      %c0_13 = arith.constant 0 : index
      %13 = vector.load %arg5[%c0_12, %c0_13] : memref<1x256xf32, #tpu.memory_space<vmem>>, vector<1x256xf32>
      %14 = vector.broadcast %13 : vector<1x256xf32> to vector<16x256xf32>
      %15 = arith.addf %12, %14 : vector<16x256xf32>
      %c0_14 = arith.constant 0 : index
      %c0_15 = arith.constant 0 : index
      %16 = vector.load %arg6[%c0_14, %c0_15] : memref<16x256xf32, #tpu.memory_space<vmem>>, vector<16x256xf32>
      tpu.vector_store %arg6[%c0_14, %c0_15], %15 {strides = array<i32>} : memref<16x256xf32, #tpu.memory_space<vmem>>, vector<16x256xf32>,
    } else {
    }
    return
  }
  func.func @transform_0(%arg0: i32, %arg1: i32, %arg2: i32) -> (i32, i32) {
    %c0_i32 = arith.constant 0 : i32
    return %arg0, %arg2 : i32, i32
  }
  func.func @transform_1(%arg0: i32, %arg1: i32, %arg2: i32) -> (i32, i32) {
    %c0_i32 = arith.constant 0 : i32
    return %arg2, %arg1 : i32, i32
  }
  func.func @transform_2(%arg0: i32, %arg1: i32, %arg2: i32) -> (i32, i32) {
    %c0_i32 = arith.constant 0 : i32
    %c0_i32_0 = arith.constant 0 : i32
    return %c0_i32, %arg1 : i32, i32
  }
  func.func @transform_3(%arg0: i32, %arg1: i32, %arg2: i32) -> (i32, i32) {
    %c0_i32 = arith.constant 0 : i32
    return %arg0, %arg1 : i32, i32
  }
}

module attributes {stable_mosaic.version = 11 : i64} {
  func.func @_mm_kernel(%arg0: i32, %arg1: i32, %arg2: i32, %arg3: memref<16x768xbf16, #tpu.memory_space<vmem>>, %arg4: memref<768x256xbf16, #tpu.memory_space<vmem>>, %arg5: memref<1x256xf32, #tpu.memory_space<vmem>>, %arg6: memref<16x256xf32, #tpu.memory_space<vmem>>, %arg7: memref<16x256xf32, #tpu.memory_space<vmem>>, %arg8: memref<16x256xf32, #tpu.memory_space<vmem>>) attributes {dimension_semantics = [#tpu.dimension_semantics<parallel>, #tpu.dimension_semantics<parallel>, #tpu.dimension_semantics<arbitrary>], iteration_bounds = array<i64: 1, 2, 6>, scalar_prefetch = 0 : i64, scratch_operands = 1 : i64, tpu.core_type = #tpu.core_type<tc>, window_params = [{transform_indices = @transform_0, window_bounds = array<i64: 16, 768>}, {transform_indices = @transform_1, window_bounds = array<i64: 768, 256>}, {transform_indices = @transform_2, window_bounds = array<i64: 1, 256>}, {transform_indices = @transform_3, window_bounds = array<i64: 16, 256>}, {transform_indices = @transform_4, window_bounds = array<i64: 16, 256>}]} {
    %c0_i32 = arith.constant 0 : i32
    %0 = arith.cmpi eq, %arg2, %c0_i32 : i32
    %1 = arith.extui %0 : i1 to i32
    %c0_i32_0 = arith.constant 0 : i32
    %2 = arith.cmpi ne, %1, %c0_i32_0 : i32
    scf.if %2 {
      %cst_9 = arith.constant 0.000000e+00 : f32
      %12 = vector.broadcast %cst_9 : f32 to vector<16x256xf32>
      %c0_10 = arith.constant 0 : index
      %c0_11 = arith.constant 0 : index
      %13 = vector.load %arg8[%c0_10, %c0_11] : memref<16x256xf32, #tpu.memory_space<vmem>>, vector<16x256xf32>
      tpu.vector_store %arg8[%c0_10, %c0_11], %12 {strides = array<i32>} : memref<16x256xf32, #tpu.memory_space<vmem>>, vector<16x256xf32>,
    } else {
    }
    %c0 = arith.constant 0 : index
    %c0_1 = arith.constant 0 : index
    %3 = vector.load %arg8[%c0, %c0_1] : memref<16x256xf32, #tpu.memory_space<vmem>>, vector<16x256xf32>
    %c0_2 = arith.constant 0 : index
    %c0_3 = arith.constant 0 : index
    %4 = vector.load %arg3[%c0_2, %c0_3] : memref<16x768xbf16, #tpu.memory_space<vmem>>, vector<16x768xbf16>
    %c0_4 = arith.constant 0 : index
    %c0_5 = arith.constant 0 : index
    %5 = vector.load %arg4[%c0_4, %c0_5] : memref<768x256xbf16, #tpu.memory_space<vmem>>, vector<768x256xbf16>
    %cst = arith.constant dense<0.000000e+00> : vector<16x256xf32>
    %6 = tpu.matmul %4, %5, %cst {dimension_numbers = #tpu.dot_dimension_numbers<[1], [0], [0], [1], [0, 0, 1, 1], [], []>} : vector<16x768xbf16>, vector<768x256xbf16>, vector<16x256xf32> -> vector<16x256xf32>
    %7 = arith.addf %3, %6 : vector<16x256xf32>
    %c0_6 = arith.constant 0 : index
    %c0_7 = arith.constant 0 : index
    %8 = vector.load %arg8[%c0_6, %c0_7] : memref<16x256xf32, #tpu.memory_space<vmem>>, vector<16x256xf32>
    tpu.vector_store %arg8[%c0_6, %c0_7], %7 {strides = array<i32>} : memref<16x256xf32, #tpu.memory_space<vmem>>, vector<16x256xf32>,
    %c5_i32 = arith.constant 5 : i32
    %9 = arith.cmpi eq, %arg2, %c5_i32 : i32
    %10 = arith.extui %9 : i1 to i32
    %c0_i32_8 = arith.constant 0 : i32
    %11 = arith.cmpi ne, %10, %c0_i32_8 : i32
    scf.if %11 {
      %c0_9 = arith.constant 0 : index
      %c0_10 = arith.constant 0 : index
      %12 = vector.load %arg8[%c0_9, %c0_10] : memref<16x256xf32, #tpu.memory_space<vmem>>, vector<16x256xf32>
      %c0_11 = arith.constant 0 : index
      %c0_12 = arith.constant 0 : index
      %13 = vector.load %arg5[%c0_11, %c0_12] : memref<1x256xf32, #tpu.memory_space<vmem>>, vector<1x256xf32>
      %14 = vector.broadcast %13 : vector<1x256xf32> to vector<16x256xf32>
      %15 = arith.addf %12, %14 : vector<16x256xf32>
      %c0_13 = arith.constant 0 : index
      %c0_14 = arith.constant 0 : index
      %16 = vector.load %arg6[%c0_13, %c0_14] : memref<16x256xf32, #tpu.memory_space<vmem>>, vector<16x256xf32>
      %17 = arith.addf %15, %16 : vector<16x256xf32>
      %cst_15 = arith.constant 0.000000e+00 : f32
      %18 = vector.broadcast %cst_15 : f32 to vector<16x256xf32>
      %19 = arith.maximumf %17, %18 : vector<16x256xf32>
      %c0_16 = arith.constant 0 : index
      %c0_17 = arith.constant 0 : index
      %20 = vector.load %arg7[%c0_16, %c0_17] : memref<16x256xf32, #tpu.memory_space<vmem>>, vector<16x256xf32>
      tpu.vector_store %arg7[%c0_16, %c0_17], %19 {strides = array<i32>} : memref<16x256xf32, #tpu.memory_space<vmem>>, vector<16x256xf32>,
    } else {
    }
    return
  }
  func.func @transform_0(%arg0: i32, %arg1: i32, %arg2: i32) -> (i32, i32) {
    %c0_i32 = arith.constant 0 : i32
    return %arg0, %arg2 : i32, i32
  }
  func.func @transform_1(%arg0: i32, %arg1: i32, %arg2: i32) -> (i32, i32) {
    %c0_i32 = arith.constant 0 : i32
    return %arg2, %arg1 : i32, i32
  }
  func.func @transform_2(%arg0: i32, %arg1: i32, %arg2: i32) -> (i32, i32) {
    %c0_i32 = arith.constant 0 : i32
    %c0_i32_0 = arith.constant 0 : i32
    return %c0_i32, %arg1 : i32, i32
  }
  func.func @transform_3(%arg0: i32, %arg1: i32, %arg2: i32) -> (i32, i32) {
    %c0_i32 = arith.constant 0 : i32
    return %arg0, %arg1 : i32, i32
  }
  func.func @transform_4(%arg0: i32, %arg1: i32, %arg2: i32) -> (i32, i32) {
    %c0_i32 = arith.constant 0 : i32
    return %arg0, %arg1 : i32, i32
  }
}

module attributes {stable_mosaic.version = 11 : i64} {
  func.func @_mm_kernel(%arg0: i32, %arg1: i32, %arg2: i32, %arg3: memref<16x512xbf16, #tpu.memory_space<vmem>>, %arg4: memref<512x256xbf16, #tpu.memory_space<vmem>>, %arg5: memref<1x256xf32, #tpu.memory_space<vmem>>, %arg6: memref<16x256xf32, #tpu.memory_space<vmem>>, %arg7: memref<16x256xf32, #tpu.memory_space<vmem>>) attributes {dimension_semantics = [#tpu.dimension_semantics<parallel>, #tpu.dimension_semantics<parallel>, #tpu.dimension_semantics<arbitrary>], iteration_bounds = array<i64: 1, 2, 1>, scalar_prefetch = 0 : i64, scratch_operands = 1 : i64, tpu.core_type = #tpu.core_type<tc>, window_params = [{transform_indices = @transform_0, window_bounds = array<i64: 16, 512>}, {transform_indices = @transform_1, window_bounds = array<i64: 512, 256>}, {transform_indices = @transform_2, window_bounds = array<i64: 1, 256>}, {transform_indices = @transform_3, window_bounds = array<i64: 16, 256>}]} {
    %c0_i32 = arith.constant 0 : i32
    %0 = arith.cmpi eq, %arg2, %c0_i32 : i32
    %1 = arith.extui %0 : i1 to i32
    %c0_i32_0 = arith.constant 0 : i32
    %2 = arith.cmpi ne, %1, %c0_i32_0 : i32
    scf.if %2 {
      %cst_10 = arith.constant 0.000000e+00 : f32
      %12 = vector.broadcast %cst_10 : f32 to vector<16x256xf32>
      %c0_11 = arith.constant 0 : index
      %c0_12 = arith.constant 0 : index
      %13 = vector.load %arg7[%c0_11, %c0_12] : memref<16x256xf32, #tpu.memory_space<vmem>>, vector<16x256xf32>
      tpu.vector_store %arg7[%c0_11, %c0_12], %12 {strides = array<i32>} : memref<16x256xf32, #tpu.memory_space<vmem>>, vector<16x256xf32>,
    } else {
    }
    %c0 = arith.constant 0 : index
    %c0_1 = arith.constant 0 : index
    %3 = vector.load %arg7[%c0, %c0_1] : memref<16x256xf32, #tpu.memory_space<vmem>>, vector<16x256xf32>
    %c0_2 = arith.constant 0 : index
    %c0_3 = arith.constant 0 : index
    %4 = vector.load %arg3[%c0_2, %c0_3] : memref<16x512xbf16, #tpu.memory_space<vmem>>, vector<16x512xbf16>
    %c0_4 = arith.constant 0 : index
    %c0_5 = arith.constant 0 : index
    %5 = vector.load %arg4[%c0_4, %c0_5] : memref<512x256xbf16, #tpu.memory_space<vmem>>, vector<512x256xbf16>
    %cst = arith.constant dense<0.000000e+00> : vector<16x256xf32>
    %6 = tpu.matmul %4, %5, %cst {dimension_numbers = #tpu.dot_dimension_numbers<[1], [0], [0], [1], [0, 0, 1, 1], [], []>} : vector<16x512xbf16>, vector<512x256xbf16>, vector<16x256xf32> -> vector<16x256xf32>
    %7 = arith.addf %3, %6 : vector<16x256xf32>
    %c0_6 = arith.constant 0 : index
    %c0_7 = arith.constant 0 : index
    %8 = vector.load %arg7[%c0_6, %c0_7] : memref<16x256xf32, #tpu.memory_space<vmem>>, vector<16x256xf32>
    tpu.vector_store %arg7[%c0_6, %c0_7], %7 {strides = array<i32>} : memref<16x256xf32, #tpu.memory_space<vmem>>, vector<16x256xf32>,
    %c0_i32_8 = arith.constant 0 : i32
    %9 = arith.cmpi eq, %arg2, %c0_i32_8 : i32
    %10 = arith.extui %9 : i1 to i32
    %c0_i32_9 = arith.constant 0 : i32
    %11 = arith.cmpi ne, %10, %c0_i32_9 : i32
    scf.if %11 {
      %c0_10 = arith.constant 0 : index
      %c0_11 = arith.constant 0 : index
      %12 = vector.load %arg7[%c0_10, %c0_11] : memref<16x256xf32, #tpu.memory_space<vmem>>, vector<16x256xf32>
      %c0_12 = arith.constant 0 : index
      %c0_13 = arith.constant 0 : index
      %13 = vector.load %arg5[%c0_12, %c0_13] : memref<1x256xf32, #tpu.memory_space<vmem>>, vector<1x256xf32>
      %14 = vector.broadcast %13 : vector<1x256xf32> to vector<16x256xf32>
      %15 = arith.addf %12, %14 : vector<16x256xf32>
      %cst_14 = arith.constant 5.000000e-01 : f32
      %16 = vector.broadcast %cst_14 : f32 to vector<16x256xf32>
      %17 = arith.mulf %16, %15 : vector<16x256xf32>
      %cst_15 = arith.constant 0.707106769 : f32
      %18 = vector.broadcast %cst_15 : f32 to vector<16x256xf32>
      %19 = arith.mulf %15, %18 : vector<16x256xf32>
      %cst_16 = arith.constant 0.000000e+00 : f32
      %20 = vector.broadcast %cst_16 : f32 to vector<16x256xf32>
      %21 = arith.cmpf olt, %19, %20 : vector<16x256xf32>
      %cst_17 = arith.constant -1.000000e+00 : f32
      %cst_18 = arith.constant 1.000000e+00 : f32
      %22 = vector.broadcast %cst_17 : f32 to vector<16x256xf32>
      %23 = vector.broadcast %cst_18 : f32 to vector<16x256xf32>
      %24 = arith.select %21, %22, %23 : vector<16x256xi1>, vector<16x256xf32>
      %25 = math.absf %19 : vector<16x256xf32>
      %cst_19 = arith.constant 0.327591091 : f32
      %26 = vector.broadcast %cst_19 : f32 to vector<16x256xf32>
      %27 = arith.mulf %26, %25 : vector<16x256xf32>
      %cst_20 = arith.constant 1.000000e+00 : f32
      %28 = vector.broadcast %cst_20 : f32 to vector<16x256xf32>
      %29 = arith.addf %28, %27 : vector<16x256xf32>
      %cst_21 = arith.constant 1.000000e+00 : f32
      %30 = vector.broadcast %cst_21 : f32 to vector<16x256xf32>
      %31 = arith.divf %30, %29 : vector<16x256xf32>
      %cst_22 = arith.constant 1.06140542 : f32
      %32 = vector.broadcast %cst_22 : f32 to vector<16x256xf32>
      %33 = arith.mulf %32, %31 : vector<16x256xf32>
      %cst_23 = arith.constant -1.45315206 : f32
      %34 = vector.broadcast %cst_23 : f32 to vector<16x256xf32>
      %35 = arith.addf %33, %34 : vector<16x256xf32>
      %36 = arith.mulf %35, %31 : vector<16x256xf32>
      %cst_24 = arith.constant 1.42141378 : f32
      %37 = vector.broadcast %cst_24 : f32 to vector<16x256xf32>
      %38 = arith.addf %36, %37 : vector<16x256xf32>
      %39 = arith.mulf %38, %31 : vector<16x256xf32>
      %cst_25 = arith.constant -0.284496725 : f32
      %40 = vector.broadcast %cst_25 : f32 to vector<16x256xf32>
      %41 = arith.addf %39, %40 : vector<16x256xf32>
      %42 = arith.mulf %41, %31 : vector<16x256xf32>
      %cst_26 = arith.constant 0.254829586 : f32
      %43 = vector.broadcast %cst_26 : f32 to vector<16x256xf32>
      %44 = arith.addf %42, %43 : vector<16x256xf32>
      %45 = arith.mulf %44, %31 : vector<16x256xf32>
      %cst_27 = arith.constant 0.000000e+00 : f32
      %46 = vector.broadcast %cst_27 : f32 to vector<16x256xf32>
      %47 = arith.subf %46, %25 : vector<16x256xf32>
      %48 = arith.mulf %47, %25 : vector<16x256xf32>
      %49 = math.exp %48 : vector<16x256xf32>
      %50 = arith.mulf %45, %49 : vector<16x256xf32>
      %cst_28 = arith.constant 1.000000e+00 : f32
      %51 = vector.broadcast %cst_28 : f32 to vector<16x256xf32>
      %52 = arith.subf %51, %50 : vector<16x256xf32>
      %53 = arith.mulf %24, %52 : vector<16x256xf32>
      %cst_29 = arith.constant 1.000000e+00 : f32
      %54 = vector.broadcast %cst_29 : f32 to vector<16x256xf32>
      %55 = arith.addf %54, %53 : vector<16x256xf32>
      %56 = arith.mulf %17, %55 : vector<16x256xf32>
      %c0_30 = arith.constant 0 : index
      %c0_31 = arith.constant 0 : index
      %57 = vector.load %arg6[%c0_30, %c0_31] : memref<16x256xf32, #tpu.memory_space<vmem>>, vector<16x256xf32>
      tpu.vector_store %arg6[%c0_30, %c0_31], %56 {strides = array<i32>} : memref<16x256xf32, #tpu.memory_space<vmem>>, vector<16x256xf32>,
    } else {
    }
    return
  }
  func.func @transform_0(%arg0: i32, %arg1: i32, %arg2: i32) -> (i32, i32) {
    %c0_i32 = arith.constant 0 : i32
    return %arg0, %arg2 : i32, i32
  }
  func.func @transform_1(%arg0: i32, %arg1: i32, %arg2: i32) -> (i32, i32) {
    %c0_i32 = arith.constant 0 : i32
    return %arg2, %arg1 : i32, i32
  }
  func.func @transform_2(%arg0: i32, %arg1: i32, %arg2: i32) -> (i32, i32) {
    %c0_i32 = arith.constant 0 : i32
    %c0_i32_0 = arith.constant 0 : i32
    return %c0_i32, %arg1 : i32, i32
  }
  func.func @transform_3(%arg0: i32, %arg1: i32, %arg2: i32) -> (i32, i32) {
    %c0_i32 = arith.constant 0 : i32
    return %arg0, %arg1 : i32, i32
  }
}

</mosaic_0001>

<bundles_post_ra>
// kernel: resnet_triplet_forward.15
= control target key start
LH: loop header
LB: loop body
LE: loop exit
PB: predicated region body
PF: predicated region fallthrough
CT: control target
= control target key end

     0   :  { %s470_s0 = inlined_call_operand.vmem [shape: f32[16,512], index: 0, kind: input, shape index: {}]   ;;  %s471_s1 = inlined_call_operand.vmem [shape: f32[16,512], index: 1, kind: input, shape index: {}]   ;;  %s472_s2 = inlined_call_operand.vmem [shape: f32[16,512], index: 2, kind: input, shape index: {}]   ;;  %s473_s3 = inlined_call_operand.vmem [shape: f32[16,512], index: 3, kind: input, shape index: {}]   ;;  %s474_s4 = inlined_call_operand.vmem [shape: f32[16,512], index: 4, kind: input, shape index: {}]   ;;  %s475_s5 = inlined_call_operand.vmem [shape: f32[16,512], index: 5, kind: input, shape index: {}]   ;;  %s476_s6 = inlined_call_operand.vmem [shape: f32[16,512], index: 6, kind: input, shape index: {}]   ;;  %s477_s7 = inlined_call_operand.vmem [shape: f32[16,512], index: 7, kind: input, shape index: {}]   ;;  %s478_s8 = inlined_call_operand.vmem [shape: f32[16,512], index: 8, kind: input, shape index: {}]   ;;  %s479_s9 = inlined_call_operand.vmem [shape: f32[16,512], index: 9, kind: output, shape index: {}]  }
   0x1   :  { %v32_v0 = vld [vmem:[%s470_s0] sm:$0xff]  ;;  %v33_v6 = vld [vmem:[%s470_s0 + $0x8] sm:$0xff]  ;;  %v34_v15 = vld [vmem:[%s470_s0 + $0x10] sm:$0xff] }
   0x2   :  { %v40_v1 = vld [vmem:[%s471_s1] sm:$0xff]  ;;  %v41_v7 = vld [vmem:[%s471_s1 + $0x8] sm:$0xff]  ;;  %v42_v16 = vld [vmem:[%s471_s1 + $0x10] sm:$0xff] }
   0x3   :  { %v56_v2 = vld [vmem:[%s472_s2] sm:$0xff]  ;;  %v48_v3 = vmax.f32 %v32_v0, %v40_v1  ;;  %v57_v8 = vld [vmem:[%s472_s2 + $0x8] sm:$0xff]  ;;  %v49_v10 = vmax.f32 %v33_v6, %v41_v7  ;;  %v58_v17 = vld [vmem:[%s472_s2 + $0x10] sm:$0xff]  ;;  %v50_v20 = vmax.f32 %v34_v15, %v42_v16 }
   0x4   :  { %v72_v4 = vld [vmem:[%s473_s3] sm:$0xff]  ;;  %v73_v13 = vld [vmem:[%s473_s3 + $0x8] sm:$0xff]  ;;  %v74_v24 = vld [vmem:[%s473_s3 + $0x10] sm:$0xff] }
   0x5   :  { %v64_v5 = vmax.f32 %v48_v3, %v56_v2  ;;  %v88_v9 = vld [vmem:[%s474_s4] sm:$0xff]  ;;  %v65_v14 = vmax.f32 %v49_v10, %v57_v8  ;;  %v89_v19 = vld [vmem:[%s474_s4 + $0x8] sm:$0xff]  ;;  %v66_v26 = vmax.f32 %v50_v20, %v58_v17  ;;  %v35_v27 = vld [vmem:[%s470_s0 + $0x18] sm:$0xff] }
   0x6   :  { %v104_v12 = vld [vmem:[%s475_s5] sm:$0xff]  ;;  %v105_v23 = vld [vmem:[%s475_s5 + $0x8] sm:$0xff]  ;;  %v43_v28 = vld [vmem:[%s471_s1 + $0x18] sm:$0xff] }
   0x7   :  { %v80_v11 = vmax.f32 %v64_v5, %v72_v4  ;;  %v120_v21 = vld [vmem:[%s476_s6] sm:$0xff]  ;;  %v81_v22 = vmax.f32 %v65_v14, %v73_v13  ;;  %v59_v29 = vld [vmem:[%s472_s2 + $0x18] sm:$0xff]  ;;  %v90_v33 = vld [vmem:[%s474_s4 + $0x10] sm:$0xff]  ;;  %v51_v34 = vmax.f32 %v35_v27, %v43_v28  ;;  %v82_v37 = vmax.f32 %v66_v26, %v74_v24 }
   0x8   :  { %v136_v30 = vld [vmem:[%s477_s7] sm:$0xff]  ;;  %v121_v36 = vld [vmem:[%s476_s6 + $0x8] sm:$0xff]  ;;  %v106_v38 = vld [vmem:[%s475_s5 + $0x10] sm:$0xff] }
   0x9   :  { %v96_v18 = vmax.f32 %v80_v11, %v88_v9  ;;  %v152_v31 = vld [vmem:[%s478_s8] sm:$0xff]  ;;  %v97_v32 = vmax.f32 %v81_v22, %v89_v19  ;;  %v75_v39 = vld [vmem:[%s473_s3 + $0x18] sm:$0xff]  ;;  %v67_v41 = vmax.f32 %v51_v34, %v59_v29  ;;  %v137_v46 = vld [vmem:[%s477_s7 + $0x8] sm:$0xff]  ;;  %v98_v48 = vmax.f32 %v82_v37, %v90_v33 }
   0xa   :  { %v36_v42 = vld [vmem:[%s470_s0 + $0x20] sm:$0xff]  ;;  %v153_v47 = vld [vmem:[%s478_s8 + $0x8] sm:$0xff]  ;;  %v91_v49 = vld [vmem:[%s474_s4 + $0x18] sm:$0xff] }
   0xb   :  { %v112_v25 = vmax.f32 %v96_v18, %v104_v12  ;;  %v113_v40 = vmax.f32 %v97_v32, %v105_v23  ;;  %v44_v43 = vld [vmem:[%s471_s1 + $0x20] sm:$0xff]  ;;  %v122_v52 = vld [vmem:[%s476_s6 + $0x10] sm:$0xff]  ;;  %v83_v53 = vmax.f32 %v67_v41, %v75_v39  ;;  %v107_v54 = vld [vmem:[%s475_s5 + $0x18] sm:$0xff]  ;;  %v114_v57 = vmax.f32 %v98_v48, %v106_v38 }
   0xc   :  { %v60_v44 = vld [vmem:[%s472_s2 + $0x20] sm:$0xff]  ;;  %v52_v50 = vmax.f32 %v36_v42, %v44_v43  ;;  %v37_v59 = vld [vmem:[%s470_s0 + $0x28] sm:$0xff]  ;;  %v138_v63 = vld [vmem:[%s477_s7 + $0x10] sm:$0xff] }
   0xd   :  { %v128_v35 = vmax.f32 %v112_v25, %v120_v21  ;;  %v129_v51 = vmax.f32 %v113_v40, %v121_v36  ;;  %v76_v55 = vld [vmem:[%s473_s3 + $0x20] sm:$0xff]  ;;  %v45_v60 = vld [vmem:[%s471_s1 + $0x28] sm:$0xff]  ;;  %v154_v0 = vld [vmem:[%s478_s8 + $0x10] sm:$0xff]  ;;  %v99_v1 = vmax.f32 %v83_v53, %v91_v49  ;;  %v130_v4 = vmax.f32 %v114_v57, %v122_v52 }
   0xe   :  { %v68_v58 = vmax.f32 %v52_v50, %v60_v44  ;;  %v61_v61 = vld [vmem:[%s472_s2 + $0x28] sm:$0xff]  ;;  %v92_v2 = vld [vmem:[%s474_s4 + $0x20] sm:$0xff]  ;;  %v53_v3 = vmax.f32 %v37_v59, %v45_v60  ;;  %v123_v5 = vld [vmem:[%s476_s6 + $0x18] sm:$0xff] }
   0xf   :  { %v144_v45 = vmax.f32 %v128_v35, %v136_v30  ;;  %v145_v62 = vmax.f32 %v129_v51, %v137_v46  ;;  %v108_v7 = vld [vmem:[%s475_s5 + $0x20] sm:$0xff]  ;;  %v77_v8 = vld [vmem:[%s473_s3 + $0x28] sm:$0xff]  ;;  %v115_v10 = vmax.f32 %v99_v1, %v107_v54  ;;  %v38_v12 = vld [vmem:[%s470_s0 + $0x30] sm:$0xff]  ;;  %v146_v15 = vmax.f32 %v130_v4, %v138_v63 }
  0x10   :  { %v84_v6 = vmax.f32 %v68_v58, %v76_v55  ;;  %v69_v11 = vmax.f32 %v53_v3, %v61_v61  ;;  %v46_v13 = vld [vmem:[%s471_s1 + $0x30] sm:$0xff]  ;;  %v139_v16 = vld [vmem:[%s477_s7 + $0x18] sm:$0xff]  ;;  %v93_v19 = vld [vmem:[%s474_s4 + $0x28] sm:$0xff] }
  0x11   :  { %v160_v56 = vmax.f32 %v144_v45, %v152_v31  ;;  %v161_v9 = vmax.f32 %v145_v62, %v153_v47  ;;  %v62_v14 = vld [vmem:[%s472_s2 + $0x30] sm:$0xff]  ;;  %v155_v17 = vld [vmem:[%s478_s8 + $0x18] sm:$0xff]  ;;  %v54_v20 = vmax.f32 %v38_v12, %v46_v13  ;;  %v131_v21 = vmax.f32 %v115_v10, %v123_v5  ;;  %v124_v22 = vld [vmem:[%s476_s6 + $0x20] sm:$0xff] }
  0x12   :  { %v100_v18 = vmax.f32 %v84_v6, %v92_v2  ;;  %v85_v23 = vmax.f32 %v69_v11, %v77_v8  ;;  %v109_v24 = vld [vmem:[%s475_s5 + $0x28] sm:$0xff]  ;;  %v78_v25 = vld [vmem:[%s473_s3 + $0x30] sm:$0xff]  ;;  %v162_v26 = vmax.f32 %v146_v15, %v154_v0  ;;  %v39_v29 = vld [vmem:[%s470_s0 + $0x38] sm:$0xff] }
  0x13   :  { %168 = vst [vmem:[%s479_s9] sm:$0xff] %v160_v56  ;;  %169 = vst [vmem:[%s479_s9 + $0x8] sm:$0xff] %v161_v9  ;;  %v70_v28 = vmax.f32 %v54_v20, %v62_v14  ;;  %v47_v30 = vld [vmem:[%s471_s1 + $0x38] sm:$0xff]  ;;  %v147_v32 = vmax.f32 %v131_v21, %v139_v16  ;;  %v140_v33 = vld [vmem:[%s477_s7 + $0x20] sm:$0xff] }
  0x14   :  { %v116_v27 = vmax.f32 %v100_v18, %v108_v7  ;;  %v63_v31 = vld [vmem:[%s472_s2 + $0x38] sm:$0xff]  ;;  %v101_v34 = vmax.f32 %v85_v23, %v93_v19  ;;  %v94_v35 = vld [vmem:[%s474_s4 + $0x30] sm:$0xff]  ;;  %v55_v36 = vmax.f32 %v39_v29, %v47_v30  ;;  %170 = vst [vmem:[%s479_s9 + $0x10] sm:$0xff] %v162_v26  ;;  %v125_v38 = vld [vmem:[%s476_s6 + $0x28] sm:$0xff] }
  0x15   :  { %v86_v39 = vmax.f32 %v70_v28, %v78_v25  ;;  %v79_v40 = vld [vmem:[%s473_s3 + $0x38] sm:$0xff]  ;;  %v163_v41 = vmax.f32 %v147_v32, %v155_v17  ;;  %v156_v42 = vld [vmem:[%s478_s8 + $0x20] sm:$0xff]  ;;  %v110_v44 = vld [vmem:[%s475_s5 + $0x30] sm:$0xff] }
  0x16   :  { %v132_v37 = vmax.f32 %v116_v27, %v124_v22  ;;  %v117_v43 = vmax.f32 %v101_v34, %v109_v24  ;;  %v71_v45 = vmax.f32 %v55_v36, %v63_v31  ;;  %v141_v47 = vld [vmem:[%s477_s7 + $0x28] sm:$0xff]  ;;  %v95_v49 = vld [vmem:[%s474_s4 + $0x38] sm:$0xff]  ;;  %v126_v51 = vld [vmem:[%s476_s6 + $0x30] sm:$0xff] }
  0x17   :  { %v102_v48 = vmax.f32 %v86_v39, %v94_v35  ;;  %171 = vst [vmem:[%s479_s9 + $0x18] sm:$0xff] %v163_v41  ;;  %v157_v54 = vld [vmem:[%s478_s8 + $0x28] sm:$0xff]  ;;  %v111_v56 = vld [vmem:[%s475_s5 + $0x38] sm:$0xff]  ;;  %v142_v58 = vld [vmem:[%s477_s7 + $0x30] sm:$0xff] }
  0x18   :  { %v148_v46 = vmax.f32 %v132_v37, %v140_v33  ;;  %v133_v50 = vmax.f32 %v117_v43, %v125_v38  ;;  %v87_v52 = vmax.f32 %v71_v45, %v79_v40  ;;  %v127_v61 = vld [vmem:[%s476_s6 + $0x38] sm:$0xff]  ;;  %v158_v63 = vld [vmem:[%s478_s8 + $0x30] sm:$0xff] }
  0x19   :  { %v118_v55 = vmax.f32 %v102_v48, %v110_v44  ;;  %v143_v2 = vld [vmem:[%s477_s7 + $0x38] sm:$0xff] }
  0x1a   :  { %v164_v53 = vmax.f32 %v148_v46, %v156_v42  ;;  %v149_v57 = vmax.f32 %v133_v50, %v141_v47  ;;  %v103_v59 = vmax.f32 %v87_v52, %v95_v49  ;;  %v159_v5 = vld [vmem:[%s478_s8 + $0x38] sm:$0xff] }
  0x1b   :  { %v134_v60 = vmax.f32 %v118_v55, %v126_v51 }
  0x1c   :  { %172 = vst [vmem:[%s479_s9 + $0x20] sm:$0xff] %v164_v53  ;;  %v165_v62 = vmax.f32 %v149_v57, %v157_v54  ;;  %v119_v0 = vmax.f32 %v103_v59, %v111_v56 }
  0x1d   :  { %v150_v1 = vmax.f32 %v134_v60, %v142_v58 }
  0x1e   :  { %173 = vst [vmem:[%s479_s9 + $0x28] sm:$0xff] %v165_v62  ;;  %v135_v3 = vmax.f32 %v119_v0, %v127_v61 }
  0x1f   :  { %v166_v4 = vmax.f32 %v150_v1, %v158_v63 }
  0x20   :  { %v151_v6 = vmax.f32 %v135_v3, %v143_v2 }
  0x21   :  { %174 = vst [vmem:[%s479_s9 + $0x30] sm:$0xff] %v166_v4 }
  0x22   :  { %v167_v7 = vmax.f32 %v151_v6, %v159_v5 }
  0x24   :  { %175 = vst [vmem:[%s479_s9 + $0x38] sm:$0xff] %v167_v7 }

// kernel: resnet_triplet_forward.14
= control target key start
LH: loop header
LB: loop body
LE: loop exit
PB: predicated region body
PF: predicated region fallthrough
CT: control target
= control target key end

     0   :  { %s1212_s12 = smov 0   ;;  %s1214_s13 = smov 0   ;;  %s1362_s0 = inlined_call_operand.vmem [shape: bf16[512,128], index: 0, kind: input, shape index: {}]   ;;  %s1363_s1 = inlined_call_operand.vmem [shape: bf16[128,128], index: 1, kind: input, shape index: {}]   ;;  %s1364_s2 = inlined_call_operand.vmem [shape: f32[1,128], index: 2, kind: input, shape index: {}]   ;;  %s1365_s3 = inlined_call_operand.vmem [shape: f32[512,128], index: 3, kind: output, shape index: {}]  }
   0x1   :  { %s1216_s14 = smov 0  }
   0x2 LB: > { %s32_s15 = sadd.s32 1, %s1186_s13  ;;  %p1000_p0 = scmp.ge.s32.totalorder %s1190_s14, 1  ;;  %s1190_s14 = sphi %s1216_s14, %s13_s14   ;;  %s1186_s13 = sphi %s1214_s13, %s1367_s13   ;;  %s1182_s12 = sphi %s1212_s12, %s1366_s12  }
   0x3   : > { %p34_p1 = scmp.ge.s32.totalorder %s32_s15, 2  ;;  %p188_p2 = scmp.lt.s32.totalorder %s1190_s14, 3 }
   0x5   : > { %s1369_s15 = smov (%p34_p1, %s32_s15), 0  ;;  %p189_p3 = pnand %p1000_p0, %p188_p2 }
   0x6   : > { %v1144_v0 = vld [vmem:[%s1363_s1] sm:$0xff] (!%p189_p3)   ;;  %s1001_s18 = sshll.u32 (!%p189_p3), %s1182_s12, 5  ;;  %v1145_v1 = vld [vmem:[%s1363_s1 + $0x8] sm:$0xff] (!%p189_p3)   ;;  %v1146_v2 = vld [vmem:[%s1363_s1 + $0x10] sm:$0xff] (!%p189_p3)  }
   0x7   : > { %192 = sbr.rel (%p189_p3) target bundleno = 283 (0x11b), region = 32  ;;  %p230_p4 = scmp.lt.s32.totalorder (!%p189_p3), %s1001_s18, 63  ;;  %1056 = vmatprep.subr.bf16.mxu0 (!%p189_p3), %v1144_v0  ;;  %1104 = vmatprep.subr.bf16.mxu1 (!%p189_p3), %v1144_v0  ;;  %v1147_v3 = vld [vmem:[%s1363_s1 + $0x18] sm:$0xff] (!%p189_p3)   ;;  %v1148_v6 = vld [vmem:[%s1363_s1 + $0x20] sm:$0xff] (!%p189_p3)   ;;  %v1149_v7 = vld [vmem:[%s1363_s1 + $0x28] sm:$0xff] (!%p189_p3)  }
   0x8   : > { %1057 = vmatpush3.bf16.msra.mxu0 (!%p189_p3), %v1144_v0  ;;  %1112 = vmatpush3.bf16.msra.mxu1 (!%p189_p3), %v1144_v0  ;;  %v1150_v8 = vld [vmem:[%s1363_s1 + $0x30] sm:$0xff] (!%p189_p3)   ;;  %v1151_v9 = vld [vmem:[%s1363_s1 + $0x38] sm:$0xff] (!%p189_p3)   ;;  %v1281_v24 = vld [vmem:[%s1364_s2] ss:$0 sm:$0xff] (!%p189_p3) }
   0x9   : > { %1058 = vmatprep.subr.bf16.mxu0 (!%p189_p3), %v1145_v1  ;;  %1105 = vmatprep.subr.bf16.mxu1 (!%p189_p3), %v1145_v1 }
   0xc   : > { %1059 = vmatpush3.bf16.msra.mxu0 (!%p189_p3), %v1145_v1  ;;  %1113 = vmatpush3.bf16.msra.mxu1 (!%p189_p3), %v1145_v1 }
   0xd   : > { %1060 = vmatprep.subr.bf16.mxu0 (!%p189_p3), %v1146_v2  ;;  %1106 = vmatprep.subr.bf16.mxu1 (!%p189_p3), %v1146_v2 }
   0xe   : > { %s1371_s18 = smov (!%p230_p4, %s1001_s18), 63 }
   0xf   : > { %s1002_s23 = sshll.u32 %s1371_s18, 2  ;;  %s1004_s12 = sshll.u32 %s1371_s18, 3 }
  0x10   : > { %s1245_s26 = scalar_lea.vmem %s1362_s0, %s1002_s23  ;;  %1061 = vmatpush3.bf16.msra.mxu0 %v1146_v2  ;;  %1114 = vmatpush3.bf16.msra.mxu1 %v1146_v2  ;;  %s1289_s19 = scalar_lea.vmem %s1365_s3, %s1004_s12 }
  0x11   : > { %v1152_v4 = vld [vmem:[%s1245_s26] sm:$0xff]   ;;  %1062 = vmatprep.subr.bf16.mxu0 %v1147_v3  ;;  %1107 = vmatprep.subr.bf16.mxu1 %v1147_v3  ;;  %v1154_v10 = vld [vmem:[%s1245_s26 + $0x8] sm:$0xff]   ;;  %v1156_v12 = vld [vmem:[%s1245_s26 + $0x10] sm:$0xff]  }
  0x12   : > { %v1153_v5 = vld [vmem:[%s1245_s26 + $0x40] sm:$0xff]   ;;  %1072 = vmatprep.mubr.bf16.mxu0 %v1152_v4  ;;  %v1155_v11 = vld [vmem:[%s1245_s26 + $0x48] sm:$0xff]   ;;  %v1157_v13 = vld [vmem:[%s1245_s26 + $0x50] sm:$0xff]  }
  0x13   : > { %1088 = vmatprep.mubr.bf16.mxu1 %v1153_v5  ;;  %v1158_v14 = vld [vmem:[%s1245_s26 + $0x18] sm:$0xff]   ;;  %v1160_v16 = vld [vmem:[%s1245_s26 + $0x20] sm:$0xff]   ;;  %v1162_v18 = vld [vmem:[%s1245_s26 + $0x28] sm:$0xff]  }
  0x14   : > { %1063 = vmatpush3.bf16.msra.mxu0 %v1147_v3  ;;  %1115 = vmatpush3.bf16.msra.mxu1 %v1147_v3  ;;  %v1159_v15 = vld [vmem:[%s1245_s26 + $0x58] sm:$0xff]   ;;  %v1161_v17 = vld [vmem:[%s1245_s26 + $0x60] sm:$0xff]   ;;  %v1163_v19 = vld [vmem:[%s1245_s26 + $0x68] sm:$0xff]  }
  0x15   : > { %1064 = vmatprep.subr.bf16.mxu0 %v1148_v6  ;;  %1108 = vmatprep.subr.bf16.mxu1 %v1148_v6  ;;  %v1164_v20 = vld [vmem:[%s1245_s26 + $0x30] sm:$0xff]   ;;  %v1166_v22 = vld [vmem:[%s1245_s26 + $0x38] sm:$0xff]  }
  0x16   : > { %v1165_v21 = vld [vmem:[%s1245_s26 + $0x70] sm:$0xff]   ;;  %v1167_v23 = vld [vmem:[%s1245_s26 + $0x78] sm:$0xff]  }
  0x18   : > { %1065 = vmatpush3.bf16.msra.mxu0 %v1148_v6  ;;  %1116 = vmatpush3.bf16.msra.mxu1 %v1148_v6 }
  0x19   : > { %1066 = vmatprep.subr.bf16.mxu0 %v1149_v7  ;;  %1109 = vmatprep.subr.bf16.mxu1 %v1149_v7 }
  0x1c   : > { %1067 = vmatpush3.bf16.msra.mxu0 %v1149_v7  ;;  %1117 = vmatpush3.bf16.msra.mxu1 %v1149_v7 }
  0x1d   : > { %1068 = vmatprep.subr.bf16.mxu0 %v1150_v8  ;;  %1110 = vmatprep.subr.bf16.mxu1 %v1150_v8 }
  0x20   : > { %1069 = vmatpush3.bf16.msra.mxu0 %v1150_v8  ;;  %1118 = vmatpush3.bf16.msra.mxu1 %v1150_v8 }
  0x21   : > { %1070 = vmatprep.subr.bf16.mxu0 %v1151_v9  ;;  %1111 = vmatprep.subr.bf16.mxu1 %v1151_v9 }
  0x24   : > { %1071 = vmatpush3.bf16.msra.mxu0 %v1151_v9  ;;  %1119 = vmatpush3.bf16.msra.mxu1 %v1151_v9 }
  0x27   : > { %1073 = vmatmul.mubr.bf16.vlgmr.msra.gmra.mrb[0].mxu0 %v1154_v10  ;;  %1089 = vmatmul.mubr.bf16.vlgmr.msra.gmra.mrb[0].mxu1 %v1155_v11 }
  0x28   : > { %1076 = vmatprep.mubr.bf16.mxu0 %v1156_v12  ;;  %1092 = vmatprep.mubr.bf16.mxu1 %v1157_v13 }
  0x2f   : > { %1077 = vmatmul.mubr.bf16.gmra.mrb[4].mxu0 %v1158_v14  ;;  %1093 = vmatmul.mubr.bf16.gmra.mrb[4].mxu1 %v1159_v15 }
  0x30   : > { %1080 = vmatprep.mubr.bf16.mxu0 %v1160_v16  ;;  %1096 = vmatprep.mubr.bf16.mxu1 %v1161_v17 }
  0x37   : > { %1081 = vmatmul.mubr.bf16.gmra.mrb[8].mxu0 %v1162_v18  ;;  %1097 = vmatmul.mubr.bf16.gmra.mrb[8].mxu1 %v1163_v19 }
  0x38   : > { %1084 = vmatprep.mubr.bf16.mxu0 %v1164_v20  ;;  %1100 = vmatprep.mubr.bf16.mxu1 %v1165_v21 }
  0x3f   : > { %1085 = vmatmul.mubr.bf16.gmra.mrb[12].mxu0 %v1166_v22  ;;  %1101 = vmatmul.mubr.bf16.gmra.mrb[12].mxu1 %v1167_v23 }
  0xfa   : > { %v1074_v25 = vpop.f32.mrb[0].mxu0  ;;  %v1090_v26 = vpop.f32.mrb[0].mxu1 }
  0xfb   : > { %v789_v27 = vadd.f32 %v1074_v25, %v1281_v24  ;;  %v805_v28 = vadd.f32 %v1090_v26, %v1281_v24  ;;  %v554_v29 = vpop.f32.mrb[1].mxu0  ;;  %v618_v30 = vpop.f32.mrb[1].mxu1 }
  0xfc   : > { %v787_v31 = vadd.f32 %v1281_v24, %v554_v29  ;;  %v803_v32 = vadd.f32 %v1281_v24, %v618_v30  ;;  %v1075_v33 = vpop.f32.mrb[2].mxu0  ;;  %v1091_v34 = vpop.f32.mrb[2].mxu1 }
  0xfd   : > { %v821_v35 = vmax.f32 %v789_v27, 0.0  ;;  %v837_v36 = vmax.f32 %v805_v28, 0.0  ;;  %v790_v37 = vadd.f32 %v1075_v33, %v1281_v24  ;;  %v806_v38 = vadd.f32 %v1091_v34, %v1281_v24  ;;  %v557_v39 = vpop.f32.mrb[3].mxu0  ;;  %v621_v40 = vpop.f32.mrb[3].mxu1 }
  0xfe   : > { %v819_v41 = vmax.f32 %v787_v31, 0.0  ;;  %v835_v42 = vmax.f32 %v803_v32, 0.0  ;;  %v788_v43 = vadd.f32 %v1281_v24, %v557_v39  ;;  %v804_v44 = vadd.f32 %v1281_v24, %v621_v40 }
  0xff   : > { %853 = vst [vmem:[%s1289_s19 + $0x10] sm:$0xff] %v821_v35  ;;  %869 = vst [vmem:[%s1289_s19 + $0x90] sm:$0xff] %v837_v36  ;;  %v822_v45 = vmax.f32 %v790_v37, 0.0  ;;  %v838_v46 = vmax.f32 %v806_v38, 0.0 }
 0x100   : > { %851 = vst [vmem:[%s1289_s19] sm:$0xff] %v819_v41  ;;  %867 = vst [vmem:[%s1289_s19 + $0x80] sm:$0xff] %v835_v42  ;;  %v820_v47 = vmax.f32 %v788_v43, 0.0  ;;  %v836_v48 = vmax.f32 %v804_v44, 0.0 }
 0x101   : > { %854 = vst [vmem:[%s1289_s19 + $0x18] sm:$0xff] %v822_v45  ;;  %870 = vst [vmem:[%s1289_s19 + $0x98] sm:$0xff] %v838_v46 }
 0x102   : > { %852 = vst [vmem:[%s1289_s19 + $0x8] sm:$0xff] %v820_v47  ;;  %868 = vst [vmem:[%s1289_s19 + $0x88] sm:$0xff] %v836_v48  ;;  %v1078_v49 = vpop.f32.mrb[4].mxu0  ;;  %v1094_v50 = vpop.f32.mrb[4].mxu1 }
 0x103   : > { %v793_v51 = vadd.f32 %v1078_v49, %v1281_v24  ;;  %v809_v52 = vadd.f32 %v1094_v50, %v1281_v24  ;;  %v570_v53 = vpop.f32.mrb[5].mxu0  ;;  %v634_v54 = vpop.f32.mrb[5].mxu1 }
 0x104   : > { %v791_v55 = vadd.f32 %v1281_v24, %v570_v53  ;;  %v807_v56 = vadd.f32 %v1281_v24, %v634_v54  ;;  %v1079_v57 = vpop.f32.mrb[6].mxu0  ;;  %v1095_v58 = vpop.f32.mrb[6].mxu1 }
 0x105   : > { %v825_v59 = vmax.f32 %v793_v51, 0.0  ;;  %v841_v60 = vmax.f32 %v809_v52, 0.0  ;;  %v794_v61 = vadd.f32 %v1079_v57, %v1281_v24  ;;  %v810_v62 = vadd.f32 %v1095_v58, %v1281_v24  ;;  %v573_v63 = vpop.f32.mrb[7].mxu0  ;;  %v637_v0 = vpop.f32.mrb[7].mxu1 }
 0x106   : > { %v823_v1 = vmax.f32 %v791_v55, 0.0  ;;  %v839_v2 = vmax.f32 %v807_v56, 0.0  ;;  %v792_v3 = vadd.f32 %v1281_v24, %v573_v63  ;;  %v808_v4 = vadd.f32 %v1281_v24, %v637_v0 }
 0x107   : > { %857 = vst [vmem:[%s1289_s19 + $0x30] sm:$0xff] %v825_v59  ;;  %873 = vst [vmem:[%s1289_s19 + $0xb0] sm:$0xff] %v841_v60  ;;  %v826_v5 = vmax.f32 %v794_v61, 0.0  ;;  %v842_v6 = vmax.f32 %v810_v62, 0.0 }
 0x108   : > { %855 = vst [vmem:[%s1289_s19 + $0x20] sm:$0xff] %v823_v1  ;;  %871 = vst [vmem:[%s1289_s19 + $0xa0] sm:$0xff] %v839_v2  ;;  %v824_v7 = vmax.f32 %v792_v3, 0.0  ;;  %v840_v8 = vmax.f32 %v808_v4, 0.0 }
 0x109   : > { %858 = vst [vmem:[%s1289_s19 + $0x38] sm:$0xff] %v826_v5  ;;  %874 = vst [vmem:[%s1289_s19 + $0xb8] sm:$0xff] %v842_v6 }
 0x10a   : > { %856 = vst [vmem:[%s1289_s19 + $0x28] sm:$0xff] %v824_v7  ;;  %872 = vst [vmem:[%s1289_s19 + $0xa8] sm:$0xff] %v840_v8  ;;  %v1082_v9 = vpop.f32.mrb[8].mxu0  ;;  %v1098_v10 = vpop.f32.mrb[8].mxu1 }
 0x10b   : > { %v797_v11 = vadd.f32 %v1082_v9, %v1281_v24  ;;  %v813_v12 = vadd.f32 %v1098_v10, %v1281_v24  ;;  %v586_v13 = vpop.f32.mrb[9].mxu0  ;;  %v650_v14 = vpop.f32.mrb[9].mxu1 }
 0x10c   : > { %v795_v15 = vadd.f32 %v1281_v24, %v586_v13  ;;  %v811_v16 = vadd.f32 %v1281_v24, %v650_v14  ;;  %v1083_v17 = vpop.f32.mrb[10].mxu0  ;;  %v1099_v18 = vpop.f32.mrb[10].mxu1 }
 0x10d   : > { %v829_v19 = vmax.f32 %v797_v11, 0.0  ;;  %v845_v20 = vmax.f32 %v813_v12, 0.0  ;;  %v798_v21 = vadd.f32 %v1083_v17, %v1281_v24  ;;  %v814_v22 = vadd.f32 %v1099_v18, %v1281_v24  ;;  %v589_v23 = vpop.f32.mrb[11].mxu0  ;;  %v653_v25 = vpop.f32.mrb[11].mxu1 }
 0x10e   : > { %v827_v26 = vmax.f32 %v795_v15, 0.0  ;;  %v843_v27 = vmax.f32 %v811_v16, 0.0  ;;  %v796_v28 = vadd.f32 %v1281_v24, %v589_v23  ;;  %v812_v29 = vadd.f32 %v1281_v24, %v653_v25 }
 0x10f   : > { %861 = vst [vmem:[%s1289_s19 + $0x50] sm:$0xff] %v829_v19  ;;  %877 = vst [vmem:[%s1289_s19 + $0xd0] sm:$0xff] %v845_v20  ;;  %v830_v30 = vmax.f32 %v798_v21, 0.0  ;;  %v846_v31 = vmax.f32 %v814_v22, 0.0 }
 0x110   : > { %859 = vst [vmem:[%s1289_s19 + $0x40] sm:$0xff] %v827_v26  ;;  %875 = vst [vmem:[%s1289_s19 + $0xc0] sm:$0xff] %v843_v27  ;;  %v828_v32 = vmax.f32 %v796_v28, 0.0  ;;  %v844_v33 = vmax.f32 %v812_v29, 0.0 }
 0x111   : > { %862 = vst [vmem:[%s1289_s19 + $0x58] sm:$0xff] %v830_v30  ;;  %878 = vst [vmem:[%s1289_s19 + $0xd8] sm:$0xff] %v846_v31 }
 0x112   : > { %860 = vst [vmem:[%s1289_s19 + $0x48] sm:$0xff] %v828_v32  ;;  %876 = vst [vmem:[%s1289_s19 + $0xc8] sm:$0xff] %v844_v33  ;;  %v1086_v34 = vpop.f32.mrb[12].mxu0  ;;  %v1102_v35 = vpop.f32.mrb[12].mxu1 }
 0x113   : > { %v801_v36 = vadd.f32 %v1086_v34, %v1281_v24  ;;  %v817_v37 = vadd.f32 %v1102_v35, %v1281_v24  ;;  %v602_v38 = vpop.f32.mrb[13].mxu0  ;;  %v666_v39 = vpop.f32.mrb[13].mxu1 }
 0x114   : > { %v799_v40 = vadd.f32 %v1281_v24, %v602_v38  ;;  %v815_v41 = vadd.f32 %v1281_v24, %v666_v39  ;;  %v1087_v42 = vpop.f32.mrb[14].mxu0  ;;  %v1103_v43 = vpop.f32.mrb[14].mxu1 }
 0x115   : > { %v833_v44 = vmax.f32 %v801_v36, 0.0  ;;  %v849_v45 = vmax.f32 %v817_v37, 0.0  ;;  %v802_v46 = vadd.f32 %v1087_v42, %v1281_v24  ;;  %v818_v47 = vadd.f32 %v1103_v43, %v1281_v24  ;;  %v605_v48 = vpop.f32.mrb[15].mxu0  ;;  %v669_v49 = vpop.f32.mrb[15].mxu1 }
 0x116   : > { %v831_v50 = vmax.f32 %v799_v40, 0.0  ;;  %v847_v51 = vmax.f32 %v815_v41, 0.0  ;;  %v800_v52 = vadd.f32 %v1281_v24, %v605_v48  ;;  %v816_v53 = vadd.f32 %v1281_v24, %v669_v49 }
 0x117   : > { %865 = vst [vmem:[%s1289_s19 + $0x70] sm:$0xff] %v833_v44  ;;  %881 = vst [vmem:[%s1289_s19 + $0xf0] sm:$0xff] %v849_v45  ;;  %v834_v54 = vmax.f32 %v802_v46, 0.0  ;;  %v850_v55 = vmax.f32 %v818_v47, 0.0 }
 0x118   : > { %863 = vst [vmem:[%s1289_s19 + $0x60] sm:$0xff] %v831_v50  ;;  %879 = vst [vmem:[%s1289_s19 + $0xe0] sm:$0xff] %v847_v51  ;;  %v832_v56 = vmax.f32 %v800_v52, 0.0  ;;  %v848_v57 = vmax.f32 %v816_v53, 0.0 }
 0x119   : > { %866 = vst [vmem:[%s1289_s19 + $0x78] sm:$0xff] %v834_v54  ;;  %882 = vst [vmem:[%s1289_s19 + $0xf8] sm:$0xff] %v850_v55 }
 0x11a   : > { %864 = vst [vmem:[%s1289_s19 + $0x68] sm:$0xff] %v832_v56  ;;  %880 = vst [vmem:[%s1289_s19 + $0xe8] sm:$0xff] %v848_v57 }
 0x11b PF: > { %s13_s14 = sadd.s32 1, %s1190_s14   ;;  %s1366_s12 = smov %s1186_s13 }
 0x11c   : > { %p10_p5 = scmp.ge.s32.totalorder %s13_s14, 4   ;;  %s1367_s13 = smov %s1369_s15 }
 0x11e   :  { %12 = sbr.rel (!%p10_p5) target bundleno = 2 (0x2), region = 76 }

// kernel: resnet_triplet_forward.16
= control target key start
LH: loop header
LB: loop body
LE: loop exit
PB: predicated region body
PF: predicated region fallthrough
CT: control target
= control target key end

     0   :  { %s1759_s1 = inlined_call_operand.vmem [shape: bf16[640,128], index: 1, kind: input, shape index: {}]   ;;  %s1760_s0 = inlined_call_operand.vmem [shape: bf16[128,640], index: 0, kind: input, shape index: {}]   ;;  %s1761_s2 = inlined_call_operand.vmem [shape: f32[1,128], index: 2, kind: input, shape index: {}]   ;;  %s1762_s3 = inlined_call_operand.vmem [shape: f32[128,128], index: 3, kind: output, shape index: {}]  }
   0x1   :  { %v1301_v0 = vld [vmem:[%s1759_s1 + $0x40] sm:$0xff]   ;;  %v1305_v4 = vld [vmem:[%s1759_s1 + $0x48] sm:$0xff]   ;;  %v1309_v8 = vld [vmem:[%s1759_s1 + $0x50] sm:$0xff]  }
   0x2   :  { %v1302_v1 = vld [vmem:[%s1759_s1 + $0xc0] sm:$0xff]   ;;  %1109 = vmatprep.subr.bf16.mxu0 %v1301_v0  ;;  %v1306_v5 = vld [vmem:[%s1759_s1 + $0xc8] sm:$0xff]   ;;  %v1310_v9 = vld [vmem:[%s1759_s1 + $0xd0] sm:$0xff]  }
   0x3   :  { %v1303_v2 = vld [vmem:[%s1759_s1] sm:$0xff]   ;;  %1173 = vmatprep.subr.bf16.mxu1 %v1302_v1  ;;  %v1307_v6 = vld [vmem:[%s1759_s1 + $0x8] sm:$0xff]   ;;  %v1311_v10 = vld [vmem:[%s1759_s1 + $0x10] sm:$0xff]  }
   0x4   :  { %v1304_v3 = vld [vmem:[%s1759_s1 + $0x80] sm:$0xff]   ;;  %1110 = vmatpush3.bf16.msra.mxu0 %v1303_v2  ;;  %v1308_v7 = vld [vmem:[%s1759_s1 + $0x88] sm:$0xff]   ;;  %v1312_v11 = vld [vmem:[%s1759_s1 + $0x90] sm:$0xff]  }
   0x5   :  { %1174 = vmatpush3.bf16.msra.mxu1 %v1304_v3  ;;  %1111 = vmatprep.subr.bf16.mxu0 %v1305_v4  ;;  %v1313_v12 = vld [vmem:[%s1759_s1 + $0x58] sm:$0xff]   ;;  %v1317_v16 = vld [vmem:[%s1759_s1 + $0x60] sm:$0xff]   ;;  %v1321_v20 = vld [vmem:[%s1759_s1 + $0x68] sm:$0xff]  }
   0x6   :  { %1175 = vmatprep.subr.bf16.mxu1 %v1306_v5  ;;  %v1314_v13 = vld [vmem:[%s1759_s1 + $0xd8] sm:$0xff]   ;;  %v1318_v17 = vld [vmem:[%s1759_s1 + $0xe0] sm:$0xff]   ;;  %v1322_v21 = vld [vmem:[%s1759_s1 + $0xe8] sm:$0xff]  }
   0x7   :  { %v1315_v14 = vld [vmem:[%s1759_s1 + $0x18] sm:$0xff]   ;;  %v1319_v18 = vld [vmem:[%s1759_s1 + $0x20] sm:$0xff]   ;;  %v1323_v22 = vld [vmem:[%s1759_s1 + $0x28] sm:$0xff]  }
   0x8   :  { %1112 = vmatpush3.bf16.msra.mxu0 %v1307_v6  ;;  %v1316_v15 = vld [vmem:[%s1759_s1 + $0x98] sm:$0xff]   ;;  %v1320_v19 = vld [vmem:[%s1759_s1 + $0xa0] sm:$0xff]   ;;  %v1324_v23 = vld [vmem:[%s1759_s1 + $0xa8] sm:$0xff]  }
   0x9   :  { %1176 = vmatpush3.bf16.msra.mxu1 %v1308_v7  ;;  %1113 = vmatprep.subr.bf16.mxu0 %v1309_v8  ;;  %v1325_v24 = vld [vmem:[%s1759_s1 + $0x70] sm:$0xff]   ;;  %v1329_v28 = vld [vmem:[%s1759_s1 + $0x78] sm:$0xff]   ;;  %v1338_v35 = vld [vmem:[%s1760_s0 + $0xc] ss:$20 sps:$4 sm:$0xff]  }
   0xa   :  { %1177 = vmatprep.subr.bf16.mxu1 %v1310_v9  ;;  %v1326_v25 = vld [vmem:[%s1759_s1 + $0xf0] sm:$0xff]   ;;  %v1330_v29 = vld [vmem:[%s1759_s1 + $0xf8] sm:$0xff]   ;;  %v1339_v36 = vld [vmem:[%s1759_s1 + $0x100] sm:$0xff]   ;;  %756 = vmatprep.mubr.bf16.mxu1 %v1338_v35 }
   0xb   :  { %v1327_v26 = vld [vmem:[%s1759_s1 + $0x30] sm:$0xff]   ;;  %v1331_v30 = vld [vmem:[%s1759_s1 + $0x38] sm:$0xff]   ;;  %v1340_v37 = vld [vmem:[%s1760_s0 + $0x2c] ss:$20 sps:$4 sm:$0xff]  }
   0xc   :  { %1114 = vmatpush3.bf16.msra.mxu0 %v1311_v10  ;;  %v1328_v27 = vld [vmem:[%s1759_s1 + $0xb0] sm:$0xff]   ;;  %v1332_v31 = vld [vmem:[%s1759_s1 + $0xb8] sm:$0xff]   ;;  %v1346_v39 = vld [vmem:[%s1759_s1 + $0x108] sm:$0xff]  }
   0xd   :  { %1178 = vmatpush3.bf16.msra.mxu1 %v1312_v11  ;;  %1115 = vmatprep.subr.bf16.mxu0 %v1313_v12  ;;  %v1333_v32 = vld [vmem:[%s1760_s0] ss:$20 sps:$4 sm:$0xff]   ;;  %v1335_v33 = vld [vmem:[%s1760_s0 + $0x4] ss:$20 sps:$4 sm:$0xff]   ;;  %v1336_v34 = vld [vmem:[%s1760_s0 + $0x8] ss:$20 sps:$4 sm:$0xff]  }
   0xe   :  { %1179 = vmatprep.subr.bf16.mxu1 %v1314_v13  ;;  %659 = vmatprep.mubr.bf16.mxu0 %v1335_v33  ;;  %v1342_v38 = vld [vmem:[%s1760_s0 + $0x34] ss:$20 sps:$4 sm:$0xff]   ;;  %v1345_v41 = vld [vmem:[%s1760_s0 + $0x30] ss:$20 sps:$4 sm:$0xff]   ;;  %v1360_v45 = vld [vmem:[%s1759_s1 + $0x118] sm:$0xff]  }
   0xf   :  { %v1344_v40 = vld [vmem:[%s1760_s0 + $0x28] ss:$20 sps:$4 sm:$0xff]   ;;  %v1353_v44 = vld [vmem:[%s1759_s1 + $0x110] sm:$0xff]   ;;  %v1352_v47 = vld [vmem:[%s1760_s0 + $0x58] ss:$20 sps:$4 sm:$0xff]  }
  0x10   :  { %1116 = vmatpush3.bf16.msra.mxu0 %v1315_v14  ;;  %v1347_v42 = vld [vmem:[%s1760_s0 + $0x54] ss:$20 sps:$4 sm:$0xff]   ;;  %v1349_v43 = vld [vmem:[%s1760_s0 + $0x5c] ss:$20 sps:$4 sm:$0xff]   ;;  %v1356_v49 = vld [vmem:[%s1760_s0 + $0x84] ss:$20 sps:$4 sm:$0xff]  }
  0x11   :  { %1180 = vmatpush3.bf16.msra.mxu1 %v1316_v15  ;;  %1117 = vmatprep.subr.bf16.mxu0 %v1317_v16  ;;  %v1351_v46 = vld [vmem:[%s1760_s0 + $0x50] ss:$20 sps:$4 sm:$0xff]   ;;  %v1374_v51 = vld [vmem:[%s1759_s1 + $0x128] sm:$0xff]   ;;  %v1359_v53 = vld [vmem:[%s1760_s0 + $0x80] ss:$20 sps:$4 sm:$0xff]  }
  0x12   :  { %1181 = vmatprep.subr.bf16.mxu1 %v1318_v17  ;;  %v1354_v48 = vld [vmem:[%s1760_s0 + $0x7c] ss:$20 sps:$4 sm:$0xff]   ;;  %v1367_v50 = vld [vmem:[%s1759_s1 + $0x120] sm:$0xff]   ;;  %v1358_v52 = vld [vmem:[%s1760_s0 + $0x78] ss:$20 sps:$4 sm:$0xff]  }
  0x13   :  { %v1361_v54 = vld [vmem:[%s1760_s0 + $0xa4] ss:$20 sps:$4 sm:$0xff]   ;;  %v1381_v55 = vld [vmem:[%s1759_s1 + $0x130] sm:$0xff]   ;;  %v1363_v56 = vld [vmem:[%s1760_s0 + $0xac] ss:$20 sps:$4 sm:$0xff]  }
  0x14   :  { %1118 = vmatpush3.bf16.msra.mxu0 %v1319_v18  ;;  %v1388_v57 = vld [vmem:[%s1759_s1 + $0x138] sm:$0xff]   ;;  %v1365_v58 = vld [vmem:[%s1760_s0 + $0xa0] ss:$20 sps:$4 sm:$0xff]   ;;  %v1373_v63 = vld [vmem:[%s1760_s0 + $0xd0] ss:$20 sps:$4 sm:$0xff]  }
  0x15   :  { %1182 = vmatpush3.bf16.msra.mxu1 %v1320_v19  ;;  %1119 = vmatprep.subr.bf16.mxu0 %v1321_v20  ;;  %v1366_v59 = vld [vmem:[%s1760_s0 + $0xa8] ss:$20 sps:$4 sm:$0xff]   ;;  %v1368_v60 = vld [vmem:[%s1760_s0 + $0xcc] ss:$20 sps:$4 sm:$0xff]   ;;  %v1379_v2 = vld [vmem:[%s1760_s0 + $0xf0] ss:$20 sps:$4 sm:$0xff]  }
  0x16   :  { %1183 = vmatprep.subr.bf16.mxu1 %v1322_v21  ;;  %v1370_v61 = vld [vmem:[%s1760_s0 + $0xd4] ss:$20 sps:$4 sm:$0xff]   ;;  %v1377_v1 = vld [vmem:[%s1760_s0 + $0xfc] ss:$20 sps:$4 sm:$0xff]   ;;  %v1380_v3 = vld [vmem:[%s1760_s0 + $0xf8] ss:$20 sps:$4 sm:$0xff]  }
  0x17   :  { %v1372_v62 = vld [vmem:[%s1760_s0 + $0xc8] ss:$20 sps:$4 sm:$0xff]   ;;  %v1384_v5 = vld [vmem:[%s1760_s0 + $0x124] ss:$20 sps:$4 sm:$0xff]   ;;  %v1387_v7 = vld [vmem:[%s1760_s0 + $0x120] ss:$20 sps:$4 sm:$0xff]  }
  0x18   :  { %1120 = vmatpush3.bf16.msra.mxu0 %v1323_v22  ;;  %v1375_v0 = vld [vmem:[%s1760_s0 + $0xf4] ss:$20 sps:$4 sm:$0xff]   ;;  %v1382_v4 = vld [vmem:[%s1760_s0 + $0x11c] ss:$20 sps:$4 sm:$0xff]   ;;  %v1386_v6 = vld [vmem:[%s1760_s0 + $0x118] ss:$20 sps:$4 sm:$0xff]  }
  0x19   :  { %1184 = vmatpush3.bf16.msra.mxu1 %v1324_v23  ;;  %1121 = vmatprep.subr.bf16.mxu0 %v1325_v24  ;;  %v1389_v8 = vld [vmem:[%s1760_s0 + $0x10] ss:$20 sps:$4 sm:$0xff]   ;;  %v1391_v10 = vld [vmem:[%s1760_s0 + $0x38] ss:$20 sps:$4 sm:$0xff]   ;;  %v1393_v12 = vld [vmem:[%s1760_s0 + $0x60] ss:$20 sps:$4 sm:$0xff]  }
  0x1a   :  { %1185 = vmatprep.subr.bf16.mxu1 %v1326_v25  ;;  %v1390_v9 = vld [vmem:[%s1760_s0 + $0xb0] ss:$20 sps:$4 sm:$0xff]   ;;  %v1392_v11 = vld [vmem:[%s1760_s0 + $0xd8] ss:$20 sps:$4 sm:$0xff]   ;;  %v1394_v13 = vld [vmem:[%s1760_s0 + $0x100] ss:$20 sps:$4 sm:$0xff]  }
  0x1b   :  { %v1395_v14 = vld [vmem:[%s1760_s0 + $0x88] ss:$20 sps:$4 sm:$0xff]  }
  0x1c   :  { %1122 = vmatpush3.bf16.msra.mxu0 %v1327_v26  ;;  %v1396_v15 = vld [vmem:[%s1760_s0 + $0x128] ss:$20 sps:$4 sm:$0xff]  }
  0x1d   :  { %1186 = vmatpush3.bf16.msra.mxu1 %v1328_v27  ;;  %1123 = vmatprep.subr.bf16.mxu0 %v1329_v28 }
  0x1e   :  { %1187 = vmatprep.subr.bf16.mxu1 %v1330_v29 }
  0x20   :  { %1124 = vmatpush3.bf16.msra.mxu0 %v1331_v30 }
  0x21   :  { %1188 = vmatpush3.bf16.msra.mxu1 %v1332_v31  ;;  %1253 = vmatprep.subr.bf16.mxu0 %v1339_v36 }
  0x22   :  { %1285 = vmatprep.subr.bf16.mxu1 %v1339_v36 }
  0x23   :  { %660 = vmatmul.mubr.bf16.vlgmr.msra.gmra.mrb[0].mxu0 %v1333_v32 }
  0x24   :  { %757 = vmatmul.mubr.bf16.vlgmr.msra.gmra.mrb[0].mxu1 %v1336_v34  ;;  %1254 = vmatpush3.bf16.msra.mxu0 %v1339_v36 }
  0x25   :  { %1293 = vmatpush3.bf16.msra.mxu1 %v1339_v36  ;;  %667 = vmatprep.mubr.bf16.mxu0 %v1340_v37 }
  0x26   :  { %764 = vmatprep.mubr.bf16.mxu1 %v1342_v38  ;;  %1255 = vmatprep.subr.bf16.mxu0 %v1346_v39 }
  0x27   :  { %1286 = vmatprep.subr.bf16.mxu1 %v1346_v39 }
  0x28   :  { %1256 = vmatpush3.bf16.msra.mxu0 %v1346_v39 }
  0x29   :  { %1294 = vmatpush3.bf16.msra.mxu1 %v1346_v39  ;;  %1257 = vmatprep.subr.bf16.mxu0 %v1353_v44 }
  0x2a   :  { %1287 = vmatprep.subr.bf16.mxu1 %v1353_v44 }
  0x2b   :  { %668 = vmatmul.mubr.bf16.gmra.mrb[4].mxu0 %v1344_v40 }
  0x2c   :  { %765 = vmatmul.mubr.bf16.gmra.mrb[4].mxu1 %v1345_v41  ;;  %675 = vmatprep.mubr.bf16.mxu0 %v1347_v42 }
  0x2d   :  { %772 = vmatprep.mubr.bf16.mxu1 %v1349_v43  ;;  %1258 = vmatpush3.bf16.msra.mxu0 %v1353_v44 }
  0x2e   :  { %1295 = vmatpush3.bf16.msra.mxu1 %v1353_v44  ;;  %1259 = vmatprep.subr.bf16.mxu0 %v1360_v45 }
  0x2f   :  { %1288 = vmatprep.subr.bf16.mxu1 %v1360_v45 }
  0x31   :  { %1260 = vmatpush3.bf16.msra.mxu0 %v1360_v45 }
  0x32   :  { %1296 = vmatpush3.bf16.msra.mxu1 %v1360_v45  ;;  %1261 = vmatprep.subr.bf16.mxu0 %v1367_v50 }
  0x33   :  { %676 = vmatmul.mubr.bf16.gmra.mrb[8].mxu0 %v1351_v46  ;;  %1289 = vmatprep.subr.bf16.mxu1 %v1367_v50 }
  0x34   :  { %773 = vmatmul.mubr.bf16.gmra.mrb[8].mxu1 %v1352_v47  ;;  %683 = vmatprep.mubr.bf16.mxu0 %v1354_v48 }
  0x35   :  { %780 = vmatprep.mubr.bf16.mxu1 %v1356_v49  ;;  %1262 = vmatpush3.bf16.msra.mxu0 %v1367_v50 }
  0x36   :  { %1297 = vmatpush3.bf16.msra.mxu1 %v1367_v50  ;;  %1263 = vmatprep.subr.bf16.mxu0 %v1374_v51 }
  0x37   :  { %1290 = vmatprep.subr.bf16.mxu1 %v1374_v51 }
  0x39   :  { %1264 = vmatpush3.bf16.msra.mxu0 %v1374_v51 }
  0x3a   :  { %1298 = vmatpush3.bf16.msra.mxu1 %v1374_v51  ;;  %1265 = vmatprep.subr.bf16.mxu0 %v1381_v55 }
  0x3b   :  { %684 = vmatmul.mubr.bf16.gmra.mrb[12].mxu0 %v1358_v52  ;;  %1291 = vmatprep.subr.bf16.mxu1 %v1381_v55 }
  0x3c   :  { %781 = vmatmul.mubr.bf16.gmra.mrb[12].mxu1 %v1359_v53  ;;  %691 = vmatprep.mubr.bf16.mxu0 %v1361_v54 }
  0x3d   :  { %788 = vmatprep.mubr.bf16.mxu1 %v1363_v56  ;;  %1266 = vmatpush3.bf16.msra.mxu0 %v1381_v55 }
  0x3e   :  { %1299 = vmatpush3.bf16.msra.mxu1 %v1381_v55  ;;  %1267 = vmatprep.subr.bf16.mxu0 %v1388_v57 }
  0x3f   :  { %1292 = vmatprep.subr.bf16.mxu1 %v1388_v57 }
  0x41   :  { %1268 = vmatpush3.bf16.msra.mxu0 %v1388_v57 }
  0x42   :  { %1300 = vmatpush3.bf16.msra.mxu1 %v1388_v57 }
  0x43   :  { %692 = vmatmul.mubr.bf16.gmra.mrb[16].mxu0 %v1365_v58 }
  0x44   :  { %789 = vmatmul.mubr.bf16.gmra.mrb[16].mxu1 %v1366_v59  ;;  %699 = vmatprep.mubr.bf16.mxu0 %v1368_v60 }
  0x45   :  { %796 = vmatprep.mubr.bf16.mxu1 %v1370_v61 }
  0x4b   :  { %700 = vmatmul.mubr.bf16.gmra.mrb[20].mxu0 %v1372_v62 }
  0x4c   :  { %797 = vmatmul.mubr.bf16.gmra.mrb[20].mxu1 %v1373_v63  ;;  %707 = vmatprep.mubr.bf16.mxu0 %v1375_v0 }
  0x4d   :  { %804 = vmatprep.mubr.bf16.mxu1 %v1377_v1 }
  0x53   :  { %708 = vmatmul.mubr.bf16.gmra.mrb[24].mxu0 %v1379_v2 }
  0x54   :  { %805 = vmatmul.mubr.bf16.gmra.mrb[24].mxu1 %v1380_v3  ;;  %715 = vmatprep.mubr.bf16.mxu0 %v1382_v4 }
  0x55   :  { %812 = vmatprep.mubr.bf16.mxu1 %v1384_v5 }
  0x5b   :  { %716 = vmatmul.mubr.bf16.gmra.mrb[28].mxu0 %v1386_v6 }
  0x5c   :  { %813 = vmatmul.mubr.bf16.gmra.mrb[28].mxu1 %v1387_v7  ;;  %1269 = vmatprep.mubr.bf16.mxu0 %v1389_v8 }
  0x5d   :  { %1277 = vmatprep.mubr.bf16.mxu1 %v1390_v9 }
  0x63   :  { %1270 = vmatmul.mubr.bf16.vlgmr.msra.gmra.mrb[32].mxu0 %v1391_v10 }
  0x64   :  { %1278 = vmatmul.mubr.bf16.vlgmr.msra.gmra.mrb[32].mxu1 %v1392_v11  ;;  %1273 = vmatprep.mubr.bf16.mxu0 %v1393_v12 }
  0x65   :  { %1281 = vmatprep.mubr.bf16.mxu1 %v1394_v13 }
  0x6b   :  { %1274 = vmatmul.mubr.bf16.gmra.mrb[36].mxu0 %v1395_v14 }
  0x6c   :  { %1282 = vmatmul.mubr.bf16.gmra.mrb[36].mxu1 %v1396_v15 }
  0xf6   :  { %v1125_v16 = vpop.f32.mrb[0].mxu0 }
  0xf7   :  { %v1189_v17 = vpop.f32.mrb[0].mxu1  ;;  %v1126_v18 = vpop.f32.mrb[1].mxu0 }
  0xf8   :  { %v1127_v19 = vadd.f32 %v1126_v18, %v1125_v16  ;;  %v1190_v20 = vpop.f32.mrb[1].mxu1  ;;  %v1128_v21 = vpop.f32.mrb[2].mxu0 }
  0xf9   :  { %v1191_v22 = vadd.f32 %v1190_v20, %v1189_v17  ;;  %v1192_v23 = vpop.f32.mrb[2].mxu1  ;;  %v1129_v24 = vpop.f32.mrb[3].mxu0 }
  0xfa   :  { %v1130_v25 = vadd.f32 %v1129_v24, %v1128_v21  ;;  %v1193_v26 = vpop.f32.mrb[3].mxu1 }
  0xfb   :  { %v1194_v27 = vadd.f32 %v1193_v26, %v1192_v23  ;;  %v1657_v28 = vadd.f32 %v1191_v22, %v1127_v19 }
  0xfd   :  { %v1659_v29 = vadd.f32 %v1194_v27, %v1130_v25 }
  0xfe   :  { %v1131_v30 = vpop.f32.mrb[4].mxu0 }
  0xff   :  { %v1195_v31 = vpop.f32.mrb[4].mxu1  ;;  %v1132_v32 = vpop.f32.mrb[5].mxu0 }
 0x100   :  { %v1133_v33 = vadd.f32 %v1132_v32, %v1131_v30  ;;  %v1196_v34 = vpop.f32.mrb[5].mxu1  ;;  %v1134_v35 = vpop.f32.mrb[6].mxu0 }
 0x101   :  { %v1197_v36 = vadd.f32 %v1196_v34, %v1195_v31  ;;  %v1198_v37 = vpop.f32.mrb[6].mxu1  ;;  %v1135_v38 = vpop.f32.mrb[7].mxu0 }
 0x102   :  { %v1136_v39 = vadd.f32 %v1135_v38, %v1134_v35  ;;  %v1199_v40 = vpop.f32.mrb[7].mxu1 }
 0x103   :  { %v1200_v41 = vadd.f32 %v1199_v40, %v1198_v37  ;;  %v1661_v42 = vadd.f32 %v1197_v36, %v1133_v33 }
 0x105   :  { %v1663_v43 = vadd.f32 %v1200_v41, %v1136_v39 }
 0x106   :  { %v1137_v44 = vpop.f32.mrb[8].mxu0 }
 0x107   :  { %v1201_v45 = vpop.f32.mrb[8].mxu1  ;;  %v1138_v46 = vpop.f32.mrb[9].mxu0 }
 0x108   :  { %v1139_v47 = vadd.f32 %v1138_v46, %v1137_v44  ;;  %v1202_v48 = vpop.f32.mrb[9].mxu1  ;;  %v1140_v49 = vpop.f32.mrb[10].mxu0 }
 0x109   :  { %v1203_v50 = vadd.f32 %v1202_v48, %v1201_v45  ;;  %v1204_v51 = vpop.f32.mrb[10].mxu1  ;;  %v1141_v52 = vpop.f32.mrb[11].mxu0 }
 0x10a   :  { %v1142_v53 = vadd.f32 %v1141_v52, %v1140_v49  ;;  %v1205_v54 = vpop.f32.mrb[11].mxu1 }
 0x10b   :  { %v1206_v55 = vadd.f32 %v1205_v54, %v1204_v51  ;;  %v1665_v56 = vadd.f32 %v1203_v50, %v1139_v47 }
 0x10d   :  { %v1667_v57 = vadd.f32 %v1206_v55, %v1142_v53 }
 0x10e   :  { %v1143_v58 = vpop.f32.mrb[12].mxu0 }
 0x10f   :  { %v1207_v59 = vpop.f32.mrb[12].mxu1  ;;  %v1144_v60 = vpop.f32.mrb[13].mxu0 }
 0x110   :  { %v1145_v61 = vadd.f32 %v1144_v60, %v1143_v58  ;;  %v1208_v62 = vpop.f32.mrb[13].mxu1  ;;  %v1146_v63 = vpop.f32.mrb[14].mxu0 }
 0x111   :  { %v1209_v0 = vadd.f32 %v1208_v62, %v1207_v59  ;;  %v1210_v1 = vpop.f32.mrb[14].mxu1  ;;  %v1147_v2 = vpop.f32.mrb[15].mxu0 }
 0x112   :  { %v1148_v3 = vadd.f32 %v1147_v2, %v1146_v63  ;;  %v1211_v4 = vpop.f32.mrb[15].mxu1 }
 0x113   :  { %v1212_v5 = vadd.f32 %v1211_v4, %v1210_v1  ;;  %v1669_v6 = vadd.f32 %v1209_v0, %v1145_v61 }
 0x115   :  { %v1671_v7 = vadd.f32 %v1212_v5, %v1148_v3 }
 0x116   :  { %v1149_v8 = vpop.f32.mrb[16].mxu0 }
 0x117   :  { %v1213_v9 = vpop.f32.mrb[16].mxu1  ;;  %v1150_v10 = vpop.f32.mrb[17].mxu0 }
 0x118   :  { %v1151_v11 = vadd.f32 %v1150_v10, %v1149_v8  ;;  %v1214_v12 = vpop.f32.mrb[17].mxu1  ;;  %v1152_v13 = vpop.f32.mrb[18].mxu0 }
 0x119   :  { %v1215_v14 = vadd.f32 %v1214_v12, %v1213_v9  ;;  %v1216_v15 = vpop.f32.mrb[18].mxu1  ;;  %v1153_v16 = vpop.f32.mrb[19].mxu0  ;;  %v1682_v9 = vld [vmem:[%s1761_s2] ss:$0 sm:$0xff] }
 0x11a   :  { %v1154_v17 = vadd.f32 %v1153_v16, %v1152_v13  ;;  %v1217_v18 = vpop.f32.mrb[19].mxu1 }
 0x11b   :  { %v1218_v19 = vadd.f32 %v1217_v18, %v1216_v15  ;;  %v791_v20 = vadd.f32 %v1215_v14, %v1151_v11 }
 0x11d   :  { %v1673_v21 = vadd.f32 %v1218_v19, %v1154_v17 }
 0x11e   :  { %v1155_v22 = vpop.f32.mrb[20].mxu0 }
 0x11f   :  { %v1219_v23 = vpop.f32.mrb[20].mxu1  ;;  %v1156_v24 = vpop.f32.mrb[21].mxu0 }
 0x120   :  { %v1157_v25 = vadd.f32 %v1156_v24, %v1155_v22  ;;  %v1220_v26 = vpop.f32.mrb[21].mxu1  ;;  %v1158_v27 = vpop.f32.mrb[22].mxu0 }
 0x121   :  { %v1221_v30 = vadd.f32 %v1220_v26, %v1219_v23  ;;  %v1222_v31 = vpop.f32.mrb[22].mxu1  ;;  %v1159_v32 = vpop.f32.mrb[23].mxu0 }
 0x122   :  { %v1160_v33 = vadd.f32 %v1159_v32, %v1158_v27  ;;  %v1223_v34 = vpop.f32.mrb[23].mxu1 }
 0x123   :  { %v1224_v35 = vadd.f32 %v1223_v34, %v1222_v31  ;;  %v799_v36 = vadd.f32 %v1221_v30, %v1157_v25 }
 0x125   :  { %v802_v37 = vadd.f32 %v1224_v35, %v1160_v33 }
 0x126   :  { %v1161_v38 = vpop.f32.mrb[24].mxu0 }
 0x127   :  { %v1225_v39 = vpop.f32.mrb[24].mxu1  ;;  %v1162_v40 = vpop.f32.mrb[25].mxu0 }
 0x128   :  { %v1163_v41 = vadd.f32 %v1162_v40, %v1161_v38  ;;  %v1226_v44 = vpop.f32.mrb[25].mxu1  ;;  %v1164_v45 = vpop.f32.mrb[26].mxu0 }
 0x129   :  { %v1227_v46 = vadd.f32 %v1226_v44, %v1225_v39  ;;  %v1228_v47 = vpop.f32.mrb[26].mxu1  ;;  %v1165_v48 = vpop.f32.mrb[27].mxu0 }
 0x12a   :  { %v1166_v49 = vadd.f32 %v1165_v48, %v1164_v45  ;;  %v1229_v50 = vpop.f32.mrb[27].mxu1 }
 0x12b   :  { %v1230_v51 = vadd.f32 %v1229_v50, %v1228_v47  ;;  %v1675_v52 = vadd.f32 %v1227_v46, %v1163_v41 }
 0x12d   :  { %v1677_v53 = vadd.f32 %v1230_v51, %v1166_v49 }
 0x12e   :  { %v1167_v54 = vpop.f32.mrb[28].mxu0 }
 0x12f   :  { %v1231_v55 = vpop.f32.mrb[28].mxu1  ;;  %v1168_v58 = vpop.f32.mrb[29].mxu0 }
 0x130   :  { %v1169_v59 = vadd.f32 %v1168_v58, %v1167_v54  ;;  %v1232_v60 = vpop.f32.mrb[29].mxu1  ;;  %v1170_v61 = vpop.f32.mrb[30].mxu0 }
 0x131   :  { %v1233_v62 = vadd.f32 %v1232_v60, %v1231_v55  ;;  %v1234_v63 = vpop.f32.mrb[30].mxu1  ;;  %v1171_v0 = vpop.f32.mrb[31].mxu0 }
 0x132   :  { %v1172_v1 = vadd.f32 %v1171_v0, %v1170_v61  ;;  %v1235_v2 = vpop.f32.mrb[31].mxu1 }
 0x133   :  { %v1236_v3 = vadd.f32 %v1235_v2, %v1234_v63  ;;  %v815_v4 = vadd.f32 %v1233_v62, %v1169_v59 }
 0x135   :  { %v818_v5 = vadd.f32 %v1236_v3, %v1172_v1 }
 0x136   :  { %v1271_v8 = vpop.f32.mrb[32].mxu0 }
 0x137   :  { %v864_v10 = vadd.f32 %v1271_v8, %v1661_v42  ;;  %v1279_v11 = vpop.f32.mrb[32].mxu1  ;;  %v855_v12 = vpop.f32.mrb[33].mxu0 }
 0x138   :  { %v896_v13 = vadd.f32 %v1279_v11, %v799_v36  ;;  %v856_v14 = vadd.f32 %v855_v12, %v1657_v28  ;;  %v887_v15 = vpop.f32.mrb[33].mxu1  ;;  %v1272_v16 = vpop.f32.mrb[34].mxu0 }
 0x139   :  { %v978_v17 = vadd.f32 %v1682_v9, %v864_v10  ;;  %v888_v18 = vadd.f32 %v887_v15, %v791_v20  ;;  %v867_v19 = vadd.f32 %v1272_v16, %v1663_v43  ;;  %v1280_v22 = vpop.f32.mrb[34].mxu1  ;;  %v858_v23 = vpop.f32.mrb[35].mxu0 }
 0x13a   :  { %v986_v24 = vadd.f32 %v1682_v9, %v896_v13  ;;  %v976_v25 = vadd.f32 %v1682_v9, %v856_v14  ;;  %v899_v26 = vadd.f32 %v1280_v22, %v802_v37  ;;  %v859_v42 = vadd.f32 %v858_v23, %v1659_v29  ;;  %v890_v27 = vpop.f32.mrb[35].mxu1 }
 0x13b   :  { %v994_v30 = vmax.f32 %v978_v17, 0.0  ;;  %v984_v28 = vadd.f32 %v1682_v9, %v888_v18  ;;  %v979_v31 = vadd.f32 %v1682_v9, %v867_v19  ;;  %v891_v32 = vadd.f32 %v890_v27, %v1673_v21 }
 0x13c   :  { %v1002_v20 = vmax.f32 %v986_v24, 0.0  ;;  %v992_v33 = vmax.f32 %v976_v25, 0.0  ;;  %v987_v43 = vadd.f32 %v1682_v9, %v899_v26  ;;  %v977_v34 = vadd.f32 %v1682_v9, %v859_v42 }
 0x13d   :  { %1010 = vst [vmem:[%s1762_s3 + $0x10] sm:$0xff] %v994_v30  ;;  %v1000_v35 = vmax.f32 %v984_v28, 0.0  ;;  %v995_v29 = vmax.f32 %v979_v31, 0.0  ;;  %v985_v36 = vadd.f32 %v1682_v9, %v891_v32 }
 0x13e   :  { %1018 = vst [vmem:[%s1762_s3 + $0x50] sm:$0xff] %v1002_v20  ;;  %1008 = vst [vmem:[%s1762_s3] sm:$0xff] %v992_v33  ;;  %v1003_v21 = vmax.f32 %v987_v43, 0.0  ;;  %v993_v37 = vmax.f32 %v977_v34, 0.0  ;;  %v1275_v38 = vpop.f32.mrb[36].mxu0 }
 0x13f   :  { %1016 = vst [vmem:[%s1762_s3 + $0x40] sm:$0xff] %v1000_v35  ;;  %1011 = vst [vmem:[%s1762_s3 + $0x18] sm:$0xff] %v995_v29  ;;  %v1001_v39 = vmax.f32 %v985_v36, 0.0  ;;  %v880_v40 = vadd.f32 %v1275_v38, %v1669_v6  ;;  %v1283_v41 = vpop.f32.mrb[36].mxu1  ;;  %v871_v44 = vpop.f32.mrb[37].mxu0 }
 0x140   :  { %1019 = vst [vmem:[%s1762_s3 + $0x58] sm:$0xff] %v1003_v21  ;;  %1009 = vst [vmem:[%s1762_s3 + $0x8] sm:$0xff] %v993_v37  ;;  %v912_v45 = vadd.f32 %v1283_v41, %v815_v4  ;;  %v872_v46 = vadd.f32 %v871_v44, %v1665_v56  ;;  %v903_v47 = vpop.f32.mrb[37].mxu1  ;;  %v1276_v48 = vpop.f32.mrb[38].mxu0 }
 0x141   :  { %1017 = vst [vmem:[%s1762_s3 + $0x48] sm:$0xff] %v1001_v39  ;;  %v982_v6 = vadd.f32 %v1682_v9, %v880_v40  ;;  %v904_v49 = vadd.f32 %v903_v47, %v1675_v52  ;;  %v883_v50 = vadd.f32 %v1276_v48, %v1671_v7  ;;  %v1284_v51 = vpop.f32.mrb[38].mxu1  ;;  %v874_v54 = vpop.f32.mrb[39].mxu0 }
 0x142   :  { %v990_v55 = vadd.f32 %v1682_v9, %v912_v45  ;;  %v980_v58 = vadd.f32 %v1682_v9, %v872_v46  ;;  %v915_v59 = vadd.f32 %v1284_v51, %v818_v5  ;;  %v875_v56 = vadd.f32 %v874_v54, %v1667_v57  ;;  %v906_v60 = vpop.f32.mrb[39].mxu1 }
 0x143   :  { %v998_v61 = vmax.f32 %v982_v6, 0.0  ;;  %v988_v62 = vadd.f32 %v1682_v9, %v904_v49  ;;  %v983_v63 = vadd.f32 %v1682_v9, %v883_v50  ;;  %v907_v0 = vadd.f32 %v906_v60, %v1677_v53 }
 0x144   :  { %v1006_v52 = vmax.f32 %v990_v55, 0.0  ;;  %v996_v1 = vmax.f32 %v980_v58, 0.0  ;;  %v991_v7 = vadd.f32 %v1682_v9, %v915_v59  ;;  %v981_v2 = vadd.f32 %v1682_v9, %v875_v56 }
 0x145   :  { %1014 = vst [vmem:[%s1762_s3 + $0x30] sm:$0xff] %v998_v61  ;;  %v1004_v3 = vmax.f32 %v988_v62, 0.0  ;;  %v999_v57 = vmax.f32 %v983_v63, 0.0  ;;  %v989_v4 = vadd.f32 %v1682_v9, %v907_v0 }
 0x146   :  { %1022 = vst [vmem:[%s1762_s3 + $0x70] sm:$0xff] %v1006_v52  ;;  %1012 = vst [vmem:[%s1762_s3 + $0x20] sm:$0xff] %v996_v1  ;;  %v1007_v53 = vmax.f32 %v991_v7, 0.0  ;;  %v997_v5 = vmax.f32 %v981_v2, 0.0 }
 0x147   :  { %1020 = vst [vmem:[%s1762_s3 + $0x60] sm:$0xff] %v1004_v3  ;;  %1015 = vst [vmem:[%s1762_s3 + $0x38] sm:$0xff] %v999_v57  ;;  %v1005_v8 = vmax.f32 %v989_v4, 0.0 }
 0x148   :  { %1023 = vst [vmem:[%s1762_s3 + $0x78] sm:$0xff] %v1007_v53  ;;  %1013 = vst [vmem:[%s1762_s3 + $0x28] sm:$0xff] %v997_v5 }
 0x149   :  { %1021 = vst [vmem:[%s1762_s3 + $0x68] sm:$0xff] %v1005_v8 }

// kernel: resnet_triplet_forward.17
= control target key start
LH: loop header
LB: loop body
LE: loop exit
PB: predicated region body
PF: predicated region fallthrough
CT: control target
= control target key end

     0   :  { %s1850_s1 = inlined_call_operand.vmem [shape: bf16[640,128], index: 1, kind: input, shape index: {}]   ;;  %s1851_s0 = inlined_call_operand.vmem [shape: bf16[128,640], index: 0, kind: input, shape index: {}]   ;;  %s1852_s2 = inlined_call_operand.vmem [shape: f32[1,128], index: 2, kind: input, shape index: {}]   ;;  %s1853_s3 = inlined_call_operand.vmem [shape: f32[128,128], index: 3, kind: input, shape index: {}]   ;;  %s1854_s4 = inlined_call_operand.vmem [shape: f32[128,128], index: 4, kind: output, shape index: {}]  }
   0x1   :  { %v1336_v0 = vld [vmem:[%s1850_s1 + $0x40] sm:$0xff]   ;;  %v1340_v4 = vld [vmem:[%s1850_s1 + $0x48] sm:$0xff]   ;;  %v1344_v8 = vld [vmem:[%s1850_s1 + $0x50] sm:$0xff]  }
   0x2   :  { %v1337_v1 = vld [vmem:[%s1850_s1 + $0xc0] sm:$0xff]   ;;  %1144 = vmatprep.subr.bf16.mxu0 %v1336_v0  ;;  %v1341_v5 = vld [vmem:[%s1850_s1 + $0xc8] sm:$0xff]   ;;  %v1345_v9 = vld [vmem:[%s1850_s1 + $0xd0] sm:$0xff]  }
   0x3   :  { %v1338_v2 = vld [vmem:[%s1850_s1] sm:$0xff]   ;;  %1208 = vmatprep.subr.bf16.mxu1 %v1337_v1  ;;  %v1342_v6 = vld [vmem:[%s1850_s1 + $0x8] sm:$0xff]   ;;  %v1346_v10 = vld [vmem:[%s1850_s1 + $0x10] sm:$0xff]  }
   0x4   :  { %v1339_v3 = vld [vmem:[%s1850_s1 + $0x80] sm:$0xff]   ;;  %1145 = vmatpush3.bf16.msra.mxu0 %v1338_v2  ;;  %v1343_v7 = vld [vmem:[%s1850_s1 + $0x88] sm:$0xff]   ;;  %v1347_v11 = vld [vmem:[%s1850_s1 + $0x90] sm:$0xff]  }
   0x5   :  { %1209 = vmatpush3.bf16.msra.mxu1 %v1339_v3  ;;  %1146 = vmatprep.subr.bf16.mxu0 %v1340_v4  ;;  %v1348_v12 = vld [vmem:[%s1850_s1 + $0x58] sm:$0xff]   ;;  %v1352_v16 = vld [vmem:[%s1850_s1 + $0x60] sm:$0xff]   ;;  %v1356_v20 = vld [vmem:[%s1850_s1 + $0x68] sm:$0xff]  }
   0x6   :  { %1210 = vmatprep.subr.bf16.mxu1 %v1341_v5  ;;  %v1349_v13 = vld [vmem:[%s1850_s1 + $0xd8] sm:$0xff]   ;;  %v1353_v17 = vld [vmem:[%s1850_s1 + $0xe0] sm:$0xff]   ;;  %v1357_v21 = vld [vmem:[%s1850_s1 + $0xe8] sm:$0xff]  }
   0x7   :  { %v1350_v14 = vld [vmem:[%s1850_s1 + $0x18] sm:$0xff]   ;;  %v1354_v18 = vld [vmem:[%s1850_s1 + $0x20] sm:$0xff]   ;;  %v1358_v22 = vld [vmem:[%s1850_s1 + $0x28] sm:$0xff]  }
   0x8   :  { %1147 = vmatpush3.bf16.msra.mxu0 %v1342_v6  ;;  %v1351_v15 = vld [vmem:[%s1850_s1 + $0x98] sm:$0xff]   ;;  %v1355_v19 = vld [vmem:[%s1850_s1 + $0xa0] sm:$0xff]   ;;  %v1359_v23 = vld [vmem:[%s1850_s1 + $0xa8] sm:$0xff]  }
   0x9   :  { %1211 = vmatpush3.bf16.msra.mxu1 %v1343_v7  ;;  %1148 = vmatprep.subr.bf16.mxu0 %v1344_v8  ;;  %v1360_v24 = vld [vmem:[%s1850_s1 + $0x70] sm:$0xff]   ;;  %v1364_v28 = vld [vmem:[%s1850_s1 + $0x78] sm:$0xff]   ;;  %v1373_v35 = vld [vmem:[%s1851_s0 + $0xc] ss:$20 sps:$4 sm:$0xff]  }
   0xa   :  { %1212 = vmatprep.subr.bf16.mxu1 %v1345_v9  ;;  %v1361_v25 = vld [vmem:[%s1850_s1 + $0xf0] sm:$0xff]   ;;  %v1365_v29 = vld [vmem:[%s1850_s1 + $0xf8] sm:$0xff]   ;;  %v1374_v36 = vld [vmem:[%s1850_s1 + $0x100] sm:$0xff]   ;;  %759 = vmatprep.mubr.bf16.mxu1 %v1373_v35 }
   0xb   :  { %v1362_v26 = vld [vmem:[%s1850_s1 + $0x30] sm:$0xff]   ;;  %v1366_v30 = vld [vmem:[%s1850_s1 + $0x38] sm:$0xff]   ;;  %v1375_v37 = vld [vmem:[%s1851_s0 + $0x2c] ss:$20 sps:$4 sm:$0xff]  }
   0xc   :  { %1149 = vmatpush3.bf16.msra.mxu0 %v1346_v10  ;;  %v1363_v27 = vld [vmem:[%s1850_s1 + $0xb0] sm:$0xff]   ;;  %v1367_v31 = vld [vmem:[%s1850_s1 + $0xb8] sm:$0xff]   ;;  %v1381_v39 = vld [vmem:[%s1850_s1 + $0x108] sm:$0xff]  }
   0xd   :  { %1213 = vmatpush3.bf16.msra.mxu1 %v1347_v11  ;;  %1150 = vmatprep.subr.bf16.mxu0 %v1348_v12  ;;  %v1368_v32 = vld [vmem:[%s1851_s0] ss:$20 sps:$4 sm:$0xff]   ;;  %v1370_v33 = vld [vmem:[%s1851_s0 + $0x4] ss:$20 sps:$4 sm:$0xff]   ;;  %v1371_v34 = vld [vmem:[%s1851_s0 + $0x8] ss:$20 sps:$4 sm:$0xff]  }
   0xe   :  { %1214 = vmatprep.subr.bf16.mxu1 %v1349_v13  ;;  %662 = vmatprep.mubr.bf16.mxu0 %v1370_v33  ;;  %v1377_v38 = vld [vmem:[%s1851_s0 + $0x34] ss:$20 sps:$4 sm:$0xff]   ;;  %v1380_v41 = vld [vmem:[%s1851_s0 + $0x30] ss:$20 sps:$4 sm:$0xff]   ;;  %v1395_v45 = vld [vmem:[%s1850_s1 + $0x118] sm:$0xff]  }
   0xf   :  { %v1379_v40 = vld [vmem:[%s1851_s0 + $0x28] ss:$20 sps:$4 sm:$0xff]   ;;  %v1388_v44 = vld [vmem:[%s1850_s1 + $0x110] sm:$0xff]   ;;  %v1387_v47 = vld [vmem:[%s1851_s0 + $0x58] ss:$20 sps:$4 sm:$0xff]  }
  0x10   :  { %1151 = vmatpush3.bf16.msra.mxu0 %v1350_v14  ;;  %v1382_v42 = vld [vmem:[%s1851_s0 + $0x54] ss:$20 sps:$4 sm:$0xff]   ;;  %v1384_v43 = vld [vmem:[%s1851_s0 + $0x5c] ss:$20 sps:$4 sm:$0xff]   ;;  %v1391_v49 = vld [vmem:[%s1851_s0 + $0x84] ss:$20 sps:$4 sm:$0xff]  }
  0x11   :  { %1215 = vmatpush3.bf16.msra.mxu1 %v1351_v15  ;;  %1152 = vmatprep.subr.bf16.mxu0 %v1352_v16  ;;  %v1386_v46 = vld [vmem:[%s1851_s0 + $0x50] ss:$20 sps:$4 sm:$0xff]   ;;  %v1409_v51 = vld [vmem:[%s1850_s1 + $0x128] sm:$0xff]   ;;  %v1394_v53 = vld [vmem:[%s1851_s0 + $0x80] ss:$20 sps:$4 sm:$0xff]  }
  0x12   :  { %1216 = vmatprep.subr.bf16.mxu1 %v1353_v17  ;;  %v1389_v48 = vld [vmem:[%s1851_s0 + $0x7c] ss:$20 sps:$4 sm:$0xff]   ;;  %v1402_v50 = vld [vmem:[%s1850_s1 + $0x120] sm:$0xff]   ;;  %v1393_v52 = vld [vmem:[%s1851_s0 + $0x78] ss:$20 sps:$4 sm:$0xff]  }
  0x13   :  { %v1396_v54 = vld [vmem:[%s1851_s0 + $0xa4] ss:$20 sps:$4 sm:$0xff]   ;;  %v1416_v55 = vld [vmem:[%s1850_s1 + $0x130] sm:$0xff]   ;;  %v1398_v56 = vld [vmem:[%s1851_s0 + $0xac] ss:$20 sps:$4 sm:$0xff]  }
  0x14   :  { %1153 = vmatpush3.bf16.msra.mxu0 %v1354_v18  ;;  %v1423_v57 = vld [vmem:[%s1850_s1 + $0x138] sm:$0xff]   ;;  %v1400_v58 = vld [vmem:[%s1851_s0 + $0xa0] ss:$20 sps:$4 sm:$0xff]   ;;  %v1408_v63 = vld [vmem:[%s1851_s0 + $0xd0] ss:$20 sps:$4 sm:$0xff]  }
  0x15   :  { %1217 = vmatpush3.bf16.msra.mxu1 %v1355_v19  ;;  %1154 = vmatprep.subr.bf16.mxu0 %v1356_v20  ;;  %v1401_v59 = vld [vmem:[%s1851_s0 + $0xa8] ss:$20 sps:$4 sm:$0xff]   ;;  %v1403_v60 = vld [vmem:[%s1851_s0 + $0xcc] ss:$20 sps:$4 sm:$0xff]   ;;  %v1414_v2 = vld [vmem:[%s1851_s0 + $0xf0] ss:$20 sps:$4 sm:$0xff]  }
  0x16   :  { %1218 = vmatprep.subr.bf16.mxu1 %v1357_v21  ;;  %v1405_v61 = vld [vmem:[%s1851_s0 + $0xd4] ss:$20 sps:$4 sm:$0xff]   ;;  %v1412_v1 = vld [vmem:[%s1851_s0 + $0xfc] ss:$20 sps:$4 sm:$0xff]   ;;  %v1415_v3 = vld [vmem:[%s1851_s0 + $0xf8] ss:$20 sps:$4 sm:$0xff]  }
  0x17   :  { %v1407_v62 = vld [vmem:[%s1851_s0 + $0xc8] ss:$20 sps:$4 sm:$0xff]   ;;  %v1419_v5 = vld [vmem:[%s1851_s0 + $0x124] ss:$20 sps:$4 sm:$0xff]   ;;  %v1422_v7 = vld [vmem:[%s1851_s0 + $0x120] ss:$20 sps:$4 sm:$0xff]  }
  0x18   :  { %1155 = vmatpush3.bf16.msra.mxu0 %v1358_v22  ;;  %v1410_v0 = vld [vmem:[%s1851_s0 + $0xf4] ss:$20 sps:$4 sm:$0xff]   ;;  %v1417_v4 = vld [vmem:[%s1851_s0 + $0x11c] ss:$20 sps:$4 sm:$0xff]   ;;  %v1421_v6 = vld [vmem:[%s1851_s0 + $0x118] ss:$20 sps:$4 sm:$0xff]  }
  0x19   :  { %1219 = vmatpush3.bf16.msra.mxu1 %v1359_v23  ;;  %1156 = vmatprep.subr.bf16.mxu0 %v1360_v24  ;;  %v1424_v8 = vld [vmem:[%s1851_s0 + $0x10] ss:$20 sps:$4 sm:$0xff]   ;;  %v1426_v10 = vld [vmem:[%s1851_s0 + $0x38] ss:$20 sps:$4 sm:$0xff]   ;;  %v1428_v12 = vld [vmem:[%s1851_s0 + $0x60] ss:$20 sps:$4 sm:$0xff]  }
  0x1a   :  { %1220 = vmatprep.subr.bf16.mxu1 %v1361_v25  ;;  %v1425_v9 = vld [vmem:[%s1851_s0 + $0xb0] ss:$20 sps:$4 sm:$0xff]   ;;  %v1427_v11 = vld [vmem:[%s1851_s0 + $0xd8] ss:$20 sps:$4 sm:$0xff]   ;;  %v1429_v13 = vld [vmem:[%s1851_s0 + $0x100] ss:$20 sps:$4 sm:$0xff]  }
  0x1b   :  { %v1430_v14 = vld [vmem:[%s1851_s0 + $0x88] ss:$20 sps:$4 sm:$0xff]  }
  0x1c   :  { %1157 = vmatpush3.bf16.msra.mxu0 %v1362_v26  ;;  %v1431_v15 = vld [vmem:[%s1851_s0 + $0x128] ss:$20 sps:$4 sm:$0xff]  }
  0x1d   :  { %1221 = vmatpush3.bf16.msra.mxu1 %v1363_v27  ;;  %1158 = vmatprep.subr.bf16.mxu0 %v1364_v28 }
  0x1e   :  { %1222 = vmatprep.subr.bf16.mxu1 %v1365_v29 }
  0x20   :  { %1159 = vmatpush3.bf16.msra.mxu0 %v1366_v30 }
  0x21   :  { %1223 = vmatpush3.bf16.msra.mxu1 %v1367_v31  ;;  %1288 = vmatprep.subr.bf16.mxu0 %v1374_v36 }
  0x22   :  { %1320 = vmatprep.subr.bf16.mxu1 %v1374_v36 }
  0x23   :  { %663 = vmatmul.mubr.bf16.vlgmr.msra.gmra.mrb[0].mxu0 %v1368_v32 }
  0x24   :  { %760 = vmatmul.mubr.bf16.vlgmr.msra.gmra.mrb[0].mxu1 %v1371_v34  ;;  %1289 = vmatpush3.bf16.msra.mxu0 %v1374_v36 }
  0x25   :  { %1328 = vmatpush3.bf16.msra.mxu1 %v1374_v36  ;;  %670 = vmatprep.mubr.bf16.mxu0 %v1375_v37 }
  0x26   :  { %767 = vmatprep.mubr.bf16.mxu1 %v1377_v38  ;;  %1290 = vmatprep.subr.bf16.mxu0 %v1381_v39 }
  0x27   :  { %1321 = vmatprep.subr.bf16.mxu1 %v1381_v39 }
  0x28   :  { %1291 = vmatpush3.bf16.msra.mxu0 %v1381_v39 }
  0x29   :  { %1329 = vmatpush3.bf16.msra.mxu1 %v1381_v39  ;;  %1292 = vmatprep.subr.bf16.mxu0 %v1388_v44 }
  0x2a   :  { %1322 = vmatprep.subr.bf16.mxu1 %v1388_v44 }
  0x2b   :  { %671 = vmatmul.mubr.bf16.gmra.mrb[4].mxu0 %v1379_v40 }
  0x2c   :  { %768 = vmatmul.mubr.bf16.gmra.mrb[4].mxu1 %v1380_v41  ;;  %678 = vmatprep.mubr.bf16.mxu0 %v1382_v42 }
  0x2d   :  { %775 = vmatprep.mubr.bf16.mxu1 %v1384_v43  ;;  %1293 = vmatpush3.bf16.msra.mxu0 %v1388_v44 }
  0x2e   :  { %1330 = vmatpush3.bf16.msra.mxu1 %v1388_v44  ;;  %1294 = vmatprep.subr.bf16.mxu0 %v1395_v45 }
  0x2f   :  { %1323 = vmatprep.subr.bf16.mxu1 %v1395_v45 }
  0x31   :  { %1295 = vmatpush3.bf16.msra.mxu0 %v1395_v45 }
  0x32   :  { %1331 = vmatpush3.bf16.msra.mxu1 %v1395_v45  ;;  %1296 = vmatprep.subr.bf16.mxu0 %v1402_v50 }
  0x33   :  { %679 = vmatmul.mubr.bf16.gmra.mrb[8].mxu0 %v1386_v46  ;;  %1324 = vmatprep.subr.bf16.mxu1 %v1402_v50 }
  0x34   :  { %776 = vmatmul.mubr.bf16.gmra.mrb[8].mxu1 %v1387_v47  ;;  %686 = vmatprep.mubr.bf16.mxu0 %v1389_v48 }
  0x35   :  { %783 = vmatprep.mubr.bf16.mxu1 %v1391_v49  ;;  %1297 = vmatpush3.bf16.msra.mxu0 %v1402_v50 }
  0x36   :  { %1332 = vmatpush3.bf16.msra.mxu1 %v1402_v50  ;;  %1298 = vmatprep.subr.bf16.mxu0 %v1409_v51 }
  0x37   :  { %1325 = vmatprep.subr.bf16.mxu1 %v1409_v51 }
  0x39   :  { %1299 = vmatpush3.bf16.msra.mxu0 %v1409_v51 }
  0x3a   :  { %1333 = vmatpush3.bf16.msra.mxu1 %v1409_v51  ;;  %1300 = vmatprep.subr.bf16.mxu0 %v1416_v55 }
  0x3b   :  { %687 = vmatmul.mubr.bf16.gmra.mrb[12].mxu0 %v1393_v52  ;;  %1326 = vmatprep.subr.bf16.mxu1 %v1416_v55 }
  0x3c   :  { %784 = vmatmul.mubr.bf16.gmra.mrb[12].mxu1 %v1394_v53  ;;  %694 = vmatprep.mubr.bf16.mxu0 %v1396_v54 }
  0x3d   :  { %791 = vmatprep.mubr.bf16.mxu1 %v1398_v56  ;;  %1301 = vmatpush3.bf16.msra.mxu0 %v1416_v55 }
  0x3e   :  { %1334 = vmatpush3.bf16.msra.mxu1 %v1416_v55  ;;  %1302 = vmatprep.subr.bf16.mxu0 %v1423_v57 }
  0x3f   :  { %1327 = vmatprep.subr.bf16.mxu1 %v1423_v57 }
  0x41   :  { %1303 = vmatpush3.bf16.msra.mxu0 %v1423_v57 }
  0x42   :  { %1335 = vmatpush3.bf16.msra.mxu1 %v1423_v57 }
  0x43   :  { %695 = vmatmul.mubr.bf16.gmra.mrb[16].mxu0 %v1400_v58 }
  0x44   :  { %792 = vmatmul.mubr.bf16.gmra.mrb[16].mxu1 %v1401_v59  ;;  %702 = vmatprep.mubr.bf16.mxu0 %v1403_v60 }
  0x45   :  { %799 = vmatprep.mubr.bf16.mxu1 %v1405_v61 }
  0x4b   :  { %703 = vmatmul.mubr.bf16.gmra.mrb[20].mxu0 %v1407_v62 }
  0x4c   :  { %800 = vmatmul.mubr.bf16.gmra.mrb[20].mxu1 %v1408_v63  ;;  %710 = vmatprep.mubr.bf16.mxu0 %v1410_v0 }
  0x4d   :  { %807 = vmatprep.mubr.bf16.mxu1 %v1412_v1 }
  0x53   :  { %711 = vmatmul.mubr.bf16.gmra.mrb[24].mxu0 %v1414_v2 }
  0x54   :  { %808 = vmatmul.mubr.bf16.gmra.mrb[24].mxu1 %v1415_v3  ;;  %718 = vmatprep.mubr.bf16.mxu0 %v1417_v4 }
  0x55   :  { %815 = vmatprep.mubr.bf16.mxu1 %v1419_v5 }
  0x5b   :  { %719 = vmatmul.mubr.bf16.gmra.mrb[28].mxu0 %v1421_v6 }
  0x5c   :  { %816 = vmatmul.mubr.bf16.gmra.mrb[28].mxu1 %v1422_v7  ;;  %1304 = vmatprep.mubr.bf16.mxu0 %v1424_v8 }
  0x5d   :  { %1312 = vmatprep.mubr.bf16.mxu1 %v1425_v9 }
  0x63   :  { %1305 = vmatmul.mubr.bf16.vlgmr.msra.gmra.mrb[32].mxu0 %v1426_v10 }
  0x64   :  { %1313 = vmatmul.mubr.bf16.vlgmr.msra.gmra.mrb[32].mxu1 %v1427_v11  ;;  %1308 = vmatprep.mubr.bf16.mxu0 %v1428_v12 }
  0x65   :  { %1316 = vmatprep.mubr.bf16.mxu1 %v1429_v13 }
  0x6b   :  { %1309 = vmatmul.mubr.bf16.gmra.mrb[36].mxu0 %v1430_v14 }
  0x6c   :  { %1317 = vmatmul.mubr.bf16.gmra.mrb[36].mxu1 %v1431_v15 }
  0xf6   :  { %v1160_v16 = vpop.f32.mrb[0].mxu0 }
  0xf7   :  { %v1224_v17 = vpop.f32.mrb[0].mxu1  ;;  %v1161_v18 = vpop.f32.mrb[1].mxu0 }
  0xf8   :  { %v1162_v19 = vadd.f32 %v1161_v18, %v1160_v16  ;;  %v1225_v20 = vpop.f32.mrb[1].mxu1  ;;  %v1163_v21 = vpop.f32.mrb[2].mxu0 }
  0xf9   :  { %v1226_v22 = vadd.f32 %v1225_v20, %v1224_v17  ;;  %v1227_v23 = vpop.f32.mrb[2].mxu1  ;;  %v1164_v24 = vpop.f32.mrb[3].mxu0 }
  0xfa   :  { %v1165_v25 = vadd.f32 %v1164_v24, %v1163_v21  ;;  %v1228_v26 = vpop.f32.mrb[3].mxu1 }
  0xfb   :  { %v1229_v27 = vadd.f32 %v1228_v26, %v1227_v23  ;;  %v1697_v28 = vadd.f32 %v1226_v22, %v1162_v19 }
  0xfd   :  { %v1699_v29 = vadd.f32 %v1229_v27, %v1165_v25 }
  0xfe   :  { %v1166_v30 = vpop.f32.mrb[4].mxu0 }
  0xff   :  { %v1230_v31 = vpop.f32.mrb[4].mxu1  ;;  %v1167_v32 = vpop.f32.mrb[5].mxu0 }
 0x100   :  { %v1168_v33 = vadd.f32 %v1167_v32, %v1166_v30  ;;  %v1231_v34 = vpop.f32.mrb[5].mxu1  ;;  %v1169_v35 = vpop.f32.mrb[6].mxu0 }
 0x101   :  { %v1232_v36 = vadd.f32 %v1231_v34, %v1230_v31  ;;  %v1233_v37 = vpop.f32.mrb[6].mxu1  ;;  %v1170_v38 = vpop.f32.mrb[7].mxu0 }
 0x102   :  { %v1171_v39 = vadd.f32 %v1170_v38, %v1169_v35  ;;  %v1234_v40 = vpop.f32.mrb[7].mxu1 }
 0x103   :  { %v1235_v41 = vadd.f32 %v1234_v40, %v1233_v37  ;;  %v1701_v42 = vadd.f32 %v1232_v36, %v1168_v33 }
 0x105   :  { %v1703_v43 = vadd.f32 %v1235_v41, %v1171_v39 }
 0x106   :  { %v1172_v44 = vpop.f32.mrb[8].mxu0 }
 0x107   :  { %v1236_v45 = vpop.f32.mrb[8].mxu1  ;;  %v1173_v46 = vpop.f32.mrb[9].mxu0 }
 0x108   :  { %v1174_v47 = vadd.f32 %v1173_v46, %v1172_v44  ;;  %v1237_v48 = vpop.f32.mrb[9].mxu1  ;;  %v1175_v49 = vpop.f32.mrb[10].mxu0 }
 0x109   :  { %v1238_v50 = vadd.f32 %v1237_v48, %v1236_v45  ;;  %v1239_v51 = vpop.f32.mrb[10].mxu1  ;;  %v1176_v52 = vpop.f32.mrb[11].mxu0 }
 0x10a   :  { %v1177_v53 = vadd.f32 %v1176_v52, %v1175_v49  ;;  %v1240_v54 = vpop.f32.mrb[11].mxu1 }
 0x10b   :  { %v1241_v55 = vadd.f32 %v1240_v54, %v1239_v51  ;;  %v1705_v56 = vadd.f32 %v1238_v50, %v1174_v47 }
 0x10d   :  { %v1707_v57 = vadd.f32 %v1241_v55, %v1177_v53 }
 0x10e   :  { %v1178_v58 = vpop.f32.mrb[12].mxu0 }
 0x10f   :  { %v1242_v59 = vpop.f32.mrb[12].mxu1  ;;  %v1179_v60 = vpop.f32.mrb[13].mxu0 }
 0x110   :  { %v1180_v61 = vadd.f32 %v1179_v60, %v1178_v58  ;;  %v1243_v62 = vpop.f32.mrb[13].mxu1  ;;  %v1181_v63 = vpop.f32.mrb[14].mxu0 }
 0x111   :  { %v1244_v0 = vadd.f32 %v1243_v62, %v1242_v59  ;;  %v1245_v1 = vpop.f32.mrb[14].mxu1  ;;  %v1182_v2 = vpop.f32.mrb[15].mxu0 }
 0x112   :  { %v1183_v3 = vadd.f32 %v1182_v2, %v1181_v63  ;;  %v1246_v4 = vpop.f32.mrb[15].mxu1 }
 0x113   :  { %v1247_v5 = vadd.f32 %v1246_v4, %v1245_v1  ;;  %v1709_v6 = vadd.f32 %v1244_v0, %v1180_v61 }
 0x115   :  { %v1711_v7 = vadd.f32 %v1247_v5, %v1183_v3 }
 0x116   :  { %v1184_v8 = vpop.f32.mrb[16].mxu0 }
 0x117   :  { %v1248_v9 = vpop.f32.mrb[16].mxu1  ;;  %v1185_v10 = vpop.f32.mrb[17].mxu0 }
 0x118   :  { %v1186_v11 = vadd.f32 %v1185_v10, %v1184_v8  ;;  %v1249_v12 = vpop.f32.mrb[17].mxu1  ;;  %v1187_v13 = vpop.f32.mrb[18].mxu0 }
 0x119   :  { %v1250_v14 = vadd.f32 %v1249_v12, %v1248_v9  ;;  %v1251_v15 = vpop.f32.mrb[18].mxu1  ;;  %v1188_v16 = vpop.f32.mrb[19].mxu0  ;;  %v1724_v9 = vld [vmem:[%s1852_s2] ss:$0 sm:$0xff] }
 0x11a   :  { %v1189_v17 = vadd.f32 %v1188_v16, %v1187_v13  ;;  %v1252_v18 = vpop.f32.mrb[19].mxu1  ;;  %v997_v13 = vld [vmem:[%s1853_s3 + $0x10] sm:$0xff] }
 0x11b   :  { %v1253_v19 = vadd.f32 %v1252_v18, %v1251_v15  ;;  %v794_v20 = vadd.f32 %v1250_v14, %v1186_v11 }
 0x11d   :  { %v1713_v21 = vadd.f32 %v1253_v19, %v1189_v17  ;;  %v1005_v19 = vld [vmem:[%s1853_s3 + $0x50] sm:$0xff] }
 0x11e   :  { %v1190_v22 = vpop.f32.mrb[20].mxu0 }
 0x11f   :  { %v1254_v23 = vpop.f32.mrb[20].mxu1  ;;  %v1191_v24 = vpop.f32.mrb[21].mxu0 }
 0x120   :  { %v1192_v25 = vadd.f32 %v1191_v24, %v1190_v22  ;;  %v1255_v26 = vpop.f32.mrb[21].mxu1  ;;  %v1193_v27 = vpop.f32.mrb[22].mxu0 }
 0x121   :  { %v1256_v30 = vadd.f32 %v1255_v26, %v1254_v23  ;;  %v1257_v31 = vpop.f32.mrb[22].mxu1  ;;  %v1194_v32 = vpop.f32.mrb[23].mxu0 }
 0x122   :  { %v1195_v33 = vadd.f32 %v1194_v32, %v1193_v27  ;;  %v1258_v34 = vpop.f32.mrb[23].mxu1  ;;  %v1003_v27 = vld [vmem:[%s1853_s3 + $0x40] sm:$0xff] }
 0x123   :  { %v1259_v35 = vadd.f32 %v1258_v34, %v1257_v31  ;;  %v802_v36 = vadd.f32 %v1256_v30, %v1192_v25  ;;  %v998_v30 = vld [vmem:[%s1853_s3 + $0x18] sm:$0xff] }
 0x125   :  { %v805_v37 = vadd.f32 %v1259_v35, %v1195_v33  ;;  %v1006_v35 = vld [vmem:[%s1853_s3 + $0x58] sm:$0xff] }
 0x126   :  { %v1196_v38 = vpop.f32.mrb[24].mxu0 }
 0x127   :  { %v1260_v39 = vpop.f32.mrb[24].mxu1  ;;  %v1197_v40 = vpop.f32.mrb[25].mxu0 }
 0x128   :  { %v1198_v41 = vadd.f32 %v1197_v40, %v1196_v38  ;;  %v1261_v44 = vpop.f32.mrb[25].mxu1  ;;  %v1199_v45 = vpop.f32.mrb[26].mxu0 }
 0x129   :  { %v1262_v46 = vadd.f32 %v1261_v44, %v1260_v39  ;;  %v1263_v47 = vpop.f32.mrb[26].mxu1  ;;  %v1200_v48 = vpop.f32.mrb[27].mxu0 }
 0x12a   :  { %v1201_v49 = vadd.f32 %v1200_v48, %v1199_v45  ;;  %v1264_v50 = vpop.f32.mrb[27].mxu1 }
 0x12b   :  { %v1265_v51 = vadd.f32 %v1264_v50, %v1263_v47  ;;  %v1715_v52 = vadd.f32 %v1262_v46, %v1198_v41  ;;  %v1004_v41 = vld [vmem:[%s1853_s3 + $0x48] sm:$0xff] }
 0x12d   :  { %v1717_v53 = vadd.f32 %v1265_v51, %v1201_v49 }
 0x12e   :  { %v1202_v54 = vpop.f32.mrb[28].mxu0 }
 0x12f   :  { %v1266_v55 = vpop.f32.mrb[28].mxu1  ;;  %v1203_v58 = vpop.f32.mrb[29].mxu0 }
 0x130   :  { %v1204_v59 = vadd.f32 %v1203_v58, %v1202_v54  ;;  %v1267_v60 = vpop.f32.mrb[29].mxu1  ;;  %v1205_v61 = vpop.f32.mrb[30].mxu0 }
 0x131   :  { %v1268_v62 = vadd.f32 %v1267_v60, %v1266_v55  ;;  %v1269_v63 = vpop.f32.mrb[30].mxu1  ;;  %v1206_v0 = vpop.f32.mrb[31].mxu0 }
 0x132   :  { %v1207_v1 = vadd.f32 %v1206_v0, %v1205_v61  ;;  %v1270_v2 = vpop.f32.mrb[31].mxu1  ;;  %v1001_v0 = vld [vmem:[%s1853_s3 + $0x30] sm:$0xff] }
 0x133   :  { %v1271_v3 = vadd.f32 %v1270_v2, %v1269_v63  ;;  %v818_v4 = vadd.f32 %v1268_v62, %v1204_v59 }
 0x135   :  { %v1719_v5 = vadd.f32 %v1271_v3, %v1207_v1 }
 0x136   :  { %v1306_v8 = vpop.f32.mrb[32].mxu0 }
 0x137   :  { %v867_v10 = vadd.f32 %v1306_v8, %v1701_v42  ;;  %v1314_v11 = vpop.f32.mrb[32].mxu1  ;;  %v858_v12 = vpop.f32.mrb[33].mxu0  ;;  %v995_v42 = vld [vmem:[%s1853_s3] sm:$0xff] }
 0x138   :  { %v899_v14 = vadd.f32 %v1314_v11, %v802_v36  ;;  %v859_v15 = vadd.f32 %v858_v12, %v1697_v28  ;;  %v890_v16 = vpop.f32.mrb[33].mxu1  ;;  %v1307_v17 = vpop.f32.mrb[34].mxu0  ;;  %v996_v36 = vld [vmem:[%s1853_s3 + $0x8] sm:$0xff]  ;;  %v1009_v11 = vld [vmem:[%s1853_s3 + $0x70] sm:$0xff] }
 0x139   :  { %v981_v18 = vadd.f32 %v1724_v9, %v867_v10  ;;  %v891_v22 = vadd.f32 %v890_v16, %v794_v20  ;;  %v870_v23 = vadd.f32 %v1307_v17, %v1703_v43  ;;  %v1315_v24 = vpop.f32.mrb[34].mxu1  ;;  %v861_v25 = vpop.f32.mrb[35].mxu0 }
 0x13a   :  { %v989_v26 = vadd.f32 %v1724_v9, %v899_v14  ;;  %v979_v28 = vadd.f32 %v1724_v9, %v859_v15  ;;  %v902_v31 = vadd.f32 %v1315_v24, %v805_v37  ;;  %v862_v32 = vadd.f32 %v861_v25, %v1699_v29  ;;  %v893_v20 = vpop.f32.mrb[35].mxu1  ;;  %v1010_v24 = vld [vmem:[%s1853_s3 + $0x78] sm:$0xff] }
 0x13b   :  { %v1013_v33 = vadd.f32 %v997_v13, %v981_v18  ;;  %v987_v43 = vadd.f32 %v1724_v9, %v891_v22  ;;  %v982_v34 = vadd.f32 %v1724_v9, %v870_v23  ;;  %v894_v38 = vadd.f32 %v893_v20, %v1713_v21 }
 0x13c   :  { %v1021_v39 = vadd.f32 %v1005_v19, %v989_v26  ;;  %v1011_v37 = vadd.f32 %v995_v42, %v979_v28  ;;  %v990_v29 = vadd.f32 %v1724_v9, %v902_v31  ;;  %v980_v40 = vadd.f32 %v1724_v9, %v862_v32 }
 0x13d   :  { %v1029_v44 = vmax.f32 %v1013_v33, 0.0  ;;  %v1019_v45 = vadd.f32 %v1003_v27, %v987_v43  ;;  %v1014_v46 = vadd.f32 %v998_v30, %v982_v34  ;;  %v988_v47 = vadd.f32 %v1724_v9, %v894_v38  ;;  %v1008_v30 = vld [vmem:[%s1853_s3 + $0x68] sm:$0xff] }
 0x13e   :  { %v1037_v48 = vmax.f32 %v1021_v39, 0.0  ;;  %v1027_v49 = vmax.f32 %v1011_v37, 0.0  ;;  %v1022_v50 = vadd.f32 %v1006_v35, %v990_v29  ;;  %v1012_v51 = vadd.f32 %v996_v36, %v980_v40  ;;  %v1310_v21 = vpop.f32.mrb[36].mxu0 }
 0x13f   :  { %1045 = vst [vmem:[%s1854_s4 + $0x10] sm:$0xff] %v1029_v44  ;;  %v1035_v54 = vmax.f32 %v1019_v45, 0.0  ;;  %v1030_v55 = vmax.f32 %v1014_v46, 0.0  ;;  %v1020_v58 = vadd.f32 %v1004_v41, %v988_v47  ;;  %v883_v59 = vadd.f32 %v1310_v21, %v1709_v6  ;;  %v1318_v60 = vpop.f32.mrb[36].mxu1  ;;  %v874_v61 = vpop.f32.mrb[37].mxu0 }
 0x140   :  { %1053 = vst [vmem:[%s1854_s4 + $0x50] sm:$0xff] %v1037_v48  ;;  %1043 = vst [vmem:[%s1854_s4] sm:$0xff] %v1027_v49  ;;  %v1038_v62 = vmax.f32 %v1022_v50, 0.0  ;;  %v1028_v63 = vmax.f32 %v1012_v51, 0.0  ;;  %v915_v1 = vadd.f32 %v1318_v60, %v818_v4  ;;  %v875_v2 = vadd.f32 %v874_v61, %v1705_v56  ;;  %v906_v6 = vpop.f32.mrb[37].mxu1  ;;  %v1311_v3 = vpop.f32.mrb[38].mxu0  ;;  %v999_v56 = vld [vmem:[%s1853_s3 + $0x20] sm:$0xff] }
 0x141   :  { %1051 = vst [vmem:[%s1854_s4 + $0x40] sm:$0xff] %v1035_v54  ;;  %1046 = vst [vmem:[%s1854_s4 + $0x18] sm:$0xff] %v1030_v55  ;;  %v1036_v8 = vmax.f32 %v1020_v58, 0.0  ;;  %v985_v10 = vadd.f32 %v1724_v9, %v883_v59  ;;  %v907_v4 = vadd.f32 %v906_v6, %v1715_v52  ;;  %v886_v12 = vadd.f32 %v1311_v3, %v1711_v7  ;;  %v1319_v13 = vpop.f32.mrb[38].mxu1  ;;  %v877_v14 = vpop.f32.mrb[39].mxu0  ;;  %v1007_v52 = vld [vmem:[%s1853_s3 + $0x60] sm:$0xff] }
 0x142   :  { %1054 = vst [vmem:[%s1854_s4 + $0x58] sm:$0xff] %v1038_v62  ;;  %1044 = vst [vmem:[%s1854_s4 + $0x8] sm:$0xff] %v1028_v63  ;;  %v993_v15 = vadd.f32 %v1724_v9, %v915_v1  ;;  %v983_v16 = vadd.f32 %v1724_v9, %v875_v2  ;;  %v1002_v7 = vld [vmem:[%s1853_s3 + $0x38] sm:$0xff]  ;;  %v918_v17 = vadd.f32 %v1319_v13, %v1719_v5  ;;  %v909_v19 = vpop.f32.mrb[39].mxu1  ;;  %v1000_v5 = vld [vmem:[%s1853_s3 + $0x28] sm:$0xff] }
 0x143   :  { %v878_v18 = vadd.f32 %v877_v14, %v1707_v57  ;;  %1052 = vst [vmem:[%s1854_s4 + $0x48] sm:$0xff] %v1036_v8  ;;  %v1017_v42 = vadd.f32 %v1001_v0, %v985_v10  ;;  %v991_v22 = vadd.f32 %v1724_v9, %v907_v4  ;;  %v986_v23 = vadd.f32 %v1724_v9, %v886_v12 }
 0x144   :  { %v910_v57 = vadd.f32 %v909_v19, %v1717_v53  ;;  %v1025_v25 = vadd.f32 %v1009_v11, %v993_v15  ;;  %v1015_v26 = vadd.f32 %v999_v56, %v983_v16  ;;  %v994_v28 = vadd.f32 %v1724_v9, %v918_v17 }
 0x145   :  { %v984_v27 = vadd.f32 %v1724_v9, %v878_v18  ;;  %v1033_v31 = vmax.f32 %v1017_v42, 0.0  ;;  %v1023_v32 = vadd.f32 %v1007_v52, %v991_v22  ;;  %v1018_v20 = vadd.f32 %v1002_v7, %v986_v23 }
 0x146   :  { %v992_v33 = vadd.f32 %v1724_v9, %v910_v57  ;;  %v1041_v43 = vmax.f32 %v1025_v25, 0.0  ;;  %v1031_v34 = vmax.f32 %v1015_v26, 0.0  ;;  %v1026_v35 = vadd.f32 %v1010_v24, %v994_v28 }
 0x147   :  { %v1016_v36 = vadd.f32 %v1000_v5, %v984_v27  ;;  %1049 = vst [vmem:[%s1854_s4 + $0x30] sm:$0xff] %v1033_v31  ;;  %v1039_v53 = vmax.f32 %v1023_v32, 0.0  ;;  %v1034_v38 = vmax.f32 %v1018_v20, 0.0 }
 0x148   :  { %v1024_v39 = vadd.f32 %v1008_v30, %v992_v33  ;;  %1057 = vst [vmem:[%s1854_s4 + $0x70] sm:$0xff] %v1041_v43  ;;  %1047 = vst [vmem:[%s1854_s4 + $0x20] sm:$0xff] %v1031_v34  ;;  %v1042_v9 = vmax.f32 %v1026_v35, 0.0 }
 0x149   :  { %v1032_v37 = vmax.f32 %v1016_v36, 0.0  ;;  %1055 = vst [vmem:[%s1854_s4 + $0x60] sm:$0xff] %v1039_v53  ;;  %1050 = vst [vmem:[%s1854_s4 + $0x38] sm:$0xff] %v1034_v38 }
 0x14a   :  { %v1040_v29 = vmax.f32 %v1024_v39, 0.0  ;;  %1058 = vst [vmem:[%s1854_s4 + $0x78] sm:$0xff] %v1042_v9 }
 0x14b   :  { %1048 = vst [vmem:[%s1854_s4 + $0x28] sm:$0xff] %v1032_v37 }
 0x14c   :  { %1056 = vst [vmem:[%s1854_s4 + $0x68] sm:$0xff] %v1040_v29 }

// kernel: resnet_triplet_forward.19
= control target key start
LH: loop header
LB: loop body
LE: loop exit
PB: predicated region body
PF: predicated region fallthrough
CT: control target
= control target key end

     0   :  { %s972_s1 = inlined_call_operand.vmem [shape: bf16[640,128], index: 1, kind: input, shape index: {}]   ;;  %s973_s0 = inlined_call_operand.vmem [shape: bf16[32,640], index: 0, kind: input, shape index: {}]   ;;  %s974_s2 = inlined_call_operand.vmem [shape: f32[1,128], index: 2, kind: input, shape index: {}]   ;;  %s975_s3 = inlined_call_operand.vmem [shape: f32[32,128], index: 3, kind: output, shape index: {}]  }
   0x1   :  { %v733_v0 = vld [vmem:[%s972_s1 + $0x40] sm:$0xff]   ;;  %v737_v4 = vld [vmem:[%s972_s1 + $0x48] sm:$0xff]   ;;  %v741_v8 = vld [vmem:[%s972_s1 + $0x50] sm:$0xff]  }
   0x2   :  { %v734_v1 = vld [vmem:[%s972_s1 + $0xc0] sm:$0xff]   ;;  %647 = vmatprep.subr.bf16.mxu0 %v733_v0  ;;  %v738_v5 = vld [vmem:[%s972_s1 + $0xc8] sm:$0xff]   ;;  %v742_v9 = vld [vmem:[%s972_s1 + $0xd0] sm:$0xff]  }
   0x3   :  { %v735_v2 = vld [vmem:[%s972_s1] sm:$0xff]   ;;  %675 = vmatprep.subr.bf16.mxu1 %v734_v1  ;;  %v739_v6 = vld [vmem:[%s972_s1 + $0x8] sm:$0xff]   ;;  %v743_v10 = vld [vmem:[%s972_s1 + $0x10] sm:$0xff]  }
   0x4   :  { %v736_v3 = vld [vmem:[%s972_s1 + $0x80] sm:$0xff]   ;;  %648 = vmatpush3.bf16.msra.mxu0 %v735_v2  ;;  %v740_v7 = vld [vmem:[%s972_s1 + $0x88] sm:$0xff]   ;;  %v744_v11 = vld [vmem:[%s972_s1 + $0x90] sm:$0xff]  }
   0x5   :  { %676 = vmatpush3.bf16.msra.mxu1 %v736_v3  ;;  %649 = vmatprep.subr.bf16.mxu0 %v737_v4  ;;  %v745_v12 = vld [vmem:[%s972_s1 + $0x58] sm:$0xff]   ;;  %v749_v16 = vld [vmem:[%s972_s1 + $0x60] sm:$0xff]   ;;  %v753_v20 = vld [vmem:[%s972_s1 + $0x68] sm:$0xff]  }
   0x6   :  { %677 = vmatprep.subr.bf16.mxu1 %v738_v5  ;;  %v746_v13 = vld [vmem:[%s972_s1 + $0xd8] sm:$0xff]   ;;  %v750_v17 = vld [vmem:[%s972_s1 + $0xe0] sm:$0xff]   ;;  %v754_v21 = vld [vmem:[%s972_s1 + $0xe8] sm:$0xff]  }
   0x7   :  { %v747_v14 = vld [vmem:[%s972_s1 + $0x18] sm:$0xff]   ;;  %v751_v18 = vld [vmem:[%s972_s1 + $0x20] sm:$0xff]   ;;  %v755_v22 = vld [vmem:[%s972_s1 + $0x28] sm:$0xff]  }
   0x8   :  { %650 = vmatpush3.bf16.msra.mxu0 %v739_v6  ;;  %v748_v15 = vld [vmem:[%s972_s1 + $0x98] sm:$0xff]   ;;  %v752_v19 = vld [vmem:[%s972_s1 + $0xa0] sm:$0xff]   ;;  %v756_v23 = vld [vmem:[%s972_s1 + $0xa8] sm:$0xff]  }
   0x9   :  { %678 = vmatpush3.bf16.msra.mxu1 %v740_v7  ;;  %651 = vmatprep.subr.bf16.mxu0 %v741_v8  ;;  %v757_v24 = vld [vmem:[%s972_s1 + $0x70] sm:$0xff]   ;;  %v761_v28 = vld [vmem:[%s972_s1 + $0x78] sm:$0xff]   ;;  %v770_v35 = vld [vmem:[%s973_s0 + $0xc] ss:$20 sps:$4 sm:$0xff]  }
   0xa   :  { %679 = vmatprep.subr.bf16.mxu1 %v742_v9  ;;  %v758_v25 = vld [vmem:[%s972_s1 + $0xf0] sm:$0xff]   ;;  %v762_v29 = vld [vmem:[%s972_s1 + $0xf8] sm:$0xff]   ;;  %v771_v36 = vld [vmem:[%s972_s1 + $0x100] sm:$0xff]   ;;  %492 = vmatprep.mubr.bf16.mxu1 %v770_v35 }
   0xb   :  { %v759_v26 = vld [vmem:[%s972_s1 + $0x30] sm:$0xff]   ;;  %v763_v30 = vld [vmem:[%s972_s1 + $0x38] sm:$0xff]   ;;  %v772_v37 = vld [vmem:[%s972_s1 + $0x108] sm:$0xff]  }
   0xc   :  { %652 = vmatpush3.bf16.msra.mxu0 %v743_v10  ;;  %v760_v27 = vld [vmem:[%s972_s1 + $0xb0] sm:$0xff]   ;;  %v764_v31 = vld [vmem:[%s972_s1 + $0xb8] sm:$0xff]   ;;  %v776_v39 = vld [vmem:[%s973_s0 + $0x2c] ss:$20 sps:$4 sm:$0xff]  }
   0xd   :  { %680 = vmatpush3.bf16.msra.mxu1 %v744_v11  ;;  %653 = vmatprep.subr.bf16.mxu0 %v745_v12  ;;  %v765_v32 = vld [vmem:[%s973_s0] ss:$20 sps:$4 sm:$0xff]   ;;  %v767_v33 = vld [vmem:[%s973_s0 + $0x4] ss:$20 sps:$4 sm:$0xff]   ;;  %v768_v34 = vld [vmem:[%s973_s0 + $0x8] ss:$20 sps:$4 sm:$0xff]  }
   0xe   :  { %681 = vmatprep.subr.bf16.mxu1 %v746_v13  ;;  %443 = vmatprep.mubr.bf16.mxu0 %v767_v33  ;;  %v773_v38 = vld [vmem:[%s972_s1 + $0x110] sm:$0xff]   ;;  %v774_v41 = vld [vmem:[%s972_s1 + $0x118] sm:$0xff]   ;;  %v775_v45 = vld [vmem:[%s972_s1 + $0x120] sm:$0xff]  }
   0xf   :  { %v778_v40 = vld [vmem:[%s973_s0 + $0x34] ss:$20 sps:$4 sm:$0xff]   ;;  %v782_v43 = vld [vmem:[%s973_s0 + $0x30] ss:$20 sps:$4 sm:$0xff]   ;;  %v784_v48 = vld [vmem:[%s972_s1 + $0x138] sm:$0xff]  }
  0x10   :  { %654 = vmatpush3.bf16.msra.mxu0 %v747_v14  ;;  %v781_v42 = vld [vmem:[%s973_s0 + $0x28] ss:$20 sps:$4 sm:$0xff]   ;;  %v785_v44 = vld [vmem:[%s973_s0 + $0x10] ss:$20 sps:$4 sm:$0xff]   ;;  %v786_v49 = vld [vmem:[%s973_s0 + $0x38] ss:$20 sps:$4 sm:$0xff]  }
  0x11   :  { %682 = vmatpush3.bf16.msra.mxu1 %v748_v15  ;;  %655 = vmatprep.subr.bf16.mxu0 %v749_v16  ;;  %v780_v46 = vld [vmem:[%s972_s1 + $0x128] sm:$0xff]   ;;  %v783_v47 = vld [vmem:[%s972_s1 + $0x130] sm:$0xff]   ;;  %v646_v15 = vld [vmem:[%s974_s2] ss:$0 sm:$0xff] }
  0x12   :  { %683 = vmatprep.subr.bf16.mxu1 %v750_v17 }
  0x14   :  { %656 = vmatpush3.bf16.msra.mxu0 %v751_v18 }
  0x15   :  { %684 = vmatpush3.bf16.msra.mxu1 %v752_v19  ;;  %657 = vmatprep.subr.bf16.mxu0 %v753_v20 }
  0x16   :  { %685 = vmatprep.subr.bf16.mxu1 %v754_v21 }
  0x18   :  { %658 = vmatpush3.bf16.msra.mxu0 %v755_v22 }
  0x19   :  { %686 = vmatpush3.bf16.msra.mxu1 %v756_v23  ;;  %659 = vmatprep.subr.bf16.mxu0 %v757_v24 }
  0x1a   :  { %687 = vmatprep.subr.bf16.mxu1 %v758_v25 }
  0x1c   :  { %660 = vmatpush3.bf16.msra.mxu0 %v759_v26 }
  0x1d   :  { %688 = vmatpush3.bf16.msra.mxu1 %v760_v27  ;;  %661 = vmatprep.subr.bf16.mxu0 %v761_v28 }
  0x1e   :  { %689 = vmatprep.subr.bf16.mxu1 %v762_v29 }
  0x20   :  { %662 = vmatpush3.bf16.msra.mxu0 %v763_v30 }
  0x21   :  { %690 = vmatpush3.bf16.msra.mxu1 %v764_v31  ;;  %713 = vmatprep.subr.bf16.mxu0 %v771_v36 }
  0x23   :  { %444 = vmatmul.mubr.bf16.vlgmr.msra.gmra.mrb[0].mxu0 %v765_v32 }
  0x24   :  { %493 = vmatmul.mubr.bf16.vlgmr.msra.gmra.mrb[0].mxu1 %v768_v34  ;;  %714 = vmatpush3.bf16.msra.mxu0 %v771_v36 }
  0x25   :  { %715 = vmatprep.subr.bf16.mxu0 %v772_v37  ;;  %451 = vmatprep.mubr.bf16.mxu0 %v776_v39 }
  0x26   :  { %500 = vmatprep.mubr.bf16.mxu1 %v778_v40 }
  0x28   :  { %716 = vmatpush3.bf16.msra.mxu0 %v772_v37 }
  0x29   :  { %717 = vmatprep.subr.bf16.mxu0 %v773_v38 }
  0x2b   :  { %452 = vmatmul.mubr.bf16.gmra.mrb[4].mxu0 %v781_v42 }
  0x2c   :  { %501 = vmatmul.mubr.bf16.gmra.mrb[4].mxu1 %v782_v43  ;;  %718 = vmatpush3.bf16.msra.mxu0 %v773_v38 }
  0x2d   :  { %719 = vmatprep.subr.bf16.mxu0 %v774_v41  ;;  %729 = vmatprep.mubr.bf16.mxu0 %v785_v44 }
  0x30   :  { %720 = vmatpush3.bf16.msra.mxu0 %v774_v41 }
  0x31   :  { %721 = vmatprep.subr.bf16.mxu0 %v775_v45 }
  0x34   :  { %722 = vmatpush3.bf16.msra.mxu0 %v775_v45 }
  0x35   :  { %723 = vmatprep.subr.bf16.mxu0 %v780_v46 }
  0x38   :  { %724 = vmatpush3.bf16.msra.mxu0 %v780_v46 }
  0x39   :  { %725 = vmatprep.subr.bf16.mxu0 %v783_v47 }
  0x3c   :  { %726 = vmatpush3.bf16.msra.mxu0 %v783_v47 }
  0x3d   :  { %727 = vmatprep.subr.bf16.mxu0 %v784_v48 }
  0x40   :  { %728 = vmatpush3.bf16.msra.mxu0 %v784_v48 }
  0x43   :  { %730 = vmatmul.mubr.bf16.vlgmr.msra.gmra.mrb[8].mxu0 %v786_v49 }
  0xf6   :  { %v663_v50 = vpop.f32.mrb[0].mxu0 }
  0xf7   :  { %v691_v51 = vpop.f32.mrb[0].mxu1  ;;  %v664_v52 = vpop.f32.mrb[1].mxu0 }
  0xf8   :  { %v665_v53 = vadd.f32 %v664_v52, %v663_v50  ;;  %v692_v54 = vpop.f32.mrb[1].mxu1  ;;  %v666_v55 = vpop.f32.mrb[2].mxu0 }
  0xf9   :  { %v693_v56 = vadd.f32 %v692_v54, %v691_v51  ;;  %v694_v57 = vpop.f32.mrb[2].mxu1  ;;  %v667_v58 = vpop.f32.mrb[3].mxu0 }
  0xfa   :  { %v668_v59 = vadd.f32 %v667_v58, %v666_v55  ;;  %v695_v60 = vpop.f32.mrb[3].mxu1 }
  0xfb   :  { %v696_v61 = vadd.f32 %v695_v60, %v694_v57  ;;  %v495_v62 = vadd.f32 %v693_v56, %v665_v53 }
  0xfd   :  { %v498_v63 = vadd.f32 %v696_v61, %v668_v59 }
  0xfe   :  { %v669_v0 = vpop.f32.mrb[4].mxu0 }
  0xff   :  { %v697_v1 = vpop.f32.mrb[4].mxu1  ;;  %v670_v2 = vpop.f32.mrb[5].mxu0 }
 0x100   :  { %v671_v3 = vadd.f32 %v670_v2, %v669_v0  ;;  %v698_v4 = vpop.f32.mrb[5].mxu1  ;;  %v672_v5 = vpop.f32.mrb[6].mxu0 }
 0x101   :  { %v699_v6 = vadd.f32 %v698_v4, %v697_v1  ;;  %v700_v7 = vpop.f32.mrb[6].mxu1  ;;  %v673_v8 = vpop.f32.mrb[7].mxu0 }
 0x102   :  { %v674_v9 = vadd.f32 %v673_v8, %v672_v5  ;;  %v701_v10 = vpop.f32.mrb[7].mxu1 }
 0x103   :  { %v702_v11 = vadd.f32 %v701_v10, %v700_v7  ;;  %v503_v12 = vadd.f32 %v699_v6, %v671_v3 }
 0x105   :  { %v506_v13 = vadd.f32 %v702_v11, %v674_v9 }
 0x116   :  { %v731_v14 = vpop.f32.mrb[8].mxu0 }
 0x117   :  { %v552_v16 = vadd.f32 %v731_v14, %v503_v12  ;;  %v543_v17 = vpop.f32.mrb[9].mxu0 }
 0x118   :  { %v544_v18 = vadd.f32 %v543_v17, %v495_v62  ;;  %v732_v19 = vpop.f32.mrb[10].mxu0 }
 0x119   :  { %v582_v20 = vadd.f32 %v646_v15, %v552_v16  ;;  %v555_v21 = vadd.f32 %v732_v19, %v506_v13  ;;  %v546_v22 = vpop.f32.mrb[11].mxu0 }
 0x11a   :  { %v580_v23 = vadd.f32 %v646_v15, %v544_v18  ;;  %v547_v24 = vadd.f32 %v546_v22, %v498_v63 }
 0x11b   :  { %v586_v25 = vmax.f32 %v582_v20, 0.0  ;;  %v583_v26 = vadd.f32 %v646_v15, %v555_v21 }
 0x11c   :  { %v584_v27 = vmax.f32 %v580_v23, 0.0  ;;  %v581_v28 = vadd.f32 %v646_v15, %v547_v24 }
 0x11d   :  { %590 = vst [vmem:[%s975_s3 + $0x10] sm:$0xff] %v586_v25  ;;  %v587_v29 = vmax.f32 %v583_v26, 0.0 }
 0x11e   :  { %588 = vst [vmem:[%s975_s3] sm:$0xff] %v584_v27  ;;  %v585_v30 = vmax.f32 %v581_v28, 0.0 }
 0x11f   :  { %591 = vst [vmem:[%s975_s3 + $0x18] sm:$0xff] %v587_v29 }
 0x120   :  { %589 = vst [vmem:[%s975_s3 + $0x8] sm:$0xff] %v585_v30 }

// kernel: resnet_triplet_forward.18
= control target key start
LH: loop header
LB: loop body
LE: loop exit
PB: predicated region body
PF: predicated region fallthrough
CT: control target
= control target key end

     0   :  { %s306_s1 = inlined_call_operand.vmem [shape: bf16[128,128], index: 1, kind: input, shape index: {}]   ;;  %s307_s0 = inlined_call_operand.vmem [shape: bf16[32,128], index: 0, kind: input, shape index: {}]   ;;  %s308_s2 = inlined_call_operand.vmem [shape: f32[1,128], index: 2, kind: input, shape index: {}]   ;;  %s309_s3 = inlined_call_operand.vmem [shape: f32[32,128], index: 3, kind: output, shape index: {}]  }
   0x1   :  { %v231_v0 = vld [vmem:[%s306_s1] sm:$0xff]   ;;  %v232_v1 = vld [vmem:[%s306_s1 + $0x8] sm:$0xff]   ;;  %v233_v2 = vld [vmem:[%s306_s1 + $0x10] sm:$0xff]  }
   0x2   :  { %211 = vmatprep.subr.bf16.mxu0 %v231_v0  ;;  %v234_v3 = vld [vmem:[%s306_s1 + $0x18] sm:$0xff]   ;;  %v239_v4 = vld [vmem:[%s307_s0] sm:$0xff]   ;;  %v236_v6 = vld [vmem:[%s306_s1 + $0x28] sm:$0xff]  }
   0x3   :  { %212 = vmatpush3.bf16.msra.mxu0 %v231_v0  ;;  %227 = vmatprep.mubr.bf16.mxu0 %v239_v4  ;;  %v235_v5 = vld [vmem:[%s306_s1 + $0x20] sm:$0xff]   ;;  %v237_v7 = vld [vmem:[%s306_s1 + $0x30] sm:$0xff]   ;;  %v238_v8 = vld [vmem:[%s306_s1 + $0x38] sm:$0xff]  }
   0x4   :  { %213 = vmatprep.subr.bf16.mxu0 %v232_v1  ;;  %v240_v9 = vld [vmem:[%s307_s0 + $0x8] sm:$0xff]   ;;  %v200_v10 = vld [vmem:[%s308_s2] ss:$0 sm:$0xff] }
   0x7   :  { %214 = vmatpush3.bf16.msra.mxu0 %v232_v1 }
   0x8   :  { %215 = vmatprep.subr.bf16.mxu0 %v233_v2 }
   0xb   :  { %216 = vmatpush3.bf16.msra.mxu0 %v233_v2 }
   0xc   :  { %217 = vmatprep.subr.bf16.mxu0 %v234_v3 }
   0xf   :  { %218 = vmatpush3.bf16.msra.mxu0 %v234_v3 }
  0x10   :  { %219 = vmatprep.subr.bf16.mxu0 %v235_v5 }
  0x13   :  { %220 = vmatpush3.bf16.msra.mxu0 %v235_v5 }
  0x14   :  { %221 = vmatprep.subr.bf16.mxu0 %v236_v6 }
  0x17   :  { %222 = vmatpush3.bf16.msra.mxu0 %v236_v6 }
  0x18   :  { %223 = vmatprep.subr.bf16.mxu0 %v237_v7 }
  0x1b   :  { %224 = vmatpush3.bf16.msra.mxu0 %v237_v7 }
  0x1c   :  { %225 = vmatprep.subr.bf16.mxu0 %v238_v8 }
  0x1f   :  { %226 = vmatpush3.bf16.msra.mxu0 %v238_v8 }
  0x22   :  { %228 = vmatmul.mubr.bf16.vlgmr.msra.gmra.mrb[0].mxu0 %v240_v9 }
  0xf5   :  { %v229_v11 = vpop.f32.mrb[0].mxu0 }
  0xf6   :  { %v180_v12 = vadd.f32 %v229_v11, %v200_v10  ;;  %v141_v13 = vpop.f32.mrb[1].mxu0 }
  0xf7   :  { %v178_v14 = vadd.f32 %v200_v10, %v141_v13  ;;  %v230_v15 = vpop.f32.mrb[2].mxu0 }
  0xf8   :  { %184 = vst [vmem:[%s309_s3 + $0x10] sm:$0xff] %v180_v12  ;;  %v181_v16 = vadd.f32 %v230_v15, %v200_v10  ;;  %v144_v17 = vpop.f32.mrb[3].mxu0 }
  0xf9   :  { %182 = vst [vmem:[%s309_s3] sm:$0xff] %v178_v14  ;;  %v179_v18 = vadd.f32 %v200_v10, %v144_v17 }
  0xfa   :  { %185 = vst [vmem:[%s309_s3 + $0x18] sm:$0xff] %v181_v16 }
  0xfb   :  { %183 = vst [vmem:[%s309_s3 + $0x8] sm:$0xff] %v179_v18 }

// kernel: resnet_triplet_forward.20
= control target key start
LH: loop header
LB: loop body
LE: loop exit
PB: predicated region body
PF: predicated region fallthrough
CT: control target
= control target key end

     0   :  { %s1128_s15 = smov 0   ;;  %s1130_s16 = smov 0   ;;  %s1256_s0 = inlined_call_operand.vmem [shape: bf16[32,1152], index: 0, kind: input, shape index: {}]   ;;  %s1257_s1 = inlined_call_operand.vmem [shape: bf16[1152,128], index: 1, kind: input, shape index: {}]   ;;  %s1258_s2 = inlined_call_operand.vmem [shape: f32[1,128], index: 2, kind: input, shape index: {}]   ;;  %s1259_s3 = inlined_call_operand.vmem [shape: f32[32,128], index: 3, kind: input, shape index: {}]   ;;  %s1260_s4 = inlined_call_operand.vmem [shape: f32[32,128], index: 4, kind: output, shape index: {}]  }
   0x1   :  { %s1132_s17 = smov 0   ;;  %s1134_s18 = smov 0  }
   0x2   :  { %s1136_s19 = smov 0  }
   0x3 LB: > { %s26_s20 = sadd.s32 1, %s1096_s18  ;;  %p49_p1 = scmp.ne.s32.totalorder %s1088_s16, %s1084_s15  ;;  %s1100_s19 = sphi %s1136_s19, %s14_s19   ;;  %s1096_s18 = sphi %s1134_s18, %s1264_s18   ;;  %s1092_s17 = sphi %s1132_s17, %s1263_s17   ;;  %s1088_s16 = sphi %s1130_s16, %s1262_s16   ;;  %s1084_s15 = sphi %s1128_s15, %s1261_s15  }
   0x4   : > { %p27_p0 = scmp.ge.s32.totalorder %s26_s20, 3  ;;  %p50_p2 = scmp.eq.s32.totalorder %s1100_s19, 0 }
   0x5   : > { %s42_s22 = sadd.s32 1, %s1088_s16  ;;  %p879_p5 = scmp.ge.s32.totalorder %s1100_s19, 3 }
   0x6   : > { %s1266_s20 = smov (%p27_p0, %s26_s20), 0  ;;  %p51_p3 = por %p50_p2, %p49_p1 }
   0x7   : > { %s38_s21 = ssub.s32 %s1096_s18, %s1266_s20  ;;  %203 = sbr.rel (%p879_p5) target bundleno = 23 (0x17), region = 24 }
   0x8   : > { %p40_p4 = scmp.eq.s32.totalorder %s38_s21, 0 }
   0xa   : > { %s1163_s23 = scalar_select %p40_p4, %s1088_s16, %s42_s22  }
   0xe   : > { %206 = sbr.rel (!%p51_p3) target bundleno = 23 (0x17), region = 28  ;;  %s208_s24 = sand.u32 (%p51_p3), 1, %s1088_s16  }
   0xf   : > { %s928_s25 = smul.u32 (%p51_p3), 12, %s1096_s18 }
  0x10   : > { %s987_s26 = smul.u32 (%p51_p3), 48, %s208_s24 }
  0x11   : > { %s216_s29 = scalar_lea.vmem (%p51_p3), %s1256_s0, %s928_s25 }
  0x12   : > { %v231_v0 = vld [vmem:[%s216_s29] sm:$0xff] (%p51_p3)  ;;  %v235_v2 = vld [vmem:[%s216_s29 + $0x48] sm:$0xff] (%p51_p3)  ;;  %s210_s30 = scalar_lea.vmem (%p51_p3), [#allocation3], %s987_s26  ;;  %v885_v6 = vld [vmem:[%s216_s29 + $0x50] sm:$0xf] (%p51_p3) }
  0x13   : > { %v233_v1 = vld [vmem:[%s216_s29 + $0x24] sm:$0xff] (%p51_p3)  ;;  %232 = vst [vmem:[%s210_s30] sm:$0xff] (%p51_p3), %v231_v0  ;;  %236 = vst [vmem:[%s210_s30 + $0x18] sm:$0xff] (%p51_p3), %v235_v2  ;;  %v237_v3 = vld [vmem:[%s216_s29 + $0x6c] sm:$0xff] (%p51_p3) }
  0x14   : > { %234 = vst [vmem:[%s210_s30 + $0xc] sm:$0xff] (%p51_p3), %v233_v1  ;;  %v881_v4 = vld [vmem:[%s216_s29 + $0x8] sm:$0xf] (%p51_p3)  ;;  %v883_v5 = vld [vmem:[%s216_s29 + $0x2c] sm:$0xf] (%p51_p3)  ;;  %238 = vst [vmem:[%s210_s30 + $0x24] sm:$0xff] (%p51_p3), %v237_v3 }
  0x15   : > { %882 = vst [vmem:[%s210_s30 + $0x8] sm:$0xf] %v881_v4  ;;  %884 = vst [vmem:[%s210_s30 + $0x14] sm:$0xf] %v883_v5  ;;  %v887_v7 = vld [vmem:[%s216_s29 + $0x74] sm:$0xf] }
  0x16   : > { %886 = vst [vmem:[%s210_s30 + $0x20] sm:$0xf] %v885_v6  ;;  %888 = vst [vmem:[%s210_s30 + $0x2c] sm:$0xf] %v887_v7 }
  0x17 PF: > { %p889_p6 = scmp.ge.s32.totalorder %s1100_s19, 1  ;;  %p270_p7 = scmp.lt.s32.totalorder %s1100_s19, 4 }
  0x19   : > { %p271_p8 = pnand %p889_p6, %p270_p7 }
  0x1a   : > { %s277_s5 = sand.u32 (!%p271_p8), 1, %s1084_s15   ;;  %s326_s6 = smul.u32 (!%p271_p8), 48, %s1092_s17 }
  0x1b   : > { %274 = sbr.rel (%p271_p8) target bundleno = 318 (0x13e), region = 58  ;;  %p891_p10 = scmp.ne.s32.totalorder (!%p271_p8), %s1092_s17, 0 }
  0x1c   : > { %s988_s7 = smul.u32 (!%p271_p8), 48, %s277_s5  ;;  %p327_p9 = scmp.lt.s32.totalorder (!%p271_p8), %s326_s6, 143 }
  0x1e   : > { %s1180_s12 = scalar_lea.vmem (!%p271_p8), [#allocation3], %s988_s7 }
  0x22   : > { %s1268_s6 = smov (!%p327_p9, %s326_s6), 143  ;;  %360 = sbr.rel (%p891_p10) target bundleno = 41 (0x29), region = 66 }
  0x23   : > { %s890_s8 = sshll.u32 %s1268_s6, 2  ;;  %v1102_v8 = vmov (!%p891_p10), 0.0  }
  0x24   : > { %s1178_s11 = scalar_lea.vmem %s1257_s1, %s890_s8  ;;  %361 = vst [vmem:[#allocation2] sm:$0xff] (!%p891_p10), %v1102_v8  ;;  %362 = vst [vmem:[#allocation2 + $0x8] sm:$0xff] (!%p891_p10), %v1102_v8 }
  0x25   : > { %363 = vst [vmem:[#allocation2 + $0x10] sm:$0xff] (!%p891_p10), %v1102_v8  ;;  %364 = vst [vmem:[#allocation2 + $0x18] sm:$0xff] (!%p891_p10), %v1102_v8 }
  0x29 PF: > { %v1030_v9 = vld [vmem:[%s1178_s11 + $0x40] sm:$0xff]   ;;  %v1033_v12 = vld [vmem:[%s1178_s11 + $0x48] sm:$0xff]   ;;  %v1036_v15 = vld [vmem:[%s1178_s11 + $0x50] sm:$0xff]   ;;  %p922_p11 = scmp.ne.s32.totalorder %s1092_s17, 2 }
  0x2a   : > { %v1031_v10 = vld [vmem:[%s1178_s11] sm:$0xff]   ;;  %929 = vmatprep.subr.bf16.mxu0 %v1030_v9  ;;  %v1034_v13 = vld [vmem:[%s1178_s11 + $0x8] sm:$0xff]   ;;  %v1037_v16 = vld [vmem:[%s1178_s11 + $0x10] sm:$0xff]  }
  0x2b   : > { %v1032_v11 = vld [vmem:[%s1178_s11 + $0x80] sm:$0xff]   ;;  %930 = vmatpush3.bf16.msra.mxu0 %v1031_v10  ;;  %v1035_v14 = vld [vmem:[%s1178_s11 + $0x88] sm:$0xff]   ;;  %v1038_v17 = vld [vmem:[%s1178_s11 + $0x90] sm:$0xff]  }
  0x2c   : > { %967 = vmatprep.subr.bf16.mxu1 %v1032_v11  ;;  %931 = vmatprep.subr.bf16.mxu0 %v1033_v12  ;;  %v1039_v18 = vld [vmem:[%s1178_s11 + $0x58] sm:$0xff]   ;;  %v1042_v21 = vld [vmem:[%s1178_s11 + $0x60] sm:$0xff]   ;;  %v1045_v24 = vld [vmem:[%s1178_s11 + $0x68] sm:$0xff]  }
  0x2d   : > { %968 = vmatpush3.bf16.msra.mxu1 %v1032_v11  ;;  %v1040_v19 = vld [vmem:[%s1178_s11 + $0x18] sm:$0xff]   ;;  %v1044_v22 = vld [vmem:[%s1178_s11 + $0xa0] sm:$0xff]   ;;  %v1047_v25 = vld [vmem:[%s1178_s11 + $0xa8] sm:$0xff]  }
  0x2e   : > { %969 = vmatprep.subr.bf16.mxu1 %v1035_v14  ;;  %v1041_v20 = vld [vmem:[%s1178_s11 + $0x98] sm:$0xff]   ;;  %v1043_v23 = vld [vmem:[%s1178_s11 + $0x20] sm:$0xff]   ;;  %v1046_v26 = vld [vmem:[%s1178_s11 + $0x28] sm:$0xff]  }
  0x2f   : > { %932 = vmatpush3.bf16.msra.mxu0 %v1034_v13  ;;  %v1048_v27 = vld [vmem:[%s1178_s11 + $0x70] sm:$0xff]   ;;  %v1051_v30 = vld [vmem:[%s1178_s11 + $0x78] sm:$0xff]   ;;  %v365_v45 = vld [vmem:[#allocation2] sm:$0xff] }
  0x30   : > { %933 = vmatprep.subr.bf16.mxu0 %v1036_v15  ;;  %v1049_v28 = vld [vmem:[%s1178_s11 + $0x30] sm:$0xff]   ;;  %v1053_v31 = vld [vmem:[%s1178_s11 + $0xb8] sm:$0xff]   ;;  %v366_v50 = vld [vmem:[#allocation2 + $0x8] sm:$0xff] }
  0x31   : > { %970 = vmatpush3.bf16.msra.mxu1 %v1035_v14  ;;  %v1050_v29 = vld [vmem:[%s1178_s11 + $0xb0] sm:$0xff]   ;;  %v1052_v34 = vld [vmem:[%s1178_s11 + $0x38] sm:$0xff]   ;;  %v923_v4 = vld [vmem:[%s1258_s2] ss:$0 sm:$0xff] (!%p922_p11) }
  0x32   : > { %971 = vmatprep.subr.bf16.mxu1 %v1038_v17  ;;  %v1056_v32 = vld [vmem:[%s1180_s12 + $0x4] ss:$12 sps:$4 sm:$0xff]   ;;  %v1057_v33 = vld [vmem:[%s1180_s12 + $0x8] ss:$12 sps:$4 sm:$0xff]   ;;  %v1054_v35 = vld [vmem:[%s1180_s12] ss:$12 sps:$4 sm:$0xff]  }
  0x33   : > { %934 = vmatpush3.bf16.msra.mxu0 %v1037_v16  ;;  %633 = vmatprep.mubr.bf16.mxu0 %v1056_v32  ;;  %v1059_v36 = vld [vmem:[%s1180_s12 + $0x1c] ss:$12 sps:$4 sm:$0xff]   ;;  %v1058_v37 = vld [vmem:[%s1180_s12 + $0x20] ss:$12 sps:$4 sm:$0xff]   ;;  %v1061_v38 = vld [vmem:[%s1180_s12 + $0x18] ss:$12 sps:$4 sm:$0xff]  }
  0x34   : > { %935 = vmatprep.subr.bf16.mxu0 %v1039_v18  ;;  %983 = vmatprep.mubr.bf16.mxu1 %v1057_v33  ;;  %v367_v59 = vld [vmem:[#allocation2 + $0x10] sm:$0xff]  ;;  %v368_v63 = vld [vmem:[#allocation2 + $0x18] sm:$0xff]  ;;  %v726_v5 = vld [vmem:[%s1259_s3] sm:$0xff] (!%p922_p11) }
  0x35   : > { %972 = vmatpush3.bf16.msra.mxu1 %v1038_v17  ;;  %v727_v8 = vld [vmem:[%s1259_s3 + $0x8] sm:$0xff] (!%p922_p11)  ;;  %v728_v12 = vld [vmem:[%s1259_s3 + $0x10] sm:$0xff] (!%p922_p11)  ;;  %v729_v14 = vld [vmem:[%s1259_s3 + $0x18] sm:$0xff] (!%p922_p11) }
  0x36   : > { %973 = vmatprep.subr.bf16.mxu1 %v1041_v20 }
  0x37   : > { %936 = vmatpush3.bf16.msra.mxu0 %v1040_v19 }
  0x38   : > { %937 = vmatprep.subr.bf16.mxu0 %v1042_v21 }
  0x39   : > { %974 = vmatpush3.bf16.msra.mxu1 %v1041_v20 }
  0x3a   : > { %975 = vmatprep.subr.bf16.mxu1 %v1044_v22 }
  0x3b   : > { %938 = vmatpush3.bf16.msra.mxu0 %v1043_v23 }
  0x3c   : > { %939 = vmatprep.subr.bf16.mxu0 %v1045_v24 }
  0x3d   : > { %976 = vmatpush3.bf16.msra.mxu1 %v1044_v22 }
  0x3e   : > { %977 = vmatprep.subr.bf16.mxu1 %v1047_v25 }
  0x3f   : > { %940 = vmatpush3.bf16.msra.mxu0 %v1046_v26 }
  0x40   : > { %941 = vmatprep.subr.bf16.mxu0 %v1048_v27 }
  0x41   : > { %978 = vmatpush3.bf16.msra.mxu1 %v1047_v25 }
  0x42   : > { %979 = vmatprep.subr.bf16.mxu1 %v1050_v29 }
  0x43   : > { %942 = vmatpush3.bf16.msra.mxu0 %v1049_v28 }
  0x44   : > { %943 = vmatprep.subr.bf16.mxu0 %v1051_v30 }
  0x45   : > { %980 = vmatpush3.bf16.msra.mxu1 %v1050_v29 }
  0x46   : > { %981 = vmatprep.subr.bf16.mxu1 %v1053_v31 }
  0x47   : > { %944 = vmatpush3.bf16.msra.mxu0 %v1052_v34 }
  0x49   : > { %982 = vmatpush3.bf16.msra.mxu1 %v1053_v31 }
  0x4a   : > { %634 = vmatmul.mubr.bf16.vlgmr.msra.gmra.mrb[0].mxu0 %v1054_v35 }
  0x4b   : > { %641 = vmatprep.mubr.bf16.mxu0 %v1059_v36 }
  0x4c   : > { %984 = vmatmul.mubr.bf16.vlgmr.msra.gmra.mrb[0].mxu1 %v1058_v37 }
  0x52   : > { %642 = vmatmul.mubr.bf16.gmra.mrb[4].mxu0 %v1061_v38 }
 0x11d   : > { %v945_v39 = vpop.f32.mrb[0].mxu0 }
 0x11e   : > { %v946_v40 = vpop.f32.mrb[1].mxu0 }
 0x11f   : > { %v947_v41 = vadd.f32 %v946_v40, %v945_v39  ;;  %v948_v42 = vpop.f32.mrb[2].mxu0  ;;  %v985_v43 = vpop.f32.mrb[0].mxu1 }
 0x120   : > { %v949_v44 = vpop.f32.mrb[3].mxu0  ;;  %v684_v46 = vpop.f32.mrb[1].mxu1 }
 0x121   : > { %v950_v47 = vadd.f32 %v949_v44, %v948_v42  ;;  %v685_v48 = vadd.f32 %v947_v41, %v684_v46  ;;  %v986_v49 = vpop.f32.mrb[2].mxu1 }
 0x122   : > { %v687_v51 = vpop.f32.mrb[3].mxu1 }
 0x123   : > { %v699_v52 = vadd.f32 %v685_v48, %v365_v45  ;;  %v688_v53 = vadd.f32 %v950_v47, %v687_v51 }
 0x125   : > { %703 = vst [vmem:[#allocation2] sm:$0xff] %v699_v52  ;;  %v700_v54 = vadd.f32 %v688_v53, %v366_v50  ;;  %v951_v55 = vpop.f32.mrb[4].mxu0 }
 0x126   : > { %v952_v56 = vpop.f32.mrb[5].mxu0 }
 0x127   : > { %704 = vst [vmem:[#allocation2 + $0x8] sm:$0xff] %v700_v54  ;;  %v953_v57 = vadd.f32 %v952_v56, %v951_v55  ;;  %v954_v58 = vpop.f32.mrb[6].mxu0 }
 0x128   : > { %v955_v60 = vpop.f32.mrb[7].mxu0 }
 0x129   : > { %v693_v61 = vadd.f32 %v985_v43, %v953_v57  ;;  %v956_v62 = vadd.f32 %v955_v60, %v954_v58  ;;  %710 = sbr.rel (%p922_p11) target bundleno = 318 (0x13e), region = 70 }
 0x12b   : > { %v701_v0 = vadd.f32 %v693_v61, %v367_v59  ;;  %v696_v1 = vadd.f32 %v986_v49, %v956_v62 }
 0x12c   : > { %v711_v3 = vld [vmem:[#allocation2] sm:$0xff] (!%p922_p11) }
 0x12d   : > { %705 = vst [vmem:[#allocation2 + $0x10] sm:$0xff] %v701_v0  ;;  %v702_v2 = vadd.f32 %v696_v1, %v368_v63  ;;  %v722_v6 = vadd.f32 (!%p922_p11), %v923_v4, %v711_v3 }
 0x12e   : > { %v712_v7 = vld [vmem:[#allocation2 + $0x8] sm:$0xff] (!%p922_p11) }
 0x12f   : > { %706 = vst [vmem:[#allocation2 + $0x18] sm:$0xff] %v702_v2  ;;  %v723_v10 = vadd.f32 (!%p922_p11), %v923_v4, %v712_v7  ;;  %v730_v15 = vadd.f32 (!%p922_p11), %v726_v5, %v722_v6 }
 0x131   : > { %v731_v17 = vadd.f32 %v727_v8, %v723_v10  ;;  %v734_v19 = vmax.f32 %v730_v15, 0.0 }
 0x133   : > { %v735_v21 = vmax.f32 %v731_v17, 0.0  ;;  %738 = vst [vmem:[%s1260_s4] sm:$0xff] %v734_v19 }
 0x134   : > { %v713_v9 = vld [vmem:[#allocation2 + $0x10] sm:$0xff] }
 0x135   : > { %v724_v11 = vadd.f32 %v923_v4, %v713_v9  ;;  %739 = vst [vmem:[%s1260_s4 + $0x8] sm:$0xff] %v735_v21 }
 0x136   : > { %v714_v13 = vld [vmem:[#allocation2 + $0x18] sm:$0xff] }
 0x137   : > { %v725_v16 = vadd.f32 %v923_v4, %v714_v13  ;;  %v732_v18 = vadd.f32 %v728_v12, %v724_v11 }
 0x139   : > { %v733_v20 = vadd.f32 %v729_v14, %v725_v16  ;;  %v736_v22 = vmax.f32 %v732_v18, 0.0 }
 0x13b   : > { %v737_v23 = vmax.f32 %v733_v20, 0.0  ;;  %740 = vst [vmem:[%s1260_s4 + $0x10] sm:$0xff] %v736_v22 }
 0x13d   : > { %741 = vst [vmem:[%s1260_s4 + $0x18] sm:$0xff] %v737_v23 }
 0x13e PF: > { %s14_s19 = sadd.s32 1, %s1100_s19   ;;  %s1261_s15 = smov %s1088_s16 }
 0x13f   : > { %p11_p12 = scmp.ge.s32.totalorder %s14_s19, 5   ;;  %s1262_s16 = smov %s1163_s23 }
 0x140   : > { %s1263_s17 = smov %s1096_s18  ;;  %s1264_s18 = smov %s1266_s20 }
 0x141   :  { %13 = sbr.rel (!%p11_p12) target bundleno = 3 (0x3), region = 120 }

// kernel: resnet_triplet_forward.22
= control target key start
LH: loop header
LB: loop body
LE: loop exit
PB: predicated region body
PF: predicated region fallthrough
CT: control target
= control target key end

     0   :  { %s1137_s12 = smov 0   ;;  %s1139_s13 = smov 0   ;;  %s1274_s0 = inlined_call_operand.vmem [shape: bf16[16,1152], index: 0, kind: input, shape index: {}]   ;;  %s1275_s1 = inlined_call_operand.vmem [shape: bf16[1152,256], index: 1, kind: input, shape index: {}]   ;;  %s1276_s2 = inlined_call_operand.vmem [shape: f32[1,256], index: 2, kind: input, shape index: {}]   ;;  %s1277_s3 = inlined_call_operand.vmem [shape: f32[16,256], index: 3, kind: output, shape index: {}]  }
   0x1   :  { %s1141_s14 = smov 0   ;;  %s1143_s15 = smov 0  }
   0x2   :  { %s1145_s16 = smov 0  }
   0x3 LB: > { %s25_s17 = sadd.s32 1, %s1109_s15  ;;  %p48_p1 = scmp.ne.s32.totalorder %s1101_s13, %s1097_s12  ;;  %s1113_s16 = sphi %s1145_s16, %s13_s16   ;;  %s1109_s15 = sphi %s1143_s15, %s1281_s15   ;;  %s1105_s14 = sphi %s1141_s14, %s1280_s14   ;;  %s1101_s13 = sphi %s1139_s13, %s1279_s13   ;;  %s1097_s12 = sphi %s1137_s12, %s1278_s12  }
   0x4   : > { %p26_p0 = scmp.ge.s32.totalorder %s25_s17, 3  ;;  %p49_p2 = scmp.eq.s32.totalorder %s1113_s16, 0 }
   0x5   : > { %s41_s19 = sadd.s32 1, %s1101_s13  ;;  %p883_p5 = scmp.ge.s32.totalorder %s1113_s16, 3 }
   0x6   : > { %s1283_s17 = smov (%p26_p0, %s25_s17), 0  ;;  %p50_p3 = por %p49_p2, %p48_p1 }
   0x7   : > { %s37_s18 = ssub.s32 %s1109_s15, %s1283_s17  ;;  %164 = sbr.rel (%p883_p5) target bundleno = 21 (0x15), region = 20 }
   0x8   : > { %p39_p4 = scmp.eq.s32.totalorder %s37_s18, 0 }
   0xa   : > { %s1172_s20 = scalar_select %p39_p4, %s1101_s13, %s41_s19  }
   0xe   : > { %167 = sbr.rel (!%p50_p3) target bundleno = 21 (0x15), region = 24  ;;  %s169_s21 = sand.u32 (%p50_p3), 1, %s1101_s13  }
   0xf   : > { %s949_s22 = smul.u32 (%p50_p3), 12, %s1109_s15 }
  0x10   : > { %s955_s23 = smul.u32 (%p50_p3), 24, %s169_s21 }
  0x11   : > { %s177_s26 = scalar_lea.vmem (%p50_p3), %s1274_s0, %s949_s22 }
  0x12   : > { %v192_v0 = vld [vmem:[%s177_s26] sm:$0xff] (%p50_p3)  ;;  %v885_v2 = vld [vmem:[%s177_s26 + $0x8] sm:$0xf] (%p50_p3)  ;;  %s171_s27 = scalar_lea.vmem (%p50_p3), [#allocation3], %s955_s23  ;;  %v887_v3 = vld [vmem:[%s177_s26 + $0x2c] sm:$0xf] (%p50_p3) }
  0x13   : > { %v194_v1 = vld [vmem:[%s177_s26 + $0x24] sm:$0xff] (%p50_p3)  ;;  %193 = vst [vmem:[%s171_s27] sm:$0xff] (%p50_p3), %v192_v0  ;;  %886 = vst [vmem:[%s171_s27 + $0x8] sm:$0xf] (%p50_p3), %v885_v2 }
  0x14   : > { %195 = vst [vmem:[%s171_s27 + $0xc] sm:$0xff] (%p50_p3), %v194_v1  ;;  %888 = vst [vmem:[%s171_s27 + $0x14] sm:$0xf] (%p50_p3), %v887_v3 }
  0x15 PF: > { %p889_p6 = scmp.ge.s32.totalorder %s1113_s16, 1  ;;  %p226_p7 = scmp.lt.s32.totalorder %s1113_s16, 4 }
  0x17   : > { %p227_p8 = pnand %p889_p6, %p226_p7 }
  0x18   : > { %s233_s28 = sand.u32 (!%p227_p8), 1, %s1097_s12   ;;  %s277_s29 = smul.u32 (!%p227_p8), 48, %s1105_s14 }
  0x19   : > { %230 = sbr.rel (%p227_p8) target bundleno = 336 (0x150), region = 54  ;;  %p892_p10 = scmp.ne.s32.totalorder (!%p227_p8), %s1105_s14, 0 }
  0x1a   : > { %s956_s30 = smul.u32 (!%p227_p8), 24, %s233_s28  ;;  %p279_p9 = scmp.lt.s32.totalorder (!%p227_p8), %s277_s29, 143 }
  0x1c   : > { %s1189_s8 = scalar_lea.vmem (!%p227_p8), [#allocation3], %s956_s30 }
  0x20   : > { %s1285_s29 = smov (!%p279_p9, %s277_s29), 143  ;;  %310 = sbr.rel (%p892_p10) target bundleno = 39 (0x27), region = 62 }
  0x21   : > { %s950_s4 = sshll.u32 %s1285_s29, 3  ;;  %v1115_v4 = vmov (!%p892_p10), 0.0  }
  0x22   : > { %s1187_s7 = scalar_lea.vmem %s1275_s1, %s950_s4  ;;  %311 = vst [vmem:[#allocation2] sm:$0xff] (!%p892_p10), %v1115_v4  ;;  %312 = vst [vmem:[#allocation2 + $0x8] sm:$0xff] (!%p892_p10), %v1115_v4 }
  0x23   : > { %313 = vst [vmem:[#allocation2 + $0x10] sm:$0xff] (!%p892_p10), %v1115_v4  ;;  %314 = vst [vmem:[#allocation2 + $0x18] sm:$0xff] (!%p892_p10), %v1115_v4 }
  0x27 PF: > { %v999_v5 = vld [vmem:[%s1187_s7 + $0x4] ss:$8 sps:$4 sm:$0xff]   ;;  %v1001_v6 = vld [vmem:[%s1187_s7] ss:$8 sps:$4 sm:$0xff]   ;;  %v1116_v7 = vmov 0   ;;  %p944_p11 = scmp.ne.s32.totalorder %s1105_s14, 2 }
  0x28   : > { %702 = vmatprep.mubr.bf16.mxu0 %v1116_v7  ;;  %627 = vmatprep.subr.bf16.mxu1 %v999_v5  ;;  %v1002_v8 = vld [vmem:[%s1187_s7 + $0x14] ss:$8 sps:$4 sm:$0xff]   ;;  %v1004_v9 = vld [vmem:[%s1187_s7 + $0x10] ss:$8 sps:$4 sm:$0xff]   ;;  %v1005_v10 = vld [vmem:[%s1187_s7 + $0x24] ss:$8 sps:$4 sm:$0xff]  }
  0x29   : > { %628 = vmatpush1.bf16.msra.mxu1 %v1001_v6  ;;  %v1007_v11 = vld [vmem:[%s1187_s7 + $0x20] ss:$8 sps:$4 sm:$0xff]   ;;  %v1008_v12 = vld [vmem:[%s1187_s7 + $0x34] ss:$8 sps:$4 sm:$0xff]   ;;  %v1010_v13 = vld [vmem:[%s1187_s7 + $0x30] ss:$8 sps:$4 sm:$0xff]  }
  0x2a   : > { %629 = vmatprep.subr.bf16.mxu1 %v1002_v8  ;;  %v1023_v14 = vld [vmem:[%s1187_s7 + $0x104] ss:$8 sps:$4 sm:$0xff]   ;;  %v1025_v15 = vld [vmem:[%s1187_s7 + $0x100] ss:$8 sps:$4 sm:$0xff]   ;;  %v1029_v17 = vld [vmem:[%s1187_s7 + $0x114] ss:$8 sps:$4 sm:$0xff]  }
  0x2b   : > { %v1011_v16 = vld [vmem:[%s1187_s7 + $0x44] ss:$8 sps:$4 sm:$0xff]   ;;  %670 = vmatprep.subr.bf16.mxu0 %v1023_v14  ;;  %v1031_v18 = vld [vmem:[%s1187_s7 + $0x110] ss:$8 sps:$4 sm:$0xff]   ;;  %v1013_v19 = vld [vmem:[%s1187_s7 + $0x40] ss:$8 sps:$4 sm:$0xff]  }
  0x2c   : > { %671 = vmatpush1.bf16.msra.mxu0 %v1025_v15  ;;  %v1014_v20 = vld [vmem:[%s1187_s7 + $0x54] ss:$8 sps:$4 sm:$0xff]   ;;  %v1035_v21 = vld [vmem:[%s1187_s7 + $0x124] ss:$8 sps:$4 sm:$0xff]   ;;  %v1037_v22 = vld [vmem:[%s1187_s7 + $0x120] ss:$8 sps:$4 sm:$0xff]  }
  0x2d   : > { %630 = vmatpush1.bf16.msra.mxu1 %v1004_v9  ;;  %672 = vmatprep.subr.bf16.mxu0 %v1029_v17  ;;  %v1016_v23 = vld [vmem:[%s1187_s7 + $0x50] ss:$8 sps:$4 sm:$0xff]   ;;  %v1041_v24 = vld [vmem:[%s1187_s7 + $0x134] ss:$8 sps:$4 sm:$0xff]   ;;  %v1017_v25 = vld [vmem:[%s1187_s7 + $0x64] ss:$8 sps:$4 sm:$0xff]  }
  0x2e   : > { %631 = vmatprep.subr.bf16.mxu1 %v1005_v10  ;;  %v1043_v26 = vld [vmem:[%s1187_s7 + $0x130] ss:$8 sps:$4 sm:$0xff]   ;;  %v1019_v27 = vld [vmem:[%s1187_s7 + $0x60] ss:$8 sps:$4 sm:$0xff]   ;;  %v1047_v28 = vld [vmem:[%s1187_s7 + $0x144] ss:$8 sps:$4 sm:$0xff]  }
  0x2f   : > { %v1020_v29 = vld [vmem:[%s1187_s7 + $0x74] ss:$8 sps:$4 sm:$0xff]   ;;  %v1049_v30 = vld [vmem:[%s1187_s7 + $0x140] ss:$8 sps:$4 sm:$0xff]   ;;  %v1022_v31 = vld [vmem:[%s1187_s7 + $0x70] ss:$8 sps:$4 sm:$0xff]  }
  0x30   : > { %673 = vmatpush1.bf16.msra.mxu0 %v1031_v18  ;;  %v1053_v32 = vld [vmem:[%s1187_s7 + $0x154] ss:$8 sps:$4 sm:$0xff]   ;;  %v1026_v33 = vld [vmem:[%s1187_s7 + $0x84] ss:$8 sps:$4 sm:$0xff]   ;;  %v1055_v34 = vld [vmem:[%s1187_s7 + $0x150] ss:$8 sps:$4 sm:$0xff]  }
  0x31   : > { %632 = vmatpush1.bf16.msra.mxu1 %v1007_v11  ;;  %674 = vmatprep.subr.bf16.mxu0 %v1035_v21  ;;  %v1028_v35 = vld [vmem:[%s1187_s7 + $0x80] ss:$8 sps:$4 sm:$0xff]   ;;  %v1059_v36 = vld [vmem:[%s1187_s7 + $0x164] ss:$8 sps:$4 sm:$0xff]   ;;  %v1032_v37 = vld [vmem:[%s1187_s7 + $0x94] ss:$8 sps:$4 sm:$0xff]  }
  0x32   : > { %633 = vmatprep.subr.bf16.mxu1 %v1008_v12  ;;  %v1061_v38 = vld [vmem:[%s1187_s7 + $0x160] ss:$8 sps:$4 sm:$0xff]   ;;  %v1034_v40 = vld [vmem:[%s1187_s7 + $0x90] ss:$8 sps:$4 sm:$0xff]   ;;  %v1065_v41 = vld [vmem:[%s1187_s7 + $0x174] ss:$8 sps:$4 sm:$0xff]  }
  0x33   : > { %v1074_v39 = vld [vmem:[%s1189_s8 + $0x4] ss:$12 sps:$4 sm:$0xff]   ;;  %v1071_v46 = vld [vmem:[%s1189_s8 + $0x8] ss:$12 sps:$4 sm:$0xff]   ;;  %v1072_v56 = vld [vmem:[%s1189_s8] ss:$12 sps:$4 sm:$0xff]  }
  0x34   : > { %675 = vmatpush1.bf16.msra.mxu0 %v1037_v22  ;;  %v1038_v42 = vld [vmem:[%s1187_s7 + $0xa4] ss:$8 sps:$4 sm:$0xff]   ;;  %659 = vmatprep.mubr.bf16.mxu1 %v1074_v39  ;;  %v1067_v43 = vld [vmem:[%s1187_s7 + $0x170] ss:$8 sps:$4 sm:$0xff]   ;;  %v1040_v44 = vld [vmem:[%s1187_s7 + $0xa0] ss:$8 sps:$4 sm:$0xff]  }
  0x35   : > { %634 = vmatpush1.bf16.msra.mxu1 %v1010_v13  ;;  %676 = vmatprep.subr.bf16.mxu0 %v1041_v24  ;;  %v1044_v45 = vld [vmem:[%s1187_s7 + $0xb4] ss:$8 sps:$4 sm:$0xff]   ;;  %v1046_v47 = vld [vmem:[%s1187_s7 + $0xb0] ss:$8 sps:$4 sm:$0xff]   ;;  %v1050_v48 = vld [vmem:[%s1187_s7 + $0xc4] ss:$8 sps:$4 sm:$0xff]   ;;  %v731_v13 = vlaneseq (!%p944_p11) }
  0x36   : > { %635 = vmatprep.subr.bf16.mxu1 %v1011_v16  ;;  %v1052_v49 = vld [vmem:[%s1187_s7 + $0xc0] ss:$8 sps:$4 sm:$0xff]   ;;  %v1056_v50 = vld [vmem:[%s1187_s7 + $0xd4] ss:$8 sps:$4 sm:$0xff]   ;;  %v1058_v51 = vld [vmem:[%s1187_s7 + $0xd0] ss:$8 sps:$4 sm:$0xff]  }
  0x37   : > { %v1062_v52 = vld [vmem:[%s1187_s7 + $0xe4] ss:$8 sps:$4 sm:$0xff]   ;;  %v1064_v53 = vld [vmem:[%s1187_s7 + $0xe0] ss:$8 sps:$4 sm:$0xff]   ;;  %v1068_v54 = vld [vmem:[%s1187_s7 + $0xf4] ss:$8 sps:$4 sm:$0xff]  }
  0x38   : > { %677 = vmatpush1.bf16.msra.mxu0 %v1043_v26  ;;  %v1070_v55 = vld [vmem:[%s1187_s7 + $0xf0] ss:$8 sps:$4 sm:$0xff]   ;;  %v315_v61 = vld [vmem:[#allocation2] sm:$0xff]  ;;  %v316_v0 = vld [vmem:[#allocation2 + $0x8] sm:$0xff]  ;;  %v732_v14 = vshrl.u32 (!%p944_p11), %v731_v13, 7 }
  0x39   : > { %636 = vmatpush1.bf16.msra.mxu1 %v1013_v19  ;;  %678 = vmatprep.subr.bf16.mxu0 %v1047_v28  ;;  %v317_v3 = vld [vmem:[#allocation2 + $0x10] sm:$0xff]  ;;  %v318_v7 = vld [vmem:[#allocation2 + $0x18] sm:$0xff]  ;;  %v729_v15 = vld [vmem:[%s1276_s2] sm:$0x3] (!%p944_p11) }
  0x3a   : > { %637 = vmatprep.subr.bf16.mxu1 %v1014_v20  ;;  %v733_v17 = vsub.s32 (!%p944_p11), 0, %v732_v14  ;;  %v737_v18 = vsub.s32 (!%p944_p11), 1, %v732_v14 }
  0x3c   : > { %679 = vmatpush1.bf16.msra.mxu0 %v1049_v30  ;;  %v734_v22 = vrot.slane (!%p944_p11), %v729_v15, %v733_v17 }
  0x3d   : > { %638 = vmatpush1.bf16.msra.mxu1 %v1016_v23  ;;  %680 = vmatprep.subr.bf16.mxu0 %v1053_v32  ;;  %v738_v23 = vrot.slane (!%p944_p11), %v729_v15, %v737_v18 }
  0x3e   : > { %639 = vmatprep.subr.bf16.mxu1 %v1017_v25 }
  0x40   : > { %681 = vmatpush1.bf16.msra.mxu0 %v1055_v34 }
  0x41   : > { %640 = vmatpush1.bf16.msra.mxu1 %v1019_v27  ;;  %682 = vmatprep.subr.bf16.mxu0 %v1059_v36 }
  0x42   : > { %641 = vmatprep.subr.bf16.mxu1 %v1020_v29 }
  0x44   : > { %683 = vmatpush1.bf16.msra.mxu0 %v1061_v38 }
  0x45   : > { %642 = vmatpush1.bf16.msra.mxu1 %v1022_v31  ;;  %684 = vmatprep.subr.bf16.mxu0 %v1065_v41 }
  0x46   : > { %643 = vmatprep.subr.bf16.mxu1 %v1026_v33 }
  0x48   : > { %685 = vmatpush1.bf16.msra.mxu0 %v1067_v43 }
  0x49   : > { %644 = vmatpush1.bf16.msra.mxu1 %v1028_v35 }
  0x4a   : > { %645 = vmatprep.subr.bf16.mxu1 %v1032_v37 }
  0x4b   : > { %703 = vmatmul.mubr.bf16.vlgmr.msra.gmra.mrb[0].mxu0 %v1071_v46 }
  0x4d   : > { %646 = vmatpush1.bf16.msra.mxu1 %v1034_v40 }
  0x4e   : > { %647 = vmatprep.subr.bf16.mxu1 %v1038_v42 }
  0x51   : > { %648 = vmatpush1.bf16.msra.mxu1 %v1040_v44 }
  0x52   : > { %649 = vmatprep.subr.bf16.mxu1 %v1044_v45 }
  0x55   : > { %650 = vmatpush1.bf16.msra.mxu1 %v1046_v47 }
  0x56   : > { %651 = vmatprep.subr.bf16.mxu1 %v1050_v48 }
  0x59   : > { %652 = vmatpush1.bf16.msra.mxu1 %v1052_v49 }
  0x5a   : > { %653 = vmatprep.subr.bf16.mxu1 %v1056_v50 }
  0x5d   : > { %654 = vmatpush1.bf16.msra.mxu1 %v1058_v51 }
  0x5e   : > { %655 = vmatprep.subr.bf16.mxu1 %v1062_v52 }
  0x61   : > { %656 = vmatpush1.bf16.msra.mxu1 %v1064_v53 }
  0x62   : > { %657 = vmatprep.subr.bf16.mxu1 %v1068_v54 }
  0x65   : > { %658 = vmatpush1.bf16.msra.mxu1 %v1070_v55 }
  0x68   : > { %660 = vmatmul.mubr.bf16.vlgmr.msra.gmra.mrb[0].mxu1 %v1072_v56 }
 0x11e   : > { %v704_v57 = vpop.f32.mrb[0].mxu0 }
 0x11f   : > { %v706_v58 = vpop.f32.mrb[1].mxu0 }
 0x120   : > { %v708_v59 = vpop.f32.mrb[2].mxu0 }
 0x121   : > { %v710_v60 = vpop.f32.mrb[3].mxu0 }
 0x13b   : > { %v661_v62 = vpop.f32.mrb[0].mxu1 }
 0x13c   : > { %v705_v63 = vadd.f32 %v704_v57, %v661_v62  ;;  %v663_v1 = vpop.f32.mrb[1].mxu1 }
 0x13d   : > { %v707_v2 = vadd.f32 %v706_v58, %v663_v1  ;;  %v665_v4 = vpop.f32.mrb[2].mxu1  ;;  %724 = sbr.rel (%p944_p11) target bundleno = 336 (0x150), region = 66 }
 0x13e   : > { %v713_v5 = vadd.f32 %v705_v63, %v315_v61  ;;  %v709_v6 = vadd.f32 %v708_v59, %v665_v4  ;;  %v667_v8 = vpop.f32.mrb[3].mxu1 }
 0x13f   : > { %v714_v9 = vadd.f32 %v707_v2, %v316_v0  ;;  %v711_v10 = vadd.f32 %v710_v60, %v667_v8 }
 0x140   : > { %717 = vst [vmem:[#allocation2] sm:$0xff] %v713_v5  ;;  %v715_v11 = vadd.f32 %v709_v6, %v317_v3 }
 0x141   : > { %718 = vst [vmem:[#allocation2 + $0x8] sm:$0xff] %v714_v9  ;;  %v716_v12 = vadd.f32 %v711_v10, %v318_v7 }
 0x142   : > { %719 = vst [vmem:[#allocation2 + $0x10] sm:$0xff] %v715_v11 }
 0x143   : > { %720 = vst [vmem:[#allocation2 + $0x18] sm:$0xff] %v716_v12 }
 0x147   : > { %v725_v16 = vld [vmem:[#allocation2] sm:$0xff] }
 0x148   : > { %v726_v19 = vld [vmem:[#allocation2 + $0x8] sm:$0xff]  ;;  %v741_v24 = vadd.f32 %v734_v22, %v725_v16 }
 0x149   : > { %v727_v20 = vld [vmem:[#allocation2 + $0x10] sm:$0xff]  ;;  %v742_v25 = vadd.f32 %v738_v23, %v726_v19 }
 0x14a   : > { %v728_v21 = vld [vmem:[#allocation2 + $0x18] sm:$0xff]  ;;  %v743_v26 = vadd.f32 %v734_v22, %v727_v20  ;;  %v745_v28 = vmax.f32 %v741_v24, 0.0 }
 0x14b   : > { %v744_v27 = vadd.f32 %v738_v23, %v728_v21  ;;  %v746_v29 = vmax.f32 %v742_v25, 0.0 }
 0x14c   : > { %v747_v30 = vmax.f32 %v743_v26, 0.0  ;;  %749 = vst [vmem:[%s1277_s3] sm:$0xff] %v745_v28 }
 0x14d   : > { %v748_v31 = vmax.f32 %v744_v27, 0.0  ;;  %750 = vst [vmem:[%s1277_s3 + $0x8] sm:$0xff] %v746_v29 }
 0x14e   : > { %751 = vst [vmem:[%s1277_s3 + $0x10] sm:$0xff] %v747_v30 }
 0x14f   : > { %752 = vst [vmem:[%s1277_s3 + $0x18] sm:$0xff] %v748_v31 }
 0x150 PF: > { %s13_s16 = sadd.s32 1, %s1113_s16   ;;  %s1278_s12 = smov %s1101_s13 }
 0x151   : > { %p10_p12 = scmp.ge.s32.totalorder %s13_s16, 5   ;;  %s1279_s13 = smov %s1172_s20 }
 0x152   : > { %s1280_s14 = smov %s1109_s15  ;;  %s1281_s15 = smov %s1283_s17 }
 0x153   :  { %12 = sbr.rel (!%p10_p12) target bundleno = 3 (0x3), region = 113 }

// kernel: resnet_triplet_forward.21
= control target key start
LH: loop header
LB: loop body
LE: loop exit
PB: predicated region body
PF: predicated region fallthrough
CT: control target
= control target key end

     0   :  { %v256_v1 = vmov 0   ;;  %v191_v18 = vlaneseq  ;;  %s343_s1 = inlined_call_operand.vmem [shape: bf16[128,256], index: 1, kind: input, shape index: {}]   ;;  %s344_s0 = inlined_call_operand.vmem [shape: bf16[16,128], index: 0, kind: input, shape index: {}]   ;;  %s345_s2 = inlined_call_operand.vmem [shape: f32[1,256], index: 2, kind: input, shape index: {}]   ;;  %s346_s3 = inlined_call_operand.vmem [shape: f32[16,256], index: 3, kind: output, shape index: {}]  }
   0x1   :  { %v231_v0 = vld [vmem:[%s343_s1 + $0x4] ss:$8 sps:$4 sm:$0xff]   ;;  %163 = vmatprep.mubr.bf16.mxu0 %v256_v1  ;;  %v233_v2 = vld [vmem:[%s343_s1] ss:$8 sps:$4 sm:$0xff]   ;;  %v234_v3 = vld [vmem:[%s343_s1 + $0x14] ss:$8 sps:$4 sm:$0xff]  }
   0x2   :  { %131 = vmatprep.subr.bf16.mxu0 %v231_v0  ;;  %v236_v4 = vld [vmem:[%s343_s1 + $0x10] ss:$8 sps:$4 sm:$0xff]   ;;  %v237_v5 = vld [vmem:[%s343_s1 + $0x24] ss:$8 sps:$4 sm:$0xff]   ;;  %v239_v6 = vld [vmem:[%s343_s1 + $0x20] ss:$8 sps:$4 sm:$0xff]  }
   0x3   :  { %132 = vmatpush1.bf16.msra.mxu0 %v233_v2  ;;  %v240_v7 = vld [vmem:[%s343_s1 + $0x34] ss:$8 sps:$4 sm:$0xff]   ;;  %v242_v8 = vld [vmem:[%s343_s1 + $0x30] ss:$8 sps:$4 sm:$0xff]   ;;  %v243_v9 = vld [vmem:[%s343_s1 + $0x44] ss:$8 sps:$4 sm:$0xff]  }
   0x4   :  { %133 = vmatprep.subr.bf16.mxu0 %v234_v3  ;;  %v245_v10 = vld [vmem:[%s343_s1 + $0x40] ss:$8 sps:$4 sm:$0xff]   ;;  %v246_v11 = vld [vmem:[%s343_s1 + $0x54] ss:$8 sps:$4 sm:$0xff]   ;;  %v248_v12 = vld [vmem:[%s343_s1 + $0x50] ss:$8 sps:$4 sm:$0xff]  }
   0x5   :  { %v249_v13 = vld [vmem:[%s343_s1 + $0x64] ss:$8 sps:$4 sm:$0xff]   ;;  %v251_v14 = vld [vmem:[%s343_s1 + $0x60] ss:$8 sps:$4 sm:$0xff]   ;;  %v252_v15 = vld [vmem:[%s343_s1 + $0x74] ss:$8 sps:$4 sm:$0xff]  }
   0x6   :  { %v254_v16 = vld [vmem:[%s343_s1 + $0x70] ss:$8 sps:$4 sm:$0xff]   ;;  %v255_v17 = vld [vmem:[%s344_s0] sm:$0xff]   ;;  %v192_v19 = vshrl.u32 %v191_v18, 7 }
   0x7   :  { %134 = vmatpush1.bf16.msra.mxu0 %v236_v4  ;;  %v189_v21 = vld [vmem:[%s345_s2] sm:$0x3] }
   0x8   :  { %135 = vmatprep.subr.bf16.mxu0 %v237_v5  ;;  %v193_v20 = vsub.s32 0, %v192_v19  ;;  %v197_v22 = vsub.s32 1, %v192_v19 }
   0xa   :  { %v194_v23 = vrot.slane %v189_v21, %v193_v20  ;;  %v198_v24 = vrot.slane %v189_v21, %v197_v22 }
   0xb   :  { %136 = vmatpush1.bf16.msra.mxu0 %v239_v6 }
   0xc   :  { %137 = vmatprep.subr.bf16.mxu0 %v240_v7 }
   0xf   :  { %138 = vmatpush1.bf16.msra.mxu0 %v242_v8 }
  0x10   :  { %139 = vmatprep.subr.bf16.mxu0 %v243_v9 }
  0x13   :  { %140 = vmatpush1.bf16.msra.mxu0 %v245_v10 }
  0x14   :  { %141 = vmatprep.subr.bf16.mxu0 %v246_v11 }
  0x17   :  { %142 = vmatpush1.bf16.msra.mxu0 %v248_v12 }
  0x18   :  { %143 = vmatprep.subr.bf16.mxu0 %v249_v13 }
  0x1b   :  { %144 = vmatpush1.bf16.msra.mxu0 %v251_v14 }
  0x1c   :  { %145 = vmatprep.subr.bf16.mxu0 %v252_v15 }
  0x1f   :  { %146 = vmatpush1.bf16.msra.mxu0 %v254_v16 }
  0x22   :  { %164 = vmatmul.mubr.bf16.vlgmr.msra.gmra.mrb[0].mxu0 %v255_v17 }
  0xf5   :  { %v165_v25 = vpop.f32.mrb[0].mxu0 }
  0xf6   :  { %v201_v26 = vadd.f32 %v194_v23, %v165_v25  ;;  %v167_v27 = vpop.f32.mrb[1].mxu0 }
  0xf7   :  { %v202_v28 = vadd.f32 %v198_v24, %v167_v27  ;;  %v169_v29 = vpop.f32.mrb[2].mxu0 }
  0xf8   :  { %205 = vst [vmem:[%s346_s3] sm:$0xff] %v201_v26  ;;  %v203_v30 = vadd.f32 %v194_v23, %v169_v29  ;;  %v171_v31 = vpop.f32.mrb[3].mxu0 }
  0xf9   :  { %206 = vst [vmem:[%s346_s3 + $0x8] sm:$0xff] %v202_v28  ;;  %v204_v32 = vadd.f32 %v198_v24, %v171_v31 }
  0xfa   :  { %207 = vst [vmem:[%s346_s3 + $0x10] sm:$0xff] %v203_v30 }
  0xfb   :  { %208 = vst [vmem:[%s346_s3 + $0x18] sm:$0xff] %v204_v32 }

// kernel: resnet_triplet_forward.23
= control target key start
LH: loop header
LB: loop body
LE: loop exit
PB: predicated region body
PF: predicated region fallthrough
CT: control target
= control target key end

     0   :  { %s1703_s15 = smov 0   ;;  %s1705_s16 = smov 0   ;;  %s1903_s0 = inlined_call_operand.vmem [shape: bf16[16,2304], index: 0, kind: input, shape index: {}]   ;;  %s1904_s1 = inlined_call_operand.vmem [shape: bf16[2304,256], index: 1, kind: input, shape index: {}]   ;;  %s1905_s2 = inlined_call_operand.vmem [shape: f32[1,256], index: 2, kind: input, shape index: {}]   ;;  %s1906_s3 = inlined_call_operand.vmem [shape: f32[16,256], index: 3, kind: input, shape index: {}]   ;;  %s1907_s4 = inlined_call_operand.vmem [shape: f32[16,256], index: 4, kind: output, shape index: {}]  }
   0x1   :  { %s1707_s17 = smov 0   ;;  %s1709_s18 = smov 0  }
   0x2   :  { %s1711_s19 = smov 0  }
   0x3 LB: > { %s26_s20 = sadd.s32 1, %s1671_s18  ;;  %p49_p1 = scmp.ne.s32.totalorder %s1663_s16, %s1659_s15  ;;  %s1675_s19 = sphi %s1711_s19, %s14_s19   ;;  %s1671_s18 = sphi %s1709_s18, %s1911_s18   ;;  %s1667_s17 = sphi %s1707_s17, %s1910_s17   ;;  %s1663_s16 = sphi %s1705_s16, %s1909_s16   ;;  %s1659_s15 = sphi %s1703_s15, %s1908_s15  }
   0x4   : > { %p27_p0 = scmp.ge.s32.totalorder %s26_s20, 3  ;;  %p50_p2 = scmp.eq.s32.totalorder %s1675_s19, 0 }
   0x5   : > { %s42_s22 = sadd.s32 1, %s1663_s16  ;;  %p1318_p5 = scmp.ge.s32.totalorder %s1675_s19, 3 }
   0x6   : > { %s1913_s20 = smov (%p27_p0, %s26_s20), 0  ;;  %p51_p3 = por %p50_p2, %p49_p1 }
   0x7   : > { %s38_s21 = ssub.s32 %s1671_s18, %s1913_s20  ;;  %208 = sbr.rel (%p1318_p5) target bundleno = 22 (0x16), region = 24 }
   0x8   : > { %p40_p4 = scmp.eq.s32.totalorder %s38_s21, 0 }
   0xa   : > { %s1738_s23 = scalar_select %p40_p4, %s1663_s16, %s42_s22  }
   0xe   : > { %211 = sbr.rel (!%p51_p3) target bundleno = 22 (0x16), region = 28  ;;  %s213_s24 = sand.u32 (%p51_p3), 1, %s1663_s16  }
   0xf   : > { %s1431_s25 = smul.u32 (%p51_p3), 24, %s1671_s18 }
  0x10   : > { %s1441_s26 = smul.u32 (%p51_p3), 48, %s213_s24 }
  0x11   : > { %s221_s29 = scalar_lea.vmem (%p51_p3), %s1903_s0, %s1431_s25 }
  0x12   : > { %v234_v0 = vld [vmem:[%s221_s29] sm:$0xff] (%p51_p3)  ;;  %v236_v1 = vld [vmem:[%s221_s29 + $0x8] sm:$0xff] (%p51_p3)  ;;  %v238_v2 = vld [vmem:[%s221_s29 + $0x10] sm:$0xff] (%p51_p3)  ;;  %s215_s30 = scalar_lea.vmem (%p51_p3), [#allocation3], %s1441_s26 }
  0x13   : > { %235 = vst [vmem:[%s215_s30] sm:$0xff] (%p51_p3), %v234_v0  ;;  %237 = vst [vmem:[%s215_s30 + $0x8] sm:$0xff] (%p51_p3), %v236_v1  ;;  %v240_v3 = vld [vmem:[%s221_s29 + $0x48] sm:$0xff] (%p51_p3)  ;;  %v242_v4 = vld [vmem:[%s221_s29 + $0x50] sm:$0xff] (%p51_p3) }
  0x14   : > { %239 = vst [vmem:[%s215_s30 + $0x10] sm:$0xff] (%p51_p3), %v238_v2  ;;  %v244_v5 = vld [vmem:[%s221_s29 + $0x58] sm:$0xff] (%p51_p3)  ;;  %241 = vst [vmem:[%s215_s30 + $0x18] sm:$0xff] (%p51_p3), %v240_v3 }
  0x15   : > { %243 = vst [vmem:[%s215_s30 + $0x20] sm:$0xff] %v242_v4  ;;  %245 = vst [vmem:[%s215_s30 + $0x28] sm:$0xff] %v244_v5 }
  0x16 PF: > { %p1320_p6 = scmp.ge.s32.totalorder %s1675_s19, 1  ;;  %p265_p7 = scmp.lt.s32.totalorder %s1675_s19, 4 }
  0x18   : > { %p266_p8 = pnand %p1320_p6, %p265_p7 }
  0x19   : > { %s272_s5 = sand.u32 (!%p266_p8), 1, %s1659_s15   ;;  %s328_s6 = smul.u32 (!%p266_p8), 96, %s1667_s17 }
  0x1a   : > { %269 = sbr.rel (%p266_p8) target bundleno = 403 (0x193), region = 55  ;;  %p1323_p10 = scmp.ne.s32.totalorder (!%p266_p8), %s1667_s17, 0 }
  0x1b   : > { %s1442_s7 = smul.u32 (!%p266_p8), 48, %s272_s5  ;;  %p330_p9 = scmp.lt.s32.totalorder (!%p266_p8), %s328_s6, 287 }
  0x1d   : > { %s1755_s12 = scalar_lea.vmem (!%p266_p8), [#allocation3], %s1442_s7 }
  0x21   : > { %s1915_s6 = smov (!%p330_p9, %s328_s6), 287  ;;  %372 = sbr.rel (%p1323_p10) target bundleno = 40 (0x28), region = 63 }
  0x22   : > { %s1432_s8 = sshll.u32 %s1915_s6, 3  ;;  %v1677_v6 = vmov (!%p1323_p10), 0.0  }
  0x23   : > { %s1753_s11 = scalar_lea.vmem %s1904_s1, %s1432_s8  ;;  %373 = vst [vmem:[#allocation2] sm:$0xff] (!%p1323_p10), %v1677_v6  ;;  %374 = vst [vmem:[#allocation2 + $0x8] sm:$0xff] (!%p1323_p10), %v1677_v6 }
  0x24   : > { %375 = vst [vmem:[#allocation2 + $0x10] sm:$0xff] (!%p1323_p10), %v1677_v6  ;;  %376 = vst [vmem:[#allocation2 + $0x18] sm:$0xff] (!%p1323_p10), %v1677_v6 }
  0x28 PF: > { %v1484_v7 = vld [vmem:[%s1753_s11 + $0x104] ss:$8 sps:$4 sm:$0xff]   ;;  %v1486_v8 = vld [vmem:[%s1753_s11 + $0x100] ss:$8 sps:$4 sm:$0xff]   ;;  %v1487_v9 = vld [vmem:[%s1753_s11 + $0x114] ss:$8 sps:$4 sm:$0xff]  }
  0x29   : > { %1036 = vmatprep.subr.bf16.mxu0 %v1484_v7  ;;  %v1489_v10 = vld [vmem:[%s1753_s11 + $0x110] ss:$8 sps:$4 sm:$0xff]   ;;  %v1490_v11 = vld [vmem:[%s1753_s11 + $0x124] ss:$8 sps:$4 sm:$0xff]   ;;  %v1492_v12 = vld [vmem:[%s1753_s11 + $0x120] ss:$8 sps:$4 sm:$0xff]  }
  0x2a   : > { %1037 = vmatpush1.bf16.msra.mxu0 %v1486_v8  ;;  %v1493_v13 = vld [vmem:[%s1753_s11 + $0x134] ss:$8 sps:$4 sm:$0xff]   ;;  %v1495_v14 = vld [vmem:[%s1753_s11 + $0x130] ss:$8 sps:$4 sm:$0xff]   ;;  %v1496_v15 = vld [vmem:[%s1753_s11 + $0x144] ss:$8 sps:$4 sm:$0xff]  }
  0x2b   : > { %1038 = vmatprep.subr.bf16.mxu0 %v1487_v9  ;;  %v1498_v16 = vld [vmem:[%s1753_s11 + $0x140] ss:$8 sps:$4 sm:$0xff]   ;;  %v1499_v17 = vld [vmem:[%s1753_s11 + $0x154] ss:$8 sps:$4 sm:$0xff]   ;;  %v1501_v18 = vld [vmem:[%s1753_s11 + $0x150] ss:$8 sps:$4 sm:$0xff]  }
  0x2c   : > { %v1502_v19 = vld [vmem:[%s1753_s11 + $0x164] ss:$8 sps:$4 sm:$0xff]   ;;  %v1534_v21 = vld [vmem:[%s1753_s11] ss:$8 sps:$4 sm:$0xff]   ;;  %v1505_v24 = vld [vmem:[%s1753_s11 + $0x174] ss:$8 sps:$4 sm:$0xff]  }
  0x2d   : > { %v1531_v20 = vld [vmem:[%s1753_s11 + $0x4] ss:$8 sps:$4 sm:$0xff]   ;;  %v1504_v22 = vld [vmem:[%s1753_s11 + $0x160] ss:$8 sps:$4 sm:$0xff]   ;;  %v1541_v25 = vld [vmem:[%s1753_s11 + $0x14] ss:$8 sps:$4 sm:$0xff]  }
  0x2e   : > { %1039 = vmatpush1.bf16.msra.mxu0 %v1489_v10  ;;  %993 = vmatprep.subr.bf16.mxu1 %v1531_v20  ;;  %v1537_v23 = vld [vmem:[%s1755_s12 + $0xc] ss:$24 sps:$4 sm:$0xff]   ;;  %v1543_v26 = vld [vmem:[%s1753_s11 + $0x10] ss:$8 sps:$4 sm:$0xff]   ;;  %v1549_v30 = vld [vmem:[%s1753_s11 + $0x20] ss:$8 sps:$4 sm:$0xff]  }
  0x2f   : > { %1040 = vmatprep.subr.bf16.mxu0 %v1490_v11  ;;  %994 = vmatpush1.bf16.msra.mxu1 %v1534_v21  ;;  %v1507_v27 = vld [vmem:[%s1753_s11 + $0x170] ss:$8 sps:$4 sm:$0xff]   ;;  %v1508_v28 = vld [vmem:[%s1753_s11 + $0x184] ss:$8 sps:$4 sm:$0xff]   ;;  %v1510_v31 = vld [vmem:[%s1753_s11 + $0x180] ss:$8 sps:$4 sm:$0xff]  }
  0x30   : > { %1068 = vmatprep.mubr.bf16.mxu0 %v1537_v23  ;;  %995 = vmatprep.subr.bf16.mxu1 %v1541_v25  ;;  %v1547_v29 = vld [vmem:[%s1753_s11 + $0x24] ss:$8 sps:$4 sm:$0xff]   ;;  %v1553_v32 = vld [vmem:[%s1753_s11 + $0x34] ss:$8 sps:$4 sm:$0xff]   ;;  %v1555_v34 = vld [vmem:[%s1753_s11 + $0x30] ss:$8 sps:$4 sm:$0xff]  }
  0x31   : > { %v1511_v33 = vld [vmem:[%s1753_s11 + $0x194] ss:$8 sps:$4 sm:$0xff]   ;;  %v1559_v35 = vld [vmem:[%s1753_s11 + $0x44] ss:$8 sps:$4 sm:$0xff]   ;;  %v1513_v36 = vld [vmem:[%s1753_s11 + $0x190] ss:$8 sps:$4 sm:$0xff]  }
  0x32   : > { %1041 = vmatpush1.bf16.msra.mxu0 %v1492_v12  ;;  %v1514_v37 = vld [vmem:[%s1753_s11 + $0x1a4] ss:$8 sps:$4 sm:$0xff]   ;;  %v1561_v38 = vld [vmem:[%s1753_s11 + $0x40] ss:$8 sps:$4 sm:$0xff]   ;;  %v1565_v39 = vld [vmem:[%s1753_s11 + $0x54] ss:$8 sps:$4 sm:$0xff]  }
  0x33   : > { %1042 = vmatprep.subr.bf16.mxu0 %v1493_v13  ;;  %996 = vmatpush1.bf16.msra.mxu1 %v1543_v26  ;;  %v1516_v40 = vld [vmem:[%s1753_s11 + $0x1a0] ss:$8 sps:$4 sm:$0xff]   ;;  %v1517_v41 = vld [vmem:[%s1753_s11 + $0x1b4] ss:$8 sps:$4 sm:$0xff]   ;;  %v1567_v42 = vld [vmem:[%s1753_s11 + $0x50] ss:$8 sps:$4 sm:$0xff]  }
  0x34   : > { %997 = vmatprep.subr.bf16.mxu1 %v1547_v29  ;;  %v1571_v43 = vld [vmem:[%s1753_s11 + $0x64] ss:$8 sps:$4 sm:$0xff]   ;;  %v1519_v44 = vld [vmem:[%s1753_s11 + $0x1b0] ss:$8 sps:$4 sm:$0xff]   ;;  %v1573_v46 = vld [vmem:[%s1753_s11 + $0x60] ss:$8 sps:$4 sm:$0xff]  }
  0x35   : > { %v1520_v45 = vld [vmem:[%s1753_s11 + $0x1c4] ss:$8 sps:$4 sm:$0xff]   ;;  %v1577_v47 = vld [vmem:[%s1753_s11 + $0x74] ss:$8 sps:$4 sm:$0xff]   ;;  %v1522_v48 = vld [vmem:[%s1753_s11 + $0x1c0] ss:$8 sps:$4 sm:$0xff]  }
  0x36   : > { %1043 = vmatpush1.bf16.msra.mxu0 %v1495_v14  ;;  %v1523_v49 = vld [vmem:[%s1753_s11 + $0x1d4] ss:$8 sps:$4 sm:$0xff]   ;;  %v1579_v50 = vld [vmem:[%s1753_s11 + $0x70] ss:$8 sps:$4 sm:$0xff]   ;;  %v1583_v51 = vld [vmem:[%s1753_s11 + $0x84] ss:$8 sps:$4 sm:$0xff]  }
  0x37   : > { %1044 = vmatprep.subr.bf16.mxu0 %v1496_v15  ;;  %998 = vmatpush1.bf16.msra.mxu1 %v1549_v30  ;;  %v1525_v52 = vld [vmem:[%s1753_s11 + $0x1d0] ss:$8 sps:$4 sm:$0xff]   ;;  %v1526_v53 = vld [vmem:[%s1753_s11 + $0x1e4] ss:$8 sps:$4 sm:$0xff]   ;;  %v1585_v54 = vld [vmem:[%s1753_s11 + $0x80] ss:$8 sps:$4 sm:$0xff]  }
  0x38   : > { %999 = vmatprep.subr.bf16.mxu1 %v1553_v32  ;;  %v1589_v55 = vld [vmem:[%s1753_s11 + $0x94] ss:$8 sps:$4 sm:$0xff]   ;;  %v1528_v56 = vld [vmem:[%s1753_s11 + $0x1e0] ss:$8 sps:$4 sm:$0xff]   ;;  %v1591_v58 = vld [vmem:[%s1753_s11 + $0x90] ss:$8 sps:$4 sm:$0xff]  }
  0x39   : > { %v1529_v57 = vld [vmem:[%s1753_s11 + $0x1f4] ss:$8 sps:$4 sm:$0xff]   ;;  %v1595_v59 = vld [vmem:[%s1753_s11 + $0xa4] ss:$8 sps:$4 sm:$0xff]   ;;  %v1533_v60 = vld [vmem:[%s1753_s11 + $0x1f0] ss:$8 sps:$4 sm:$0xff]  }
  0x3a   : > { %1045 = vmatpush1.bf16.msra.mxu0 %v1498_v16  ;;  %v1540_v61 = vld [vmem:[%s1753_s11 + $0x204] ss:$8 sps:$4 sm:$0xff]   ;;  %v1597_v62 = vld [vmem:[%s1753_s11 + $0xa0] ss:$8 sps:$4 sm:$0xff]   ;;  %v1601_v0 = vld [vmem:[%s1753_s11 + $0xb4] ss:$8 sps:$4 sm:$0xff]  }
  0x3b   : > { %1046 = vmatprep.subr.bf16.mxu0 %v1499_v17  ;;  %1000 = vmatpush1.bf16.msra.mxu1 %v1555_v34  ;;  %v1535_v63 = vld [vmem:[%s1755_s12 + $0x8] ss:$24 sps:$4 sm:$0xff]   ;;  %v1546_v2 = vld [vmem:[%s1753_s11 + $0x214] ss:$8 sps:$4 sm:$0xff]   ;;  %v1607_v5 = vld [vmem:[%s1753_s11 + $0xc4] ss:$8 sps:$4 sm:$0xff]  }
  0x3c   : > { %1001 = vmatprep.subr.bf16.mxu1 %v1559_v35  ;;  %v1538_v1 = vld [vmem:[%s1753_s11 + $0x200] ss:$8 sps:$4 sm:$0xff]   ;;  %v1603_v3 = vld [vmem:[%s1753_s11 + $0xb0] ss:$8 sps:$4 sm:$0xff]   ;;  %v1630_v4 = vld [vmem:[%s1755_s12 + $0x4] ss:$24 sps:$4 sm:$0xff]  }
  0x3d   : > { %v1544_v6 = vld [vmem:[%s1753_s11 + $0x210] ss:$8 sps:$4 sm:$0xff]   ;;  %1025 = vmatprep.mubr.bf16.mxu1 %v1630_v4  ;;  %v1636_v7 = vld [vmem:[%s1755_s12 + $0x14] ss:$24 sps:$4 sm:$0xff]   ;;  %v1609_v9 = vld [vmem:[%s1753_s11 + $0xc0] ss:$8 sps:$4 sm:$0xff]  }
  0x3e   : > { %1047 = vmatpush1.bf16.msra.mxu0 %v1501_v18  ;;  %v1552_v8 = vld [vmem:[%s1753_s11 + $0x224] ss:$8 sps:$4 sm:$0xff]   ;;  %v1613_v10 = vld [vmem:[%s1753_s11 + $0xd4] ss:$8 sps:$4 sm:$0xff]   ;;  %v1550_v11 = vld [vmem:[%s1753_s11 + $0x220] ss:$8 sps:$4 sm:$0xff]  }
  0x3f   : > { %1048 = vmatprep.subr.bf16.mxu0 %v1502_v19  ;;  %1002 = vmatpush1.bf16.msra.mxu1 %v1561_v38  ;;  %v1558_v12 = vld [vmem:[%s1753_s11 + $0x234] ss:$8 sps:$4 sm:$0xff]   ;;  %v1615_v13 = vld [vmem:[%s1753_s11 + $0xd0] ss:$8 sps:$4 sm:$0xff]   ;;  %v1619_v14 = vld [vmem:[%s1753_s11 + $0xe4] ss:$8 sps:$4 sm:$0xff]  }
  0x40   : > { %1003 = vmatprep.subr.bf16.mxu1 %v1565_v39  ;;  %v1556_v15 = vld [vmem:[%s1753_s11 + $0x230] ss:$8 sps:$4 sm:$0xff]   ;;  %v1564_v16 = vld [vmem:[%s1753_s11 + $0x244] ss:$8 sps:$4 sm:$0xff]   ;;  %v1621_v17 = vld [vmem:[%s1753_s11 + $0xe0] ss:$8 sps:$4 sm:$0xff]  }
  0x41   : > { %v1625_v18 = vld [vmem:[%s1753_s11 + $0xf4] ss:$8 sps:$4 sm:$0xff]   ;;  %v1562_v19 = vld [vmem:[%s1753_s11 + $0x240] ss:$8 sps:$4 sm:$0xff]   ;;  %v1627_v21 = vld [vmem:[%s1753_s11 + $0xf0] ss:$8 sps:$4 sm:$0xff]  }
  0x42   : > { %1049 = vmatpush1.bf16.msra.mxu0 %v1504_v22  ;;  %v1570_v20 = vld [vmem:[%s1753_s11 + $0x254] ss:$8 sps:$4 sm:$0xff]   ;;  %v1568_v22 = vld [vmem:[%s1753_s11 + $0x250] ss:$8 sps:$4 sm:$0xff]   ;;  %v1576_v23 = vld [vmem:[%s1753_s11 + $0x264] ss:$8 sps:$4 sm:$0xff]  }
  0x43   : > { %1050 = vmatprep.subr.bf16.mxu0 %v1505_v24  ;;  %1004 = vmatpush1.bf16.msra.mxu1 %v1567_v42  ;;  %v1628_v24 = vld [vmem:[%s1755_s12] ss:$24 sps:$4 sm:$0xff]   ;;  %v1582_v26 = vld [vmem:[%s1753_s11 + $0x274] ss:$8 sps:$4 sm:$0xff]   ;;  %v1600_v32 = vld [vmem:[%s1753_s11 + $0x2a4] ss:$8 sps:$4 sm:$0xff]  }
  0x44   : > { %1005 = vmatprep.subr.bf16.mxu1 %v1571_v43  ;;  %v1574_v25 = vld [vmem:[%s1753_s11 + $0x260] ss:$8 sps:$4 sm:$0xff]   ;;  %v1594_v30 = vld [vmem:[%s1753_s11 + $0x294] ss:$8 sps:$4 sm:$0xff]   ;;  %v1604_v35 = vld [vmem:[%s1753_s11 + $0x2b0] ss:$8 sps:$4 sm:$0xff]  }
  0x45   : > { %v1586_v29 = vld [vmem:[%s1753_s11 + $0x280] ss:$8 sps:$4 sm:$0xff]   ;;  %v1606_v34 = vld [vmem:[%s1753_s11 + $0x2b4] ss:$8 sps:$4 sm:$0xff]   ;;  %v1616_v39 = vld [vmem:[%s1753_s11 + $0x2d0] ss:$8 sps:$4 sm:$0xff]  }
  0x46   : > { %1051 = vmatpush1.bf16.msra.mxu0 %v1507_v27  ;;  %v1580_v27 = vld [vmem:[%s1753_s11 + $0x270] ss:$8 sps:$4 sm:$0xff]   ;;  %v1618_v38 = vld [vmem:[%s1753_s11 + $0x2d4] ss:$8 sps:$4 sm:$0xff]   ;;  %p1426_p11 = scmp.ne.s32.totalorder %s1667_s17, 2 }
  0x47   : > { %1052 = vmatprep.subr.bf16.mxu0 %v1508_v28  ;;  %1006 = vmatpush1.bf16.msra.mxu1 %v1573_v46  ;;  %v1588_v28 = vld [vmem:[%s1753_s11 + $0x284] ss:$8 sps:$4 sm:$0xff]   ;;  %v1633_v42 = vld [vmem:[%s1753_s11 + $0x2f4] ss:$8 sps:$4 sm:$0xff]   ;;  %v1631_v43 = vld [vmem:[%s1753_s11 + $0x2f0] ss:$8 sps:$4 sm:$0xff]  }
  0x48   : > { %1007 = vmatprep.subr.bf16.mxu1 %v1577_v47 }
  0x4a   : > { %1053 = vmatpush1.bf16.msra.mxu0 %v1510_v31  ;;  %v1592_v31 = vld [vmem:[%s1753_s11 + $0x290] ss:$8 sps:$4 sm:$0xff]  }
  0x4b   : > { %1054 = vmatprep.subr.bf16.mxu0 %v1511_v33  ;;  %1008 = vmatpush1.bf16.msra.mxu1 %v1579_v50  ;;  %v1598_v33 = vld [vmem:[%s1753_s11 + $0x2a0] ss:$8 sps:$4 sm:$0xff]  }
  0x4c   : > { %1009 = vmatprep.subr.bf16.mxu1 %v1583_v51 }
  0x4e   : > { %1055 = vmatpush1.bf16.msra.mxu0 %v1513_v36  ;;  %v1612_v36 = vld [vmem:[%s1753_s11 + $0x2c4] ss:$8 sps:$4 sm:$0xff]  }
  0x4f   : > { %1056 = vmatprep.subr.bf16.mxu0 %v1514_v37  ;;  %1010 = vmatpush1.bf16.msra.mxu1 %v1585_v54  ;;  %v1610_v37 = vld [vmem:[%s1753_s11 + $0x2c0] ss:$8 sps:$4 sm:$0xff]  }
  0x50   : > { %1011 = vmatprep.subr.bf16.mxu1 %v1589_v55  ;;  %v379_v55 = vld [vmem:[#allocation2 + $0x10] sm:$0xff] }
  0x52   : > { %1057 = vmatpush1.bf16.msra.mxu0 %v1516_v40  ;;  %v1624_v40 = vld [vmem:[%s1753_s11 + $0x2e4] ss:$8 sps:$4 sm:$0xff]  }
  0x53   : > { %1058 = vmatprep.subr.bf16.mxu0 %v1517_v41  ;;  %1012 = vmatpush1.bf16.msra.mxu1 %v1591_v58  ;;  %v1622_v41 = vld [vmem:[%s1753_s11 + $0x2e0] ss:$8 sps:$4 sm:$0xff]  }
  0x54   : > { %1013 = vmatprep.subr.bf16.mxu1 %v1595_v59  ;;  %v380_v59 = vld [vmem:[#allocation2 + $0x18] sm:$0xff] }
  0x56   : > { %1059 = vmatpush1.bf16.msra.mxu0 %v1519_v44  ;;  %v1634_v44 = vld [vmem:[%s1755_s12 + $0x10] ss:$24 sps:$4 sm:$0xff]  }
  0x57   : > { %1060 = vmatprep.subr.bf16.mxu0 %v1520_v45  ;;  %1014 = vmatpush1.bf16.msra.mxu1 %v1597_v62 }
  0x58   : > { %1015 = vmatprep.subr.bf16.mxu1 %v1601_v0 }
  0x5a   : > { %1061 = vmatpush1.bf16.msra.mxu0 %v1522_v48 }
  0x5b   : > { %1062 = vmatprep.subr.bf16.mxu0 %v1523_v49  ;;  %1016 = vmatpush1.bf16.msra.mxu1 %v1603_v3  ;;  %v377_v49 = vld [vmem:[#allocation2] sm:$0xff] }
  0x5c   : > { %1017 = vmatprep.subr.bf16.mxu1 %v1607_v5  ;;  %v1138_v3 = vld [vmem:[%s1905_s2] sm:$0x3] (!%p1426_p11) }
  0x5e   : > { %1063 = vmatpush1.bf16.msra.mxu0 %v1525_v52  ;;  %v378_v52 = vld [vmem:[#allocation2 + $0x8] sm:$0xff] }
  0x5f   : > { %1064 = vmatprep.subr.bf16.mxu0 %v1526_v53  ;;  %1018 = vmatpush1.bf16.msra.mxu1 %v1609_v9 }
  0x60   : > { %1019 = vmatprep.subr.bf16.mxu1 %v1613_v10 }
  0x62   : > { %1065 = vmatpush1.bf16.msra.mxu0 %v1528_v56 }
  0x63   : > { %1066 = vmatprep.subr.bf16.mxu0 %v1529_v57  ;;  %1020 = vmatpush1.bf16.msra.mxu1 %v1615_v13  ;;  %v1155_v13 = vld [vmem:[%s1906_s3 + $0x8] sm:$0xff] (!%p1426_p11) }
  0x64   : > { %1021 = vmatprep.subr.bf16.mxu1 %v1619_v14  ;;  %v1156_v14 = vld [vmem:[%s1906_s3 + $0x10] sm:$0xff] (!%p1426_p11) }
  0x66   : > { %1067 = vmatpush1.bf16.msra.mxu0 %v1533_v60 }
  0x67   : > { %1079 = vmatprep.subr.bf16.mxu0 %v1540_v61  ;;  %1022 = vmatpush1.bf16.msra.mxu1 %v1621_v17 }
  0x68   : > { %1023 = vmatprep.subr.bf16.mxu1 %v1625_v18 }
  0x69   : > { %1069 = vmatmul.mubr.bf16.vlgmr.msra.gmra.mrb[0].mxu0 %v1535_v63 }
  0x6a   : > { %1080 = vmatpush1.bf16.msra.mxu0 %v1538_v1  ;;  %1111 = vmatprep.mubr.bf16.mxu0 %v1636_v7  ;;  %v1140_v1 = vlaneseq (!%p1426_p11) }
  0x6b   : > { %1081 = vmatprep.subr.bf16.mxu0 %v1546_v2  ;;  %1024 = vmatpush1.bf16.msra.mxu1 %v1627_v21 }
  0x6c   : > { %v1141_v2 = vshrl.u32 (!%p1426_p11), %v1140_v1, 7 }
  0x6e   : > { %1082 = vmatpush1.bf16.msra.mxu0 %v1544_v6  ;;  %1026 = vmatmul.mubr.bf16.vlgmr.msra.gmra.mrb[0].mxu1 %v1628_v24  ;;  %v1142_v5 = vsub.s32 (!%p1426_p11), 0, %v1141_v2  ;;  %v1146_v6 = vsub.s32 (!%p1426_p11), 1, %v1141_v2 }
  0x6f   : > { %1083 = vmatprep.subr.bf16.mxu0 %v1552_v8 }
  0x70   : > { %v1143_v10 = vrot.slane (!%p1426_p11), %v1138_v3, %v1142_v5 }
  0x72   : > { %1084 = vmatpush1.bf16.msra.mxu0 %v1550_v11  ;;  %v1154_v11 = vld [vmem:[%s1906_s3] sm:$0xff] (!%p1426_p11) }
  0x73   : > { %1085 = vmatprep.subr.bf16.mxu0 %v1558_v12  ;;  %v1147_v12 = vrot.slane (!%p1426_p11), %v1138_v3, %v1146_v6 }
  0x76   : > { %1086 = vmatpush1.bf16.msra.mxu0 %v1556_v15  ;;  %v1157_v15 = vld [vmem:[%s1906_s3 + $0x18] sm:$0xff] (!%p1426_p11) }
  0x77   : > { %1087 = vmatprep.subr.bf16.mxu0 %v1564_v16 }
  0x7a   : > { %1088 = vmatpush1.bf16.msra.mxu0 %v1562_v19 }
  0x7b   : > { %1089 = vmatprep.subr.bf16.mxu0 %v1570_v20 }
  0x7e   : > { %1090 = vmatpush1.bf16.msra.mxu0 %v1568_v22 }
  0x7f   : > { %1091 = vmatprep.subr.bf16.mxu0 %v1576_v23 }
  0x82   : > { %1092 = vmatpush1.bf16.msra.mxu0 %v1574_v25 }
  0x83   : > { %1093 = vmatprep.subr.bf16.mxu0 %v1582_v26 }
  0x86   : > { %1094 = vmatpush1.bf16.msra.mxu0 %v1580_v27 }
  0x87   : > { %1095 = vmatprep.subr.bf16.mxu0 %v1588_v28 }
  0x8a   : > { %1096 = vmatpush1.bf16.msra.mxu0 %v1586_v29 }
  0x8b   : > { %1097 = vmatprep.subr.bf16.mxu0 %v1594_v30 }
  0x8e   : > { %1098 = vmatpush1.bf16.msra.mxu0 %v1592_v31 }
  0x8f   : > { %1099 = vmatprep.subr.bf16.mxu0 %v1600_v32 }
  0x92   : > { %1100 = vmatpush1.bf16.msra.mxu0 %v1598_v33 }
  0x93   : > { %1101 = vmatprep.subr.bf16.mxu0 %v1606_v34 }
  0x96   : > { %1102 = vmatpush1.bf16.msra.mxu0 %v1604_v35 }
  0x97   : > { %1103 = vmatprep.subr.bf16.mxu0 %v1612_v36 }
  0x9a   : > { %1104 = vmatpush1.bf16.msra.mxu0 %v1610_v37 }
  0x9b   : > { %1105 = vmatprep.subr.bf16.mxu0 %v1618_v38 }
  0x9e   : > { %1106 = vmatpush1.bf16.msra.mxu0 %v1616_v39 }
  0x9f   : > { %1107 = vmatprep.subr.bf16.mxu0 %v1624_v40 }
  0xa2   : > { %1108 = vmatpush1.bf16.msra.mxu0 %v1622_v41 }
  0xa3   : > { %1109 = vmatprep.subr.bf16.mxu0 %v1633_v42 }
  0xa6   : > { %1110 = vmatpush1.bf16.msra.mxu0 %v1631_v43 }
  0xa9   : > { %1112 = vmatmul.mubr.bf16.vlgmr.msra.gmra.mrb[0].mxu0 %v1634_v44 }
 0x141   : > { %v1027_v45 = vpop.f32.mrb[0].mxu1 }
 0x142   : > { %v1029_v46 = vpop.f32.mrb[1].mxu1 }
 0x143   : > { %v1031_v47 = vpop.f32.mrb[2].mxu1 }
 0x144   : > { %v1033_v48 = vpop.f32.mrb[3].mxu1 }
 0x17c   : > { %v1113_v50 = vpop.f32.mrb[0].mxu0 }
 0x17d   : > { %v1433_v51 = vadd.f32 %v1113_v50, %v1027_v45  ;;  %v1115_v53 = vpop.f32.mrb[1].mxu0 }
 0x17e   : > { %v1434_v54 = vadd.f32 %v1115_v53, %v1029_v46  ;;  %v1117_v56 = vpop.f32.mrb[2].mxu0  ;;  %1133 = sbr.rel (%p1426_p11) target bundleno = 403 (0x193), region = 67 }
 0x17f   : > { %v1122_v57 = vadd.f32 %v1433_v51, %v377_v49  ;;  %v1435_v58 = vadd.f32 %v1117_v56, %v1031_v47  ;;  %v1119_v60 = vpop.f32.mrb[3].mxu0 }
 0x180   : > { %v1123_v61 = vadd.f32 %v1434_v54, %v378_v52  ;;  %v1436_v62 = vadd.f32 %v1119_v60, %v1033_v48 }
 0x181   : > { %1126 = vst [vmem:[#allocation2] sm:$0xff] %v1122_v57  ;;  %v1124_v63 = vadd.f32 %v1435_v58, %v379_v55 }
 0x182   : > { %1127 = vst [vmem:[#allocation2 + $0x8] sm:$0xff] %v1123_v61  ;;  %v1125_v0 = vadd.f32 %v1436_v62, %v380_v59 }
 0x183   : > { %1128 = vst [vmem:[#allocation2 + $0x10] sm:$0xff] %v1124_v63 }
 0x184   : > { %1129 = vst [vmem:[#allocation2 + $0x18] sm:$0xff] %v1125_v0 }
 0x188   : > { %v1134_v4 = vld [vmem:[#allocation2] sm:$0xff] }
 0x189   : > { %v1135_v7 = vld [vmem:[#allocation2 + $0x8] sm:$0xff]  ;;  %v1150_v16 = vadd.f32 %v1143_v10, %v1134_v4 }
 0x18a   : > { %v1136_v8 = vld [vmem:[#allocation2 + $0x10] sm:$0xff]  ;;  %v1151_v17 = vadd.f32 %v1147_v12, %v1135_v7 }
 0x18b   : > { %v1137_v9 = vld [vmem:[#allocation2 + $0x18] sm:$0xff]  ;;  %v1152_v18 = vadd.f32 %v1143_v10, %v1136_v8  ;;  %v1158_v20 = vadd.f32 %v1154_v11, %v1150_v16 }
 0x18c   : > { %v1153_v19 = vadd.f32 %v1147_v12, %v1137_v9  ;;  %v1159_v21 = vadd.f32 %v1155_v13, %v1151_v17 }
 0x18d   : > { %v1160_v22 = vadd.f32 %v1156_v14, %v1152_v18  ;;  %v1162_v24 = vmax.f32 %v1158_v20, 0.0 }
 0x18e   : > { %v1161_v23 = vadd.f32 %v1157_v15, %v1153_v19  ;;  %v1163_v25 = vmax.f32 %v1159_v21, 0.0 }
 0x18f   : > { %v1164_v26 = vmax.f32 %v1160_v22, 0.0  ;;  %1166 = vst [vmem:[%s1907_s4] sm:$0xff] %v1162_v24 }
 0x190   : > { %v1165_v27 = vmax.f32 %v1161_v23, 0.0  ;;  %1167 = vst [vmem:[%s1907_s4 + $0x8] sm:$0xff] %v1163_v25 }
 0x191   : > { %1168 = vst [vmem:[%s1907_s4 + $0x10] sm:$0xff] %v1164_v26 }
 0x192   : > { %1169 = vst [vmem:[%s1907_s4 + $0x18] sm:$0xff] %v1165_v27 }
 0x193 PF: > { %s14_s19 = sadd.s32 1, %s1675_s19   ;;  %s1908_s15 = smov %s1663_s16 }
 0x194   : > { %p11_p12 = scmp.ge.s32.totalorder %s14_s19, 5   ;;  %s1909_s16 = smov %s1738_s23 }
 0x195   : > { %s1910_s17 = smov %s1671_s18  ;;  %s1911_s18 = smov %s1913_s20 }
 0x196   :  { %13 = sbr.rel (!%p11_p12) target bundleno = 3 (0x3), region = 111 }

// kernel: resnet_triplet_forward.25
= control target key start
LH: loop header
LB: loop body
LE: loop exit
PB: predicated region body
PF: predicated region fallthrough
CT: control target
= control target key end

     0   :  { %s2592_s0 = inlined_call_operand.vmem [shape: bf16[16,2304], index: 0, kind: input, shape index: {}]   ;;  %s2593_s1 = inlined_call_operand.vmem [shape: bf16[2304,512], index: 1, kind: input, shape index: {}]   ;;  %s2594_s2 = inlined_call_operand.vmem [shape: f32[1,512], index: 2, kind: input, shape index: {}]   ;;  %s2595_s3 = inlined_call_operand.vmem [shape: f32[16,512], index: 3, kind: output, shape index: {}]  }
   0x1   :  { %2597 = sst [smem:[#allocation7_spill]] %s2592_s0 }
   0x2   :  { %2598 = sst [smem:[#allocation8_spill]] %s2593_s1 }
   0x3   :  { %s2108_s12 = smov 0   ;;  %s2110_s13 = smov 0  }
   0x4   :  { %s2112_s14 = smov 0   ;;  %s2114_s15 = smov 0  }
   0x5   :  { %s2116_s16 = smov 0   ;;  %s2118_s17 = smov 0  }
   0x6   :  { %s2120_s18 = smov 0   ;;  %s2122_s19 = smov 0  }
   0x7   :  { %s2124_s20 = smov 0   ;;  %s2126_s21 = smov 0  }
   0x8   :  { %s2128_s22 = smov 0  }
   0x9 LB: > { %s1622_s23 = sadd.s32 4294967295, %s2085_s22   ;;  %s25_s24 = sadd.s32 1, %s2077_s20  ;;  %s2085_s22 = sphi %s2128_s22, %s13_s22   ;;  %s2081_s21 = sphi %s2126_s21, %s2615_s21   ;;  %s2077_s20 = sphi %s2124_s20, %s2614_s20   ;;  %s2073_s19 = sphi %s2122_s19, %s2613_s19   ;;  %s2069_s18 = sphi %s2120_s18, %s2612_s18   ;;  %s2065_s17 = sphi %s2118_s17, %s2611_s17   ;;  %s2061_s16 = sphi %s2116_s16, %s2610_s16   ;;  %s2057_s15 = sphi %s2114_s15, %s2609_s15   ;;  %s2053_s14 = sphi %s2112_s14, %s2608_s14   ;;  %s2049_s13 = sphi %s2110_s13, %s2607_s13   ;;  %s2045_s12 = sphi %s2108_s12, %s2606_s12  }
   0xa   : > { %p26_p0 = scmp.ge.s32.totalorder %s25_s24, 3  ;;  %s28_s25 = sadd.s32 1, %s2081_s21 }
   0xb   : > { %s41_s26 = sadd.s32 1, %s2065_s17  ;;  %p48_p1 = scmp.ne.s32.totalorder %s2065_s17, %s2061_s16 }
   0xc   : > { %s2617_s24 = smov (%p26_p0, %s25_s24), 0  ;;  %s2619_s25 = smov (!%p26_p0, %s28_s25), %s2081_s21 }
   0xd   : > { %s37_s27 = ssub.s32 %s2077_s20, %s2617_s24  ;;  %p49_p2 = scmp.eq.s32.totalorder %s2085_s22, 0 }
   0xe   : > { %p30_p3 = scmp.ge.s32.totalorder %s2619_s25, 2  ;;  %p39_p4 = scmp.eq.s32.totalorder %s37_s27, 0 }
   0xf   : > { %p2175_p5 = por %p49_p2, %p48_p1  ;;  %s69_s29 = sadd.s32 1, %s2057_s15 }
  0x10   : > { %s2621_s25 = smov (%p30_p3, %s2619_s25), 0  ;;  %p76_p6 = scmp.ne.s32.totalorder %s2057_s15, %s2053_s14 }
  0x11   : > { %2600 = sst [smem:[#allocation6_spill]] %s2621_s25  ;;  %s65_s4 = ssub.s32 %s2081_s21, %s2621_s25 }
  0x12   : > { %s2183_s30 = scalar_select %p39_p4, %s2065_s17, %s41_s26  }
  0x13   : > { %s66_s5 = sor.u32 %s65_s4, %s37_s27  ;;  %p121_p7 = scmp.eq.s32.totalorder %s65_s4, 0 }
  0x14   : > { %p67_p8 = scmp.eq.s32.totalorder %s66_s5, 0  ;;  %p2189_p9 = por %p76_p6, %p49_p2 }
  0x15   : > { %s123_s7 = sadd.s32 1, %s2049_s13  ;;  %p133_p10 = scmp.ne.s32.totalorder %s2049_s13, %s2045_s12 }
  0x16   : > { %s2197_s8 = scalar_select %p67_p8, %s2057_s15, %s69_s29  }
  0x17   : > { %s2200_s9 = scalar_select %p121_p7, %s2049_s13, %s123_s7  }
  0x18   : > { %p134_p11 = scmp.eq.s32.totalorder %s1622_s23, 5  ;;  %p1625_p13 = scmp.ge.s32.totalorder %s2085_s22, 6 }
  0x1a   : > { %p2202_p12 = por %p134_p11, %p133_p10  ;;  %156 = sbr.rel (%p1625_p13) target bundleno = 103 (0x67), region = 16 }
  0x21   : > { %159 = sbr.rel (!%p2175_p5) target bundleno = 45 (0x2d), region = 20  ;;  %s161_s11 = sand.u32 (%p2175_p5), 1, %s2065_s17  }
  0x22   : > { %s1742_s26 = smul.u32 (%p2175_p5), 24, %s2077_s20  ;;  %s2603_s0 = sld [smem:[#allocation7_spill]] (%p2175_p5) }
  0x23   : > { %s1753_s27 = smul.u32 (%p2175_p5), 48, %s161_s11 }
  0x25   : > { %s163_s23 = scalar_lea.vmem (%p2175_p5), [#allocation3], %s1753_s27 }
  0x28   : > { %s169_s5 = scalar_lea.vmem %s2603_s0, %s1742_s26 }
  0x29   : > { %v182_v0 = vld [vmem:[%s169_s5] sm:$0xff]  ;;  %v184_v1 = vld [vmem:[%s169_s5 + $0x8] sm:$0xff]  ;;  %v186_v2 = vld [vmem:[%s169_s5 + $0x10] sm:$0xff] }
  0x2a   : > { %183 = vst [vmem:[%s163_s23] sm:$0xff] %v182_v0  ;;  %185 = vst [vmem:[%s163_s23 + $0x8] sm:$0xff] %v184_v1  ;;  %v188_v3 = vld [vmem:[%s169_s5 + $0x48] sm:$0xff]  ;;  %v190_v4 = vld [vmem:[%s169_s5 + $0x50] sm:$0xff] }
  0x2b   : > { %187 = vst [vmem:[%s163_s23 + $0x10] sm:$0xff] %v186_v2  ;;  %v192_v5 = vld [vmem:[%s169_s5 + $0x58] sm:$0xff]  ;;  %189 = vst [vmem:[%s163_s23 + $0x18] sm:$0xff] %v188_v3 }
  0x2c   : > { %191 = vst [vmem:[%s163_s23 + $0x20] sm:$0xff] %v190_v4  ;;  %193 = vst [vmem:[%s163_s23 + $0x28] sm:$0xff] %v192_v5 }
  0x2d PF: > { %199 = sbr.rel (!%p2189_p9) target bundleno = 103 (0x67), region = 43  ;;  %s201_s28 = sand.u32 (%p2189_p9), 1, %s2057_s15  }
  0x2e   : > { %s1754_s7 = smul.u32 (%p2189_p9), 768, %s201_s28  ;;  %s1627_s11 = sshll.u32 (%p2189_p9), %s2081_s21, 1 }
  0x2f   : > { %s1743_s26 = smul.u32 (%p2189_p9), 384, %s2077_s20  ;;  %s2604_s1 = sld [smem:[#allocation8_spill]] (%p2189_p9) }
  0x30   : > { %s2227_s6 = scalar_lea.vmem (%p2189_p9), [#allocation4], %s1754_s7 }
  0x31   : > { %s207_s27 = sadd.s32 (%p2189_p9), %s1743_s26, %s1627_s11 }
  0x32   : > { %s1629_s29 = sshll.u32 (%p2189_p9), %s207_s27, 2 }
  0x35   : > { %s2222_s5 = scalar_lea.vmem %s2604_s1, %s1629_s29 }
  0x36   : > { %v427_v6 = vld [vmem:[%s2222_s5] sm:$0xff]  ;;  %v429_v7 = vld [vmem:[%s2222_s5 + $0x10] sm:$0xff] }
  0x37   : > { %v431_v8 = vld [vmem:[%s2222_s5 + $0x20] sm:$0xff]  ;;  %428 = vst [vmem:[%s2227_s6] sm:$0xff] %v427_v6  ;;  %430 = vst [vmem:[%s2227_s6 + $0x8] sm:$0xff] %v429_v7  ;;  %v433_v9 = vld [vmem:[%s2222_s5 + $0x30] sm:$0xff] }
  0x38   : > { %432 = vst [vmem:[%s2227_s6 + $0x10] sm:$0xff] %v431_v8  ;;  %v435_v10 = vld [vmem:[%s2222_s5 + $0x40] sm:$0xff]  ;;  %v437_v11 = vld [vmem:[%s2222_s5 + $0x50] sm:$0xff]  ;;  %434 = vst [vmem:[%s2227_s6 + $0x18] sm:$0xff] %v433_v9 }
  0x39   : > { %436 = vst [vmem:[%s2227_s6 + $0x20] sm:$0xff] %v435_v10  ;;  %438 = vst [vmem:[%s2227_s6 + $0x28] sm:$0xff] %v437_v11  ;;  %v439_v12 = vld [vmem:[%s2222_s5 + $0x60] sm:$0xff]  ;;  %v441_v13 = vld [vmem:[%s2222_s5 + $0x70] sm:$0xff] }
  0x3a   : > { %v443_v14 = vld [vmem:[%s2222_s5 + $0x80] sm:$0xff]  ;;  %440 = vst [vmem:[%s2227_s6 + $0x30] sm:$0xff] %v439_v12  ;;  %442 = vst [vmem:[%s2227_s6 + $0x38] sm:$0xff] %v441_v13  ;;  %v445_v15 = vld [vmem:[%s2222_s5 + $0x90] sm:$0xff] }
  0x3b   : > { %444 = vst [vmem:[%s2227_s6 + $0x40] sm:$0xff] %v443_v14  ;;  %v447_v16 = vld [vmem:[%s2222_s5 + $0xa0] sm:$0xff]  ;;  %v449_v17 = vld [vmem:[%s2222_s5 + $0xb0] sm:$0xff]  ;;  %446 = vst [vmem:[%s2227_s6 + $0x48] sm:$0xff] %v445_v15 }
  0x3c   : > { %448 = vst [vmem:[%s2227_s6 + $0x50] sm:$0xff] %v447_v16  ;;  %450 = vst [vmem:[%s2227_s6 + $0x58] sm:$0xff] %v449_v17  ;;  %v451_v18 = vld [vmem:[%s2222_s5 + $0xc0] sm:$0xff]  ;;  %v453_v19 = vld [vmem:[%s2222_s5 + $0xd0] sm:$0xff] }
  0x3d   : > { %v455_v20 = vld [vmem:[%s2222_s5 + $0xe0] sm:$0xff]  ;;  %452 = vst [vmem:[%s2227_s6 + $0x60] sm:$0xff] %v451_v18  ;;  %454 = vst [vmem:[%s2227_s6 + $0x68] sm:$0xff] %v453_v19  ;;  %v457_v21 = vld [vmem:[%s2222_s5 + $0xf0] sm:$0xff] }
  0x3e   : > { %456 = vst [vmem:[%s2227_s6 + $0x70] sm:$0xff] %v455_v20  ;;  %v459_v22 = vld [vmem:[%s2222_s5 + $0x100] sm:$0xff]  ;;  %v461_v23 = vld [vmem:[%s2222_s5 + $0x110] sm:$0xff]  ;;  %458 = vst [vmem:[%s2227_s6 + $0x78] sm:$0xff] %v457_v21 }
  0x3f   : > { %460 = vst [vmem:[%s2227_s6 + $0x80] sm:$0xff] %v459_v22  ;;  %462 = vst [vmem:[%s2227_s6 + $0x88] sm:$0xff] %v461_v23  ;;  %v463_v24 = vld [vmem:[%s2222_s5 + $0x120] sm:$0xff]  ;;  %v465_v25 = vld [vmem:[%s2222_s5 + $0x130] sm:$0xff] }
  0x40   : > { %v467_v26 = vld [vmem:[%s2222_s5 + $0x140] sm:$0xff]  ;;  %464 = vst [vmem:[%s2227_s6 + $0x90] sm:$0xff] %v463_v24  ;;  %466 = vst [vmem:[%s2227_s6 + $0x98] sm:$0xff] %v465_v25  ;;  %v469_v27 = vld [vmem:[%s2222_s5 + $0x150] sm:$0xff] }
  0x41   : > { %468 = vst [vmem:[%s2227_s6 + $0xa0] sm:$0xff] %v467_v26  ;;  %v471_v28 = vld [vmem:[%s2222_s5 + $0x160] sm:$0xff]  ;;  %v473_v29 = vld [vmem:[%s2222_s5 + $0x170] sm:$0xff]  ;;  %470 = vst [vmem:[%s2227_s6 + $0xa8] sm:$0xff] %v469_v27 }
  0x42   : > { %472 = vst [vmem:[%s2227_s6 + $0xb0] sm:$0xff] %v471_v28  ;;  %474 = vst [vmem:[%s2227_s6 + $0xb8] sm:$0xff] %v473_v29  ;;  %v475_v30 = vld [vmem:[%s2222_s5 + $0x180] sm:$0xff]  ;;  %v477_v31 = vld [vmem:[%s2222_s5 + $0x190] sm:$0xff] }
  0x43   : > { %v479_v32 = vld [vmem:[%s2222_s5 + $0x1a0] sm:$0xff]  ;;  %476 = vst [vmem:[%s2227_s6 + $0xc0] sm:$0xff] %v475_v30  ;;  %478 = vst [vmem:[%s2227_s6 + $0xc8] sm:$0xff] %v477_v31  ;;  %v481_v33 = vld [vmem:[%s2222_s5 + $0x1b0] sm:$0xff] }
  0x44   : > { %480 = vst [vmem:[%s2227_s6 + $0xd0] sm:$0xff] %v479_v32  ;;  %v483_v34 = vld [vmem:[%s2222_s5 + $0x1c0] sm:$0xff]  ;;  %v485_v35 = vld [vmem:[%s2222_s5 + $0x1d0] sm:$0xff]  ;;  %482 = vst [vmem:[%s2227_s6 + $0xd8] sm:$0xff] %v481_v33 }
  0x45   : > { %484 = vst [vmem:[%s2227_s6 + $0xe0] sm:$0xff] %v483_v34  ;;  %486 = vst [vmem:[%s2227_s6 + $0xe8] sm:$0xff] %v485_v35  ;;  %v487_v36 = vld [vmem:[%s2222_s5 + $0x1e0] sm:$0xff]  ;;  %v489_v37 = vld [vmem:[%s2222_s5 + $0x1f0] sm:$0xff] }
  0x46   : > { %v491_v38 = vld [vmem:[%s2222_s5 + $0x200] sm:$0xff]  ;;  %488 = vst [vmem:[%s2227_s6 + $0xf0] sm:$0xff] %v487_v36  ;;  %490 = vst [vmem:[%s2227_s6 + $0xf8] sm:$0xff] %v489_v37  ;;  %v493_v39 = vld [vmem:[%s2222_s5 + $0x210] sm:$0xff] }
  0x47   : > { %492 = vst [vmem:[%s2227_s6 + $0x100] sm:$0xff] %v491_v38  ;;  %v495_v40 = vld [vmem:[%s2222_s5 + $0x220] sm:$0xff]  ;;  %v497_v41 = vld [vmem:[%s2222_s5 + $0x230] sm:$0xff]  ;;  %494 = vst [vmem:[%s2227_s6 + $0x108] sm:$0xff] %v493_v39 }
  0x48   : > { %496 = vst [vmem:[%s2227_s6 + $0x110] sm:$0xff] %v495_v40  ;;  %498 = vst [vmem:[%s2227_s6 + $0x118] sm:$0xff] %v497_v41  ;;  %v499_v42 = vld [vmem:[%s2222_s5 + $0x240] sm:$0xff]  ;;  %v501_v43 = vld [vmem:[%s2222_s5 + $0x250] sm:$0xff] }
  0x49   : > { %v503_v44 = vld [vmem:[%s2222_s5 + $0x260] sm:$0xff]  ;;  %500 = vst [vmem:[%s2227_s6 + $0x120] sm:$0xff] %v499_v42  ;;  %502 = vst [vmem:[%s2227_s6 + $0x128] sm:$0xff] %v501_v43  ;;  %v505_v45 = vld [vmem:[%s2222_s5 + $0x270] sm:$0xff] }
  0x4a   : > { %504 = vst [vmem:[%s2227_s6 + $0x130] sm:$0xff] %v503_v44  ;;  %v507_v46 = vld [vmem:[%s2222_s5 + $0x280] sm:$0xff]  ;;  %v509_v47 = vld [vmem:[%s2222_s5 + $0x290] sm:$0xff]  ;;  %506 = vst [vmem:[%s2227_s6 + $0x138] sm:$0xff] %v505_v45 }
  0x4b   : > { %508 = vst [vmem:[%s2227_s6 + $0x140] sm:$0xff] %v507_v46  ;;  %510 = vst [vmem:[%s2227_s6 + $0x148] sm:$0xff] %v509_v47  ;;  %v511_v48 = vld [vmem:[%s2222_s5 + $0x2a0] sm:$0xff]  ;;  %v513_v49 = vld [vmem:[%s2222_s5 + $0x2b0] sm:$0xff] }
  0x4c   : > { %v515_v50 = vld [vmem:[%s2222_s5 + $0x2c0] sm:$0xff]  ;;  %512 = vst [vmem:[%s2227_s6 + $0x150] sm:$0xff] %v511_v48  ;;  %514 = vst [vmem:[%s2227_s6 + $0x158] sm:$0xff] %v513_v49  ;;  %v517_v51 = vld [vmem:[%s2222_s5 + $0x2d0] sm:$0xff] }
  0x4d   : > { %516 = vst [vmem:[%s2227_s6 + $0x160] sm:$0xff] %v515_v50  ;;  %v519_v52 = vld [vmem:[%s2222_s5 + $0x2e0] sm:$0xff]  ;;  %v521_v53 = vld [vmem:[%s2222_s5 + $0x2f0] sm:$0xff]  ;;  %518 = vst [vmem:[%s2227_s6 + $0x168] sm:$0xff] %v517_v51 }
  0x4e   : > { %520 = vst [vmem:[%s2227_s6 + $0x170] sm:$0xff] %v519_v52  ;;  %522 = vst [vmem:[%s2227_s6 + $0x178] sm:$0xff] %v521_v53  ;;  %v523_v54 = vld [vmem:[%s2222_s5 + $0x300] sm:$0xff]  ;;  %v525_v55 = vld [vmem:[%s2222_s5 + $0x310] sm:$0xff] }
  0x4f   : > { %v527_v56 = vld [vmem:[%s2222_s5 + $0x320] sm:$0xff]  ;;  %524 = vst [vmem:[%s2227_s6 + $0x180] sm:$0xff] %v523_v54  ;;  %526 = vst [vmem:[%s2227_s6 + $0x188] sm:$0xff] %v525_v55  ;;  %v529_v57 = vld [vmem:[%s2222_s5 + $0x330] sm:$0xff] }
  0x50   : > { %528 = vst [vmem:[%s2227_s6 + $0x190] sm:$0xff] %v527_v56  ;;  %v531_v58 = vld [vmem:[%s2222_s5 + $0x340] sm:$0xff]  ;;  %v533_v59 = vld [vmem:[%s2222_s5 + $0x350] sm:$0xff]  ;;  %530 = vst [vmem:[%s2227_s6 + $0x198] sm:$0xff] %v529_v57 }
  0x51   : > { %532 = vst [vmem:[%s2227_s6 + $0x1a0] sm:$0xff] %v531_v58  ;;  %534 = vst [vmem:[%s2227_s6 + $0x1a8] sm:$0xff] %v533_v59  ;;  %v535_v60 = vld [vmem:[%s2222_s5 + $0x360] sm:$0xff]  ;;  %v537_v61 = vld [vmem:[%s2222_s5 + $0x370] sm:$0xff] }
  0x52   : > { %v539_v62 = vld [vmem:[%s2222_s5 + $0x380] sm:$0xff]  ;;  %536 = vst [vmem:[%s2227_s6 + $0x1b0] sm:$0xff] %v535_v60  ;;  %538 = vst [vmem:[%s2227_s6 + $0x1b8] sm:$0xff] %v537_v61  ;;  %v541_v63 = vld [vmem:[%s2222_s5 + $0x390] sm:$0xff] }
  0x53   : > { %540 = vst [vmem:[%s2227_s6 + $0x1c0] sm:$0xff] %v539_v62  ;;  %v543_v0 = vld [vmem:[%s2222_s5 + $0x3a0] sm:$0xff]  ;;  %v545_v1 = vld [vmem:[%s2222_s5 + $0x3b0] sm:$0xff]  ;;  %542 = vst [vmem:[%s2227_s6 + $0x1c8] sm:$0xff] %v541_v63 }
  0x54   : > { %544 = vst [vmem:[%s2227_s6 + $0x1d0] sm:$0xff] %v543_v0  ;;  %546 = vst [vmem:[%s2227_s6 + $0x1d8] sm:$0xff] %v545_v1  ;;  %v547_v2 = vld [vmem:[%s2222_s5 + $0x3c0] sm:$0xff]  ;;  %v549_v3 = vld [vmem:[%s2222_s5 + $0x3d0] sm:$0xff] }
  0x55   : > { %v551_v4 = vld [vmem:[%s2222_s5 + $0x3e0] sm:$0xff]  ;;  %548 = vst [vmem:[%s2227_s6 + $0x1e0] sm:$0xff] %v547_v2  ;;  %550 = vst [vmem:[%s2227_s6 + $0x1e8] sm:$0xff] %v549_v3  ;;  %v553_v5 = vld [vmem:[%s2222_s5 + $0x3f0] sm:$0xff] }
  0x56   : > { %552 = vst [vmem:[%s2227_s6 + $0x1f0] sm:$0xff] %v551_v4  ;;  %v555_v6 = vld [vmem:[%s2222_s5 + $0x400] sm:$0xff]  ;;  %v557_v7 = vld [vmem:[%s2222_s5 + $0x410] sm:$0xff]  ;;  %554 = vst [vmem:[%s2227_s6 + $0x1f8] sm:$0xff] %v553_v5 }
  0x57   : > { %556 = vst [vmem:[%s2227_s6 + $0x200] sm:$0xff] %v555_v6  ;;  %558 = vst [vmem:[%s2227_s6 + $0x208] sm:$0xff] %v557_v7  ;;  %v559_v8 = vld [vmem:[%s2222_s5 + $0x420] sm:$0xff]  ;;  %v561_v9 = vld [vmem:[%s2222_s5 + $0x430] sm:$0xff] }
  0x58   : > { %v563_v10 = vld [vmem:[%s2222_s5 + $0x440] sm:$0xff]  ;;  %560 = vst [vmem:[%s2227_s6 + $0x210] sm:$0xff] %v559_v8  ;;  %562 = vst [vmem:[%s2227_s6 + $0x218] sm:$0xff] %v561_v9  ;;  %v565_v11 = vld [vmem:[%s2222_s5 + $0x450] sm:$0xff] }
  0x59   : > { %564 = vst [vmem:[%s2227_s6 + $0x220] sm:$0xff] %v563_v10  ;;  %v567_v12 = vld [vmem:[%s2222_s5 + $0x460] sm:$0xff]  ;;  %v569_v13 = vld [vmem:[%s2222_s5 + $0x470] sm:$0xff]  ;;  %566 = vst [vmem:[%s2227_s6 + $0x228] sm:$0xff] %v565_v11 }
  0x5a   : > { %568 = vst [vmem:[%s2227_s6 + $0x230] sm:$0xff] %v567_v12  ;;  %570 = vst [vmem:[%s2227_s6 + $0x238] sm:$0xff] %v569_v13  ;;  %v571_v14 = vld [vmem:[%s2222_s5 + $0x480] sm:$0xff]  ;;  %v573_v15 = vld [vmem:[%s2222_s5 + $0x490] sm:$0xff] }
  0x5b   : > { %v575_v16 = vld [vmem:[%s2222_s5 + $0x4a0] sm:$0xff]  ;;  %572 = vst [vmem:[%s2227_s6 + $0x240] sm:$0xff] %v571_v14  ;;  %574 = vst [vmem:[%s2227_s6 + $0x248] sm:$0xff] %v573_v15  ;;  %v577_v17 = vld [vmem:[%s2222_s5 + $0x4b0] sm:$0xff] }
  0x5c   : > { %576 = vst [vmem:[%s2227_s6 + $0x250] sm:$0xff] %v575_v16  ;;  %v579_v18 = vld [vmem:[%s2222_s5 + $0x4c0] sm:$0xff]  ;;  %v581_v19 = vld [vmem:[%s2222_s5 + $0x4d0] sm:$0xff]  ;;  %578 = vst [vmem:[%s2227_s6 + $0x258] sm:$0xff] %v577_v17 }
  0x5d   : > { %580 = vst [vmem:[%s2227_s6 + $0x260] sm:$0xff] %v579_v18  ;;  %582 = vst [vmem:[%s2227_s6 + $0x268] sm:$0xff] %v581_v19  ;;  %v583_v20 = vld [vmem:[%s2222_s5 + $0x4e0] sm:$0xff]  ;;  %v585_v21 = vld [vmem:[%s2222_s5 + $0x4f0] sm:$0xff] }
  0x5e   : > { %v587_v22 = vld [vmem:[%s2222_s5 + $0x500] sm:$0xff]  ;;  %584 = vst [vmem:[%s2227_s6 + $0x270] sm:$0xff] %v583_v20  ;;  %586 = vst [vmem:[%s2227_s6 + $0x278] sm:$0xff] %v585_v21  ;;  %v589_v23 = vld [vmem:[%s2222_s5 + $0x510] sm:$0xff] }
  0x5f   : > { %588 = vst [vmem:[%s2227_s6 + $0x280] sm:$0xff] %v587_v22  ;;  %v591_v24 = vld [vmem:[%s2222_s5 + $0x520] sm:$0xff]  ;;  %v593_v25 = vld [vmem:[%s2222_s5 + $0x530] sm:$0xff]  ;;  %590 = vst [vmem:[%s2227_s6 + $0x288] sm:$0xff] %v589_v23 }
  0x60   : > { %592 = vst [vmem:[%s2227_s6 + $0x290] sm:$0xff] %v591_v24  ;;  %594 = vst [vmem:[%s2227_s6 + $0x298] sm:$0xff] %v593_v25  ;;  %v595_v26 = vld [vmem:[%s2222_s5 + $0x540] sm:$0xff]  ;;  %v597_v27 = vld [vmem:[%s2222_s5 + $0x550] sm:$0xff] }
  0x61   : > { %v599_v28 = vld [vmem:[%s2222_s5 + $0x560] sm:$0xff]  ;;  %596 = vst [vmem:[%s2227_s6 + $0x2a0] sm:$0xff] %v595_v26  ;;  %598 = vst [vmem:[%s2227_s6 + $0x2a8] sm:$0xff] %v597_v27  ;;  %v601_v29 = vld [vmem:[%s2222_s5 + $0x570] sm:$0xff] }
  0x62   : > { %600 = vst [vmem:[%s2227_s6 + $0x2b0] sm:$0xff] %v599_v28  ;;  %v603_v30 = vld [vmem:[%s2222_s5 + $0x580] sm:$0xff]  ;;  %v605_v31 = vld [vmem:[%s2222_s5 + $0x590] sm:$0xff]  ;;  %602 = vst [vmem:[%s2227_s6 + $0x2b8] sm:$0xff] %v601_v29 }
  0x63   : > { %604 = vst [vmem:[%s2227_s6 + $0x2c0] sm:$0xff] %v603_v30  ;;  %606 = vst [vmem:[%s2227_s6 + $0x2c8] sm:$0xff] %v605_v31  ;;  %v607_v32 = vld [vmem:[%s2222_s5 + $0x5a0] sm:$0xff]  ;;  %v609_v33 = vld [vmem:[%s2222_s5 + $0x5b0] sm:$0xff] }
  0x64   : > { %v611_v34 = vld [vmem:[%s2222_s5 + $0x5c0] sm:$0xff]  ;;  %608 = vst [vmem:[%s2227_s6 + $0x2d0] sm:$0xff] %v607_v32  ;;  %610 = vst [vmem:[%s2227_s6 + $0x2d8] sm:$0xff] %v609_v33  ;;  %v613_v35 = vld [vmem:[%s2222_s5 + $0x5d0] sm:$0xff] }
  0x65   : > { %612 = vst [vmem:[%s2227_s6 + $0x2e0] sm:$0xff] %v611_v34  ;;  %v615_v36 = vld [vmem:[%s2222_s5 + $0x5e0] sm:$0xff]  ;;  %v617_v37 = vld [vmem:[%s2222_s5 + $0x5f0] sm:$0xff]  ;;  %614 = vst [vmem:[%s2227_s6 + $0x2e8] sm:$0xff] %v613_v35 }
  0x66   : > { %616 = vst [vmem:[%s2227_s6 + $0x2f0] sm:$0xff] %v615_v36  ;;  %618 = vst [vmem:[%s2227_s6 + $0x2f8] sm:$0xff] %v617_v37 }
  0x67 PF: > { %p1630_p0 = scmp.ge.s32.totalorder %s2085_s22, 1  ;;  %p631_p1 = scmp.lt.s32.totalorder %s2085_s22, 7 }
  0x69   : > { %p632_p2 = pnand %p1630_p0, %p631_p1 }
  0x6a   : > { %s638_s0 = sand.u32 (!%p632_p2), 1, %s2061_s16   ;;  %s645_s23 = sand.u32 (!%p632_p2), 1, %s2053_s14  }
  0x6b   : > { %635 = sbr.rel (%p632_p2) target bundleno = 490 (0x1ea), region = 85  ;;  %s672_s7 = sand.u32 (!%p632_p2), 1, %s2045_s12  }
  0x6c   : > { %s1755_s28 = smul.u32 (!%p632_p2), 48, %s638_s0  ;;  %s1631_s26 = sshll.u32 (!%p632_p2), %s672_s7, 5 }
  0x6d   : > { %s1756_s11 = smul.u32 (!%p632_p2), 768, %s645_s23  ;;  %s1632_s27 = sshll.u32 (!%p632_p2), %s2073_s19, 1 }
  0x6e   : > { %p680_p3 = scmp.lt.s32.totalorder (!%p632_p2), %s1632_s27, 3  ;;  %s2430_s6 = scalar_lea.vmem (!%p632_p2), [#allocation3], %s1755_s28 }
  0x6f   : > { %s2432_s1 = scalar_lea.vmem (!%p632_p2), [#allocation4], %s1756_s11  ;;  %s2434_s25 = scalar_lea.vmem (!%p632_p2), [#allocation5], %s1631_s26 }
  0x70   : > { %p1633_p4 = scmp.ne.s32.totalorder (!%p632_p2), %s2069_s18, 0 }
  0x72   : > { %s2623_s27 = smov (!%p680_p3, %s1632_s27), 3  ;;  %689 = sbr.rel (%p1633_p4) target bundleno = 121 (0x79), region = 97 }
  0x73   : > { %s682_s5 = scalar_lea.vmem %s2594_s2, %s2623_s27  ;;  %v2087_v38 = vmov (!%p1633_p4), 0.0  }
  0x74   : > { %690 = vst [vmem:[#allocation2] sm:$0xff] (!%p1633_p4), %v2087_v38  ;;  %691 = vst [vmem:[#allocation2 + $0x8] sm:$0xff] (!%p1633_p4), %v2087_v38 }
  0x75   : > { %692 = vst [vmem:[#allocation2 + $0x10] sm:$0xff] (!%p1633_p4), %v2087_v38  ;;  %693 = vst [vmem:[#allocation2 + $0x18] sm:$0xff] (!%p1633_p4), %v2087_v38 }
  0x79 PF: > { %v1846_v39 = vld [vmem:[%s2432_s1 + $0x104] ss:$8 sps:$4 sm:$0xff]   ;;  %v1848_v40 = vld [vmem:[%s2432_s1 + $0x100] ss:$8 sps:$4 sm:$0xff]   ;;  %v1849_v41 = vld [vmem:[%s2432_s1 + $0x114] ss:$8 sps:$4 sm:$0xff]  }
  0x7a   : > { %1353 = vmatprep.subr.bf16.mxu0 %v1846_v39  ;;  %v1851_v42 = vld [vmem:[%s2432_s1 + $0x110] ss:$8 sps:$4 sm:$0xff]   ;;  %v1852_v43 = vld [vmem:[%s2432_s1 + $0x124] ss:$8 sps:$4 sm:$0xff]   ;;  %v1854_v44 = vld [vmem:[%s2432_s1 + $0x120] ss:$8 sps:$4 sm:$0xff]  }
  0x7b   : > { %1354 = vmatpush1.bf16.msra.mxu0 %v1848_v40  ;;  %v1855_v45 = vld [vmem:[%s2432_s1 + $0x134] ss:$8 sps:$4 sm:$0xff]   ;;  %v1857_v46 = vld [vmem:[%s2432_s1 + $0x130] ss:$8 sps:$4 sm:$0xff]   ;;  %v1858_v47 = vld [vmem:[%s2432_s1 + $0x144] ss:$8 sps:$4 sm:$0xff]  }
  0x7c   : > { %1355 = vmatprep.subr.bf16.mxu0 %v1849_v41  ;;  %v1860_v48 = vld [vmem:[%s2432_s1 + $0x140] ss:$8 sps:$4 sm:$0xff]   ;;  %v1861_v49 = vld [vmem:[%s2432_s1 + $0x154] ss:$8 sps:$4 sm:$0xff]   ;;  %v1863_v50 = vld [vmem:[%s2432_s1 + $0x150] ss:$8 sps:$4 sm:$0xff]  }
  0x7d   : > { %v1864_v51 = vld [vmem:[%s2432_s1 + $0x164] ss:$8 sps:$4 sm:$0xff]   ;;  %v1896_v53 = vld [vmem:[%s2432_s1] ss:$8 sps:$4 sm:$0xff]   ;;  %v1867_v56 = vld [vmem:[%s2432_s1 + $0x174] ss:$8 sps:$4 sm:$0xff]  }
  0x7e   : > { %v1893_v52 = vld [vmem:[%s2432_s1 + $0x4] ss:$8 sps:$4 sm:$0xff]   ;;  %v1866_v54 = vld [vmem:[%s2432_s1 + $0x160] ss:$8 sps:$4 sm:$0xff]   ;;  %v1903_v57 = vld [vmem:[%s2432_s1 + $0x14] ss:$8 sps:$4 sm:$0xff]  }
  0x7f   : > { %1356 = vmatpush1.bf16.msra.mxu0 %v1851_v42  ;;  %1310 = vmatprep.subr.bf16.mxu1 %v1893_v52  ;;  %v1899_v55 = vld [vmem:[%s2430_s6 + $0xc] ss:$24 sps:$4 sm:$0xff]   ;;  %v1905_v58 = vld [vmem:[%s2432_s1 + $0x10] ss:$8 sps:$4 sm:$0xff]   ;;  %v1911_v62 = vld [vmem:[%s2432_s1 + $0x20] ss:$8 sps:$4 sm:$0xff]  }
  0x80   : > { %1357 = vmatprep.subr.bf16.mxu0 %v1852_v43  ;;  %1311 = vmatpush1.bf16.msra.mxu1 %v1896_v53  ;;  %v1869_v59 = vld [vmem:[%s2432_s1 + $0x170] ss:$8 sps:$4 sm:$0xff]   ;;  %v1870_v60 = vld [vmem:[%s2432_s1 + $0x184] ss:$8 sps:$4 sm:$0xff]   ;;  %v1872_v63 = vld [vmem:[%s2432_s1 + $0x180] ss:$8 sps:$4 sm:$0xff]  }
  0x81   : > { %1385 = vmatprep.mubr.bf16.mxu0 %v1899_v55  ;;  %1312 = vmatprep.subr.bf16.mxu1 %v1903_v57  ;;  %v1909_v61 = vld [vmem:[%s2432_s1 + $0x24] ss:$8 sps:$4 sm:$0xff]   ;;  %v1915_v0 = vld [vmem:[%s2432_s1 + $0x34] ss:$8 sps:$4 sm:$0xff]   ;;  %v1917_v2 = vld [vmem:[%s2432_s1 + $0x30] ss:$8 sps:$4 sm:$0xff]  }
  0x82   : > { %v1873_v1 = vld [vmem:[%s2432_s1 + $0x194] ss:$8 sps:$4 sm:$0xff]   ;;  %v1921_v3 = vld [vmem:[%s2432_s1 + $0x44] ss:$8 sps:$4 sm:$0xff]   ;;  %v1875_v4 = vld [vmem:[%s2432_s1 + $0x190] ss:$8 sps:$4 sm:$0xff]  }
  0x83   : > { %1358 = vmatpush1.bf16.msra.mxu0 %v1854_v44  ;;  %v1876_v5 = vld [vmem:[%s2432_s1 + $0x1a4] ss:$8 sps:$4 sm:$0xff]   ;;  %v1923_v6 = vld [vmem:[%s2432_s1 + $0x40] ss:$8 sps:$4 sm:$0xff]   ;;  %v1927_v7 = vld [vmem:[%s2432_s1 + $0x54] ss:$8 sps:$4 sm:$0xff]  }
  0x84   : > { %1359 = vmatprep.subr.bf16.mxu0 %v1855_v45  ;;  %1313 = vmatpush1.bf16.msra.mxu1 %v1905_v58  ;;  %v1878_v8 = vld [vmem:[%s2432_s1 + $0x1a0] ss:$8 sps:$4 sm:$0xff]   ;;  %v1879_v9 = vld [vmem:[%s2432_s1 + $0x1b4] ss:$8 sps:$4 sm:$0xff]   ;;  %v1929_v10 = vld [vmem:[%s2432_s1 + $0x50] ss:$8 sps:$4 sm:$0xff]  }
  0x85   : > { %1314 = vmatprep.subr.bf16.mxu1 %v1909_v61  ;;  %v1933_v11 = vld [vmem:[%s2432_s1 + $0x64] ss:$8 sps:$4 sm:$0xff]   ;;  %v1881_v12 = vld [vmem:[%s2432_s1 + $0x1b0] ss:$8 sps:$4 sm:$0xff]   ;;  %v1935_v14 = vld [vmem:[%s2432_s1 + $0x60] ss:$8 sps:$4 sm:$0xff]  }
  0x86   : > { %v1882_v13 = vld [vmem:[%s2432_s1 + $0x1c4] ss:$8 sps:$4 sm:$0xff]   ;;  %v1939_v15 = vld [vmem:[%s2432_s1 + $0x74] ss:$8 sps:$4 sm:$0xff]   ;;  %v1884_v16 = vld [vmem:[%s2432_s1 + $0x1c0] ss:$8 sps:$4 sm:$0xff]  }
  0x87   : > { %1360 = vmatpush1.bf16.msra.mxu0 %v1857_v46  ;;  %v1885_v17 = vld [vmem:[%s2432_s1 + $0x1d4] ss:$8 sps:$4 sm:$0xff]   ;;  %v1941_v18 = vld [vmem:[%s2432_s1 + $0x70] ss:$8 sps:$4 sm:$0xff]   ;;  %v1945_v19 = vld [vmem:[%s2432_s1 + $0x84] ss:$8 sps:$4 sm:$0xff]  }
  0x88   : > { %1361 = vmatprep.subr.bf16.mxu0 %v1858_v47  ;;  %1315 = vmatpush1.bf16.msra.mxu1 %v1911_v62  ;;  %v1887_v20 = vld [vmem:[%s2432_s1 + $0x1d0] ss:$8 sps:$4 sm:$0xff]   ;;  %v1888_v21 = vld [vmem:[%s2432_s1 + $0x1e4] ss:$8 sps:$4 sm:$0xff]   ;;  %v1947_v22 = vld [vmem:[%s2432_s1 + $0x80] ss:$8 sps:$4 sm:$0xff]  }
  0x89   : > { %1316 = vmatprep.subr.bf16.mxu1 %v1915_v0  ;;  %v1951_v23 = vld [vmem:[%s2432_s1 + $0x94] ss:$8 sps:$4 sm:$0xff]   ;;  %v1890_v24 = vld [vmem:[%s2432_s1 + $0x1e0] ss:$8 sps:$4 sm:$0xff]   ;;  %v1953_v26 = vld [vmem:[%s2432_s1 + $0x90] ss:$8 sps:$4 sm:$0xff]  }
  0x8a   : > { %v1891_v25 = vld [vmem:[%s2432_s1 + $0x1f4] ss:$8 sps:$4 sm:$0xff]   ;;  %v1957_v27 = vld [vmem:[%s2432_s1 + $0xa4] ss:$8 sps:$4 sm:$0xff]   ;;  %v1895_v28 = vld [vmem:[%s2432_s1 + $0x1f0] ss:$8 sps:$4 sm:$0xff]  }
  0x8b   : > { %1362 = vmatpush1.bf16.msra.mxu0 %v1860_v48  ;;  %v1902_v29 = vld [vmem:[%s2432_s1 + $0x204] ss:$8 sps:$4 sm:$0xff]   ;;  %v1959_v30 = vld [vmem:[%s2432_s1 + $0xa0] ss:$8 sps:$4 sm:$0xff]   ;;  %v1963_v32 = vld [vmem:[%s2432_s1 + $0xb4] ss:$8 sps:$4 sm:$0xff]  }
  0x8c   : > { %1363 = vmatprep.subr.bf16.mxu0 %v1861_v49  ;;  %1317 = vmatpush1.bf16.msra.mxu1 %v1917_v2  ;;  %v1897_v31 = vld [vmem:[%s2430_s6 + $0x8] ss:$24 sps:$4 sm:$0xff]   ;;  %v1908_v34 = vld [vmem:[%s2432_s1 + $0x214] ss:$8 sps:$4 sm:$0xff]   ;;  %v1969_v37 = vld [vmem:[%s2432_s1 + $0xc4] ss:$8 sps:$4 sm:$0xff]  }
  0x8d   : > { %1318 = vmatprep.subr.bf16.mxu1 %v1921_v3  ;;  %v1900_v33 = vld [vmem:[%s2432_s1 + $0x200] ss:$8 sps:$4 sm:$0xff]   ;;  %v1965_v35 = vld [vmem:[%s2432_s1 + $0xb0] ss:$8 sps:$4 sm:$0xff]   ;;  %v1992_v36 = vld [vmem:[%s2430_s6 + $0x4] ss:$24 sps:$4 sm:$0xff]  }
  0x8e   : > { %v1906_v38 = vld [vmem:[%s2432_s1 + $0x210] ss:$8 sps:$4 sm:$0xff]   ;;  %1342 = vmatprep.mubr.bf16.mxu1 %v1992_v36  ;;  %v1998_v39 = vld [vmem:[%s2430_s6 + $0x14] ss:$24 sps:$4 sm:$0xff]   ;;  %v1971_v41 = vld [vmem:[%s2432_s1 + $0xc0] ss:$8 sps:$4 sm:$0xff]  }
  0x8f   : > { %1364 = vmatpush1.bf16.msra.mxu0 %v1863_v50  ;;  %v1914_v40 = vld [vmem:[%s2432_s1 + $0x224] ss:$8 sps:$4 sm:$0xff]   ;;  %v1975_v42 = vld [vmem:[%s2432_s1 + $0xd4] ss:$8 sps:$4 sm:$0xff]   ;;  %v1912_v43 = vld [vmem:[%s2432_s1 + $0x220] ss:$8 sps:$4 sm:$0xff]  }
  0x90   : > { %1365 = vmatprep.subr.bf16.mxu0 %v1864_v51  ;;  %1319 = vmatpush1.bf16.msra.mxu1 %v1923_v6  ;;  %v1920_v44 = vld [vmem:[%s2432_s1 + $0x234] ss:$8 sps:$4 sm:$0xff]   ;;  %v1977_v45 = vld [vmem:[%s2432_s1 + $0xd0] ss:$8 sps:$4 sm:$0xff]   ;;  %v1981_v46 = vld [vmem:[%s2432_s1 + $0xe4] ss:$8 sps:$4 sm:$0xff]  }
  0x91   : > { %1320 = vmatprep.subr.bf16.mxu1 %v1927_v7  ;;  %v1918_v47 = vld [vmem:[%s2432_s1 + $0x230] ss:$8 sps:$4 sm:$0xff]   ;;  %v1926_v48 = vld [vmem:[%s2432_s1 + $0x244] ss:$8 sps:$4 sm:$0xff]   ;;  %v1983_v49 = vld [vmem:[%s2432_s1 + $0xe0] ss:$8 sps:$4 sm:$0xff]  }
  0x92   : > { %v1987_v50 = vld [vmem:[%s2432_s1 + $0xf4] ss:$8 sps:$4 sm:$0xff]   ;;  %v1924_v51 = vld [vmem:[%s2432_s1 + $0x240] ss:$8 sps:$4 sm:$0xff]   ;;  %v1989_v53 = vld [vmem:[%s2432_s1 + $0xf0] ss:$8 sps:$4 sm:$0xff]  }
  0x93   : > { %1366 = vmatpush1.bf16.msra.mxu0 %v1866_v54  ;;  %v1932_v52 = vld [vmem:[%s2432_s1 + $0x254] ss:$8 sps:$4 sm:$0xff]   ;;  %v1930_v54 = vld [vmem:[%s2432_s1 + $0x250] ss:$8 sps:$4 sm:$0xff]   ;;  %v1938_v55 = vld [vmem:[%s2432_s1 + $0x264] ss:$8 sps:$4 sm:$0xff]  }
  0x94   : > { %1367 = vmatprep.subr.bf16.mxu0 %v1867_v56  ;;  %1321 = vmatpush1.bf16.msra.mxu1 %v1929_v10  ;;  %v1990_v56 = vld [vmem:[%s2430_s6] ss:$24 sps:$4 sm:$0xff]   ;;  %v1944_v58 = vld [vmem:[%s2432_s1 + $0x274] ss:$8 sps:$4 sm:$0xff]   ;;  %v1962_v0 = vld [vmem:[%s2432_s1 + $0x2a4] ss:$8 sps:$4 sm:$0xff]  }
  0x95   : > { %1322 = vmatprep.subr.bf16.mxu1 %v1933_v11  ;;  %v1936_v57 = vld [vmem:[%s2432_s1 + $0x260] ss:$8 sps:$4 sm:$0xff]   ;;  %v1956_v62 = vld [vmem:[%s2432_s1 + $0x294] ss:$8 sps:$4 sm:$0xff]   ;;  %v1966_v3 = vld [vmem:[%s2432_s1 + $0x2b0] ss:$8 sps:$4 sm:$0xff]  }
  0x96   : > { %v1948_v61 = vld [vmem:[%s2432_s1 + $0x280] ss:$8 sps:$4 sm:$0xff]   ;;  %v1968_v2 = vld [vmem:[%s2432_s1 + $0x2b4] ss:$8 sps:$4 sm:$0xff]   ;;  %v1978_v7 = vld [vmem:[%s2432_s1 + $0x2d0] ss:$8 sps:$4 sm:$0xff]  }
  0x97   : > { %1368 = vmatpush1.bf16.msra.mxu0 %v1869_v59  ;;  %v1942_v59 = vld [vmem:[%s2432_s1 + $0x270] ss:$8 sps:$4 sm:$0xff]   ;;  %v1980_v6 = vld [vmem:[%s2432_s1 + $0x2d4] ss:$8 sps:$4 sm:$0xff]   ;;  %p1736_p5 = scmp.ne.s32.totalorder %s2069_s18, 2 }
  0x98   : > { %1369 = vmatprep.subr.bf16.mxu0 %v1870_v60  ;;  %1323 = vmatpush1.bf16.msra.mxu1 %v1935_v14  ;;  %v1950_v60 = vld [vmem:[%s2432_s1 + $0x284] ss:$8 sps:$4 sm:$0xff]   ;;  %v1995_v10 = vld [vmem:[%s2432_s1 + $0x2f4] ss:$8 sps:$4 sm:$0xff]   ;;  %v1993_v11 = vld [vmem:[%s2432_s1 + $0x2f0] ss:$8 sps:$4 sm:$0xff]  }
  0x99   : > { %1324 = vmatprep.subr.bf16.mxu1 %v1939_v15 }
  0x9b   : > { %1370 = vmatpush1.bf16.msra.mxu0 %v1872_v63  ;;  %v1954_v63 = vld [vmem:[%s2432_s1 + $0x290] ss:$8 sps:$4 sm:$0xff]  }
  0x9c   : > { %1371 = vmatprep.subr.bf16.mxu0 %v1873_v1  ;;  %1325 = vmatpush1.bf16.msra.mxu1 %v1941_v18  ;;  %v1960_v1 = vld [vmem:[%s2432_s1 + $0x2a0] ss:$8 sps:$4 sm:$0xff]  }
  0x9d   : > { %1326 = vmatprep.subr.bf16.mxu1 %v1945_v19 }
  0x9f   : > { %1372 = vmatpush1.bf16.msra.mxu0 %v1875_v4  ;;  %v1974_v4 = vld [vmem:[%s2432_s1 + $0x2c4] ss:$8 sps:$4 sm:$0xff]  }
  0xa0   : > { %1373 = vmatprep.subr.bf16.mxu0 %v1876_v5  ;;  %1327 = vmatpush1.bf16.msra.mxu1 %v1947_v22  ;;  %v1972_v5 = vld [vmem:[%s2432_s1 + $0x2c0] ss:$8 sps:$4 sm:$0xff]  }
  0xa1   : > { %1328 = vmatprep.subr.bf16.mxu1 %v1951_v23  ;;  %v696_v23 = vld [vmem:[#allocation2 + $0x10] sm:$0xff] }
  0xa3   : > { %1374 = vmatpush1.bf16.msra.mxu0 %v1878_v8  ;;  %v1986_v8 = vld [vmem:[%s2432_s1 + $0x2e4] ss:$8 sps:$4 sm:$0xff]  }
  0xa4   : > { %1375 = vmatprep.subr.bf16.mxu0 %v1879_v9  ;;  %1329 = vmatpush1.bf16.msra.mxu1 %v1953_v26  ;;  %v1984_v9 = vld [vmem:[%s2432_s1 + $0x2e0] ss:$8 sps:$4 sm:$0xff]  }
  0xa5   : > { %1330 = vmatprep.subr.bf16.mxu1 %v1957_v27  ;;  %v697_v27 = vld [vmem:[#allocation2 + $0x18] sm:$0xff] }
  0xa7   : > { %1376 = vmatpush1.bf16.msra.mxu0 %v1881_v12  ;;  %v1996_v12 = vld [vmem:[%s2430_s6 + $0x10] ss:$24 sps:$4 sm:$0xff]  }
  0xa8   : > { %1377 = vmatprep.subr.bf16.mxu0 %v1882_v13  ;;  %1331 = vmatpush1.bf16.msra.mxu1 %v1959_v30 }
  0xa9   : > { %1332 = vmatprep.subr.bf16.mxu1 %v1963_v32 }
  0xab   : > { %1378 = vmatpush1.bf16.msra.mxu0 %v1884_v16 }
  0xac   : > { %1379 = vmatprep.subr.bf16.mxu0 %v1885_v17  ;;  %1333 = vmatpush1.bf16.msra.mxu1 %v1965_v35  ;;  %v694_v17 = vld [vmem:[#allocation2] sm:$0xff] }
  0xad   : > { %1334 = vmatprep.subr.bf16.mxu1 %v1969_v37  ;;  %v1455_v35 = vld [vmem:[%s682_s5] sm:$0x3] (!%p1736_p5) }
  0xaf   : > { %1380 = vmatpush1.bf16.msra.mxu0 %v1887_v20  ;;  %v695_v20 = vld [vmem:[#allocation2 + $0x8] sm:$0xff] }
  0xb0   : > { %1381 = vmatprep.subr.bf16.mxu0 %v1888_v21  ;;  %1335 = vmatpush1.bf16.msra.mxu1 %v1971_v41 }
  0xb1   : > { %1336 = vmatprep.subr.bf16.mxu1 %v1975_v42 }
  0xb3   : > { %1382 = vmatpush1.bf16.msra.mxu0 %v1890_v24 }
  0xb4   : > { %1383 = vmatprep.subr.bf16.mxu0 %v1891_v25  ;;  %1337 = vmatpush1.bf16.msra.mxu1 %v1977_v45 }
  0xb5   : > { %1338 = vmatprep.subr.bf16.mxu1 %v1981_v46 }
  0xb7   : > { %1384 = vmatpush1.bf16.msra.mxu0 %v1895_v28 }
  0xb8   : > { %1396 = vmatprep.subr.bf16.mxu0 %v1902_v29  ;;  %1339 = vmatpush1.bf16.msra.mxu1 %v1983_v49 }
  0xb9   : > { %1340 = vmatprep.subr.bf16.mxu1 %v1987_v50 }
  0xba   : > { %1386 = vmatmul.mubr.bf16.vlgmr.msra.gmra.mrb[0].mxu0 %v1897_v31 }
  0xbb   : > { %1397 = vmatpush1.bf16.msra.mxu0 %v1900_v33  ;;  %1428 = vmatprep.mubr.bf16.mxu0 %v1998_v39  ;;  %v1457_v33 = vlaneseq (!%p1736_p5) }
  0xbc   : > { %1398 = vmatprep.subr.bf16.mxu0 %v1908_v34  ;;  %1341 = vmatpush1.bf16.msra.mxu1 %v1989_v53 }
  0xbd   : > { %v1458_v34 = vshrl.u32 (!%p1736_p5), %v1457_v33, 7 }
  0xbf   : > { %1399 = vmatpush1.bf16.msra.mxu0 %v1906_v38  ;;  %1343 = vmatmul.mubr.bf16.vlgmr.msra.gmra.mrb[0].mxu1 %v1990_v56  ;;  %v1459_v37 = vsub.s32 (!%p1736_p5), 0, %v1458_v34  ;;  %v1463_v38 = vsub.s32 (!%p1736_p5), 1, %v1458_v34 }
  0xc0   : > { %1400 = vmatprep.subr.bf16.mxu0 %v1914_v40 }
  0xc1   : > { %v1460_v42 = vrot.slane (!%p1736_p5), %v1455_v35, %v1459_v37 }
  0xc3   : > { %1401 = vmatpush1.bf16.msra.mxu0 %v1912_v43  ;;  %v1464_v43 = vrot.slane (!%p1736_p5), %v1455_v35, %v1463_v38 }
  0xc4   : > { %1402 = vmatprep.subr.bf16.mxu0 %v1920_v44 }
  0xc7   : > { %1403 = vmatpush1.bf16.msra.mxu0 %v1918_v47 }
  0xc8   : > { %1404 = vmatprep.subr.bf16.mxu0 %v1926_v48 }
  0xcb   : > { %1405 = vmatpush1.bf16.msra.mxu0 %v1924_v51 }
  0xcc   : > { %1406 = vmatprep.subr.bf16.mxu0 %v1932_v52 }
  0xcf   : > { %1407 = vmatpush1.bf16.msra.mxu0 %v1930_v54 }
  0xd0   : > { %1408 = vmatprep.subr.bf16.mxu0 %v1938_v55 }
  0xd3   : > { %1409 = vmatpush1.bf16.msra.mxu0 %v1936_v57 }
  0xd4   : > { %1410 = vmatprep.subr.bf16.mxu0 %v1944_v58 }
  0xd7   : > { %1411 = vmatpush1.bf16.msra.mxu0 %v1942_v59 }
  0xd8   : > { %1412 = vmatprep.subr.bf16.mxu0 %v1950_v60 }
  0xdb   : > { %1413 = vmatpush1.bf16.msra.mxu0 %v1948_v61 }
  0xdc   : > { %1414 = vmatprep.subr.bf16.mxu0 %v1956_v62 }
  0xdf   : > { %1415 = vmatpush1.bf16.msra.mxu0 %v1954_v63 }
  0xe0   : > { %1416 = vmatprep.subr.bf16.mxu0 %v1962_v0 }
  0xe3   : > { %1417 = vmatpush1.bf16.msra.mxu0 %v1960_v1 }
  0xe4   : > { %1418 = vmatprep.subr.bf16.mxu0 %v1968_v2 }
  0xe7   : > { %1419 = vmatpush1.bf16.msra.mxu0 %v1966_v3 }
  0xe8   : > { %1420 = vmatprep.subr.bf16.mxu0 %v1974_v4 }
  0xeb   : > { %1421 = vmatpush1.bf16.msra.mxu0 %v1972_v5 }
  0xec   : > { %1422 = vmatprep.subr.bf16.mxu0 %v1980_v6 }
  0xef   : > { %1423 = vmatpush1.bf16.msra.mxu0 %v1978_v7 }
  0xf0   : > { %1424 = vmatprep.subr.bf16.mxu0 %v1986_v8 }
  0xf3   : > { %1425 = vmatpush1.bf16.msra.mxu0 %v1984_v9 }
  0xf4   : > { %1426 = vmatprep.subr.bf16.mxu0 %v1995_v10 }
  0xf7   : > { %1427 = vmatpush1.bf16.msra.mxu0 %v1993_v11 }
  0xfa   : > { %1429 = vmatmul.mubr.bf16.vlgmr.msra.gmra.mrb[0].mxu0 %v1996_v12 }
 0x192   : > { %v1344_v13 = vpop.f32.mrb[0].mxu1 }
 0x193   : > { %v1346_v14 = vpop.f32.mrb[1].mxu1 }
 0x194   : > { %v1348_v15 = vpop.f32.mrb[2].mxu1 }
 0x195   : > { %v1350_v16 = vpop.f32.mrb[3].mxu1 }
 0x1cd   : > { %v1430_v18 = vpop.f32.mrb[0].mxu0 }
 0x1ce   : > { %v1745_v19 = vadd.f32 %v1430_v18, %v1344_v13  ;;  %v1432_v21 = vpop.f32.mrb[1].mxu0 }
 0x1cf   : > { %v1746_v22 = vadd.f32 %v1432_v21, %v1346_v14  ;;  %v1434_v24 = vpop.f32.mrb[2].mxu0  ;;  %1450 = sbr.rel (%p1736_p5) target bundleno = 482 (0x1e2), region = 101 }
 0x1d0   : > { %v1439_v25 = vadd.f32 %v1745_v19, %v694_v17  ;;  %v1747_v26 = vadd.f32 %v1434_v24, %v1348_v15  ;;  %v1436_v28 = vpop.f32.mrb[3].mxu0 }
 0x1d1   : > { %v1440_v29 = vadd.f32 %v1746_v22, %v695_v20  ;;  %v1748_v30 = vadd.f32 %v1436_v28, %v1350_v16 }
 0x1d2   : > { %1443 = vst [vmem:[#allocation2] sm:$0xff] %v1439_v25  ;;  %v1441_v31 = vadd.f32 %v1747_v26, %v696_v23 }
 0x1d3   : > { %1444 = vst [vmem:[#allocation2 + $0x8] sm:$0xff] %v1440_v29  ;;  %v1442_v32 = vadd.f32 %v1748_v30, %v697_v27 }
 0x1d4   : > { %1445 = vst [vmem:[#allocation2 + $0x10] sm:$0xff] %v1441_v31 }
 0x1d5   : > { %1446 = vst [vmem:[#allocation2 + $0x18] sm:$0xff] %v1442_v32 }
 0x1d9   : > { %v1451_v36 = vld [vmem:[#allocation2] sm:$0xff] }
 0x1da   : > { %v1452_v39 = vld [vmem:[#allocation2 + $0x8] sm:$0xff]  ;;  %v1467_v44 = vadd.f32 %v1460_v42, %v1451_v36 }
 0x1db   : > { %v1453_v40 = vld [vmem:[#allocation2 + $0x10] sm:$0xff]  ;;  %v1468_v45 = vadd.f32 %v1464_v43, %v1452_v39 }
 0x1dc   : > { %v1454_v41 = vld [vmem:[#allocation2 + $0x18] sm:$0xff]  ;;  %v1469_v46 = vadd.f32 %v1460_v42, %v1453_v40  ;;  %v1471_v48 = vmax.f32 %v1467_v44, 0.0 }
 0x1dd   : > { %v1470_v47 = vadd.f32 %v1464_v43, %v1454_v41  ;;  %v1472_v49 = vmax.f32 %v1468_v45, 0.0 }
 0x1de   : > { %v1473_v50 = vmax.f32 %v1469_v46, 0.0  ;;  %1475 = vst [vmem:[%s2434_s25] sm:$0xff] %v1471_v48 }
 0x1df   : > { %v1474_v51 = vmax.f32 %v1470_v47, 0.0  ;;  %1476 = vst [vmem:[%s2434_s25 + $0x8] sm:$0xff] %v1472_v49 }
 0x1e0   : > { %1477 = vst [vmem:[%s2434_s25 + $0x10] sm:$0xff] %v1473_v50 }
 0x1e1   : > { %1478 = vst [vmem:[%s2434_s25 + $0x18] sm:$0xff] %v1474_v51 }
 0x1e2 PF: > { %1485 = sbr.rel (!%p2202_p12) target bundleno = 490 (0x1ea), region = 105  ;;  %s1744_s14 = sshll.u32 (%p2202_p12), %s2073_s19, 4 }
 0x1e3   : > { %s1491_s0 = scalar_lea.vmem (%p2202_p12), %s2595_s3, %s1744_s14 }
 0x1e5   : > { %v1504_v52 = vld [vmem:[%s2434_s25] sm:$0xff] (%p2202_p12) }
 0x1e6   : > { %v1506_v53 = vld [vmem:[%s2434_s25 + $0x8] sm:$0xff] (%p2202_p12)  ;;  %1505 = vst [vmem:[%s1491_s0] sm:$0xff] (%p2202_p12), %v1504_v52 }
 0x1e7   : > { %v1508_v54 = vld [vmem:[%s2434_s25 + $0x10] sm:$0xff] (%p2202_p12)  ;;  %1507 = vst [vmem:[%s1491_s0 + $0x8] sm:$0xff] (%p2202_p12), %v1506_v53 }
 0x1e8   : > { %v1510_v55 = vld [vmem:[%s2434_s25 + $0x18] sm:$0xff] (%p2202_p12)  ;;  %1509 = vst [vmem:[%s1491_s0 + $0x20] sm:$0xff] (%p2202_p12), %v1508_v54 }
 0x1e9   : > { %1511 = vst [vmem:[%s1491_s0 + $0x28] sm:$0xff] %v1510_v55 }
 0x1ea PF: > { %s13_s22 = sadd.s32 1, %s2085_s22   ;;  %s2605_s10 = sld [smem:[#allocation6_spill]] }
 0x1eb   : > { %p10_p6 = scmp.ge.s32.totalorder %s13_s22, 8   ;;  %s2606_s12 = smov %s2049_s13 }
 0x1ec   : > { %s2607_s13 = smov %s2200_s9  ;;  %s2608_s14 = smov %s2057_s15 }
 0x1ed   : > { %s2609_s15 = smov %s2197_s8  ;;  %s2610_s16 = smov %s2065_s17 }
 0x1ee   : > { %s2611_s17 = smov %s2183_s30  ;;  %s2612_s18 = smov %s2077_s20 }
 0x1ef   : > { %s2613_s19 = smov %s2081_s21  ;;  %s2614_s20 = smov %s2617_s24 }
 0x1f0   : > { %s2615_s21 = smov %s2605_s10  ;;  %12 = sbr.rel (!%p10_p6) target bundleno = 9 (0x9), region = 170 }

// kernel: resnet_triplet_forward.24
= control target key start
LH: loop header
LB: loop body
LE: loop exit
PB: predicated region body
PF: predicated region fallthrough
CT: control target
= control target key end

     0   :  { %s1052_s12 = smov 0   ;;  %s1054_s13 = smov 0   ;;  %s1240_s0 = inlined_call_operand.vmem [shape: bf16[16,256], index: 0, kind: input, shape index: {}]   ;;  %s1241_s1 = inlined_call_operand.vmem [shape: bf16[256,512], index: 1, kind: input, shape index: {}]   ;;  %s1242_s2 = inlined_call_operand.vmem [shape: f32[1,512], index: 2, kind: input, shape index: {}]   ;;  %s1243_s3 = inlined_call_operand.vmem [shape: f32[16,512], index: 3, kind: output, shape index: {}]  }
   0x1   :  { %s1056_s14 = smov 0   ;;  %s1058_s15 = smov 0  }
   0x2   :  { %s1060_s16 = smov 0  }
   0x3 LB: > { %s28_s17 = sadd.s32 1, %s1026_s15  ;;  %s848_s18 = sadd.s32 4294967295, %s1030_s16   ;;  %s1030_s16 = sphi %s1060_s16, %s13_s16   ;;  %s1026_s15 = sphi %s1058_s15, %s1248_s15   ;;  %s1022_s14 = sphi %s1056_s14, %s1247_s14   ;;  %s1018_s13 = sphi %s1054_s13, %s1246_s13   ;;  %s1014_s12 = sphi %s1052_s12, %s1245_s12  }
   0x4   : > { %p30_p0 = scmp.ge.s32.totalorder %s28_s17, 2  ;;  %p76_p1 = scmp.ne.s32.totalorder %s1018_s13, %s1014_s12 }
   0x5   : > { %p77_p2 = scmp.eq.s32.totalorder %s1030_s16, 0  ;;  %p134_p4 = scmp.eq.s32.totalorder %s848_s18, 1 }
   0x6   : > { %s1250_s17 = smov (%p30_p0, %s28_s17), 0  ;;  %s69_s20 = sadd.s32 1, %s1018_s13 }
   0x7   : > { %p78_p3 = por %p77_p2, %p76_p1  ;;  %s65_s19 = ssub.s32 %s1026_s15, %s1250_s17 }
   0x8   : > { %p67_p5 = scmp.eq.s32.totalorder %s65_s19, 0  ;;  %p1087_p6 = por %p134_p4, %p76_p1 }
   0x9   : > { %p852_p7 = scmp.ge.s32.totalorder %s1030_s16, 2 }
   0xa   : > { %s1092_s22 = scalar_select %p67_p5, %s1018_s13, %s69_s20  }
   0xb   : > { %171 = sbr.rel (%p852_p7) target bundleno = 38 (0x26), region = 20 }
  0x12   : > { %174 = sbr.rel (!%p78_p3) target bundleno = 38 (0x26), region = 24  ;;  %s176_s23 = sand.u32 (%p78_p3), 1, %s1018_s13  }
  0x13   : > { %s899_s24 = sshll.u32 (%p78_p3), %s1026_s15, 3  ;;  %s853_s25 = sshll.u32 (%p78_p3), %s176_s23, 8 }
  0x14   : > { %s1100_s28 = scalar_lea.vmem (%p78_p3), %s1241_s1, %s899_s24  ;;  %s1105_s29 = scalar_lea.vmem (%p78_p3), [#allocation3], %s853_s25 }
  0x15   : > { %v274_v0 = vld [vmem:[%s1100_s28] sm:$0xff] (%p78_p3)  ;;  %v276_v1 = vld [vmem:[%s1100_s28 + $0x10] sm:$0xff] (%p78_p3) }
  0x16   : > { %v278_v2 = vld [vmem:[%s1100_s28 + $0x20] sm:$0xff] (%p78_p3)  ;;  %275 = vst [vmem:[%s1105_s29] sm:$0xff] (%p78_p3), %v274_v0  ;;  %277 = vst [vmem:[%s1105_s29 + $0x8] sm:$0xff] (%p78_p3), %v276_v1  ;;  %v280_v3 = vld [vmem:[%s1100_s28 + $0x30] sm:$0xff] (%p78_p3) }
  0x17   : > { %279 = vst [vmem:[%s1105_s29 + $0x10] sm:$0xff] (%p78_p3), %v278_v2  ;;  %v282_v4 = vld [vmem:[%s1100_s28 + $0x40] sm:$0xff] (%p78_p3)  ;;  %v284_v5 = vld [vmem:[%s1100_s28 + $0x50] sm:$0xff] (%p78_p3)  ;;  %281 = vst [vmem:[%s1105_s29 + $0x18] sm:$0xff] (%p78_p3), %v280_v3 }
  0x18   : > { %283 = vst [vmem:[%s1105_s29 + $0x20] sm:$0xff] (%p78_p3), %v282_v4  ;;  %285 = vst [vmem:[%s1105_s29 + $0x28] sm:$0xff] (%p78_p3), %v284_v5  ;;  %v286_v6 = vld [vmem:[%s1100_s28 + $0x60] sm:$0xff] (%p78_p3)  ;;  %v288_v7 = vld [vmem:[%s1100_s28 + $0x70] sm:$0xff] (%p78_p3) }
  0x19   : > { %v290_v8 = vld [vmem:[%s1100_s28 + $0x80] sm:$0xff]  ;;  %287 = vst [vmem:[%s1105_s29 + $0x30] sm:$0xff] %v286_v6  ;;  %289 = vst [vmem:[%s1105_s29 + $0x38] sm:$0xff] %v288_v7  ;;  %v292_v9 = vld [vmem:[%s1100_s28 + $0x90] sm:$0xff] }
  0x1a   : > { %291 = vst [vmem:[%s1105_s29 + $0x40] sm:$0xff] %v290_v8  ;;  %v294_v10 = vld [vmem:[%s1100_s28 + $0xa0] sm:$0xff]  ;;  %v296_v11 = vld [vmem:[%s1100_s28 + $0xb0] sm:$0xff]  ;;  %293 = vst [vmem:[%s1105_s29 + $0x48] sm:$0xff] %v292_v9 }
  0x1b   : > { %295 = vst [vmem:[%s1105_s29 + $0x50] sm:$0xff] %v294_v10  ;;  %297 = vst [vmem:[%s1105_s29 + $0x58] sm:$0xff] %v296_v11  ;;  %v298_v12 = vld [vmem:[%s1100_s28 + $0xc0] sm:$0xff]  ;;  %v300_v13 = vld [vmem:[%s1100_s28 + $0xd0] sm:$0xff] }
  0x1c   : > { %v302_v14 = vld [vmem:[%s1100_s28 + $0xe0] sm:$0xff]  ;;  %299 = vst [vmem:[%s1105_s29 + $0x60] sm:$0xff] %v298_v12  ;;  %301 = vst [vmem:[%s1105_s29 + $0x68] sm:$0xff] %v300_v13  ;;  %v304_v15 = vld [vmem:[%s1100_s28 + $0xf0] sm:$0xff] }
  0x1d   : > { %303 = vst [vmem:[%s1105_s29 + $0x70] sm:$0xff] %v302_v14  ;;  %v306_v16 = vld [vmem:[%s1100_s28 + $0x100] sm:$0xff]  ;;  %v308_v17 = vld [vmem:[%s1100_s28 + $0x110] sm:$0xff]  ;;  %305 = vst [vmem:[%s1105_s29 + $0x78] sm:$0xff] %v304_v15 }
  0x1e   : > { %307 = vst [vmem:[%s1105_s29 + $0x80] sm:$0xff] %v306_v16  ;;  %309 = vst [vmem:[%s1105_s29 + $0x88] sm:$0xff] %v308_v17  ;;  %v310_v18 = vld [vmem:[%s1100_s28 + $0x120] sm:$0xff]  ;;  %v312_v19 = vld [vmem:[%s1100_s28 + $0x130] sm:$0xff] }
  0x1f   : > { %v314_v20 = vld [vmem:[%s1100_s28 + $0x140] sm:$0xff]  ;;  %311 = vst [vmem:[%s1105_s29 + $0x90] sm:$0xff] %v310_v18  ;;  %313 = vst [vmem:[%s1105_s29 + $0x98] sm:$0xff] %v312_v19  ;;  %v316_v21 = vld [vmem:[%s1100_s28 + $0x150] sm:$0xff] }
  0x20   : > { %315 = vst [vmem:[%s1105_s29 + $0xa0] sm:$0xff] %v314_v20  ;;  %v318_v22 = vld [vmem:[%s1100_s28 + $0x160] sm:$0xff]  ;;  %v320_v23 = vld [vmem:[%s1100_s28 + $0x170] sm:$0xff]  ;;  %317 = vst [vmem:[%s1105_s29 + $0xa8] sm:$0xff] %v316_v21 }
  0x21   : > { %319 = vst [vmem:[%s1105_s29 + $0xb0] sm:$0xff] %v318_v22  ;;  %321 = vst [vmem:[%s1105_s29 + $0xb8] sm:$0xff] %v320_v23  ;;  %v322_v24 = vld [vmem:[%s1100_s28 + $0x180] sm:$0xff]  ;;  %v324_v25 = vld [vmem:[%s1100_s28 + $0x190] sm:$0xff] }
  0x22   : > { %v326_v26 = vld [vmem:[%s1100_s28 + $0x1a0] sm:$0xff]  ;;  %323 = vst [vmem:[%s1105_s29 + $0xc0] sm:$0xff] %v322_v24  ;;  %325 = vst [vmem:[%s1105_s29 + $0xc8] sm:$0xff] %v324_v25  ;;  %v328_v27 = vld [vmem:[%s1100_s28 + $0x1b0] sm:$0xff] }
  0x23   : > { %327 = vst [vmem:[%s1105_s29 + $0xd0] sm:$0xff] %v326_v26  ;;  %v330_v28 = vld [vmem:[%s1100_s28 + $0x1c0] sm:$0xff]  ;;  %v332_v29 = vld [vmem:[%s1100_s28 + $0x1d0] sm:$0xff]  ;;  %329 = vst [vmem:[%s1105_s29 + $0xd8] sm:$0xff] %v328_v27 }
  0x24   : > { %331 = vst [vmem:[%s1105_s29 + $0xe0] sm:$0xff] %v330_v28  ;;  %333 = vst [vmem:[%s1105_s29 + $0xe8] sm:$0xff] %v332_v29  ;;  %v334_v30 = vld [vmem:[%s1100_s28 + $0x1e0] sm:$0xff]  ;;  %v336_v31 = vld [vmem:[%s1100_s28 + $0x1f0] sm:$0xff] }
  0x25   : > { %335 = vst [vmem:[%s1105_s29 + $0xf0] sm:$0xff] %v334_v30  ;;  %337 = vst [vmem:[%s1105_s29 + $0xf8] sm:$0xff] %v336_v31 }
  0x26 PF: > { %p856_p8 = scmp.ge.s32.totalorder %s1030_s16, 1  ;;  %p350_p9 = scmp.lt.s32.totalorder %s1030_s16, 3 }
  0x28   : > { %p351_p10 = pnand %p856_p8, %p350_p9 }
  0x29   : > { %s357_s30 = sand.u32 (!%p351_p10), 1, %s1014_s12   ;;  %v991_v32 = vld [vmem:[%s1240_s0 + $0x4] ss:$8 sps:$4 sm:$0xff] (!%p351_p10)   ;;  %v989_v1 = vld [vmem:[%s1240_s0] ss:$8 sps:$4 sm:$0xff] (!%p351_p10)   ;;  %s859_s10 = sshll.u32 (!%p351_p10), %s1022_s14, 1  ;;  %v690_v2 = vlaneseq (!%p351_p10) }
  0x2a   : > { %354 = sbr.rel (%p351_p10) target bundleno = 335 (0x14f), region = 66  ;;  %s857_s4 = sshll.u32 (!%p351_p10), %s357_s30, 8  ;;  %662 = vmatprep.mubr.bf16.mxu0 (!%p351_p10), %v991_v32 }
  0x2b   : > { %s1176_s7 = scalar_lea.vmem (!%p351_p10), [#allocation3], %s857_s4  ;;  %p408_p11 = scmp.lt.s32.totalorder (!%p351_p10), %s859_s10, 3  ;;  %v691_v3 = vshrl.u32 (!%p351_p10), %v690_v2, 7 }
  0x2c   : > { %v941_v33 = vld [vmem:[%s1176_s7 + $0x4] ss:$8 sps:$4 sm:$0xff] (!%p351_p10)   ;;  %v943_v34 = vld [vmem:[%s1176_s7] ss:$8 sps:$4 sm:$0xff] (!%p351_p10)   ;;  %v944_v35 = vld [vmem:[%s1176_s7 + $0x14] ss:$8 sps:$4 sm:$0xff] (!%p351_p10)  }
  0x2d   : > { %630 = vmatprep.subr.bf16.mxu0 (!%p351_p10), %v941_v33  ;;  %v946_v36 = vld [vmem:[%s1176_s7 + $0x10] ss:$8 sps:$4 sm:$0xff] (!%p351_p10)   ;;  %v947_v37 = vld [vmem:[%s1176_s7 + $0x24] ss:$8 sps:$4 sm:$0xff] (!%p351_p10)   ;;  %v949_v38 = vld [vmem:[%s1176_s7 + $0x20] ss:$8 sps:$4 sm:$0xff] (!%p351_p10)  }
  0x2e   : > { %631 = vmatpush1.bf16.msra.mxu0 (!%p351_p10), %v943_v34  ;;  %v950_v39 = vld [vmem:[%s1176_s7 + $0x34] ss:$8 sps:$4 sm:$0xff] (!%p351_p10)   ;;  %v952_v40 = vld [vmem:[%s1176_s7 + $0x30] ss:$8 sps:$4 sm:$0xff] (!%p351_p10)   ;;  %v953_v41 = vld [vmem:[%s1176_s7 + $0x44] ss:$8 sps:$4 sm:$0xff] (!%p351_p10)  }
  0x2f   : > { %632 = vmatprep.subr.bf16.mxu0 (!%p351_p10), %v944_v35  ;;  %v955_v42 = vld [vmem:[%s1176_s7 + $0x40] ss:$8 sps:$4 sm:$0xff] (!%p351_p10)   ;;  %v956_v43 = vld [vmem:[%s1176_s7 + $0x54] ss:$8 sps:$4 sm:$0xff] (!%p351_p10)   ;;  %v958_v44 = vld [vmem:[%s1176_s7 + $0x50] ss:$8 sps:$4 sm:$0xff] (!%p351_p10)  }
  0x30   : > { %v959_v45 = vld [vmem:[%s1176_s7 + $0x64] ss:$8 sps:$4 sm:$0xff] (!%p351_p10)   ;;  %v961_v46 = vld [vmem:[%s1176_s7 + $0x60] ss:$8 sps:$4 sm:$0xff] (!%p351_p10)   ;;  %v962_v47 = vld [vmem:[%s1176_s7 + $0x74] ss:$8 sps:$4 sm:$0xff] (!%p351_p10)  }
  0x31   : > { %v964_v48 = vld [vmem:[%s1176_s7 + $0x70] ss:$8 sps:$4 sm:$0xff]   ;;  %v965_v49 = vld [vmem:[%s1176_s7 + $0x84] ss:$8 sps:$4 sm:$0xff]   ;;  %v967_v50 = vld [vmem:[%s1176_s7 + $0x80] ss:$8 sps:$4 sm:$0xff]  }
  0x32   : > { %633 = vmatpush1.bf16.msra.mxu0 %v946_v36  ;;  %v968_v51 = vld [vmem:[%s1176_s7 + $0x94] ss:$8 sps:$4 sm:$0xff]   ;;  %v970_v52 = vld [vmem:[%s1176_s7 + $0x90] ss:$8 sps:$4 sm:$0xff]   ;;  %v971_v53 = vld [vmem:[%s1176_s7 + $0xa4] ss:$8 sps:$4 sm:$0xff]  }
  0x33   : > { %634 = vmatprep.subr.bf16.mxu0 %v947_v37  ;;  %v973_v54 = vld [vmem:[%s1176_s7 + $0xa0] ss:$8 sps:$4 sm:$0xff]   ;;  %v974_v55 = vld [vmem:[%s1176_s7 + $0xb4] ss:$8 sps:$4 sm:$0xff]   ;;  %v976_v56 = vld [vmem:[%s1176_s7 + $0xb0] ss:$8 sps:$4 sm:$0xff]  }
  0x34   : > { %v977_v57 = vld [vmem:[%s1176_s7 + $0xc4] ss:$8 sps:$4 sm:$0xff]   ;;  %v979_v58 = vld [vmem:[%s1176_s7 + $0xc0] ss:$8 sps:$4 sm:$0xff]   ;;  %v980_v59 = vld [vmem:[%s1176_s7 + $0xd4] ss:$8 sps:$4 sm:$0xff]  }
  0x35   : > { %v982_v60 = vld [vmem:[%s1176_s7 + $0xd0] ss:$8 sps:$4 sm:$0xff]   ;;  %v983_v61 = vld [vmem:[%s1176_s7 + $0xe4] ss:$8 sps:$4 sm:$0xff]   ;;  %v985_v62 = vld [vmem:[%s1176_s7 + $0xe0] ss:$8 sps:$4 sm:$0xff]  }
  0x36   : > { %635 = vmatpush1.bf16.msra.mxu0 %v949_v38  ;;  %v986_v63 = vld [vmem:[%s1176_s7 + $0xf4] ss:$8 sps:$4 sm:$0xff]   ;;  %v988_v0 = vld [vmem:[%s1176_s7 + $0xf0] ss:$8 sps:$4 sm:$0xff]   ;;  %s1252_s10 = smov (!%p408_p11, %s859_s10), 3  ;;  %v692_v4 = vsub.s32 0, %v691_v3 }
  0x37   : > { %636 = vmatprep.subr.bf16.mxu0 %v950_v39  ;;  %s410_s19 = scalar_lea.vmem %s1242_s2, %s1252_s10  ;;  %v696_v6 = vsub.s32 1, %v691_v3  ;;  %s858_s20 = sshll.u32 %s357_s30, 5 }
  0x38   : > { %v688_v5 = vld [vmem:[%s410_s19] sm:$0x3]  ;;  %s392_s23 = scalar_lea.vmem [#allocation4], %s858_s20  ;;  %s900_s12 = sshll.u32 (%p1087_p6), %s1022_s14, 4 }
  0x39   : > { %v693_v7 = vrot.slane %v688_v5, %v692_v4  ;;  %v697_v8 = vrot.slane %v688_v5, %v696_v6  ;;  %s720_s26 = scalar_lea.vmem (%p1087_p6), %s1243_s3, %s900_s12 }
  0x3a   : > { %637 = vmatpush1.bf16.msra.mxu0 %v952_v40 }
  0x3b   : > { %638 = vmatprep.subr.bf16.mxu0 %v953_v41 }
  0x3e   : > { %639 = vmatpush1.bf16.msra.mxu0 %v955_v42 }
  0x3f   : > { %640 = vmatprep.subr.bf16.mxu0 %v956_v43 }
  0x42   : > { %641 = vmatpush1.bf16.msra.mxu0 %v958_v44 }
  0x43   : > { %642 = vmatprep.subr.bf16.mxu0 %v959_v45 }
  0x46   : > { %643 = vmatpush1.bf16.msra.mxu0 %v961_v46 }
  0x47   : > { %644 = vmatprep.subr.bf16.mxu0 %v962_v47 }
  0x4a   : > { %645 = vmatpush1.bf16.msra.mxu0 %v964_v48 }
  0x4b   : > { %646 = vmatprep.subr.bf16.mxu0 %v965_v49 }
  0x4e   : > { %647 = vmatpush1.bf16.msra.mxu0 %v967_v50 }
  0x4f   : > { %648 = vmatprep.subr.bf16.mxu0 %v968_v51 }
  0x52   : > { %649 = vmatpush1.bf16.msra.mxu0 %v970_v52 }
  0x53   : > { %650 = vmatprep.subr.bf16.mxu0 %v971_v53 }
  0x56   : > { %651 = vmatpush1.bf16.msra.mxu0 %v973_v54 }
  0x57   : > { %652 = vmatprep.subr.bf16.mxu0 %v974_v55 }
  0x5a   : > { %653 = vmatpush1.bf16.msra.mxu0 %v976_v56 }
  0x5b   : > { %654 = vmatprep.subr.bf16.mxu0 %v977_v57 }
  0x5e   : > { %655 = vmatpush1.bf16.msra.mxu0 %v979_v58 }
  0x5f   : > { %656 = vmatprep.subr.bf16.mxu0 %v980_v59 }
  0x62   : > { %657 = vmatpush1.bf16.msra.mxu0 %v982_v60 }
  0x63   : > { %658 = vmatprep.subr.bf16.mxu0 %v983_v61 }
  0x66   : > { %659 = vmatpush1.bf16.msra.mxu0 %v985_v62 }
  0x67   : > { %660 = vmatprep.subr.bf16.mxu0 %v986_v63 }
  0x6a   : > { %661 = vmatpush1.bf16.msra.mxu0 %v988_v0 }
  0x6d   : > { %663 = vmatmul.mubr.bf16.vlgmr.msra.gmra.mrb[0].mxu0 %v989_v1 }
 0x140   : > { %v664_v9 = vpop.f32.mrb[0].mxu0  ;;  %714 = sbr.rel (!%p1087_p6) target bundleno = 335 (0x14f), region = 82 }
 0x141   : > { %v700_v10 = vadd.f32 %v693_v7, %v664_v9  ;;  %v666_v11 = vpop.f32.mrb[1].mxu0 }
 0x142   : > { %v701_v12 = vadd.f32 %v697_v8, %v666_v11  ;;  %v668_v13 = vpop.f32.mrb[2].mxu0 }
 0x143   : > { %704 = vst [vmem:[%s392_s23] sm:$0xff] %v700_v10  ;;  %v702_v14 = vadd.f32 %v693_v7, %v668_v13  ;;  %v670_v15 = vpop.f32.mrb[3].mxu0 }
 0x144   : > { %705 = vst [vmem:[%s392_s23 + $0x8] sm:$0xff] %v701_v12  ;;  %v703_v16 = vadd.f32 %v697_v8, %v670_v15 }
 0x145   : > { %706 = vst [vmem:[%s392_s23 + $0x10] sm:$0xff] %v702_v14 }
 0x146   : > { %707 = vst [vmem:[%s392_s23 + $0x18] sm:$0xff] %v703_v16 }
 0x14a   : > { %v733_v17 = vld [vmem:[%s392_s23] sm:$0xff] }
 0x14b   : > { %v735_v18 = vld [vmem:[%s392_s23 + $0x8] sm:$0xff]  ;;  %734 = vst [vmem:[%s720_s26] sm:$0xff] %v733_v17 }
 0x14c   : > { %v737_v19 = vld [vmem:[%s392_s23 + $0x10] sm:$0xff]  ;;  %736 = vst [vmem:[%s720_s26 + $0x8] sm:$0xff] %v735_v18 }
 0x14d   : > { %v739_v20 = vld [vmem:[%s392_s23 + $0x18] sm:$0xff]  ;;  %738 = vst [vmem:[%s720_s26 + $0x20] sm:$0xff] %v737_v19 }
 0x14e   : > { %740 = vst [vmem:[%s720_s26 + $0x28] sm:$0xff] %v739_v20 }
 0x14f PF: > { %s13_s16 = sadd.s32 1, %s1030_s16   ;;  %s1245_s12 = smov %s1018_s13 }
 0x150   : > { %p10_p12 = scmp.ge.s32.totalorder %s13_s16, 4   ;;  %s1246_s13 = smov %s1092_s22 }
 0x151   : > { %s1247_s14 = smov %s1026_s15  ;;  %s1248_s15 = smov %s1250_s17 }
 0x152   :  { %12 = sbr.rel (!%p10_p12) target bundleno = 3 (0x3), region = 142 }

// kernel: resnet_triplet_forward.26
= control target key start
LH: loop header
LB: loop body
LE: loop exit
PB: predicated region body
PF: predicated region fallthrough
CT: control target
= control target key end

     0   :  { %s2734_s0 = inlined_call_operand.vmem [shape: bf16[16,4608], index: 0, kind: input, shape index: {}]   ;;  %s2735_s1 = inlined_call_operand.vmem [shape: bf16[4608,512], index: 1, kind: input, shape index: {}]   ;;  %s2736_s2 = inlined_call_operand.vmem [shape: f32[1,512], index: 2, kind: input, shape index: {}]   ;;  %s2737_s3 = inlined_call_operand.vmem [shape: f32[16,512], index: 3, kind: input, shape index: {}]   ;;  %s2738_s4 = inlined_call_operand.vmem [shape: f32[16,512], index: 4, kind: output, shape index: {}]  }
   0x1   :  { %2741 = sst [smem:[#allocation9_spill]] %s2734_s0 }
   0x2   :  { %2742 = sst [smem:[#allocation10_spill]] %s2735_s1 }
   0x3   :  { %s2227_s15 = smov 0   ;;  %s2229_s16 = smov 0  }
   0x4   :  { %s2231_s17 = smov 0   ;;  %s2233_s18 = smov 0  }
   0x5   :  { %s2235_s19 = smov 0   ;;  %s2237_s20 = smov 0  }
   0x6   :  { %s2239_s21 = smov 0   ;;  %s2241_s22 = smov 0  }
   0x7   :  { %s2243_s23 = smov 0   ;;  %s2245_s24 = smov 0  }
   0x8   :  { %s2247_s25 = smov 0  }
   0x9 LB: > { %s1731_s26 = sadd.s32 4294967295, %s2199_s25   ;;  %s26_s27 = sadd.s32 1, %s2191_s23  ;;  %s2199_s25 = sphi %s2247_s25, %s14_s25   ;;  %s2195_s24 = sphi %s2245_s24, %s2762_s24   ;;  %s2191_s23 = sphi %s2243_s23, %s2761_s23   ;;  %s2187_s22 = sphi %s2241_s22, %s2760_s22   ;;  %s2183_s21 = sphi %s2239_s21, %s2759_s21   ;;  %s2179_s20 = sphi %s2237_s20, %s2758_s20   ;;  %s2175_s19 = sphi %s2235_s19, %s2757_s19   ;;  %s2171_s18 = sphi %s2233_s18, %s2756_s18   ;;  %s2167_s17 = sphi %s2231_s17, %s2755_s17   ;;  %s2163_s16 = sphi %s2229_s16, %s2754_s16   ;;  %s2159_s15 = sphi %s2227_s15, %s2753_s15  }
   0xa   : > { %p27_p0 = scmp.ge.s32.totalorder %s26_s27, 6  ;;  %s29_s28 = sadd.s32 1, %s2195_s24 }
   0xb   : > { %s42_s29 = sadd.s32 1, %s2179_s20  ;;  %p49_p1 = scmp.ne.s32.totalorder %s2179_s20, %s2175_s19 }
   0xc   : > { %s2764_s27 = smov (%p27_p0, %s26_s27), 0  ;;  %s2766_s28 = smov (!%p27_p0, %s29_s28), %s2195_s24 }
   0xd   : > { %2743 = sst [smem:[#allocation7_spill]] %s2764_s27  ;;  %s38_s30 = ssub.s32 %s2191_s23, %s2764_s27 }
   0xe   : > { %p50_p2 = scmp.eq.s32.totalorder %s2199_s25, 0  ;;  %p31_p3 = scmp.ge.s32.totalorder %s2766_s28, 2 }
   0xf   : > { %p40_p4 = scmp.eq.s32.totalorder %s38_s30, 0  ;;  %s70_s6 = sadd.s32 1, %s2171_s18 }
  0x10   : > { %p2296_p5 = por %p50_p2, %p49_p1  ;;  %s2768_s28 = smov (%p31_p3, %s2766_s28), 0 }
  0x11   : > { %2745 = sst [smem:[#allocation8_spill]] %s2768_s28  ;;  %s66_s8 = ssub.s32 %s2195_s24, %s2768_s28 }
  0x12   : > { %s2304_s7 = scalar_select %p40_p4, %s2179_s20, %s42_s29  }
  0x13   : > { %p77_p6 = scmp.ne.s32.totalorder %s2171_s18, %s2167_s17  ;;  %s67_s9 = sor.u32 %s66_s8, %s38_s30 }
  0x14   : > { %p122_p7 = scmp.eq.s32.totalorder %s66_s8, 0  ;;  %p68_p8 = scmp.eq.s32.totalorder %s67_s9, 0 }
  0x15   : > { %p2312_p9 = por %p77_p6, %p50_p2  ;;  %s124_s11 = sadd.s32 1, %s2163_s16 }
  0x16   : > { %p131_p10 = scmp.ne.s32.totalorder %s2163_s16, %s2159_s15  ;;  %p163_p12 = scmp.eq.s32.totalorder %s1731_s26, 11 }
  0x17   : > { %s2320_s12 = scalar_select %p68_p8, %s2171_s18, %s70_s6  }
  0x18   : > { %s2323_s13 = scalar_select %p122_p7, %s2163_s16, %s124_s11  }
  0x19   : > { %p2327_p11 = por %p131_p10, %p50_p2  ;;  %p2331_p13 = por %p163_p12, %p131_p10 }
  0x1a   : > { %p1734_p0 = scmp.ge.s32.totalorder %s2199_s25, 12 }
  0x1c   : > { %185 = sbr.rel (%p1734_p0) target bundleno = 112 (0x70), region = 16 }
  0x23   : > { %188 = sbr.rel (!%p2296_p5) target bundleno = 47 (0x2f), region = 20  ;;  %s190_s30 = sand.u32 (%p2296_p5), 1, %s2179_s20  }
  0x24   : > { %s1855_s6 = smul.u32 (%p2296_p5), 24, %s2191_s23  ;;  %s2749_s0 = sld [smem:[#allocation9_spill]] (%p2296_p5) }
  0x25   : > { %s1867_s8 = smul.u32 (%p2296_p5), 48, %s190_s30 }
  0x27   : > { %s192_s26 = scalar_lea.vmem (%p2296_p5), [#allocation3], %s1867_s8 }
  0x2a   : > { %s198_s28 = scalar_lea.vmem %s2749_s0, %s1855_s6 }
  0x2b   : > { %v211_v0 = vld [vmem:[%s198_s28] sm:$0xff]  ;;  %v213_v1 = vld [vmem:[%s198_s28 + $0x8] sm:$0xff]  ;;  %v215_v2 = vld [vmem:[%s198_s28 + $0x10] sm:$0xff] }
  0x2c   : > { %212 = vst [vmem:[%s192_s26] sm:$0xff] %v211_v0  ;;  %214 = vst [vmem:[%s192_s26 + $0x8] sm:$0xff] %v213_v1  ;;  %v217_v3 = vld [vmem:[%s198_s28 + $0x90] sm:$0xff]  ;;  %v219_v4 = vld [vmem:[%s198_s28 + $0x98] sm:$0xff] }
  0x2d   : > { %216 = vst [vmem:[%s192_s26 + $0x10] sm:$0xff] %v215_v2  ;;  %v221_v5 = vld [vmem:[%s198_s28 + $0xa0] sm:$0xff]  ;;  %218 = vst [vmem:[%s192_s26 + $0x18] sm:$0xff] %v217_v3 }
  0x2e   : > { %220 = vst [vmem:[%s192_s26 + $0x20] sm:$0xff] %v219_v4  ;;  %222 = vst [vmem:[%s192_s26 + $0x28] sm:$0xff] %v221_v5 }
  0x2f PF: > { %228 = sbr.rel (!%p2312_p9) target bundleno = 105 (0x69), region = 43  ;;  %s230_s5 = sand.u32 (%p2312_p9), 1, %s2171_s18  }
  0x30   : > { %s1868_s30 = smul.u32 (%p2312_p9), 768, %s230_s5  ;;  %s1736_s6 = sshll.u32 (%p2312_p9), %s2195_s24, 1 }
  0x31   : > { %s1856_s8 = smul.u32 (%p2312_p9), 384, %s2191_s23  ;;  %s2750_s1 = sld [smem:[#allocation10_spill]] (%p2312_p9) }
  0x32   : > { %s2356_s10 = scalar_lea.vmem (%p2312_p9), [#allocation4], %s1868_s30 }
  0x33   : > { %s236_s9 = sadd.s32 (%p2312_p9), %s1856_s8, %s1736_s6 }
  0x34   : > { %s1738_s11 = sshll.u32 (%p2312_p9), %s236_s9, 2 }
  0x37   : > { %s2351_s28 = scalar_lea.vmem %s2750_s1, %s1738_s11 }
  0x38   : > { %v456_v6 = vld [vmem:[%s2351_s28] sm:$0xff]  ;;  %v458_v7 = vld [vmem:[%s2351_s28 + $0x10] sm:$0xff] }
  0x39   : > { %v460_v8 = vld [vmem:[%s2351_s28 + $0x20] sm:$0xff]  ;;  %457 = vst [vmem:[%s2356_s10] sm:$0xff] %v456_v6  ;;  %459 = vst [vmem:[%s2356_s10 + $0x8] sm:$0xff] %v458_v7  ;;  %v462_v9 = vld [vmem:[%s2351_s28 + $0x30] sm:$0xff] }
  0x3a   : > { %461 = vst [vmem:[%s2356_s10 + $0x10] sm:$0xff] %v460_v8  ;;  %v464_v10 = vld [vmem:[%s2351_s28 + $0x40] sm:$0xff]  ;;  %v466_v11 = vld [vmem:[%s2351_s28 + $0x50] sm:$0xff]  ;;  %463 = vst [vmem:[%s2356_s10 + $0x18] sm:$0xff] %v462_v9 }
  0x3b   : > { %465 = vst [vmem:[%s2356_s10 + $0x20] sm:$0xff] %v464_v10  ;;  %467 = vst [vmem:[%s2356_s10 + $0x28] sm:$0xff] %v466_v11  ;;  %v468_v12 = vld [vmem:[%s2351_s28 + $0x60] sm:$0xff]  ;;  %v470_v13 = vld [vmem:[%s2351_s28 + $0x70] sm:$0xff] }
  0x3c   : > { %v472_v14 = vld [vmem:[%s2351_s28 + $0x80] sm:$0xff]  ;;  %469 = vst [vmem:[%s2356_s10 + $0x30] sm:$0xff] %v468_v12  ;;  %471 = vst [vmem:[%s2356_s10 + $0x38] sm:$0xff] %v470_v13  ;;  %v474_v15 = vld [vmem:[%s2351_s28 + $0x90] sm:$0xff] }
  0x3d   : > { %473 = vst [vmem:[%s2356_s10 + $0x40] sm:$0xff] %v472_v14  ;;  %v476_v16 = vld [vmem:[%s2351_s28 + $0xa0] sm:$0xff]  ;;  %v478_v17 = vld [vmem:[%s2351_s28 + $0xb0] sm:$0xff]  ;;  %475 = vst [vmem:[%s2356_s10 + $0x48] sm:$0xff] %v474_v15 }
  0x3e   : > { %477 = vst [vmem:[%s2356_s10 + $0x50] sm:$0xff] %v476_v16  ;;  %479 = vst [vmem:[%s2356_s10 + $0x58] sm:$0xff] %v478_v17  ;;  %v480_v18 = vld [vmem:[%s2351_s28 + $0xc0] sm:$0xff]  ;;  %v482_v19 = vld [vmem:[%s2351_s28 + $0xd0] sm:$0xff] }
  0x3f   : > { %v484_v20 = vld [vmem:[%s2351_s28 + $0xe0] sm:$0xff]  ;;  %481 = vst [vmem:[%s2356_s10 + $0x60] sm:$0xff] %v480_v18  ;;  %483 = vst [vmem:[%s2356_s10 + $0x68] sm:$0xff] %v482_v19  ;;  %v486_v21 = vld [vmem:[%s2351_s28 + $0xf0] sm:$0xff] }
  0x40   : > { %485 = vst [vmem:[%s2356_s10 + $0x70] sm:$0xff] %v484_v20  ;;  %v488_v22 = vld [vmem:[%s2351_s28 + $0x100] sm:$0xff]  ;;  %v490_v23 = vld [vmem:[%s2351_s28 + $0x110] sm:$0xff]  ;;  %487 = vst [vmem:[%s2356_s10 + $0x78] sm:$0xff] %v486_v21 }
  0x41   : > { %489 = vst [vmem:[%s2356_s10 + $0x80] sm:$0xff] %v488_v22  ;;  %491 = vst [vmem:[%s2356_s10 + $0x88] sm:$0xff] %v490_v23  ;;  %v492_v24 = vld [vmem:[%s2351_s28 + $0x120] sm:$0xff]  ;;  %v494_v25 = vld [vmem:[%s2351_s28 + $0x130] sm:$0xff] }
  0x42   : > { %v496_v26 = vld [vmem:[%s2351_s28 + $0x140] sm:$0xff]  ;;  %493 = vst [vmem:[%s2356_s10 + $0x90] sm:$0xff] %v492_v24  ;;  %495 = vst [vmem:[%s2356_s10 + $0x98] sm:$0xff] %v494_v25  ;;  %v498_v27 = vld [vmem:[%s2351_s28 + $0x150] sm:$0xff] }
  0x43   : > { %497 = vst [vmem:[%s2356_s10 + $0xa0] sm:$0xff] %v496_v26  ;;  %v500_v28 = vld [vmem:[%s2351_s28 + $0x160] sm:$0xff]  ;;  %v502_v29 = vld [vmem:[%s2351_s28 + $0x170] sm:$0xff]  ;;  %499 = vst [vmem:[%s2356_s10 + $0xa8] sm:$0xff] %v498_v27 }
  0x44   : > { %501 = vst [vmem:[%s2356_s10 + $0xb0] sm:$0xff] %v500_v28  ;;  %503 = vst [vmem:[%s2356_s10 + $0xb8] sm:$0xff] %v502_v29  ;;  %v504_v30 = vld [vmem:[%s2351_s28 + $0x180] sm:$0xff]  ;;  %v506_v31 = vld [vmem:[%s2351_s28 + $0x190] sm:$0xff] }
  0x45   : > { %v508_v32 = vld [vmem:[%s2351_s28 + $0x1a0] sm:$0xff]  ;;  %505 = vst [vmem:[%s2356_s10 + $0xc0] sm:$0xff] %v504_v30  ;;  %507 = vst [vmem:[%s2356_s10 + $0xc8] sm:$0xff] %v506_v31  ;;  %v510_v33 = vld [vmem:[%s2351_s28 + $0x1b0] sm:$0xff] }
  0x46   : > { %509 = vst [vmem:[%s2356_s10 + $0xd0] sm:$0xff] %v508_v32  ;;  %v512_v34 = vld [vmem:[%s2351_s28 + $0x1c0] sm:$0xff]  ;;  %v514_v35 = vld [vmem:[%s2351_s28 + $0x1d0] sm:$0xff]  ;;  %511 = vst [vmem:[%s2356_s10 + $0xd8] sm:$0xff] %v510_v33 }
  0x47   : > { %513 = vst [vmem:[%s2356_s10 + $0xe0] sm:$0xff] %v512_v34  ;;  %515 = vst [vmem:[%s2356_s10 + $0xe8] sm:$0xff] %v514_v35  ;;  %v516_v36 = vld [vmem:[%s2351_s28 + $0x1e0] sm:$0xff]  ;;  %v518_v37 = vld [vmem:[%s2351_s28 + $0x1f0] sm:$0xff] }
  0x48   : > { %v520_v38 = vld [vmem:[%s2351_s28 + $0x200] sm:$0xff]  ;;  %517 = vst [vmem:[%s2356_s10 + $0xf0] sm:$0xff] %v516_v36  ;;  %519 = vst [vmem:[%s2356_s10 + $0xf8] sm:$0xff] %v518_v37  ;;  %v522_v39 = vld [vmem:[%s2351_s28 + $0x210] sm:$0xff] }
  0x49   : > { %521 = vst [vmem:[%s2356_s10 + $0x100] sm:$0xff] %v520_v38  ;;  %v524_v40 = vld [vmem:[%s2351_s28 + $0x220] sm:$0xff]  ;;  %v526_v41 = vld [vmem:[%s2351_s28 + $0x230] sm:$0xff]  ;;  %523 = vst [vmem:[%s2356_s10 + $0x108] sm:$0xff] %v522_v39 }
  0x4a   : > { %525 = vst [vmem:[%s2356_s10 + $0x110] sm:$0xff] %v524_v40  ;;  %527 = vst [vmem:[%s2356_s10 + $0x118] sm:$0xff] %v526_v41  ;;  %v528_v42 = vld [vmem:[%s2351_s28 + $0x240] sm:$0xff]  ;;  %v530_v43 = vld [vmem:[%s2351_s28 + $0x250] sm:$0xff] }
  0x4b   : > { %v532_v44 = vld [vmem:[%s2351_s28 + $0x260] sm:$0xff]  ;;  %529 = vst [vmem:[%s2356_s10 + $0x120] sm:$0xff] %v528_v42  ;;  %531 = vst [vmem:[%s2356_s10 + $0x128] sm:$0xff] %v530_v43  ;;  %v534_v45 = vld [vmem:[%s2351_s28 + $0x270] sm:$0xff] }
  0x4c   : > { %533 = vst [vmem:[%s2356_s10 + $0x130] sm:$0xff] %v532_v44  ;;  %v536_v46 = vld [vmem:[%s2351_s28 + $0x280] sm:$0xff]  ;;  %v538_v47 = vld [vmem:[%s2351_s28 + $0x290] sm:$0xff]  ;;  %535 = vst [vmem:[%s2356_s10 + $0x138] sm:$0xff] %v534_v45 }
  0x4d   : > { %537 = vst [vmem:[%s2356_s10 + $0x140] sm:$0xff] %v536_v46  ;;  %539 = vst [vmem:[%s2356_s10 + $0x148] sm:$0xff] %v538_v47  ;;  %v540_v48 = vld [vmem:[%s2351_s28 + $0x2a0] sm:$0xff]  ;;  %v542_v49 = vld [vmem:[%s2351_s28 + $0x2b0] sm:$0xff] }
  0x4e   : > { %v544_v50 = vld [vmem:[%s2351_s28 + $0x2c0] sm:$0xff]  ;;  %541 = vst [vmem:[%s2356_s10 + $0x150] sm:$0xff] %v540_v48  ;;  %543 = vst [vmem:[%s2356_s10 + $0x158] sm:$0xff] %v542_v49  ;;  %v546_v51 = vld [vmem:[%s2351_s28 + $0x2d0] sm:$0xff] }
  0x4f   : > { %545 = vst [vmem:[%s2356_s10 + $0x160] sm:$0xff] %v544_v50  ;;  %v548_v52 = vld [vmem:[%s2351_s28 + $0x2e0] sm:$0xff]  ;;  %v550_v53 = vld [vmem:[%s2351_s28 + $0x2f0] sm:$0xff]  ;;  %547 = vst [vmem:[%s2356_s10 + $0x168] sm:$0xff] %v546_v51 }
  0x50   : > { %549 = vst [vmem:[%s2356_s10 + $0x170] sm:$0xff] %v548_v52  ;;  %551 = vst [vmem:[%s2356_s10 + $0x178] sm:$0xff] %v550_v53  ;;  %v552_v54 = vld [vmem:[%s2351_s28 + $0x300] sm:$0xff]  ;;  %v554_v55 = vld [vmem:[%s2351_s28 + $0x310] sm:$0xff] }
  0x51   : > { %v556_v56 = vld [vmem:[%s2351_s28 + $0x320] sm:$0xff]  ;;  %553 = vst [vmem:[%s2356_s10 + $0x180] sm:$0xff] %v552_v54  ;;  %555 = vst [vmem:[%s2356_s10 + $0x188] sm:$0xff] %v554_v55  ;;  %v558_v57 = vld [vmem:[%s2351_s28 + $0x330] sm:$0xff] }
  0x52   : > { %557 = vst [vmem:[%s2356_s10 + $0x190] sm:$0xff] %v556_v56  ;;  %v560_v58 = vld [vmem:[%s2351_s28 + $0x340] sm:$0xff]  ;;  %v562_v59 = vld [vmem:[%s2351_s28 + $0x350] sm:$0xff]  ;;  %559 = vst [vmem:[%s2356_s10 + $0x198] sm:$0xff] %v558_v57 }
  0x53   : > { %561 = vst [vmem:[%s2356_s10 + $0x1a0] sm:$0xff] %v560_v58  ;;  %563 = vst [vmem:[%s2356_s10 + $0x1a8] sm:$0xff] %v562_v59  ;;  %v564_v60 = vld [vmem:[%s2351_s28 + $0x360] sm:$0xff]  ;;  %v566_v61 = vld [vmem:[%s2351_s28 + $0x370] sm:$0xff] }
  0x54   : > { %v568_v62 = vld [vmem:[%s2351_s28 + $0x380] sm:$0xff]  ;;  %565 = vst [vmem:[%s2356_s10 + $0x1b0] sm:$0xff] %v564_v60  ;;  %567 = vst [vmem:[%s2356_s10 + $0x1b8] sm:$0xff] %v566_v61  ;;  %v570_v63 = vld [vmem:[%s2351_s28 + $0x390] sm:$0xff] }
  0x55   : > { %569 = vst [vmem:[%s2356_s10 + $0x1c0] sm:$0xff] %v568_v62  ;;  %v572_v0 = vld [vmem:[%s2351_s28 + $0x3a0] sm:$0xff]  ;;  %v574_v1 = vld [vmem:[%s2351_s28 + $0x3b0] sm:$0xff]  ;;  %571 = vst [vmem:[%s2356_s10 + $0x1c8] sm:$0xff] %v570_v63 }
  0x56   : > { %573 = vst [vmem:[%s2356_s10 + $0x1d0] sm:$0xff] %v572_v0  ;;  %575 = vst [vmem:[%s2356_s10 + $0x1d8] sm:$0xff] %v574_v1  ;;  %v576_v2 = vld [vmem:[%s2351_s28 + $0x3c0] sm:$0xff]  ;;  %v578_v3 = vld [vmem:[%s2351_s28 + $0x3d0] sm:$0xff] }
  0x57   : > { %v580_v4 = vld [vmem:[%s2351_s28 + $0x3e0] sm:$0xff]  ;;  %577 = vst [vmem:[%s2356_s10 + $0x1e0] sm:$0xff] %v576_v2  ;;  %579 = vst [vmem:[%s2356_s10 + $0x1e8] sm:$0xff] %v578_v3  ;;  %v582_v5 = vld [vmem:[%s2351_s28 + $0x3f0] sm:$0xff] }
  0x58   : > { %581 = vst [vmem:[%s2356_s10 + $0x1f0] sm:$0xff] %v580_v4  ;;  %v584_v6 = vld [vmem:[%s2351_s28 + $0x400] sm:$0xff]  ;;  %v586_v7 = vld [vmem:[%s2351_s28 + $0x410] sm:$0xff]  ;;  %583 = vst [vmem:[%s2356_s10 + $0x1f8] sm:$0xff] %v582_v5 }
  0x59   : > { %585 = vst [vmem:[%s2356_s10 + $0x200] sm:$0xff] %v584_v6  ;;  %587 = vst [vmem:[%s2356_s10 + $0x208] sm:$0xff] %v586_v7  ;;  %v588_v8 = vld [vmem:[%s2351_s28 + $0x420] sm:$0xff]  ;;  %v590_v9 = vld [vmem:[%s2351_s28 + $0x430] sm:$0xff] }
  0x5a   : > { %v592_v10 = vld [vmem:[%s2351_s28 + $0x440] sm:$0xff]  ;;  %589 = vst [vmem:[%s2356_s10 + $0x210] sm:$0xff] %v588_v8  ;;  %591 = vst [vmem:[%s2356_s10 + $0x218] sm:$0xff] %v590_v9  ;;  %v594_v11 = vld [vmem:[%s2351_s28 + $0x450] sm:$0xff] }
  0x5b   : > { %593 = vst [vmem:[%s2356_s10 + $0x220] sm:$0xff] %v592_v10  ;;  %v596_v12 = vld [vmem:[%s2351_s28 + $0x460] sm:$0xff]  ;;  %v598_v13 = vld [vmem:[%s2351_s28 + $0x470] sm:$0xff]  ;;  %595 = vst [vmem:[%s2356_s10 + $0x228] sm:$0xff] %v594_v11 }
  0x5c   : > { %597 = vst [vmem:[%s2356_s10 + $0x230] sm:$0xff] %v596_v12  ;;  %599 = vst [vmem:[%s2356_s10 + $0x238] sm:$0xff] %v598_v13  ;;  %v600_v14 = vld [vmem:[%s2351_s28 + $0x480] sm:$0xff]  ;;  %v602_v15 = vld [vmem:[%s2351_s28 + $0x490] sm:$0xff] }
  0x5d   : > { %v604_v16 = vld [vmem:[%s2351_s28 + $0x4a0] sm:$0xff]  ;;  %601 = vst [vmem:[%s2356_s10 + $0x240] sm:$0xff] %v600_v14  ;;  %603 = vst [vmem:[%s2356_s10 + $0x248] sm:$0xff] %v602_v15  ;;  %v606_v17 = vld [vmem:[%s2351_s28 + $0x4b0] sm:$0xff] }
  0x5e   : > { %605 = vst [vmem:[%s2356_s10 + $0x250] sm:$0xff] %v604_v16  ;;  %v608_v18 = vld [vmem:[%s2351_s28 + $0x4c0] sm:$0xff]  ;;  %v610_v19 = vld [vmem:[%s2351_s28 + $0x4d0] sm:$0xff]  ;;  %607 = vst [vmem:[%s2356_s10 + $0x258] sm:$0xff] %v606_v17 }
  0x5f   : > { %609 = vst [vmem:[%s2356_s10 + $0x260] sm:$0xff] %v608_v18  ;;  %611 = vst [vmem:[%s2356_s10 + $0x268] sm:$0xff] %v610_v19  ;;  %v612_v20 = vld [vmem:[%s2351_s28 + $0x4e0] sm:$0xff]  ;;  %v614_v21 = vld [vmem:[%s2351_s28 + $0x4f0] sm:$0xff] }
  0x60   : > { %v616_v22 = vld [vmem:[%s2351_s28 + $0x500] sm:$0xff]  ;;  %613 = vst [vmem:[%s2356_s10 + $0x270] sm:$0xff] %v612_v20  ;;  %615 = vst [vmem:[%s2356_s10 + $0x278] sm:$0xff] %v614_v21  ;;  %v618_v23 = vld [vmem:[%s2351_s28 + $0x510] sm:$0xff] }
  0x61   : > { %617 = vst [vmem:[%s2356_s10 + $0x280] sm:$0xff] %v616_v22  ;;  %v620_v24 = vld [vmem:[%s2351_s28 + $0x520] sm:$0xff]  ;;  %v622_v25 = vld [vmem:[%s2351_s28 + $0x530] sm:$0xff]  ;;  %619 = vst [vmem:[%s2356_s10 + $0x288] sm:$0xff] %v618_v23 }
  0x62   : > { %621 = vst [vmem:[%s2356_s10 + $0x290] sm:$0xff] %v620_v24  ;;  %623 = vst [vmem:[%s2356_s10 + $0x298] sm:$0xff] %v622_v25  ;;  %v624_v26 = vld [vmem:[%s2351_s28 + $0x540] sm:$0xff]  ;;  %v626_v27 = vld [vmem:[%s2351_s28 + $0x550] sm:$0xff] }
  0x63   : > { %v628_v28 = vld [vmem:[%s2351_s28 + $0x560] sm:$0xff]  ;;  %625 = vst [vmem:[%s2356_s10 + $0x2a0] sm:$0xff] %v624_v26  ;;  %627 = vst [vmem:[%s2356_s10 + $0x2a8] sm:$0xff] %v626_v27  ;;  %v630_v29 = vld [vmem:[%s2351_s28 + $0x570] sm:$0xff] }
  0x64   : > { %629 = vst [vmem:[%s2356_s10 + $0x2b0] sm:$0xff] %v628_v28  ;;  %v632_v30 = vld [vmem:[%s2351_s28 + $0x580] sm:$0xff]  ;;  %v634_v31 = vld [vmem:[%s2351_s28 + $0x590] sm:$0xff]  ;;  %631 = vst [vmem:[%s2356_s10 + $0x2b8] sm:$0xff] %v630_v29 }
  0x65   : > { %633 = vst [vmem:[%s2356_s10 + $0x2c0] sm:$0xff] %v632_v30  ;;  %635 = vst [vmem:[%s2356_s10 + $0x2c8] sm:$0xff] %v634_v31  ;;  %v636_v32 = vld [vmem:[%s2351_s28 + $0x5a0] sm:$0xff]  ;;  %v638_v33 = vld [vmem:[%s2351_s28 + $0x5b0] sm:$0xff] }
  0x66   : > { %v640_v34 = vld [vmem:[%s2351_s28 + $0x5c0] sm:$0xff]  ;;  %637 = vst [vmem:[%s2356_s10 + $0x2d0] sm:$0xff] %v636_v32  ;;  %639 = vst [vmem:[%s2356_s10 + $0x2d8] sm:$0xff] %v638_v33  ;;  %v642_v35 = vld [vmem:[%s2351_s28 + $0x5d0] sm:$0xff] }
  0x67   : > { %641 = vst [vmem:[%s2356_s10 + $0x2e0] sm:$0xff] %v640_v34  ;;  %v644_v36 = vld [vmem:[%s2351_s28 + $0x5e0] sm:$0xff]  ;;  %v646_v37 = vld [vmem:[%s2351_s28 + $0x5f0] sm:$0xff]  ;;  %643 = vst [vmem:[%s2356_s10 + $0x2e8] sm:$0xff] %v642_v35 }
  0x68   : > { %645 = vst [vmem:[%s2356_s10 + $0x2f0] sm:$0xff] %v644_v36  ;;  %647 = vst [vmem:[%s2356_s10 + $0x2f8] sm:$0xff] %v646_v37 }
  0x69 PF: > { %661 = sbr.rel (!%p2327_p11) target bundleno = 112 (0x70), region = 85  ;;  %s663_s0 = sand.u32 (%p2327_p11), 1, %s2163_s16  }
  0x6a   : > { %s1857_s27 = sshll.u32 (%p2327_p11), %s2195_s24, 4  ;;  %s1739_s26 = sshll.u32 (%p2327_p11), %s663_s0, 5 }
  0x6b   : > { %s671_s6 = scalar_lea.vmem (%p2327_p11), %s2737_s3, %s1857_s27  ;;  %s665_s8 = scalar_lea.vmem (%p2327_p11), [#allocation5], %s1739_s26 }
  0x6c   : > { %v684_v38 = vld [vmem:[%s671_s6] sm:$0xff] (%p2327_p11)  ;;  %v686_v39 = vld [vmem:[%s671_s6 + $0x8] sm:$0xff] (%p2327_p11) }
  0x6d   : > { %v688_v40 = vld [vmem:[%s671_s6 + $0x20] sm:$0xff] (%p2327_p11)  ;;  %685 = vst [vmem:[%s665_s8] sm:$0xff] (%p2327_p11), %v684_v38  ;;  %687 = vst [vmem:[%s665_s8 + $0x8] sm:$0xff] (%p2327_p11), %v686_v39  ;;  %v690_v41 = vld [vmem:[%s671_s6 + $0x28] sm:$0xff] (%p2327_p11) }
  0x6e   : > { %689 = vst [vmem:[%s665_s8 + $0x10] sm:$0xff] (%p2327_p11), %v688_v40  ;;  %691 = vst [vmem:[%s665_s8 + $0x18] sm:$0xff] (%p2327_p11), %v690_v41 }
  0x70 PF: > { %p1742_p1 = scmp.ge.s32.totalorder %s2199_s25, 1  ;;  %p696_p2 = scmp.lt.s32.totalorder %s2199_s25, 13 }
  0x72   : > { %p697_p3 = pnand %p1742_p1, %p696_p2 }
  0x73   : > { %s703_s14 = sand.u32 (!%p697_p3), 1, %s2175_s19   ;;  %s710_s9 = sand.u32 (!%p697_p3), 1, %s2167_s17  }
  0x74   : > { %700 = sbr.rel (%p697_p3) target bundleno = 501 (0x1f5), region = 108  ;;  %s717_s28 = sand.u32 (!%p697_p3), 1, %s2159_s15  }
  0x75   : > { %s1869_s11 = smul.u32 (!%p697_p3), 48, %s703_s14  ;;  %s1743_s0 = sshll.u32 (!%p697_p3), %s717_s28, 5 }
  0x76   : > { %s1870_s10 = smul.u32 (!%p697_p3), 768, %s710_s9  ;;  %s1745_s27 = sshll.u32 (!%p697_p3), %s2187_s22, 1 }
  0x77   : > { %p758_p4 = scmp.lt.s32.totalorder (!%p697_p3), %s1745_s27, 3  ;;  %s2566_s6 = scalar_lea.vmem (!%p697_p3), [#allocation3], %s1869_s11 }
  0x78   : > { %s2568_s8 = scalar_lea.vmem (!%p697_p3), [#allocation4], %s1870_s10  ;;  %s2570_s1 = scalar_lea.vmem (!%p697_p3), [#allocation5], %s1743_s0 }
  0x79   : > { %s2572_s17 = scalar_lea.vmem (!%p697_p3), [#allocation6], %s1743_s0  ;;  %p1746_p5 = scmp.ne.s32.totalorder (!%p697_p3), %s2183_s21, 0 }
  0x7b   : > { %s2770_s27 = smov (!%p758_p4, %s1745_s27), 3  ;;  %769 = sbr.rel (%p1746_p5) target bundleno = 130 (0x82), region = 124 }
  0x7c   : > { %s760_s30 = scalar_lea.vmem %s2736_s2, %s2770_s27  ;;  %v2201_v42 = vmov (!%p1746_p5), 0.0  }
  0x7d   : > { %770 = vst [vmem:[#allocation2] sm:$0xff] (!%p1746_p5), %v2201_v42  ;;  %771 = vst [vmem:[#allocation2 + $0x8] sm:$0xff] (!%p1746_p5), %v2201_v42 }
  0x7e   : > { %772 = vst [vmem:[#allocation2 + $0x10] sm:$0xff] (!%p1746_p5), %v2201_v42  ;;  %773 = vst [vmem:[#allocation2 + $0x18] sm:$0xff] (!%p1746_p5), %v2201_v42 }
  0x82 PF: > { %v1960_v43 = vld [vmem:[%s2568_s8 + $0x104] ss:$8 sps:$4 sm:$0xff]   ;;  %v1962_v44 = vld [vmem:[%s2568_s8 + $0x100] ss:$8 sps:$4 sm:$0xff]   ;;  %v1963_v45 = vld [vmem:[%s2568_s8 + $0x114] ss:$8 sps:$4 sm:$0xff]  }
  0x83   : > { %1433 = vmatprep.subr.bf16.mxu0 %v1960_v43  ;;  %v1965_v46 = vld [vmem:[%s2568_s8 + $0x110] ss:$8 sps:$4 sm:$0xff]   ;;  %v1966_v47 = vld [vmem:[%s2568_s8 + $0x124] ss:$8 sps:$4 sm:$0xff]   ;;  %v1968_v48 = vld [vmem:[%s2568_s8 + $0x120] ss:$8 sps:$4 sm:$0xff]  }
  0x84   : > { %1434 = vmatpush1.bf16.msra.mxu0 %v1962_v44  ;;  %v1969_v49 = vld [vmem:[%s2568_s8 + $0x134] ss:$8 sps:$4 sm:$0xff]   ;;  %v1971_v50 = vld [vmem:[%s2568_s8 + $0x130] ss:$8 sps:$4 sm:$0xff]   ;;  %v1972_v51 = vld [vmem:[%s2568_s8 + $0x144] ss:$8 sps:$4 sm:$0xff]  }
  0x85   : > { %1435 = vmatprep.subr.bf16.mxu0 %v1963_v45  ;;  %v1974_v52 = vld [vmem:[%s2568_s8 + $0x140] ss:$8 sps:$4 sm:$0xff]   ;;  %v1975_v53 = vld [vmem:[%s2568_s8 + $0x154] ss:$8 sps:$4 sm:$0xff]   ;;  %v1977_v54 = vld [vmem:[%s2568_s8 + $0x150] ss:$8 sps:$4 sm:$0xff]  }
  0x86   : > { %v1978_v55 = vld [vmem:[%s2568_s8 + $0x164] ss:$8 sps:$4 sm:$0xff]   ;;  %v2010_v57 = vld [vmem:[%s2568_s8] ss:$8 sps:$4 sm:$0xff]   ;;  %v1981_v60 = vld [vmem:[%s2568_s8 + $0x174] ss:$8 sps:$4 sm:$0xff]  }
  0x87   : > { %v2007_v56 = vld [vmem:[%s2568_s8 + $0x4] ss:$8 sps:$4 sm:$0xff]   ;;  %v1980_v58 = vld [vmem:[%s2568_s8 + $0x160] ss:$8 sps:$4 sm:$0xff]   ;;  %v2017_v61 = vld [vmem:[%s2568_s8 + $0x14] ss:$8 sps:$4 sm:$0xff]  }
  0x88   : > { %1436 = vmatpush1.bf16.msra.mxu0 %v1965_v46  ;;  %1390 = vmatprep.subr.bf16.mxu1 %v2007_v56  ;;  %v2013_v59 = vld [vmem:[%s2566_s6 + $0xc] ss:$24 sps:$4 sm:$0xff]   ;;  %v2019_v62 = vld [vmem:[%s2568_s8 + $0x10] ss:$8 sps:$4 sm:$0xff]   ;;  %v2025_v2 = vld [vmem:[%s2568_s8 + $0x20] ss:$8 sps:$4 sm:$0xff]  }
  0x89   : > { %1437 = vmatprep.subr.bf16.mxu0 %v1966_v47  ;;  %1391 = vmatpush1.bf16.msra.mxu1 %v2010_v57  ;;  %v1983_v63 = vld [vmem:[%s2568_s8 + $0x170] ss:$8 sps:$4 sm:$0xff]   ;;  %v1984_v0 = vld [vmem:[%s2568_s8 + $0x184] ss:$8 sps:$4 sm:$0xff]   ;;  %v1986_v3 = vld [vmem:[%s2568_s8 + $0x180] ss:$8 sps:$4 sm:$0xff]  }
  0x8a   : > { %1465 = vmatprep.mubr.bf16.mxu0 %v2013_v59  ;;  %1392 = vmatprep.subr.bf16.mxu1 %v2017_v61  ;;  %v2023_v1 = vld [vmem:[%s2568_s8 + $0x24] ss:$8 sps:$4 sm:$0xff]   ;;  %v2029_v4 = vld [vmem:[%s2568_s8 + $0x34] ss:$8 sps:$4 sm:$0xff]   ;;  %v2031_v6 = vld [vmem:[%s2568_s8 + $0x30] ss:$8 sps:$4 sm:$0xff]  }
  0x8b   : > { %v1987_v5 = vld [vmem:[%s2568_s8 + $0x194] ss:$8 sps:$4 sm:$0xff]   ;;  %v2035_v7 = vld [vmem:[%s2568_s8 + $0x44] ss:$8 sps:$4 sm:$0xff]   ;;  %v1989_v8 = vld [vmem:[%s2568_s8 + $0x190] ss:$8 sps:$4 sm:$0xff]  }
  0x8c   : > { %1438 = vmatpush1.bf16.msra.mxu0 %v1968_v48  ;;  %v1990_v9 = vld [vmem:[%s2568_s8 + $0x1a4] ss:$8 sps:$4 sm:$0xff]   ;;  %v2037_v10 = vld [vmem:[%s2568_s8 + $0x40] ss:$8 sps:$4 sm:$0xff]   ;;  %v2041_v11 = vld [vmem:[%s2568_s8 + $0x54] ss:$8 sps:$4 sm:$0xff]  }
  0x8d   : > { %1439 = vmatprep.subr.bf16.mxu0 %v1969_v49  ;;  %1393 = vmatpush1.bf16.msra.mxu1 %v2019_v62  ;;  %v1992_v12 = vld [vmem:[%s2568_s8 + $0x1a0] ss:$8 sps:$4 sm:$0xff]   ;;  %v1993_v13 = vld [vmem:[%s2568_s8 + $0x1b4] ss:$8 sps:$4 sm:$0xff]   ;;  %v2043_v14 = vld [vmem:[%s2568_s8 + $0x50] ss:$8 sps:$4 sm:$0xff]  }
  0x8e   : > { %1394 = vmatprep.subr.bf16.mxu1 %v2023_v1  ;;  %v2047_v15 = vld [vmem:[%s2568_s8 + $0x64] ss:$8 sps:$4 sm:$0xff]   ;;  %v1995_v16 = vld [vmem:[%s2568_s8 + $0x1b0] ss:$8 sps:$4 sm:$0xff]   ;;  %v2049_v18 = vld [vmem:[%s2568_s8 + $0x60] ss:$8 sps:$4 sm:$0xff]  }
  0x8f   : > { %v1996_v17 = vld [vmem:[%s2568_s8 + $0x1c4] ss:$8 sps:$4 sm:$0xff]   ;;  %v2053_v19 = vld [vmem:[%s2568_s8 + $0x74] ss:$8 sps:$4 sm:$0xff]   ;;  %v1998_v20 = vld [vmem:[%s2568_s8 + $0x1c0] ss:$8 sps:$4 sm:$0xff]  }
  0x90   : > { %1440 = vmatpush1.bf16.msra.mxu0 %v1971_v50  ;;  %v1999_v21 = vld [vmem:[%s2568_s8 + $0x1d4] ss:$8 sps:$4 sm:$0xff]   ;;  %v2055_v22 = vld [vmem:[%s2568_s8 + $0x70] ss:$8 sps:$4 sm:$0xff]   ;;  %v2059_v23 = vld [vmem:[%s2568_s8 + $0x84] ss:$8 sps:$4 sm:$0xff]  }
  0x91   : > { %1441 = vmatprep.subr.bf16.mxu0 %v1972_v51  ;;  %1395 = vmatpush1.bf16.msra.mxu1 %v2025_v2  ;;  %v2001_v24 = vld [vmem:[%s2568_s8 + $0x1d0] ss:$8 sps:$4 sm:$0xff]   ;;  %v2002_v25 = vld [vmem:[%s2568_s8 + $0x1e4] ss:$8 sps:$4 sm:$0xff]   ;;  %v2061_v26 = vld [vmem:[%s2568_s8 + $0x80] ss:$8 sps:$4 sm:$0xff]  }
  0x92   : > { %1396 = vmatprep.subr.bf16.mxu1 %v2029_v4  ;;  %v2065_v27 = vld [vmem:[%s2568_s8 + $0x94] ss:$8 sps:$4 sm:$0xff]   ;;  %v2004_v28 = vld [vmem:[%s2568_s8 + $0x1e0] ss:$8 sps:$4 sm:$0xff]   ;;  %v2067_v30 = vld [vmem:[%s2568_s8 + $0x90] ss:$8 sps:$4 sm:$0xff]  }
  0x93   : > { %v2005_v29 = vld [vmem:[%s2568_s8 + $0x1f4] ss:$8 sps:$4 sm:$0xff]   ;;  %v2071_v31 = vld [vmem:[%s2568_s8 + $0xa4] ss:$8 sps:$4 sm:$0xff]   ;;  %v2009_v32 = vld [vmem:[%s2568_s8 + $0x1f0] ss:$8 sps:$4 sm:$0xff]  }
  0x94   : > { %1442 = vmatpush1.bf16.msra.mxu0 %v1974_v52  ;;  %v2016_v33 = vld [vmem:[%s2568_s8 + $0x204] ss:$8 sps:$4 sm:$0xff]   ;;  %v2073_v34 = vld [vmem:[%s2568_s8 + $0xa0] ss:$8 sps:$4 sm:$0xff]   ;;  %v2077_v36 = vld [vmem:[%s2568_s8 + $0xb4] ss:$8 sps:$4 sm:$0xff]  }
  0x95   : > { %1443 = vmatprep.subr.bf16.mxu0 %v1975_v53  ;;  %1397 = vmatpush1.bf16.msra.mxu1 %v2031_v6  ;;  %v2011_v35 = vld [vmem:[%s2566_s6 + $0x8] ss:$24 sps:$4 sm:$0xff]   ;;  %v2022_v38 = vld [vmem:[%s2568_s8 + $0x214] ss:$8 sps:$4 sm:$0xff]   ;;  %v2083_v41 = vld [vmem:[%s2568_s8 + $0xc4] ss:$8 sps:$4 sm:$0xff]  }
  0x96   : > { %1398 = vmatprep.subr.bf16.mxu1 %v2035_v7  ;;  %v2014_v37 = vld [vmem:[%s2568_s8 + $0x200] ss:$8 sps:$4 sm:$0xff]   ;;  %v2079_v39 = vld [vmem:[%s2568_s8 + $0xb0] ss:$8 sps:$4 sm:$0xff]   ;;  %v2106_v40 = vld [vmem:[%s2566_s6 + $0x4] ss:$24 sps:$4 sm:$0xff]  }
  0x97   : > { %v2020_v42 = vld [vmem:[%s2568_s8 + $0x210] ss:$8 sps:$4 sm:$0xff]   ;;  %1422 = vmatprep.mubr.bf16.mxu1 %v2106_v40  ;;  %v2112_v43 = vld [vmem:[%s2566_s6 + $0x14] ss:$24 sps:$4 sm:$0xff]   ;;  %v2085_v45 = vld [vmem:[%s2568_s8 + $0xc0] ss:$8 sps:$4 sm:$0xff]  }
  0x98   : > { %1444 = vmatpush1.bf16.msra.mxu0 %v1977_v54  ;;  %v2028_v44 = vld [vmem:[%s2568_s8 + $0x224] ss:$8 sps:$4 sm:$0xff]   ;;  %v2089_v46 = vld [vmem:[%s2568_s8 + $0xd4] ss:$8 sps:$4 sm:$0xff]   ;;  %v2026_v47 = vld [vmem:[%s2568_s8 + $0x220] ss:$8 sps:$4 sm:$0xff]  }
  0x99   : > { %1445 = vmatprep.subr.bf16.mxu0 %v1978_v55  ;;  %1399 = vmatpush1.bf16.msra.mxu1 %v2037_v10  ;;  %v2034_v48 = vld [vmem:[%s2568_s8 + $0x234] ss:$8 sps:$4 sm:$0xff]   ;;  %v2091_v49 = vld [vmem:[%s2568_s8 + $0xd0] ss:$8 sps:$4 sm:$0xff]   ;;  %v2095_v50 = vld [vmem:[%s2568_s8 + $0xe4] ss:$8 sps:$4 sm:$0xff]  }
  0x9a   : > { %1400 = vmatprep.subr.bf16.mxu1 %v2041_v11  ;;  %v2032_v51 = vld [vmem:[%s2568_s8 + $0x230] ss:$8 sps:$4 sm:$0xff]   ;;  %v2040_v52 = vld [vmem:[%s2568_s8 + $0x244] ss:$8 sps:$4 sm:$0xff]   ;;  %v2097_v53 = vld [vmem:[%s2568_s8 + $0xe0] ss:$8 sps:$4 sm:$0xff]  }
  0x9b   : > { %v2101_v54 = vld [vmem:[%s2568_s8 + $0xf4] ss:$8 sps:$4 sm:$0xff]   ;;  %v2038_v55 = vld [vmem:[%s2568_s8 + $0x240] ss:$8 sps:$4 sm:$0xff]   ;;  %v2103_v57 = vld [vmem:[%s2568_s8 + $0xf0] ss:$8 sps:$4 sm:$0xff]  }
  0x9c   : > { %1446 = vmatpush1.bf16.msra.mxu0 %v1980_v58  ;;  %v2046_v56 = vld [vmem:[%s2568_s8 + $0x254] ss:$8 sps:$4 sm:$0xff]   ;;  %v2044_v58 = vld [vmem:[%s2568_s8 + $0x250] ss:$8 sps:$4 sm:$0xff]   ;;  %v2052_v59 = vld [vmem:[%s2568_s8 + $0x264] ss:$8 sps:$4 sm:$0xff]  }
  0x9d   : > { %1447 = vmatprep.subr.bf16.mxu0 %v1981_v60  ;;  %1401 = vmatpush1.bf16.msra.mxu1 %v2043_v14  ;;  %v2104_v60 = vld [vmem:[%s2566_s6] ss:$24 sps:$4 sm:$0xff]   ;;  %v2058_v62 = vld [vmem:[%s2568_s8 + $0x274] ss:$8 sps:$4 sm:$0xff]   ;;  %v2076_v4 = vld [vmem:[%s2568_s8 + $0x2a4] ss:$8 sps:$4 sm:$0xff]  }
  0x9e   : > { %1402 = vmatprep.subr.bf16.mxu1 %v2047_v15  ;;  %v2050_v61 = vld [vmem:[%s2568_s8 + $0x260] ss:$8 sps:$4 sm:$0xff]   ;;  %v2070_v2 = vld [vmem:[%s2568_s8 + $0x294] ss:$8 sps:$4 sm:$0xff]   ;;  %v2080_v7 = vld [vmem:[%s2568_s8 + $0x2b0] ss:$8 sps:$4 sm:$0xff]  }
  0x9f   : > { %v2062_v1 = vld [vmem:[%s2568_s8 + $0x280] ss:$8 sps:$4 sm:$0xff]   ;;  %v2082_v6 = vld [vmem:[%s2568_s8 + $0x2b4] ss:$8 sps:$4 sm:$0xff]   ;;  %v2092_v11 = vld [vmem:[%s2568_s8 + $0x2d0] ss:$8 sps:$4 sm:$0xff]  }
  0xa0   : > { %1448 = vmatpush1.bf16.msra.mxu0 %v1983_v63  ;;  %v2056_v63 = vld [vmem:[%s2568_s8 + $0x270] ss:$8 sps:$4 sm:$0xff]   ;;  %v2094_v10 = vld [vmem:[%s2568_s8 + $0x2d4] ss:$8 sps:$4 sm:$0xff]   ;;  %p1849_p6 = scmp.ne.s32.totalorder %s2183_s21, 5 }
  0xa1   : > { %1449 = vmatprep.subr.bf16.mxu0 %v1984_v0  ;;  %1403 = vmatpush1.bf16.msra.mxu1 %v2049_v18  ;;  %v2064_v0 = vld [vmem:[%s2568_s8 + $0x284] ss:$8 sps:$4 sm:$0xff]   ;;  %v2109_v14 = vld [vmem:[%s2568_s8 + $0x2f4] ss:$8 sps:$4 sm:$0xff]   ;;  %v2107_v15 = vld [vmem:[%s2568_s8 + $0x2f0] ss:$8 sps:$4 sm:$0xff]  }
  0xa2   : > { %1404 = vmatprep.subr.bf16.mxu1 %v2053_v19 }
  0xa4   : > { %1450 = vmatpush1.bf16.msra.mxu0 %v1986_v3  ;;  %v2068_v3 = vld [vmem:[%s2568_s8 + $0x290] ss:$8 sps:$4 sm:$0xff]  }
  0xa5   : > { %1451 = vmatprep.subr.bf16.mxu0 %v1987_v5  ;;  %1405 = vmatpush1.bf16.msra.mxu1 %v2055_v22  ;;  %v2074_v5 = vld [vmem:[%s2568_s8 + $0x2a0] ss:$8 sps:$4 sm:$0xff]  }
  0xa6   : > { %1406 = vmatprep.subr.bf16.mxu1 %v2059_v23 }
  0xa8   : > { %1452 = vmatpush1.bf16.msra.mxu0 %v1989_v8  ;;  %v2088_v8 = vld [vmem:[%s2568_s8 + $0x2c4] ss:$8 sps:$4 sm:$0xff]  }
  0xa9   : > { %1453 = vmatprep.subr.bf16.mxu0 %v1990_v9  ;;  %1407 = vmatpush1.bf16.msra.mxu1 %v2061_v26  ;;  %v2086_v9 = vld [vmem:[%s2568_s8 + $0x2c0] ss:$8 sps:$4 sm:$0xff]  }
  0xaa   : > { %1408 = vmatprep.subr.bf16.mxu1 %v2065_v27  ;;  %v776_v27 = vld [vmem:[#allocation2 + $0x10] sm:$0xff] }
  0xac   : > { %1454 = vmatpush1.bf16.msra.mxu0 %v1992_v12  ;;  %v2100_v12 = vld [vmem:[%s2568_s8 + $0x2e4] ss:$8 sps:$4 sm:$0xff]  }
  0xad   : > { %1455 = vmatprep.subr.bf16.mxu0 %v1993_v13  ;;  %1409 = vmatpush1.bf16.msra.mxu1 %v2067_v30  ;;  %v2098_v13 = vld [vmem:[%s2568_s8 + $0x2e0] ss:$8 sps:$4 sm:$0xff]  }
  0xae   : > { %1410 = vmatprep.subr.bf16.mxu1 %v2071_v31  ;;  %v777_v31 = vld [vmem:[#allocation2 + $0x18] sm:$0xff] }
  0xb0   : > { %1456 = vmatpush1.bf16.msra.mxu0 %v1995_v16  ;;  %v2110_v16 = vld [vmem:[%s2566_s6 + $0x10] ss:$24 sps:$4 sm:$0xff]  }
  0xb1   : > { %1457 = vmatprep.subr.bf16.mxu0 %v1996_v17  ;;  %1411 = vmatpush1.bf16.msra.mxu1 %v2073_v34 }
  0xb2   : > { %1412 = vmatprep.subr.bf16.mxu1 %v2077_v36 }
  0xb4   : > { %1458 = vmatpush1.bf16.msra.mxu0 %v1998_v20 }
  0xb5   : > { %1459 = vmatprep.subr.bf16.mxu0 %v1999_v21  ;;  %1413 = vmatpush1.bf16.msra.mxu1 %v2079_v39  ;;  %v774_v21 = vld [vmem:[#allocation2] sm:$0xff] }
  0xb6   : > { %1414 = vmatprep.subr.bf16.mxu1 %v2083_v41  ;;  %v1535_v39 = vld [vmem:[%s760_s30] sm:$0x3] (!%p1849_p6) }
  0xb8   : > { %1460 = vmatpush1.bf16.msra.mxu0 %v2001_v24  ;;  %v775_v24 = vld [vmem:[#allocation2 + $0x8] sm:$0xff] }
  0xb9   : > { %1461 = vmatprep.subr.bf16.mxu0 %v2002_v25  ;;  %1415 = vmatpush1.bf16.msra.mxu1 %v2085_v45 }
  0xba   : > { %1416 = vmatprep.subr.bf16.mxu1 %v2089_v46 }
  0xbc   : > { %1462 = vmatpush1.bf16.msra.mxu0 %v2004_v28 }
  0xbd   : > { %1463 = vmatprep.subr.bf16.mxu0 %v2005_v29  ;;  %1417 = vmatpush1.bf16.msra.mxu1 %v2091_v49  ;;  %v1552_v49 = vld [vmem:[%s2570_s1 + $0x8] sm:$0xff] (!%p1849_p6) }
  0xbe   : > { %1418 = vmatprep.subr.bf16.mxu1 %v2095_v50  ;;  %v1553_v50 = vld [vmem:[%s2570_s1 + $0x10] sm:$0xff] (!%p1849_p6) }
  0xc0   : > { %1464 = vmatpush1.bf16.msra.mxu0 %v2009_v32 }
  0xc1   : > { %1476 = vmatprep.subr.bf16.mxu0 %v2016_v33  ;;  %1419 = vmatpush1.bf16.msra.mxu1 %v2097_v53 }
  0xc2   : > { %1420 = vmatprep.subr.bf16.mxu1 %v2101_v54 }
  0xc3   : > { %1466 = vmatmul.mubr.bf16.vlgmr.msra.gmra.mrb[0].mxu0 %v2011_v35 }
  0xc4   : > { %1477 = vmatpush1.bf16.msra.mxu0 %v2014_v37  ;;  %1508 = vmatprep.mubr.bf16.mxu0 %v2112_v43  ;;  %v1537_v37 = vlaneseq (!%p1849_p6) }
  0xc5   : > { %1478 = vmatprep.subr.bf16.mxu0 %v2022_v38  ;;  %1421 = vmatpush1.bf16.msra.mxu1 %v2103_v57 }
  0xc6   : > { %v1538_v38 = vshrl.u32 (!%p1849_p6), %v1537_v37, 7 }
  0xc8   : > { %1479 = vmatpush1.bf16.msra.mxu0 %v2020_v42  ;;  %1423 = vmatmul.mubr.bf16.vlgmr.msra.gmra.mrb[0].mxu1 %v2104_v60  ;;  %v1539_v41 = vsub.s32 (!%p1849_p6), 0, %v1538_v38  ;;  %v1543_v42 = vsub.s32 (!%p1849_p6), 1, %v1538_v38 }
  0xc9   : > { %1480 = vmatprep.subr.bf16.mxu0 %v2028_v44 }
  0xca   : > { %v1540_v46 = vrot.slane (!%p1849_p6), %v1535_v39, %v1539_v41 }
  0xcc   : > { %1481 = vmatpush1.bf16.msra.mxu0 %v2026_v47  ;;  %v1551_v47 = vld [vmem:[%s2570_s1] sm:$0xff] (!%p1849_p6) }
  0xcd   : > { %1482 = vmatprep.subr.bf16.mxu0 %v2034_v48  ;;  %v1544_v48 = vrot.slane (!%p1849_p6), %v1535_v39, %v1543_v42 }
  0xd0   : > { %1483 = vmatpush1.bf16.msra.mxu0 %v2032_v51  ;;  %v1554_v51 = vld [vmem:[%s2570_s1 + $0x18] sm:$0xff] (!%p1849_p6) }
  0xd1   : > { %1484 = vmatprep.subr.bf16.mxu0 %v2040_v52 }
  0xd4   : > { %1485 = vmatpush1.bf16.msra.mxu0 %v2038_v55 }
  0xd5   : > { %1486 = vmatprep.subr.bf16.mxu0 %v2046_v56 }
  0xd8   : > { %1487 = vmatpush1.bf16.msra.mxu0 %v2044_v58 }
  0xd9   : > { %1488 = vmatprep.subr.bf16.mxu0 %v2052_v59 }
  0xdc   : > { %1489 = vmatpush1.bf16.msra.mxu0 %v2050_v61 }
  0xdd   : > { %1490 = vmatprep.subr.bf16.mxu0 %v2058_v62 }
  0xe0   : > { %1491 = vmatpush1.bf16.msra.mxu0 %v2056_v63 }
  0xe1   : > { %1492 = vmatprep.subr.bf16.mxu0 %v2064_v0 }
  0xe4   : > { %1493 = vmatpush1.bf16.msra.mxu0 %v2062_v1 }
  0xe5   : > { %1494 = vmatprep.subr.bf16.mxu0 %v2070_v2 }
  0xe8   : > { %1495 = vmatpush1.bf16.msra.mxu0 %v2068_v3 }
  0xe9   : > { %1496 = vmatprep.subr.bf16.mxu0 %v2076_v4 }
  0xec   : > { %1497 = vmatpush1.bf16.msra.mxu0 %v2074_v5 }
  0xed   : > { %1498 = vmatprep.subr.bf16.mxu0 %v2082_v6 }
  0xf0   : > { %1499 = vmatpush1.bf16.msra.mxu0 %v2080_v7 }
  0xf1   : > { %1500 = vmatprep.subr.bf16.mxu0 %v2088_v8 }
  0xf4   : > { %1501 = vmatpush1.bf16.msra.mxu0 %v2086_v9 }
  0xf5   : > { %1502 = vmatprep.subr.bf16.mxu0 %v2094_v10 }
  0xf8   : > { %1503 = vmatpush1.bf16.msra.mxu0 %v2092_v11 }
  0xf9   : > { %1504 = vmatprep.subr.bf16.mxu0 %v2100_v12 }
  0xfc   : > { %1505 = vmatpush1.bf16.msra.mxu0 %v2098_v13 }
  0xfd   : > { %1506 = vmatprep.subr.bf16.mxu0 %v2109_v14 }
 0x100   : > { %1507 = vmatpush1.bf16.msra.mxu0 %v2107_v15 }
 0x103   : > { %1509 = vmatmul.mubr.bf16.vlgmr.msra.gmra.mrb[0].mxu0 %v2110_v16 }
 0x19b   : > { %v1424_v17 = vpop.f32.mrb[0].mxu1 }
 0x19c   : > { %v1426_v18 = vpop.f32.mrb[1].mxu1 }
 0x19d   : > { %v1428_v19 = vpop.f32.mrb[2].mxu1 }
 0x19e   : > { %v1430_v20 = vpop.f32.mrb[3].mxu1 }
 0x1d6   : > { %v1510_v22 = vpop.f32.mrb[0].mxu0 }
 0x1d7   : > { %v1859_v23 = vadd.f32 %v1510_v22, %v1424_v17  ;;  %v1512_v25 = vpop.f32.mrb[1].mxu0 }
 0x1d8   : > { %v1860_v26 = vadd.f32 %v1512_v25, %v1426_v18  ;;  %v1514_v28 = vpop.f32.mrb[2].mxu0  ;;  %1530 = sbr.rel (%p1849_p6) target bundleno = 493 (0x1ed), region = 128 }
 0x1d9   : > { %v1519_v29 = vadd.f32 %v1859_v23, %v774_v21  ;;  %v1861_v30 = vadd.f32 %v1514_v28, %v1428_v19  ;;  %v1516_v32 = vpop.f32.mrb[3].mxu0 }
 0x1da   : > { %v1520_v33 = vadd.f32 %v1860_v26, %v775_v24  ;;  %v1862_v34 = vadd.f32 %v1516_v32, %v1430_v20 }
 0x1db   : > { %1523 = vst [vmem:[#allocation2] sm:$0xff] %v1519_v29  ;;  %v1521_v35 = vadd.f32 %v1861_v30, %v776_v27 }
 0x1dc   : > { %1524 = vst [vmem:[#allocation2 + $0x8] sm:$0xff] %v1520_v33  ;;  %v1522_v36 = vadd.f32 %v1862_v34, %v777_v31 }
 0x1dd   : > { %1525 = vst [vmem:[#allocation2 + $0x10] sm:$0xff] %v1521_v35 }
 0x1de   : > { %1526 = vst [vmem:[#allocation2 + $0x18] sm:$0xff] %v1522_v36 }
 0x1e2   : > { %v1531_v40 = vld [vmem:[#allocation2] sm:$0xff] }
 0x1e3   : > { %v1532_v43 = vld [vmem:[#allocation2 + $0x8] sm:$0xff]  ;;  %v1547_v52 = vadd.f32 %v1540_v46, %v1531_v40 }
 0x1e4   : > { %v1533_v44 = vld [vmem:[#allocation2 + $0x10] sm:$0xff]  ;;  %v1548_v53 = vadd.f32 %v1544_v48, %v1532_v43 }
 0x1e5   : > { %v1534_v45 = vld [vmem:[#allocation2 + $0x18] sm:$0xff]  ;;  %v1549_v54 = vadd.f32 %v1540_v46, %v1533_v44  ;;  %v1555_v56 = vadd.f32 %v1551_v47, %v1547_v52 }
 0x1e6   : > { %v1550_v55 = vadd.f32 %v1544_v48, %v1534_v45  ;;  %v1556_v57 = vadd.f32 %v1552_v49, %v1548_v53 }
 0x1e7   : > { %v1557_v58 = vadd.f32 %v1553_v50, %v1549_v54  ;;  %v1559_v60 = vmax.f32 %v1555_v56, 0.0 }
 0x1e8   : > { %v1558_v59 = vadd.f32 %v1554_v51, %v1550_v55  ;;  %v1560_v61 = vmax.f32 %v1556_v57, 0.0 }
 0x1e9   : > { %v1561_v62 = vmax.f32 %v1557_v58, 0.0  ;;  %1563 = vst [vmem:[%s2572_s17] sm:$0xff] %v1559_v60 }
 0x1ea   : > { %v1562_v63 = vmax.f32 %v1558_v59, 0.0  ;;  %1564 = vst [vmem:[%s2572_s17 + $0x8] sm:$0xff] %v1560_v61 }
 0x1eb   : > { %1565 = vst [vmem:[%s2572_s17 + $0x10] sm:$0xff] %v1561_v62 }
 0x1ec   : > { %1566 = vst [vmem:[%s2572_s17 + $0x18] sm:$0xff] %v1562_v63 }
 0x1ed PF: > { %1573 = sbr.rel (!%p2331_p13) target bundleno = 501 (0x1f5), region = 132  ;;  %s1858_s1 = sshll.u32 (%p2331_p13), %s2187_s22, 4 }
 0x1ee   : > { %s1579_s9 = scalar_lea.vmem (%p2331_p13), %s2738_s4, %s1858_s1 }
 0x1f0   : > { %v1592_v0 = vld [vmem:[%s2572_s17] sm:$0xff] (%p2331_p13) }
 0x1f1   : > { %v1594_v1 = vld [vmem:[%s2572_s17 + $0x8] sm:$0xff] (%p2331_p13)  ;;  %1593 = vst [vmem:[%s1579_s9] sm:$0xff] (%p2331_p13), %v1592_v0 }
 0x1f2   : > { %v1596_v2 = vld [vmem:[%s2572_s17 + $0x10] sm:$0xff] (%p2331_p13)  ;;  %1595 = vst [vmem:[%s1579_s9 + $0x8] sm:$0xff] (%p2331_p13), %v1594_v1 }
 0x1f3   : > { %v1598_v3 = vld [vmem:[%s2572_s17 + $0x18] sm:$0xff] (%p2331_p13)  ;;  %1597 = vst [vmem:[%s1579_s9 + $0x20] sm:$0xff] (%p2331_p13), %v1596_v2 }
 0x1f4   : > { %1599 = vst [vmem:[%s1579_s9 + $0x28] sm:$0xff] %v1598_v3 }
 0x1f5 PF: > { %s14_s25 = sadd.s32 1, %s2199_s25   ;;  %s2751_s29 = sld [smem:[#allocation7_spill]] }
 0x1f6   : > { %p11_p7 = scmp.ge.s32.totalorder %s14_s25, 14   ;;  %s2752_s11 = sld [smem:[#allocation8_spill]] }
 0x1f7   : > { %s2753_s15 = smov %s2163_s16  ;;  %s2754_s16 = smov %s2323_s13 }
 0x1f8   : > { %s2755_s17 = smov %s2171_s18  ;;  %s2756_s18 = smov %s2320_s12 }
 0x1f9   : > { %s2757_s19 = smov %s2179_s20  ;;  %s2758_s20 = smov %s2304_s7 }
 0x1fa   : > { %s2759_s21 = smov %s2191_s23  ;;  %s2760_s22 = smov %s2195_s24 }
 0x1fb   : > { %s2761_s23 = smov %s2751_s29  ;;  %13 = sbr.rel (!%p11_p7) target bundleno = 9 (0x9), region = 205 }
 0x1fc   : > { %s2762_s24 = smov %s2752_s11 }

// kernel: resnet_triplet_forward.27
= control target key start
LH: loop header
LB: loop body
LE: loop exit
PB: predicated region body
PF: predicated region fallthrough
CT: control target
= control target key end

     0   :  { %s1642_s12 = smov 0   ;;  %s1644_s13 = smov 0   ;;  %s1964_s0 = inlined_call_operand.vmem [shape: bf16[16,512], index: 0, kind: input, shape index: {}]   ;;  %s1965_s1 = inlined_call_operand.vmem [shape: bf16[512,512], index: 1, kind: input, shape index: {}]   ;;  %s1966_s2 = inlined_call_operand.vmem [shape: f32[1,512], index: 2, kind: input, shape index: {}]   ;;  %s1967_s3 = inlined_call_operand.vmem [shape: f32[16,512], index: 3, kind: output, shape index: {}]  }
   0x1   :  { %s1646_s14 = smov 0   ;;  %s1648_s15 = smov 0  }
   0x2   :  { %s1650_s16 = smov 0  }
   0x3 LB: > { %s28_s17 = sadd.s32 1, %s1615_s15  ;;  %s1331_s18 = sadd.s32 4294967295, %s1619_s16   ;;  %s1619_s16 = sphi %s1650_s16, %s13_s16   ;;  %s1615_s15 = sphi %s1648_s15, %s1972_s15   ;;  %s1611_s14 = sphi %s1646_s14, %s1971_s14   ;;  %s1607_s13 = sphi %s1644_s13, %s1970_s13   ;;  %s1603_s12 = sphi %s1642_s12, %s1969_s12  }
   0x4   : > { %p30_p0 = scmp.ge.s32.totalorder %s28_s17, 2  ;;  %p76_p1 = scmp.ne.s32.totalorder %s1607_s13, %s1603_s12 }
   0x5   : > { %p77_p2 = scmp.eq.s32.totalorder %s1619_s16, 0  ;;  %p134_p4 = scmp.eq.s32.totalorder %s1331_s18, 1 }
   0x6   : > { %s1974_s17 = smov (%p30_p0, %s28_s17), 0  ;;  %s69_s20 = sadd.s32 1, %s1607_s13 }
   0x7   : > { %p78_p3 = por %p77_p2, %p76_p1  ;;  %s65_s19 = ssub.s32 %s1615_s15, %s1974_s17 }
   0x8   : > { %p67_p5 = scmp.eq.s32.totalorder %s65_s19, 0  ;;  %p1677_p6 = por %p134_p4, %p76_p1 }
   0x9   : > { %p1335_p7 = scmp.ge.s32.totalorder %s1619_s16, 2 }
   0xa   : > { %s1682_s22 = scalar_select %p67_p5, %s1607_s13, %s69_s20  }
   0xb   : > { %171 = sbr.rel (%p1335_p7) target bundleno = 54 (0x36), region = 20 }
  0x12   : > { %174 = sbr.rel (!%p78_p3) target bundleno = 54 (0x36), region = 24  ;;  %s176_s23 = sand.u32 (%p78_p3), 1, %s1607_s13  }
  0x13   : > { %s1416_s24 = sshll.u32 (%p78_p3), %s1615_s15, 3  ;;  %s1336_s25 = sshll.u32 (%p78_p3), %s176_s23, 9 }
  0x14   : > { %s1690_s28 = scalar_lea.vmem (%p78_p3), %s1965_s1, %s1416_s24  ;;  %s1695_s29 = scalar_lea.vmem (%p78_p3), [#allocation3], %s1336_s25 }
  0x15   : > { %v338_v0 = vld [vmem:[%s1690_s28] sm:$0xff] (%p78_p3)  ;;  %v340_v1 = vld [vmem:[%s1690_s28 + $0x10] sm:$0xff] (%p78_p3) }
  0x16   : > { %v342_v2 = vld [vmem:[%s1690_s28 + $0x20] sm:$0xff] (%p78_p3)  ;;  %339 = vst [vmem:[%s1695_s29] sm:$0xff] (%p78_p3), %v338_v0  ;;  %341 = vst [vmem:[%s1695_s29 + $0x8] sm:$0xff] (%p78_p3), %v340_v1  ;;  %v344_v3 = vld [vmem:[%s1690_s28 + $0x30] sm:$0xff] (%p78_p3) }
  0x17   : > { %343 = vst [vmem:[%s1695_s29 + $0x10] sm:$0xff] (%p78_p3), %v342_v2  ;;  %v346_v4 = vld [vmem:[%s1690_s28 + $0x40] sm:$0xff] (%p78_p3)  ;;  %v348_v5 = vld [vmem:[%s1690_s28 + $0x50] sm:$0xff] (%p78_p3)  ;;  %345 = vst [vmem:[%s1695_s29 + $0x18] sm:$0xff] (%p78_p3), %v344_v3 }
  0x18   : > { %347 = vst [vmem:[%s1695_s29 + $0x20] sm:$0xff] (%p78_p3), %v346_v4  ;;  %349 = vst [vmem:[%s1695_s29 + $0x28] sm:$0xff] (%p78_p3), %v348_v5  ;;  %v350_v6 = vld [vmem:[%s1690_s28 + $0x60] sm:$0xff] (%p78_p3)  ;;  %v352_v7 = vld [vmem:[%s1690_s28 + $0x70] sm:$0xff] (%p78_p3) }
  0x19   : > { %v354_v8 = vld [vmem:[%s1690_s28 + $0x80] sm:$0xff]  ;;  %351 = vst [vmem:[%s1695_s29 + $0x30] sm:$0xff] %v350_v6  ;;  %353 = vst [vmem:[%s1695_s29 + $0x38] sm:$0xff] %v352_v7  ;;  %v356_v9 = vld [vmem:[%s1690_s28 + $0x90] sm:$0xff] }
  0x1a   : > { %355 = vst [vmem:[%s1695_s29 + $0x40] sm:$0xff] %v354_v8  ;;  %v358_v10 = vld [vmem:[%s1690_s28 + $0xa0] sm:$0xff]  ;;  %v360_v11 = vld [vmem:[%s1690_s28 + $0xb0] sm:$0xff]  ;;  %357 = vst [vmem:[%s1695_s29 + $0x48] sm:$0xff] %v356_v9 }
  0x1b   : > { %359 = vst [vmem:[%s1695_s29 + $0x50] sm:$0xff] %v358_v10  ;;  %361 = vst [vmem:[%s1695_s29 + $0x58] sm:$0xff] %v360_v11  ;;  %v362_v12 = vld [vmem:[%s1690_s28 + $0xc0] sm:$0xff]  ;;  %v364_v13 = vld [vmem:[%s1690_s28 + $0xd0] sm:$0xff] }
  0x1c   : > { %v366_v14 = vld [vmem:[%s1690_s28 + $0xe0] sm:$0xff]  ;;  %363 = vst [vmem:[%s1695_s29 + $0x60] sm:$0xff] %v362_v12  ;;  %365 = vst [vmem:[%s1695_s29 + $0x68] sm:$0xff] %v364_v13  ;;  %v368_v15 = vld [vmem:[%s1690_s28 + $0xf0] sm:$0xff] }
  0x1d   : > { %367 = vst [vmem:[%s1695_s29 + $0x70] sm:$0xff] %v366_v14  ;;  %v370_v16 = vld [vmem:[%s1690_s28 + $0x100] sm:$0xff]  ;;  %v372_v17 = vld [vmem:[%s1690_s28 + $0x110] sm:$0xff]  ;;  %369 = vst [vmem:[%s1695_s29 + $0x78] sm:$0xff] %v368_v15 }
  0x1e   : > { %371 = vst [vmem:[%s1695_s29 + $0x80] sm:$0xff] %v370_v16  ;;  %373 = vst [vmem:[%s1695_s29 + $0x88] sm:$0xff] %v372_v17  ;;  %v374_v18 = vld [vmem:[%s1690_s28 + $0x120] sm:$0xff]  ;;  %v376_v19 = vld [vmem:[%s1690_s28 + $0x130] sm:$0xff] }
  0x1f   : > { %v378_v20 = vld [vmem:[%s1690_s28 + $0x140] sm:$0xff]  ;;  %375 = vst [vmem:[%s1695_s29 + $0x90] sm:$0xff] %v374_v18  ;;  %377 = vst [vmem:[%s1695_s29 + $0x98] sm:$0xff] %v376_v19  ;;  %v380_v21 = vld [vmem:[%s1690_s28 + $0x150] sm:$0xff] }
  0x20   : > { %379 = vst [vmem:[%s1695_s29 + $0xa0] sm:$0xff] %v378_v20  ;;  %v382_v22 = vld [vmem:[%s1690_s28 + $0x160] sm:$0xff]  ;;  %v384_v23 = vld [vmem:[%s1690_s28 + $0x170] sm:$0xff]  ;;  %381 = vst [vmem:[%s1695_s29 + $0xa8] sm:$0xff] %v380_v21 }
  0x21   : > { %383 = vst [vmem:[%s1695_s29 + $0xb0] sm:$0xff] %v382_v22  ;;  %385 = vst [vmem:[%s1695_s29 + $0xb8] sm:$0xff] %v384_v23  ;;  %v386_v24 = vld [vmem:[%s1690_s28 + $0x180] sm:$0xff]  ;;  %v388_v25 = vld [vmem:[%s1690_s28 + $0x190] sm:$0xff] }
  0x22   : > { %v390_v26 = vld [vmem:[%s1690_s28 + $0x1a0] sm:$0xff]  ;;  %387 = vst [vmem:[%s1695_s29 + $0xc0] sm:$0xff] %v386_v24  ;;  %389 = vst [vmem:[%s1695_s29 + $0xc8] sm:$0xff] %v388_v25  ;;  %v392_v27 = vld [vmem:[%s1690_s28 + $0x1b0] sm:$0xff] }
  0x23   : > { %391 = vst [vmem:[%s1695_s29 + $0xd0] sm:$0xff] %v390_v26  ;;  %v394_v28 = vld [vmem:[%s1690_s28 + $0x1c0] sm:$0xff]  ;;  %v396_v29 = vld [vmem:[%s1690_s28 + $0x1d0] sm:$0xff]  ;;  %393 = vst [vmem:[%s1695_s29 + $0xd8] sm:$0xff] %v392_v27 }
  0x24   : > { %395 = vst [vmem:[%s1695_s29 + $0xe0] sm:$0xff] %v394_v28  ;;  %397 = vst [vmem:[%s1695_s29 + $0xe8] sm:$0xff] %v396_v29  ;;  %v398_v30 = vld [vmem:[%s1690_s28 + $0x1e0] sm:$0xff]  ;;  %v400_v31 = vld [vmem:[%s1690_s28 + $0x1f0] sm:$0xff] }
  0x25   : > { %v402_v32 = vld [vmem:[%s1690_s28 + $0x200] sm:$0xff]  ;;  %399 = vst [vmem:[%s1695_s29 + $0xf0] sm:$0xff] %v398_v30  ;;  %401 = vst [vmem:[%s1695_s29 + $0xf8] sm:$0xff] %v400_v31  ;;  %v404_v33 = vld [vmem:[%s1690_s28 + $0x210] sm:$0xff] }
  0x26   : > { %403 = vst [vmem:[%s1695_s29 + $0x100] sm:$0xff] %v402_v32  ;;  %v406_v34 = vld [vmem:[%s1690_s28 + $0x220] sm:$0xff]  ;;  %v408_v35 = vld [vmem:[%s1690_s28 + $0x230] sm:$0xff]  ;;  %405 = vst [vmem:[%s1695_s29 + $0x108] sm:$0xff] %v404_v33 }
  0x27   : > { %407 = vst [vmem:[%s1695_s29 + $0x110] sm:$0xff] %v406_v34  ;;  %409 = vst [vmem:[%s1695_s29 + $0x118] sm:$0xff] %v408_v35  ;;  %v410_v36 = vld [vmem:[%s1690_s28 + $0x240] sm:$0xff]  ;;  %v412_v37 = vld [vmem:[%s1690_s28 + $0x250] sm:$0xff] }
  0x28   : > { %v414_v38 = vld [vmem:[%s1690_s28 + $0x260] sm:$0xff]  ;;  %411 = vst [vmem:[%s1695_s29 + $0x120] sm:$0xff] %v410_v36  ;;  %413 = vst [vmem:[%s1695_s29 + $0x128] sm:$0xff] %v412_v37  ;;  %v416_v39 = vld [vmem:[%s1690_s28 + $0x270] sm:$0xff] }
  0x29   : > { %415 = vst [vmem:[%s1695_s29 + $0x130] sm:$0xff] %v414_v38  ;;  %v418_v40 = vld [vmem:[%s1690_s28 + $0x280] sm:$0xff]  ;;  %v420_v41 = vld [vmem:[%s1690_s28 + $0x290] sm:$0xff]  ;;  %417 = vst [vmem:[%s1695_s29 + $0x138] sm:$0xff] %v416_v39 }
  0x2a   : > { %419 = vst [vmem:[%s1695_s29 + $0x140] sm:$0xff] %v418_v40  ;;  %421 = vst [vmem:[%s1695_s29 + $0x148] sm:$0xff] %v420_v41  ;;  %v422_v42 = vld [vmem:[%s1690_s28 + $0x2a0] sm:$0xff]  ;;  %v424_v43 = vld [vmem:[%s1690_s28 + $0x2b0] sm:$0xff] }
  0x2b   : > { %v426_v44 = vld [vmem:[%s1690_s28 + $0x2c0] sm:$0xff]  ;;  %423 = vst [vmem:[%s1695_s29 + $0x150] sm:$0xff] %v422_v42  ;;  %425 = vst [vmem:[%s1695_s29 + $0x158] sm:$0xff] %v424_v43  ;;  %v428_v45 = vld [vmem:[%s1690_s28 + $0x2d0] sm:$0xff] }
  0x2c   : > { %427 = vst [vmem:[%s1695_s29 + $0x160] sm:$0xff] %v426_v44  ;;  %v430_v46 = vld [vmem:[%s1690_s28 + $0x2e0] sm:$0xff]  ;;  %v432_v47 = vld [vmem:[%s1690_s28 + $0x2f0] sm:$0xff]  ;;  %429 = vst [vmem:[%s1695_s29 + $0x168] sm:$0xff] %v428_v45 }
  0x2d   : > { %431 = vst [vmem:[%s1695_s29 + $0x170] sm:$0xff] %v430_v46  ;;  %433 = vst [vmem:[%s1695_s29 + $0x178] sm:$0xff] %v432_v47  ;;  %v434_v48 = vld [vmem:[%s1690_s28 + $0x300] sm:$0xff]  ;;  %v436_v49 = vld [vmem:[%s1690_s28 + $0x310] sm:$0xff] }
  0x2e   : > { %v438_v50 = vld [vmem:[%s1690_s28 + $0x320] sm:$0xff]  ;;  %435 = vst [vmem:[%s1695_s29 + $0x180] sm:$0xff] %v434_v48  ;;  %437 = vst [vmem:[%s1695_s29 + $0x188] sm:$0xff] %v436_v49  ;;  %v440_v51 = vld [vmem:[%s1690_s28 + $0x330] sm:$0xff] }
  0x2f   : > { %439 = vst [vmem:[%s1695_s29 + $0x190] sm:$0xff] %v438_v50  ;;  %v442_v52 = vld [vmem:[%s1690_s28 + $0x340] sm:$0xff]  ;;  %v444_v53 = vld [vmem:[%s1690_s28 + $0x350] sm:$0xff]  ;;  %441 = vst [vmem:[%s1695_s29 + $0x198] sm:$0xff] %v440_v51 }
  0x30   : > { %443 = vst [vmem:[%s1695_s29 + $0x1a0] sm:$0xff] %v442_v52  ;;  %445 = vst [vmem:[%s1695_s29 + $0x1a8] sm:$0xff] %v444_v53  ;;  %v446_v54 = vld [vmem:[%s1690_s28 + $0x360] sm:$0xff]  ;;  %v448_v55 = vld [vmem:[%s1690_s28 + $0x370] sm:$0xff] }
  0x31   : > { %v450_v56 = vld [vmem:[%s1690_s28 + $0x380] sm:$0xff]  ;;  %447 = vst [vmem:[%s1695_s29 + $0x1b0] sm:$0xff] %v446_v54  ;;  %449 = vst [vmem:[%s1695_s29 + $0x1b8] sm:$0xff] %v448_v55  ;;  %v452_v57 = vld [vmem:[%s1690_s28 + $0x390] sm:$0xff] }
  0x32   : > { %451 = vst [vmem:[%s1695_s29 + $0x1c0] sm:$0xff] %v450_v56  ;;  %v454_v58 = vld [vmem:[%s1690_s28 + $0x3a0] sm:$0xff]  ;;  %v456_v59 = vld [vmem:[%s1690_s28 + $0x3b0] sm:$0xff]  ;;  %453 = vst [vmem:[%s1695_s29 + $0x1c8] sm:$0xff] %v452_v57 }
  0x33   : > { %455 = vst [vmem:[%s1695_s29 + $0x1d0] sm:$0xff] %v454_v58  ;;  %457 = vst [vmem:[%s1695_s29 + $0x1d8] sm:$0xff] %v456_v59  ;;  %v458_v60 = vld [vmem:[%s1690_s28 + $0x3c0] sm:$0xff]  ;;  %v460_v61 = vld [vmem:[%s1690_s28 + $0x3d0] sm:$0xff] }
  0x34   : > { %v462_v62 = vld [vmem:[%s1690_s28 + $0x3e0] sm:$0xff]  ;;  %459 = vst [vmem:[%s1695_s29 + $0x1e0] sm:$0xff] %v458_v60  ;;  %461 = vst [vmem:[%s1695_s29 + $0x1e8] sm:$0xff] %v460_v61  ;;  %v464_v63 = vld [vmem:[%s1690_s28 + $0x3f0] sm:$0xff] }
  0x35   : > { %463 = vst [vmem:[%s1695_s29 + $0x1f0] sm:$0xff] %v462_v62  ;;  %465 = vst [vmem:[%s1695_s29 + $0x1f8] sm:$0xff] %v464_v63 }
  0x36 PF: > { %p1339_p8 = scmp.ge.s32.totalorder %s1619_s16, 1  ;;  %p478_p9 = scmp.lt.s32.totalorder %s1619_s16, 3 }
  0x38   : > { %p479_p10 = pnand %p1339_p8, %p478_p9 }
  0x39   : > { %s485_s30 = sand.u32 (!%p479_p10), 1, %s1603_s12   ;;  %v1561_v0 = vld [vmem:[%s1964_s0 + $0x4] ss:$16 sps:$4 sm:$0xff] (!%p479_p10)   ;;  %v1564_v1 = vld [vmem:[%s1964_s0 + $0xc] ss:$16 sps:$4 sm:$0xff] (!%p479_p10)   ;;  %s1342_s20 = sshll.u32 (!%p479_p10), %s1611_s14, 1 }
  0x3a   : > { %482 = sbr.rel (%p479_p10) target bundleno = 401 (0x191), region = 66  ;;  %s1340_s4 = sshll.u32 (!%p479_p10), %s485_s30, 9  ;;  %994 = vmatprep.mubr.bf16.mxu1 (!%p479_p10), %v1561_v0  ;;  %1037 = vmatprep.mubr.bf16.mxu0 (!%p479_p10), %v1564_v1 }
  0x3b   : > { %s1833_s9 = scalar_lea.vmem (!%p479_p10), [#allocation3], %s1340_s4  ;;  %p536_p11 = scmp.lt.s32.totalorder (!%p479_p10), %s1342_s20, 3 }
  0x3c   : > { %v1463_v2 = vld [vmem:[%s1833_s9 + $0x4] ss:$8 sps:$4 sm:$0xff] (!%p479_p10)   ;;  %v1467_v4 = vld [vmem:[%s1833_s9] ss:$8 sps:$4 sm:$0xff] (!%p479_p10)   ;;  %v1469_v6 = vld [vmem:[%s1833_s9 + $0x14] ss:$8 sps:$4 sm:$0xff] (!%p479_p10)  }
  0x3d   : > { %v1465_v3 = vld [vmem:[%s1833_s9 + $0x104] ss:$8 sps:$4 sm:$0xff] (!%p479_p10)   ;;  %962 = vmatprep.subr.bf16.mxu1 (!%p479_p10), %v1463_v2  ;;  %v1468_v5 = vld [vmem:[%s1833_s9 + $0x100] ss:$8 sps:$4 sm:$0xff] (!%p479_p10)   ;;  %v1471_v7 = vld [vmem:[%s1833_s9 + $0x114] ss:$8 sps:$4 sm:$0xff] (!%p479_p10)  }
  0x3e   : > { %1005 = vmatprep.subr.bf16.mxu0 (!%p479_p10), %v1465_v3  ;;  %963 = vmatpush1.bf16.msra.mxu1 (!%p479_p10), %v1467_v4  ;;  %v1473_v8 = vld [vmem:[%s1833_s9 + $0x10] ss:$8 sps:$4 sm:$0xff] (!%p479_p10)   ;;  %v1475_v10 = vld [vmem:[%s1833_s9 + $0x24] ss:$8 sps:$4 sm:$0xff] (!%p479_p10)   ;;  %v1479_v12 = vld [vmem:[%s1833_s9 + $0x20] ss:$8 sps:$4 sm:$0xff] (!%p479_p10)   ;;  %v1065_v4 = vlaneseq (!%p479_p10) }
  0x3f   : > { %1006 = vmatpush1.bf16.msra.mxu0 (!%p479_p10), %v1468_v5  ;;  %964 = vmatprep.subr.bf16.mxu1 (!%p479_p10), %v1469_v6  ;;  %v1474_v9 = vld [vmem:[%s1833_s9 + $0x110] ss:$8 sps:$4 sm:$0xff] (!%p479_p10)   ;;  %v1477_v11 = vld [vmem:[%s1833_s9 + $0x124] ss:$8 sps:$4 sm:$0xff] (!%p479_p10)   ;;  %v1480_v13 = vld [vmem:[%s1833_s9 + $0x120] ss:$8 sps:$4 sm:$0xff] (!%p479_p10)  }
  0x40   : > { %1007 = vmatprep.subr.bf16.mxu0 (!%p479_p10), %v1471_v7  ;;  %v1481_v14 = vld [vmem:[%s1833_s9 + $0x34] ss:$8 sps:$4 sm:$0xff] (!%p479_p10)   ;;  %v1485_v16 = vld [vmem:[%s1833_s9 + $0x30] ss:$8 sps:$4 sm:$0xff] (!%p479_p10)   ;;  %v1487_v18 = vld [vmem:[%s1833_s9 + $0x44] ss:$8 sps:$4 sm:$0xff] (!%p479_p10)  }
  0x41   : > { %v1483_v15 = vld [vmem:[%s1833_s9 + $0x134] ss:$8 sps:$4 sm:$0xff]   ;;  %v1486_v17 = vld [vmem:[%s1833_s9 + $0x130] ss:$8 sps:$4 sm:$0xff]   ;;  %v1489_v19 = vld [vmem:[%s1833_s9 + $0x144] ss:$8 sps:$4 sm:$0xff]  }
  0x42   : > { %965 = vmatpush1.bf16.msra.mxu1 %v1473_v8  ;;  %v1491_v20 = vld [vmem:[%s1833_s9 + $0x40] ss:$8 sps:$4 sm:$0xff]   ;;  %v1493_v22 = vld [vmem:[%s1833_s9 + $0x54] ss:$8 sps:$4 sm:$0xff]   ;;  %v1497_v24 = vld [vmem:[%s1833_s9 + $0x50] ss:$8 sps:$4 sm:$0xff]  }
  0x43   : > { %1008 = vmatpush1.bf16.msra.mxu0 %v1474_v9  ;;  %966 = vmatprep.subr.bf16.mxu1 %v1475_v10  ;;  %v1492_v21 = vld [vmem:[%s1833_s9 + $0x140] ss:$8 sps:$4 sm:$0xff]   ;;  %v1495_v23 = vld [vmem:[%s1833_s9 + $0x154] ss:$8 sps:$4 sm:$0xff]   ;;  %v1498_v25 = vld [vmem:[%s1833_s9 + $0x150] ss:$8 sps:$4 sm:$0xff]  }
  0x44   : > { %1009 = vmatprep.subr.bf16.mxu0 %v1477_v11  ;;  %v1499_v26 = vld [vmem:[%s1833_s9 + $0x64] ss:$8 sps:$4 sm:$0xff]   ;;  %v1503_v28 = vld [vmem:[%s1833_s9 + $0x60] ss:$8 sps:$4 sm:$0xff]   ;;  %v1505_v30 = vld [vmem:[%s1833_s9 + $0x74] ss:$8 sps:$4 sm:$0xff]  }
  0x45   : > { %v1501_v27 = vld [vmem:[%s1833_s9 + $0x164] ss:$8 sps:$4 sm:$0xff]   ;;  %v1504_v29 = vld [vmem:[%s1833_s9 + $0x160] ss:$8 sps:$4 sm:$0xff]   ;;  %v1507_v31 = vld [vmem:[%s1833_s9 + $0x174] ss:$8 sps:$4 sm:$0xff]  }
  0x46   : > { %967 = vmatpush1.bf16.msra.mxu1 %v1479_v12  ;;  %v1509_v32 = vld [vmem:[%s1833_s9 + $0x70] ss:$8 sps:$4 sm:$0xff]   ;;  %v1511_v34 = vld [vmem:[%s1833_s9 + $0x84] ss:$8 sps:$4 sm:$0xff]   ;;  %v1515_v36 = vld [vmem:[%s1833_s9 + $0x80] ss:$8 sps:$4 sm:$0xff]  }
  0x47   : > { %1010 = vmatpush1.bf16.msra.mxu0 %v1480_v13  ;;  %968 = vmatprep.subr.bf16.mxu1 %v1481_v14  ;;  %v1510_v33 = vld [vmem:[%s1833_s9 + $0x170] ss:$8 sps:$4 sm:$0xff]   ;;  %v1513_v35 = vld [vmem:[%s1833_s9 + $0x184] ss:$8 sps:$4 sm:$0xff]   ;;  %v1516_v37 = vld [vmem:[%s1833_s9 + $0x180] ss:$8 sps:$4 sm:$0xff]  }
  0x48   : > { %1011 = vmatprep.subr.bf16.mxu0 %v1483_v15  ;;  %v1517_v38 = vld [vmem:[%s1833_s9 + $0x94] ss:$8 sps:$4 sm:$0xff]   ;;  %v1521_v40 = vld [vmem:[%s1833_s9 + $0x90] ss:$8 sps:$4 sm:$0xff]   ;;  %v1523_v42 = vld [vmem:[%s1833_s9 + $0xa4] ss:$8 sps:$4 sm:$0xff]  }
  0x49   : > { %v1519_v39 = vld [vmem:[%s1833_s9 + $0x194] ss:$8 sps:$4 sm:$0xff]   ;;  %v1522_v41 = vld [vmem:[%s1833_s9 + $0x190] ss:$8 sps:$4 sm:$0xff]   ;;  %v1525_v43 = vld [vmem:[%s1833_s9 + $0x1a4] ss:$8 sps:$4 sm:$0xff]  }
  0x4a   : > { %969 = vmatpush1.bf16.msra.mxu1 %v1485_v16  ;;  %v1527_v44 = vld [vmem:[%s1833_s9 + $0xa0] ss:$8 sps:$4 sm:$0xff]   ;;  %v1529_v46 = vld [vmem:[%s1833_s9 + $0xb4] ss:$8 sps:$4 sm:$0xff]   ;;  %v1533_v48 = vld [vmem:[%s1833_s9 + $0xb0] ss:$8 sps:$4 sm:$0xff]  }
  0x4b   : > { %1012 = vmatpush1.bf16.msra.mxu0 %v1486_v17  ;;  %970 = vmatprep.subr.bf16.mxu1 %v1487_v18  ;;  %v1528_v45 = vld [vmem:[%s1833_s9 + $0x1a0] ss:$8 sps:$4 sm:$0xff]   ;;  %v1531_v47 = vld [vmem:[%s1833_s9 + $0x1b4] ss:$8 sps:$4 sm:$0xff]   ;;  %v1534_v49 = vld [vmem:[%s1833_s9 + $0x1b0] ss:$8 sps:$4 sm:$0xff]  }
  0x4c   : > { %1013 = vmatprep.subr.bf16.mxu0 %v1489_v19  ;;  %v1535_v50 = vld [vmem:[%s1833_s9 + $0xc4] ss:$8 sps:$4 sm:$0xff]   ;;  %v1539_v52 = vld [vmem:[%s1833_s9 + $0xc0] ss:$8 sps:$4 sm:$0xff]   ;;  %v1541_v54 = vld [vmem:[%s1833_s9 + $0xd4] ss:$8 sps:$4 sm:$0xff]  }
  0x4d   : > { %v1537_v51 = vld [vmem:[%s1833_s9 + $0x1c4] ss:$8 sps:$4 sm:$0xff]   ;;  %v1540_v53 = vld [vmem:[%s1833_s9 + $0x1c0] ss:$8 sps:$4 sm:$0xff]   ;;  %v1543_v55 = vld [vmem:[%s1833_s9 + $0x1d4] ss:$8 sps:$4 sm:$0xff]  }
  0x4e   : > { %971 = vmatpush1.bf16.msra.mxu1 %v1491_v20  ;;  %v1545_v56 = vld [vmem:[%s1833_s9 + $0xd0] ss:$8 sps:$4 sm:$0xff]   ;;  %v1547_v58 = vld [vmem:[%s1833_s9 + $0xe4] ss:$8 sps:$4 sm:$0xff]   ;;  %v1551_v60 = vld [vmem:[%s1833_s9 + $0xe0] ss:$8 sps:$4 sm:$0xff]  }
  0x4f   : > { %1014 = vmatpush1.bf16.msra.mxu0 %v1492_v21  ;;  %972 = vmatprep.subr.bf16.mxu1 %v1493_v22  ;;  %v1546_v57 = vld [vmem:[%s1833_s9 + $0x1d0] ss:$8 sps:$4 sm:$0xff]   ;;  %v1549_v59 = vld [vmem:[%s1833_s9 + $0x1e4] ss:$8 sps:$4 sm:$0xff]   ;;  %v1552_v61 = vld [vmem:[%s1833_s9 + $0x1e0] ss:$8 sps:$4 sm:$0xff]  }
  0x50   : > { %1015 = vmatprep.subr.bf16.mxu0 %v1495_v23  ;;  %v1553_v62 = vld [vmem:[%s1833_s9 + $0xf4] ss:$8 sps:$4 sm:$0xff]   ;;  %v1557_v0 = vld [vmem:[%s1833_s9 + $0xf0] ss:$8 sps:$4 sm:$0xff]   ;;  %s1976_s20 = smov (!%p536_p11, %s1342_s20), 3  ;;  %v1066_v5 = vshrl.u32 %v1065_v4, 7 }
  0x51   : > { %v1555_v63 = vld [vmem:[%s1833_s9 + $0x1f4] ss:$8 sps:$4 sm:$0xff]   ;;  %v1558_v1 = vld [vmem:[%s1833_s9 + $0x1f0] ss:$8 sps:$4 sm:$0xff]   ;;  %s538_s25 = scalar_lea.vmem %s1966_s2, %s1976_s20  ;;  %s1341_s26 = sshll.u32 %s485_s30, 5 }
  0x52   : > { %973 = vmatpush1.bf16.msra.mxu1 %v1497_v24  ;;  %v1559_v2 = vld [vmem:[%s1964_s0] ss:$16 sps:$4 sm:$0xff]   ;;  %v1562_v3 = vld [vmem:[%s1964_s0 + $0x8] ss:$16 sps:$4 sm:$0xff]   ;;  %v1067_v6 = vsub.s32 0, %v1066_v5  ;;  %v1071_v8 = vsub.s32 1, %v1066_v5 }
  0x53   : > { %1016 = vmatpush1.bf16.msra.mxu0 %v1498_v25  ;;  %974 = vmatprep.subr.bf16.mxu1 %v1499_v26  ;;  %v1063_v7 = vld [vmem:[%s538_s25] sm:$0x3]  ;;  %s520_s12 = scalar_lea.vmem [#allocation4], %s1341_s26  ;;  %s1417_s27 = sshll.u32 (%p1677_p6), %s1611_s14, 4 }
  0x54   : > { %1017 = vmatprep.subr.bf16.mxu0 %v1501_v27  ;;  %v1068_v9 = vrot.slane %v1063_v7, %v1067_v6  ;;  %v1072_v12 = vrot.slane %v1063_v7, %v1071_v8  ;;  %s1203_s30 = scalar_lea.vmem (%p1677_p6), %s1967_s3, %s1417_s27 }
  0x56   : > { %975 = vmatpush1.bf16.msra.mxu1 %v1503_v28 }
  0x57   : > { %1018 = vmatpush1.bf16.msra.mxu0 %v1504_v29  ;;  %976 = vmatprep.subr.bf16.mxu1 %v1505_v30 }
  0x58   : > { %1019 = vmatprep.subr.bf16.mxu0 %v1507_v31 }
  0x5a   : > { %977 = vmatpush1.bf16.msra.mxu1 %v1509_v32 }
  0x5b   : > { %1020 = vmatpush1.bf16.msra.mxu0 %v1510_v33  ;;  %978 = vmatprep.subr.bf16.mxu1 %v1511_v34 }
  0x5c   : > { %1021 = vmatprep.subr.bf16.mxu0 %v1513_v35 }
  0x5e   : > { %979 = vmatpush1.bf16.msra.mxu1 %v1515_v36 }
  0x5f   : > { %1022 = vmatpush1.bf16.msra.mxu0 %v1516_v37  ;;  %980 = vmatprep.subr.bf16.mxu1 %v1517_v38 }
  0x60   : > { %1023 = vmatprep.subr.bf16.mxu0 %v1519_v39 }
  0x62   : > { %981 = vmatpush1.bf16.msra.mxu1 %v1521_v40 }
  0x63   : > { %1024 = vmatpush1.bf16.msra.mxu0 %v1522_v41  ;;  %982 = vmatprep.subr.bf16.mxu1 %v1523_v42 }
  0x64   : > { %1025 = vmatprep.subr.bf16.mxu0 %v1525_v43 }
  0x66   : > { %983 = vmatpush1.bf16.msra.mxu1 %v1527_v44 }
  0x67   : > { %1026 = vmatpush1.bf16.msra.mxu0 %v1528_v45  ;;  %984 = vmatprep.subr.bf16.mxu1 %v1529_v46 }
  0x68   : > { %1027 = vmatprep.subr.bf16.mxu0 %v1531_v47 }
  0x6a   : > { %985 = vmatpush1.bf16.msra.mxu1 %v1533_v48 }
  0x6b   : > { %1028 = vmatpush1.bf16.msra.mxu0 %v1534_v49  ;;  %986 = vmatprep.subr.bf16.mxu1 %v1535_v50 }
  0x6c   : > { %1029 = vmatprep.subr.bf16.mxu0 %v1537_v51 }
  0x6e   : > { %987 = vmatpush1.bf16.msra.mxu1 %v1539_v52 }
  0x6f   : > { %1030 = vmatpush1.bf16.msra.mxu0 %v1540_v53  ;;  %988 = vmatprep.subr.bf16.mxu1 %v1541_v54 }
  0x70   : > { %1031 = vmatprep.subr.bf16.mxu0 %v1543_v55 }
  0x72   : > { %989 = vmatpush1.bf16.msra.mxu1 %v1545_v56 }
  0x73   : > { %1032 = vmatpush1.bf16.msra.mxu0 %v1546_v57  ;;  %990 = vmatprep.subr.bf16.mxu1 %v1547_v58 }
  0x74   : > { %1033 = vmatprep.subr.bf16.mxu0 %v1549_v59 }
  0x76   : > { %991 = vmatpush1.bf16.msra.mxu1 %v1551_v60 }
  0x77   : > { %1034 = vmatpush1.bf16.msra.mxu0 %v1552_v61  ;;  %992 = vmatprep.subr.bf16.mxu1 %v1553_v62 }
  0x78   : > { %1035 = vmatprep.subr.bf16.mxu0 %v1555_v63 }
  0x7a   : > { %993 = vmatpush1.bf16.msra.mxu1 %v1557_v0 }
  0x7b   : > { %1036 = vmatpush1.bf16.msra.mxu0 %v1558_v1 }
  0x7d   : > { %995 = vmatmul.mubr.bf16.vlgmr.msra.gmra.mrb[0].mxu1 %v1559_v2 }
  0x7e   : > { %1038 = vmatmul.mubr.bf16.vlgmr.msra.gmra.mrb[0].mxu0 %v1562_v3 }
 0x150   : > { %v996_v10 = vpop.f32.mrb[0].mxu1 }
 0x151   : > { %v1039_v11 = vpop.f32.mrb[0].mxu0  ;;  %v998_v14 = vpop.f32.mrb[1].mxu1 }
 0x152   : > { %v1040_v13 = vadd.f32 %v1039_v11, %v996_v10  ;;  %v1041_v15 = vpop.f32.mrb[1].mxu0  ;;  %v1000_v17 = vpop.f32.mrb[2].mxu1 }
 0x153   : > { %v1042_v16 = vadd.f32 %v1041_v15, %v998_v14  ;;  %v1043_v18 = vpop.f32.mrb[2].mxu0  ;;  %v1002_v21 = vpop.f32.mrb[3].mxu1 }
 0x154   : > { %v1909_v19 = vadd.f32 %v1068_v9, %v1040_v13  ;;  %v1044_v20 = vadd.f32 %v1043_v18, %v1000_v17  ;;  %v1045_v22 = vpop.f32.mrb[3].mxu0 }
 0x155   : > { %v1911_v23 = vadd.f32 %v1072_v12, %v1042_v16  ;;  %v1046_v24 = vadd.f32 %v1045_v22, %v1002_v21 }
 0x156   : > { %v1914_v25 = vmul.f32 0.70710677, %v1909_v19  ;;  %v1916_v26 = vadd.f32 %v1068_v9, %v1044_v20 }
 0x157   : > { %v1919_v27 = vmul.f32 0.70710677, %v1911_v23  ;;  %v1925_v30 = vadd.f32 %v1072_v12, %v1046_v24 }
 0x158   : > { %v1095_v28 = vand.u32 2147483647, %v1914_v25  ;;  %v1923_v29 = vmul.f32 0.70710677, %v1916_v26  ;;  %vm1087_vm0 = vcmp.lt.f32.partialorder %v1914_v25, 0.0 }
 0x159   : > { %v1096_v31 = vand.u32 2147483647, %v1919_v27  ;;  %v1930_v36 = vmul.f32 0.70710677, %v1925_v30  ;;  %vm1088_vm1 = vcmp.lt.f32.partialorder %v1919_v27, 0.0  ;;  %v1079_v27 = vmul.f32 0.5, %v1909_v19 }
 0x15a   : > { %v1099_v32 = vmul.f32 0.3275911, %v1095_v28  ;;  %v1097_v34 = vand.u32 2147483647, %v1923_v29  ;;  %v1151_v43 = vsub.f32 0.0, %v1095_v28  ;;  %vm1089_vm2 = vcmp.lt.f32.partialorder %v1923_v29, 0.0 }
 0x15b   : > { %v1100_v33 = vmul.f32 0.3275911, %v1096_v31  ;;  %v1098_v39 = vand.u32 2147483647, %v1930_v36  ;;  %v1152_v44 = vsub.f32 0.0, %v1096_v31  ;;  %vm1090_vm3 = vcmp.lt.f32.partialorder %v1930_v36, 0.0 }
 0x15c   : > { %v1103_v35 = vadd.f32 1.0, %v1099_v32  ;;  %v1101_v38 = vmul.f32 0.3275911, %v1097_v34  ;;  %v1155_v46 = vmul.f32 %v1151_v43, %v1095_v28  ;;  %v1153_v47 = vsub.f32 0.0, %v1097_v34 }
 0x15d   : > { %v1104_v37 = vadd.f32 1.0, %v1100_v33  ;;  %v1102_v41 = vmul.f32 0.3275911, %v1098_v39  ;;  %v1156_v50 = vmul.f32 %v1152_v44, %v1096_v31  ;;  %v1154_v52 = vsub.f32 0.0, %v1098_v39 }
 0x15e   : > { %1565 = vrcp.f32 %v1103_v35  ;;  %v1105_v40 = vadd.f32 1.0, %v1101_v38  ;;  %v1159_v55 = vmul.f32 1.442695, %v1155_v46  ;;  %v1157_v57 = vmul.f32 %v1153_v47, %v1097_v34 }
 0x15f   : > { %1567 = vrcp.f32 %v1104_v37  ;;  %v1106_v42 = vadd.f32 1.0, %v1102_v41  ;;  %v1161_v59 = vmul.f32 1.442695, %v1156_v50  ;;  %v1158_v63 = vmul.f32 %v1154_v52, %v1098_v39 }
 0x160   : > { %1569 = vrcp.f32 %v1105_v40  ;;  %v1163_v4 = vmul.f32 1.442695, %v1157_v57  ;;  %v1621_v44 = vmov 1.0   ;;  %v1082_v36 = vmul.f32 0.5, %v1925_v30 }
 0x161   : > { %1571 = vrcp.f32 %v1106_v42  ;;  %v1165_v9 = vmul.f32 1.442695, %v1158_v63  ;;  %v1092_v46 = vsel %vm1088_vm1, -1.0, %v1621_v44  ;;  %v1093_v57 = vsel %vm1089_vm2, -1.0, %v1621_v44 }
 0x162   : > { %1573 = vpow2.f32 %v1159_v55  ;;  %v1080_v55 = vmul.f32 0.5, %v1911_v23  ;;  %v1094_v29 = vsel %vm1090_vm3, -1.0, %v1621_v44 }
 0x163   : > { %1575 = vpow2.f32 %v1161_v59 }
 0x164   : > { %1577 = vpow2.f32 %v1163_v4 }
 0x165   : > { %1579 = vpow2.f32 %v1165_v9 }
 0x168   : > { %v1566_v45 = vpop.eup %1565 }
 0x169   : > { %v1568_v48 = vpop.eup %1567  ;;  %v1115_v49 = vmul.f32 1.0614054, %v1566_v45 }
 0x16a   : > { %v1116_v51 = vmul.f32 1.0614054, %v1568_v48  ;;  %v1570_v54 = vpop.eup %1569 }
 0x16b   : > { %v1119_v53 = vadd.f32 -1.4531521, %v1115_v49  ;;  %v1117_v60 = vmul.f32 1.0614054, %v1570_v54  ;;  %v1572_v61 = vpop.eup %1571 }
 0x16c   : > { %v1120_v56 = vadd.f32 -1.4531521, %v1116_v51  ;;  %v1118_v2 = vmul.f32 1.0614054, %v1572_v61  ;;  %v1574_v32 = vpop.eup %1573 }
 0x16d   : > { %v1123_v58 = vmul.f32 %v1566_v45, %v1119_v53  ;;  %v1121_v1 = vadd.f32 -1.4531521, %v1117_v60  ;;  %v1576_v34 = vpop.eup %1575 }
 0x16e   : > { %v1124_v62 = vmul.f32 %v1568_v48, %v1120_v56  ;;  %v1122_v7 = vadd.f32 -1.4531521, %v1118_v2  ;;  %v1578_v43 = vpop.eup %1577 }
 0x16f   : > { %v1127_v0 = vadd.f32 1.4214138, %v1123_v58  ;;  %v1125_v6 = vmul.f32 %v1570_v54, %v1121_v1  ;;  %v1580_v50 = vpop.eup %1579 }
 0x170   : > { %v1128_v3 = vadd.f32 1.4214138, %v1124_v62  ;;  %v1126_v12 = vmul.f32 %v1572_v61, %v1122_v7 }
 0x171   : > { %v1131_v5 = vmul.f32 %v1566_v45, %v1127_v0  ;;  %v1129_v11 = vadd.f32 1.4214138, %v1125_v6 }
 0x172   : > { %v1132_v8 = vmul.f32 %v1568_v48, %v1128_v3  ;;  %v1130_v16 = vadd.f32 1.4214138, %v1126_v12 }
 0x173   : > { %v1135_v10 = vadd.f32 -0.28449672, %v1131_v5  ;;  %v1133_v15 = vmul.f32 %v1570_v54, %v1129_v11 }
 0x174   : > { %v1136_v13 = vadd.f32 -0.28449672, %v1132_v8  ;;  %v1134_v21 = vmul.f32 %v1572_v61, %v1130_v16 }
 0x175   : > { %v1139_v14 = vmul.f32 %v1566_v45, %v1135_v10  ;;  %v1137_v20 = vadd.f32 -0.28449672, %v1133_v15 }
 0x176   : > { %v1140_v17 = vmul.f32 %v1568_v48, %v1136_v13  ;;  %v1138_v31 = vadd.f32 -0.28449672, %v1134_v21 }
 0x177   : > { %v1143_v18 = vadd.f32 0.2548296, %v1139_v14  ;;  %v1141_v28 = vmul.f32 %v1570_v54, %v1137_v20 }
 0x178   : > { %v1144_v22 = vadd.f32 0.2548296, %v1140_v17  ;;  %v1142_v38 = vmul.f32 %v1572_v61, %v1138_v31 }
 0x179   : > { %v1147_v24 = vmul.f32 %v1566_v45, %v1143_v18  ;;  %v1145_v37 = vadd.f32 0.2548296, %v1141_v28  ;;  %v1091_v45 = vsel %vm1087_vm0, -1.0, %v1621_v44 }
 0x17a   : > { %v1148_v33 = vmul.f32 %v1568_v48, %v1144_v22  ;;  %v1146_v42 = vadd.f32 0.2548296, %v1142_v38 }
 0x17b   : > { %v1167_v35 = vmul.f32 %v1574_v32, %v1147_v24  ;;  %v1149_v41 = vmul.f32 %v1570_v54, %v1145_v37 }
 0x17c   : > { %v1168_v39 = vmul.f32 %v1576_v34, %v1148_v33  ;;  %v1150_v49 = vmul.f32 %v1572_v61, %v1146_v42  ;;  %v1081_v61 = vmul.f32 0.5, %v1916_v26 }
 0x17d   : > { %v1171_v40 = vsub.f32 1.0, %v1167_v35  ;;  %v1169_v48 = vmul.f32 %v1578_v43, %v1149_v41 }
 0x17e   : > { %v1172_v47 = vsub.f32 1.0, %v1168_v39  ;;  %v1170_v54 = vmul.f32 %v1580_v50, %v1150_v49 }
 0x17f   : > { %v1175_v25 = vmul.f32 %v1171_v40, %v1091_v45  ;;  %v1173_v53 = vsub.f32 1.0, %v1169_v48 }
 0x180   : > { %v1176_v51 = vmul.f32 %v1172_v47, %v1092_v46  ;;  %v1174_v60 = vsub.f32 1.0, %v1170_v54 }
 0x181   : > { %v1179_v52 = vadd.f32 1.0, %v1175_v25  ;;  %v1177_v59 = vmul.f32 %v1173_v53, %v1093_v57 }
 0x182   : > { %v1180_v56 = vadd.f32 1.0, %v1176_v51  ;;  %v1178_v63 = vmul.f32 %v1174_v60, %v1094_v29  ;;  %1197 = sbr.rel (!%p1677_p6) target bundleno = 401 (0x191), region = 82 }
 0x183   : > { %v1183_v58 = vmul.f32 %v1179_v52, %v1079_v27  ;;  %v1181_v19 = vadd.f32 1.0, %v1177_v59 }
 0x184   : > { %v1184_v62 = vmul.f32 %v1180_v56, %v1080_v55  ;;  %v1182_v1 = vadd.f32 1.0, %v1178_v63 }
 0x185   : > { %1187 = vst [vmem:[%s520_s12] sm:$0xff] %v1183_v58  ;;  %v1185_v0 = vmul.f32 %v1181_v19, %v1081_v61 }
 0x186   : > { %1188 = vst [vmem:[%s520_s12 + $0x8] sm:$0xff] %v1184_v62  ;;  %v1186_v23 = vmul.f32 %v1182_v1, %v1082_v36 }
 0x187   : > { %1189 = vst [vmem:[%s520_s12 + $0x10] sm:$0xff] %v1185_v0 }
 0x188   : > { %1190 = vst [vmem:[%s520_s12 + $0x18] sm:$0xff] %v1186_v23 }
 0x18c   : > { %v1216_v2 = vld [vmem:[%s520_s12] sm:$0xff] }
 0x18d   : > { %v1218_v3 = vld [vmem:[%s520_s12 + $0x8] sm:$0xff]  ;;  %1217 = vst [vmem:[%s1203_s30] sm:$0xff] %v1216_v2 }
 0x18e   : > { %v1220_v4 = vld [vmem:[%s520_s12 + $0x10] sm:$0xff]  ;;  %1219 = vst [vmem:[%s1203_s30 + $0x8] sm:$0xff] %v1218_v3 }
 0x18f   : > { %v1222_v26 = vld [vmem:[%s520_s12 + $0x18] sm:$0xff]  ;;  %1221 = vst [vmem:[%s1203_s30 + $0x20] sm:$0xff] %v1220_v4 }
 0x190   : > { %1223 = vst [vmem:[%s1203_s30 + $0x28] sm:$0xff] %v1222_v26 }
 0x191 PF: > { %s13_s16 = sadd.s32 1, %s1619_s16   ;;  %s1969_s12 = smov %s1607_s13 }
 0x192   : > { %p10_p12 = scmp.ge.s32.totalorder %s13_s16, 4   ;;  %s1970_s13 = smov %s1682_s22 }
 0x193   : > { %s1971_s14 = smov %s1615_s15  ;;  %s1972_s15 = smov %s1974_s17 }
 0x194   :  { %12 = sbr.rel (!%p10_p12) target bundleno = 3 (0x3), region = 142 }

</bundles_post_ra>
